<compile_context>
chip_gen: v7x
topology: tpu7x:2x2x1
jax: 0.10.0
libtpu: 0.0.40
codegen_flags: <defaults>
</compile_context>

<pallas_src>
import functools

import jax
import jax.numpy as jnp
from jax import lax
from jax.experimental import pallas as pl
from jax.experimental.pallas import tpu as pltpu


# ----------------------------- kernel ---------------------------------------


def _gru_fc_kernel(x_ref, h0_ref,
                   wih0_ref, gbias0_ref, wbig_ref,
                   bhh0n_ref, b1rz_ref, b1nih_ref, b1nhh_ref,
                   wfc_ref, bfc_ref,
                   out_ref, hout_ref,
                   hcarry_ref, gx0_ref,
                   *, hp, seq_len, chunk_w, need_drain, tail_pad):
    """One grid step = one (batch block, time chunk).

    x_ref    : (W, Bb, Ep)      padded time-major embeddings for this chunk
    h0_ref   : (2, Bb, Hp)      initial hidden state (read at chunk 0)
    wih0_ref : (Ep, 3Hp)        layer-0 input weights (pre-transposed, gate-slab padded)
    gbias0_ref: (1, 3Hp)        bih0 with bhh0_{r,z} folded in
    wbig_ref : (2Hp, 9Hp)       fused recurrent weights [whh0 | wih1 | whh1] (block-structured)
    bhh0n/b1rz/b1nih/b1nhh     : hoisted gate biases
    wfc_ref  : (Hp, Op), bfc_ref: (1, Op)
    out_ref  : (Bb, Op)         logits of last real timestep (written at last chunk)
    hout_ref : (2, Bb, Hp)      final hidden state (written at last chunk)
    hcarry_ref: (Bb, 2Hp) VMEM  [h0 | h1] carry across chunks (layer 1 skewed by 1 step)
    gx0_ref  : (W, Bb, 3Hp) VMEM  hoisted layer-0 input projection for this chunk
    """
    c = pl.program_id(1)
    n_chunks = pl.num_programs(1)
    W, Bb, Ep = x_ref.shape
    GP = 3 * hp

    # --- chunk prologue: layer-0 input projection (one throughput MXU matmul) ---
    x_flat = x_ref[...].reshape(W * Bb, Ep)
    gx0 = jnp.dot(x_flat, wih0_ref[...], preferred_element_type=jnp.float32)
    gx0_ref[...] = (gx0 + gbias0_ref[...]).reshape(W, Bb, GP)

    @pl.when(c == 0)
    def _init():
        hcarry_ref[...] = jnp.concatenate([h0_ref[0], h0_ref[1]], axis=1)

    # Loop-invariant weight load + bias broadcasts hoisted out of the recurrence
    # (JAX does not CSE broadcast_in_dim inside the unrolled loop).
    w_big = wbig_ref[...]
    bhh0n = jnp.broadcast_to(bhh0n_ref[...], (Bb, hp))
    b1rz = jnp.broadcast_to(b1rz_ref[...], (Bb, 2 * hp))
    b1nih = jnp.broadcast_to(b1nih_ref[...], (Bb, hp))
    b1nhh = jnp.broadcast_to(b1nhh_ref[...], (Bb, hp))

    def cell(gx_rz, gx_n, gh_rz, gh_n, h_prev):
        # PyTorch GRU:  r,z = sigmoid(.);  n = tanh(Wx+b_in + r*(Wh+b_hn))
        rz = jax.nn.sigmoid(gx_rz + gh_rz)
        r = rz[:, :hp]
        z = rz[:, hp:]
        n = jnp.tanh(gx_n + r * gh_n)
        return n + z * (h_prev - n)                      # == (1-z)*n + z*h_prev

    def layer1_step(g, h1_prev):
        return cell(g[:, 3 * hp:5 * hp] + b1rz,
                    g[:, 5 * hp:6 * hp] + b1nih,
                    g[:, 6 * hp:8 * hp],
                    g[:, 8 * hp:9 * hp] + b1nhh,
                    h1_prev)

    t_base = c * chunk_w

    def step(i, hcat):
        # Fused iteration t: layer 0 advances to time t, layer 1 to time t-1.
        t = t_base + i
        h0_prev = hcat[:, :hp]
        h1_prev = hcat[:, hp:]
        # Single fused MXU push: [gh_l0 | gx_l1 | gh_l1]
        g = jnp.dot(hcat, w_big, preferred_element_type=jnp.float32)
        gx0_t = gx0_ref[i]                                        # (Bb, 3Hp)
        h0_new = cell(gx0_t[:, :2 * hp], gx0_t[:, 2 * hp:],
                      g[:, :2 * hp], g[:, 2 * hp:3 * hp] + bhh0n, h0_prev)
        h1_new = layer1_step(g, h1_prev)
        # Masked (arithmetic-select) updates: layer 0 valid for t < T,
        # layer 1 (computing time t-1) valid for 1 <= t <= T.
        if tail_pad:
            m0 = (t < seq_len).astype(jnp.float32)
            h0_next = h0_prev + m0 * (h0_new - h0_prev)
            m1 = jnp.logical_and(t >= 1, t <= seq_len).astype(jnp.float32)
        else:
            h0_next = h0_new
            m1 = (t >= 1).astype(jnp.float32)
        h1_next = h1_prev + m1 * (h1_new - h1_prev)
        return jnp.concatenate([h0_next, h1_next], axis=1)

    hcat = lax.fori_loop(0, W, step, hcarry_ref[...], unroll=min(W, 8))
    hcarry_ref[...] = hcat

    @pl.when(c == n_chunks - 1)
    def _finalize():
        h0_fin = hcat[:, :hp]
        h1_fin = hcat[:, hp:]
        if need_drain:
            # Drain: layer 1's last timestep (only when no tail padding absorbed it).
            g = jnp.dot(hcat, w_big, preferred_element_type=jnp.float32)
            h1_fin = layer1_step(g, h1_fin)
        hout_ref[0] = h0_fin
        hout_ref[1] = h1_fin
        # dropout is identity in eval mode; fc applied only to the last timestep.
        out_ref[...] = (jnp.dot(h1_fin, wfc_ref[...], preferred_element_type=jnp.float32)
                        + bfc_ref[...])


# ----------------------------- wrapper ---------------------------------------


def _round_up(n, m):
    return ((n + m - 1) // m) * m


def _pad_to(x, axis, target):
    pad = target - x.shape[axis]
    if pad <= 0:
        return x
    widths = [(0, 0)] * x.ndim
    widths[axis] = (0, pad)
    return jnp.pad(x, widths)


def _gate_pack_weight(w, rows_pad, hp):
    """PyTorch (3H, in) gate weight -> (rows_pad, 3*hp) transposed, each (r,z,n)
    gate in its own lane-aligned hp-wide slab; zero padding keeps padded hidden
    columns exactly 0 through the recurrence."""
    H = w.shape[0] // 3
    wt = w.T.astype(jnp.float32)                          # (in, 3H)
    gates = [_pad_to(wt[:, g * H:(g + 1) * H], 1, hp) for g in range(3)]
    return _pad_to(jnp.concatenate(gates, axis=1), 0, rows_pad)


def _gate_pack_bias(b, hp):
    H = b.shape[0] // 3
    return jnp.concatenate(
        [jnp.pad(b[g * H:(g + 1) * H].astype(jnp.float32), (0, hp - H))
         for g in range(3)])


def rnn_forward(tokens, hidden, params, *, chunk_w=64):
    """Returns (output (B, O), hidden (L, B, H)) matching the PyTorch module (eval mode)."""
    emb = params["embedding"]                              # (V, E)
    B, T = tokens.shape
    L, _, H = hidden.shape
    E = emb.shape[1]
    O = params["w_fc"].shape[0]
    assert L == 2, "kernel is specialized for n_layers == 2"

    Bp = _round_up(max(B, 8), 8)
    Hp = _round_up(max(H, 128), 128)
    Ep = _round_up(max(E, 128), 128)
    Op = _round_up(max(O, 128), 128)

    # Time chunking (bounds VMEM; BlockSpec double-buffers the x chunk).
    W = max(1, min(chunk_w, T))
    Tp = _round_up(T, W)
    n_chunks = Tp // W
    need_drain = (Tp == T)          # layer-1 last step not absorbed by tail padding
    tail_pad = (Tp != T)

    # Batch blocking: split across v7x's two TensorCores when batch is large.
    n_bblk = 2 if (Bp >= 16 and Bp % 16 == 0) else 1
    Bb = Bp // n_bblk

    # Embedding gather done in the wrapper (glue).
    # TODO(synk): fuse the gather into the kernel via scalar-prefetched token ids
    # (pl.Element row gather) to avoid the HBM round-trip of the padded (T,B,E) x.
    x = jnp.take(emb, tokens, axis=0).astype(jnp.float32)  # (B, T, E)
    x = jnp.transpose(x, (1, 0, 2))                        # (T, B, E) time-major
    x = _pad_to(_pad_to(_pad_to(x, 2, Ep), 1, Bp), 0, Tp)  # (Tp, Bp, Ep)

    h0 = _pad_to(_pad_to(hidden.astype(jnp.float32), 2, Hp), 1, Bp)   # (L, Bp, Hp)

    # --- weight prep: pre-transposed, gate-slab padded -----------------------
    wih0 = _gate_pack_weight(params["w_ih0"], Ep, Hp)      # (Ep, 3Hp)
    whh0 = _gate_pack_weight(params["w_hh0"], Hp, Hp)      # (Hp, 3Hp)
    wih1 = _gate_pack_weight(params["w_ih1"], Hp, Hp)
    whh1 = _gate_pack_weight(params["w_hh1"], Hp, Hp)

    bih0 = _gate_pack_bias(params["b_ih0"], Hp)
    bhh0 = _gate_pack_bias(params["b_hh0"], Hp)
    bih1 = _gate_pack_bias(params["b_ih1"], Hp)
    bhh1 = _gate_pack_bias(params["b_hh1"], Hp)

    # Bias folding / hoisting: r,z halves of bhh0 go straight into the layer-0
    # input projection; the rest are hoisted constants added once per chunk.
    gbias0 = jnp.concatenate([bih0[:2 * Hp] + bhh0[:2 * Hp],
                              bih0[2 * Hp:]]).reshape(1, 3 * Hp)
    bhh0_n = bhh0[2 * Hp:].reshape(1, Hp)
    b1_rz = (bih1[:2 * Hp] + bhh1[:2 * Hp]).reshape(1, 2 * Hp)
    b1_n_ih = bih1[2 * Hp:].reshape(1, Hp)
    b1_n_hh = bhh1[2 * Hp:].reshape(1, Hp)

    # Fused per-step recurrent weight: [h0 | h1] @ w_big = [gh_l0 | gx_l1 | gh_l1]
    w_big = jnp.zeros((2 * Hp, 9 * Hp), jnp.float32)
    w_big = w_big.at[:Hp, 0:3 * Hp].set(whh0)
    w_big = w_big.at[:Hp, 3 * Hp:6 * Hp].set(wih1)
    w_big = w_big.at[Hp:, 6 * Hp:9 * Hp].set(whh1)

    wfc = _pad_to(_pad_to(params["w_fc"].T.astype(jnp.float32), 0, Hp), 1, Op)  # (Hp, Op)
    bfc = _pad_to(params["b_fc"].astype(jnp.float32), 0, Op).reshape(1, Op)

    # Explicit VMEM budget (scoped default is 16/32 MiB, well below physical).
    f32 = 4
    vmem_bytes = (2 * W * Bb * Ep * f32        # x chunk, double-buffered
                  + W * Bb * 3 * Hp * f32      # gx0 scratch
                  + Ep * 3 * Hp * f32          # wih0
                  + 2 * Hp * 9 * Hp * f32      # w_big
                  + Hp * Op * f32              # wfc
                  + 2 * L * Bb * Hp * f32      # h0 in + hidden out
                  + Bb * 2 * Hp * f32          # h carry
                  + Bb * Op * f32              # logits
                  + 16 * Hp * f32)             # biases
    vmem_limit = min(max(int(vmem_bytes * 1.5) + (2 << 20), 24 << 20), 64 << 20)

    kernel = functools.partial(_gru_fc_kernel, hp=Hp, seq_len=T, chunk_w=W,
                               need_drain=need_drain, tail_pad=tail_pad)

    out, h_out = pl.pallas_call(
        kernel,
        out_shape=(
            jax.ShapeDtypeStruct((Bp, Op), jnp.float32),
            jax.ShapeDtypeStruct((L, Bp, Hp), jnp.float32),
        ),
        grid_spec=pltpu.PrefetchScalarGridSpec(
            num_scalar_prefetch=0,
            grid=(n_bblk, n_chunks),
            in_specs=[
                pl.BlockSpec((W, Bb, Ep), lambda b, c: (c, b, 0)),        # x chunk
                pl.BlockSpec((L, Bb, Hp), lambda b, c: (0, b, 0)),        # h0
                pl.BlockSpec((Ep, 3 * Hp), lambda b, c: (0, 0)),          # wih0
                pl.BlockSpec((1, 3 * Hp), lambda b, c: (0, 0)),           # gbias0
                pl.BlockSpec((2 * Hp, 9 * Hp), lambda b, c: (0, 0)),      # w_big
                pl.BlockSpec((1, Hp), lambda b, c: (0, 0)),               # bhh0_n
                pl.BlockSpec((1, 2 * Hp), lambda b, c: (0, 0)),           # b1_rz
                pl.BlockSpec((1, Hp), lambda b, c: (0, 0)),               # b1_n_ih
                pl.BlockSpec((1, Hp), lambda b, c: (0, 0)),               # b1_n_hh
                pl.BlockSpec((Hp, Op), lambda b, c: (0, 0)),              # wfc
                pl.BlockSpec((1, Op), lambda b, c: (0, 0)),               # bfc
            ],
            out_specs=[
                pl.BlockSpec((Bb, Op), lambda b, c: (b, 0)),              # logits
                pl.BlockSpec((L, Bb, Hp), lambda b, c: (0, b, 0)),        # hidden out
            ],
            scratch_shapes=[
                pltpu.VMEM((Bb, 2 * Hp), jnp.float32),                    # [h0|h1] carry
                pltpu.VMEM((W, Bb, 3 * Hp), jnp.float32),                 # chunk gx0
            ],
        ),
        input_output_aliases={1: 1},                      # h0 buffer reused for h_out
        compiler_params=pltpu.CompilerParams(
            dimension_semantics=("parallel", "arbitrary"),
            vmem_limit_bytes=vmem_limit),
    )(x, h0, wih0, gbias0, w_big, bhh0_n, b1_rz, b1_n_ih, b1_n_hh, wfc, bfc)

    return out[:B, :O], h_out[:, :B, :H]


# ----------------------------- reference -------------------------------------


def _reference_forward(tokens, hidden, params):
    """Pure-JAX reference of the same forward pass (for correctness check)."""
    emb = params["embedding"]
    x = jnp.take(emb, tokens, axis=0).astype(jnp.float32)  # (B, T, E)
    B, T, E = x.shape
    L, _, H = hidden.shape

    layer_w = [
        (params["w_ih0"], params["w_hh0"], params["b_ih0"], params["b_hh0"]),
        (params["w_ih1"], params["w_hh1"], params["b_ih1"], params["b_hh1"]),
    ]

    h = [hidden[l] for l in range(L)]
    x_in = None
    for t in range(T):
        x_in = x[:, t, :]
        for l in range(L):
            wih, whh, bih, bhh = layer_w[l]
            gx = x_in @ wih.T + bih
            gh = h[l] @ whh.T + bhh
            r = jax.nn.sigmoid(gx[:, 0:H] + gh[:, 0:H])
            z = jax.nn.sigmoid(gx[:, H:2 * H] + gh[:, H:2 * H])
            n = jnp.tanh(gx[:, 2 * H:3 * H] + r * gh[:, 2 * H:3 * H])
            h[l] = (1.0 - z) * n + z * h[l]
            x_in = h[l]
    logits = x_in @ params["w_fc"].T + params["b_fc"]
    return logits, jnp.stack(h, axis=0)


def init_params(key, vocab_size, output_size, embedding_dim, hidden_dim):
    """Deterministic PyTorch-style uniform init (synthetic weights)."""
    ks = jax.random.split(key, 12)
    H, E, V, O = hidden_dim, embedding_dim, vocab_size, output_size
    s = 1.0 / jnp.sqrt(H)
    u = lambda k, shape, sc: jax.random.uniform(k, shape, jnp.float32, -sc, sc)
    return {
        "embedding": jax.random.normal(ks[0], (V, E), jnp.float32),
        "w_ih0": u(ks[1], (3 * H, E), s), "w_hh0": u(ks[2], (3 * H, H), s),
        "b_ih0": u(ks[3], (3 * H,), s),   "b_hh0": u(ks[4], (3 * H,), s),
        "w_ih1": u(ks[5], (3 * H, H), s), "w_hh1": u(ks[6], (3 * H, H), s),
        "b_ih1": u(ks[7], (3 * H,), s),   "b_hh1": u(ks[8], (3 * H,), s),
        "w_fc": u(ks[9], (O, H), s),      "b_fc": u(ks[10], (O,), s),
    }


if __name__ == "__main__":
    # Small shapes consistent with the module.
    VOCAB, OUTPUT, EMB, HIDDEN, LAYERS = 32, 10, 16, 32, 2
    B, T = 2, 8

    key = jax.random.PRNGKey(0)
    pkey, tkey, hkey = jax.random.split(key, 3)
    params = init_params(pkey, VOCAB, OUTPUT, EMB, HIDDEN)

    tokens = jax.random.randint(tkey, (B, T), 0, VOCAB, dtype=jnp.int32)
    # Nonzero hidden exercises the skewed-carry / bias-fold paths more strongly
    # (the module's init_hidden() zeros are a special case of this).
    hidden0 = 0.1 * jax.random.normal(hkey, (LAYERS, B, HIDDEN), jnp.float32)

    ref_out, ref_h = _reference_forward(tokens, hidden0, params)

    # 1) single chunk (exercises the layer-1 drain epilogue)
    out, h_out = rnn_forward(tokens, hidden0, params, chunk_w=8)
    out = jax.block_until_ready(out); h_out = jax.block_until_ready(h_out)
    assert out.shape == (B, OUTPUT) and h_out.shape == (LAYERS, B, HIDDEN)
    assert jnp.allclose(out, ref_out, atol=1e-4, rtol=1e-4)
    assert jnp.allclose(h_out, ref_h, atol=1e-4, rtol=1e-4)

    # 2) multi-chunk, T divisible by W (carry across chunks + drain)
    out, h_out = rnn_forward(tokens, hidden0, params, chunk_w=4)
    out = jax.block_until_ready(out); h_out = jax.block_until_ready(h_out)
    assert jnp.allclose(out, ref_out, atol=1e-4, rtol=1e-4)
    assert jnp.allclose(h_out, ref_h, atol=1e-4, rtol=1e-4)

    # 3) multi-chunk with tail padding (carry + masked updates, no drain)
    out, h_out = rnn_forward(tokens, hidden0, params, chunk_w=3)
    out = jax.block_until_ready(out); h_out = jax.block_until_ready(h_out)
    assert jnp.allclose(out, ref_out, atol=1e-4, rtol=1e-4)
    assert jnp.allclose(h_out, ref_h, atol=1e-4, rtol=1e-4)

    print("KERNEL_OK")
</pallas_src>

<mosaic_0001>
module attributes {stable_mosaic.version = 11 : i64} {
  func.func @_gru_fc_kernel(%arg0: i32, %arg1: i32, %arg2: memref<8x8x128xf32, #tpu.memory_space<vmem>>, %arg3: memref<2x8x128xf32, #tpu.memory_space<vmem>>, %arg4: memref<128x384xf32, #tpu.memory_space<vmem>>, %arg5: memref<1x384xf32, #tpu.memory_space<vmem>>, %arg6: memref<256x1152xf32, #tpu.memory_space<vmem>>, %arg7: memref<1x128xf32, #tpu.memory_space<vmem>>, %arg8: memref<1x256xf32, #tpu.memory_space<vmem>>, %arg9: memref<1x128xf32, #tpu.memory_space<vmem>>, %arg10: memref<1x128xf32, #tpu.memory_space<vmem>>, %arg11: memref<128x128xf32, #tpu.memory_space<vmem>>, %arg12: memref<1x128xf32, #tpu.memory_space<vmem>>, %arg13: memref<8x128xf32, #tpu.memory_space<vmem>>, %arg14: memref<2x8x128xf32, #tpu.memory_space<vmem>>, %arg15: memref<8x256xf32, #tpu.memory_space<vmem>>, %arg16: memref<8x8x384xf32, #tpu.memory_space<vmem>>) attributes {dimension_semantics = [#tpu.dimension_semantics<parallel>, #tpu.dimension_semantics<arbitrary>], iteration_bounds = array<i64: 1, 1>, scalar_prefetch = 0 : i64, scratch_operands = 2 : i64, tpu.core_type = #tpu.core_type<tc>, window_params = [{transform_indices = @transform_0, window_bounds = array<i64: 8, 8, 128>}, {transform_indices = @transform_1, window_bounds = array<i64: 2, 8, 128>}, {pipeline_mode = #tpu.pipeline_mode<synchronous>, transform_indices = @transform_2, window_bounds = array<i64: 128, 384>}, {pipeline_mode = #tpu.pipeline_mode<synchronous>, transform_indices = @transform_3, window_bounds = array<i64: 1, 384>}, {pipeline_mode = #tpu.pipeline_mode<synchronous>, transform_indices = @transform_4, window_bounds = array<i64: 256, 1152>}, {pipeline_mode = #tpu.pipeline_mode<synchronous>, transform_indices = @transform_5, window_bounds = array<i64: 1, 128>}, {pipeline_mode = #tpu.pipeline_mode<synchronous>, transform_indices = @transform_6, window_bounds = array<i64: 1, 256>}, {pipeline_mode = #tpu.pipeline_mode<synchronous>, transform_indices = @transform_7, window_bounds = array<i64: 1, 128>}, {pipeline_mode = #tpu.pipeline_mode<synchronous>, transform_indices = @transform_8, window_bounds = array<i64: 1, 128>}, {pipeline_mode = #tpu.pipeline_mode<synchronous>, transform_indices = @transform_9, window_bounds = array<i64: 128, 128>}, {pipeline_mode = #tpu.pipeline_mode<synchronous>, transform_indices = @transform_10, window_bounds = array<i64: 1, 128>}, {transform_indices = @transform_11, window_bounds = array<i64: 8, 128>}, {transform_indices = @transform_12, window_bounds = array<i64: 2, 8, 128>}]} {
    %c0 = arith.constant 0 : index
    %c0_0 = arith.constant 0 : index
    %c0_1 = arith.constant 0 : index
    %0 = vector.load %arg2[%c0, %c0_0, %c0_1] : memref<8x8x128xf32, #tpu.memory_space<vmem>>, vector<8x8x128xf32>
    %1 = vector.shape_cast %0 : vector<8x8x128xf32> to vector<64x128xf32>
    %c0_2 = arith.constant 0 : index
    %c0_3 = arith.constant 0 : index
    %2 = vector.load %arg4[%c0_2, %c0_3] : memref<128x384xf32, #tpu.memory_space<vmem>>, vector<128x384xf32>
    %cst = arith.constant dense<0.000000e+00> : vector<64x384xf32>
    %3 = tpu.matmul %1, %2, %cst {dimension_numbers = #tpu.dot_dimension_numbers<[1], [0], [0], [1], [0, 0, 1, 1], [], []>} : vector<64x128xf32>, vector<128x384xf32>, vector<64x384xf32> -> vector<64x384xf32>
    %c0_4 = arith.constant 0 : index
    %c0_5 = arith.constant 0 : index
    %4 = vector.load %arg5[%c0_4, %c0_5] : memref<1x384xf32, #tpu.memory_space<vmem>>, vector<1x384xf32>
    %5 = vector.broadcast %4 : vector<1x384xf32> to vector<64x384xf32>
    %6 = arith.addf %3, %5 : vector<64x384xf32>
    %7 = vector.shape_cast %6 : vector<64x384xf32> to vector<8x8x384xf32>
    %c0_6 = arith.constant 0 : index
    %c0_7 = arith.constant 0 : index
    %c0_8 = arith.constant 0 : index
    %8 = vector.load %arg16[%c0_6, %c0_7, %c0_8] : memref<8x8x384xf32, #tpu.memory_space<vmem>>, vector<8x8x384xf32>
    tpu.vector_store %arg16[%c0_6, %c0_7, %c0_8], %7 {strides = array<i32>} : memref<8x8x384xf32, #tpu.memory_space<vmem>>, vector<8x8x384xf32>,
    %c0_i32 = arith.constant 0 : i32
    %9 = arith.cmpi eq, %arg1, %c0_i32 : i32
    %10 = arith.extui %9 : i1 to i32
    %c0_i32_9 = arith.constant 0 : i32
    %11 = arith.cmpi ne, %10, %c0_i32_9 : i32
    scf.if %11 {
      %c0_76 = arith.constant 0 : index
      %c0_77 = arith.constant 0 : index
      %c0_78 = arith.constant 0 : index
      %471 = vector.load %arg3[%c0_76, %c0_77, %c0_78] : memref<2x8x128xf32, #tpu.memory_space<vmem>>, vector<1x8x128xf32>
      %472 = vector.shape_cast %471 : vector<1x8x128xf32> to vector<8x128xf32>
      %c1 = arith.constant 1 : index
      %c0_79 = arith.constant 0 : index
      %c0_80 = arith.constant 0 : index
      %473 = vector.load %arg3[%c1, %c0_79, %c0_80] : memref<2x8x128xf32, #tpu.memory_space<vmem>>, vector<1x8x128xf32>
      %474 = vector.shape_cast %473 : vector<1x8x128xf32> to vector<8x128xf32>
      %475 = tpu.concatenate %472, %474 in 1 : vector<8x128xf32>, vector<8x128xf32> -> vector<8x256xf32>
      %c0_81 = arith.constant 0 : index
      %c0_82 = arith.constant 0 : index
      %476 = vector.load %arg15[%c0_81, %c0_82] : memref<8x256xf32, #tpu.memory_space<vmem>>, vector<8x256xf32>
      tpu.vector_store %arg15[%c0_81, %c0_82], %475 {strides = array<i32>} : memref<8x256xf32, #tpu.memory_space<vmem>>, vector<8x256xf32>,
    } else {
    }
    %c0_10 = arith.constant 0 : index
    %c0_11 = arith.constant 0 : index
    %12 = vector.load %arg6[%c0_10, %c0_11] : memref<256x1152xf32, #tpu.memory_space<vmem>>, vector<256x1152xf32>
    %c0_12 = arith.constant 0 : index
    %c0_13 = arith.constant 0 : index
    %13 = vector.load %arg7[%c0_12, %c0_13] : memref<1x128xf32, #tpu.memory_space<vmem>>, vector<1x128xf32>
    %14 = vector.shape_cast %13 : vector<1x128xf32> to vector<1x128xf32>
    %15 = vector.broadcast %14 : vector<1x128xf32> to vector<8x128xf32>
    %c0_14 = arith.constant 0 : index
    %c0_15 = arith.constant 0 : index
    %16 = vector.load %arg8[%c0_14, %c0_15] : memref<1x256xf32, #tpu.memory_space<vmem>>, vector<1x256xf32>
    %17 = vector.shape_cast %16 : vector<1x256xf32> to vector<1x256xf32>
    %18 = vector.broadcast %17 : vector<1x256xf32> to vector<8x256xf32>
    %c0_16 = arith.constant 0 : index
    %c0_17 = arith.constant 0 : index
    %19 = vector.load %arg9[%c0_16, %c0_17] : memref<1x128xf32, #tpu.memory_space<vmem>>, vector<1x128xf32>
    %20 = vector.shape_cast %19 : vector<1x128xf32> to vector<1x128xf32>
    %21 = vector.broadcast %20 : vector<1x128xf32> to vector<8x128xf32>
    %c0_18 = arith.constant 0 : index
    %c0_19 = arith.constant 0 : index
    %22 = vector.load %arg10[%c0_18, %c0_19] : memref<1x128xf32, #tpu.memory_space<vmem>>, vector<1x128xf32>
    %23 = vector.shape_cast %22 : vector<1x128xf32> to vector<1x128xf32>
    %24 = vector.broadcast %23 : vector<1x128xf32> to vector<8x128xf32>
    %c8_i32 = arith.constant 8 : i32
    %25 = arith.muli %arg1, %c8_i32 : i32
    %c0_20 = arith.constant 0 : index
    %c0_21 = arith.constant 0 : index
    %26 = vector.load %arg15[%c0_20, %c0_21] : memref<8x256xf32, #tpu.memory_space<vmem>>, vector<8x256xf32>
    %c0_i32_22 = arith.constant 0 : i32
    %27 = arith.addi %25, %c0_i32_22 : i32
    %28 = vector.extract_strided_slice %26 {offsets = [0, 0], sizes = [8, 128], strides = [1, 1]} : vector<8x256xf32> to vector<8x128xf32>
    %29 = vector.extract_strided_slice %26 {offsets = [0, 128], sizes = [8, 128], strides = [1, 1]} : vector<8x256xf32> to vector<8x128xf32>
    %cst_23 = arith.constant dense<0.000000e+00> : vector<8x1152xf32>
    %30 = tpu.matmul %26, %12, %cst_23 {dimension_numbers = #tpu.dot_dimension_numbers<[1], [0], [0], [1], [0, 0, 1, 1], [], []>} : vector<8x256xf32>, vector<256x1152xf32>, vector<8x1152xf32> -> vector<8x1152xf32>
    %31 = arith.index_cast %c0_i32_22 : i32 to index
    %c0_24 = arith.constant 0 : index
    %c0_25 = arith.constant 0 : index
    %32 = vector.load %arg16[%31, %c0_24, %c0_25] : memref<8x8x384xf32, #tpu.memory_space<vmem>>, vector<1x8x384xf32>
    %33 = vector.shape_cast %32 : vector<1x8x384xf32> to vector<8x384xf32>
    %34 = vector.extract_strided_slice %33 {offsets = [0, 0], sizes = [8, 256], strides = [1, 1]} : vector<8x384xf32> to vector<8x256xf32>
    %35 = vector.extract_strided_slice %33 {offsets = [0, 256], sizes = [8, 128], strides = [1, 1]} : vector<8x384xf32> to vector<8x128xf32>
    %36 = vector.extract_strided_slice %30 {offsets = [0, 0], sizes = [8, 256], strides = [1, 1]} : vector<8x1152xf32> to vector<8x256xf32>
    %37 = vector.extract_strided_slice %30 {offsets = [0, 256], sizes = [8, 128], strides = [1, 1]} : vector<8x1152xf32> to vector<8x128xf32>
    %38 = arith.addf %37, %15 : vector<8x128xf32>
    %39 = arith.addf %34, %36 : vector<8x256xf32>
    %40 = arith.negf %39 : vector<8x256xf32>
    %41 = math.exp %40 : vector<8x256xf32>
    %cst_26 = arith.constant 1.000000e+00 : f32
    %42 = vector.broadcast %cst_26 : f32 to vector<8x256xf32>
    %43 = arith.addf %42, %41 : vector<8x256xf32>
    %44 = arith.divf %42, %43 : vector<8x256xf32>
    %45 = vector.extract_strided_slice %44 {offsets = [0, 0], sizes = [8, 128], strides = [1, 1]} : vector<8x256xf32> to vector<8x128xf32>
    %46 = vector.extract_strided_slice %44 {offsets = [0, 128], sizes = [8, 128], strides = [1, 1]} : vector<8x256xf32> to vector<8x128xf32>
    %47 = arith.mulf %45, %38 : vector<8x128xf32>
    %48 = arith.addf %35, %47 : vector<8x128xf32>
    %49 = math.tanh %48 : vector<8x128xf32>
    %50 = arith.subf %28, %49 : vector<8x128xf32>
    %51 = arith.mulf %46, %50 : vector<8x128xf32>
    %52 = arith.addf %49, %51 : vector<8x128xf32>
    %53 = vector.extract_strided_slice %30 {offsets = [0, 384], sizes = [8, 256], strides = [1, 1]} : vector<8x1152xf32> to vector<8x256xf32>
    %54 = arith.addf %53, %18 : vector<8x256xf32>
    %55 = vector.extract_strided_slice %30 {offsets = [0, 640], sizes = [8, 128], strides = [1, 1]} : vector<8x1152xf32> to vector<8x128xf32>
    %56 = arith.addf %55, %21 : vector<8x128xf32>
    %57 = vector.extract_strided_slice %30 {offsets = [0, 768], sizes = [8, 256], strides = [1, 1]} : vector<8x1152xf32> to vector<8x256xf32>
    %58 = vector.extract_strided_slice %30 {offsets = [0, 1024], sizes = [8, 128], strides = [1, 1]} : vector<8x1152xf32> to vector<8x128xf32>
    %59 = arith.addf %58, %24 : vector<8x128xf32>
    %60 = arith.addf %54, %57 : vector<8x256xf32>
    %61 = arith.negf %60 : vector<8x256xf32>
    %62 = math.exp %61 : vector<8x256xf32>
    %cst_27 = arith.constant 1.000000e+00 : f32
    %63 = vector.broadcast %cst_27 : f32 to vector<8x256xf32>
    %64 = arith.addf %63, %62 : vector<8x256xf32>
    %65 = arith.divf %63, %64 : vector<8x256xf32>
    %66 = vector.extract_strided_slice %65 {offsets = [0, 0], sizes = [8, 128], strides = [1, 1]} : vector<8x256xf32> to vector<8x128xf32>
    %67 = vector.extract_strided_slice %65 {offsets = [0, 128], sizes = [8, 128], strides = [1, 1]} : vector<8x256xf32> to vector<8x128xf32>
    %68 = arith.mulf %66, %59 : vector<8x128xf32>
    %69 = arith.addf %56, %68 : vector<8x128xf32>
    %70 = math.tanh %69 : vector<8x128xf32>
    %71 = arith.subf %29, %70 : vector<8x128xf32>
    %72 = arith.mulf %67, %71 : vector<8x128xf32>
    %73 = arith.addf %70, %72 : vector<8x128xf32>
    %c1_i32 = arith.constant 1 : i32
    %74 = arith.cmpi sge, %27, %c1_i32 : i32
    %75 = arith.extui %74 : i1 to i32
    %76 = arith.sitofp %75 : i32 to f32
    %77 = arith.subf %73, %29 : vector<8x128xf32>
    %78 = vector.broadcast %76 : f32 to vector<8x128xf32>
    %79 = arith.mulf %78, %77 : vector<8x128xf32>
    %80 = arith.addf %29, %79 : vector<8x128xf32>
    %81 = tpu.concatenate %52, %80 in 1 : vector<8x128xf32>, vector<8x128xf32> -> vector<8x256xf32>
    %c1_i32_28 = arith.constant 1 : i32
    %82 = arith.addi %25, %c1_i32_28 : i32
    %83 = vector.extract_strided_slice %81 {offsets = [0, 0], sizes = [8, 128], strides = [1, 1]} : vector<8x256xf32> to vector<8x128xf32>
    %84 = vector.extract_strided_slice %81 {offsets = [0, 128], sizes = [8, 128], strides = [1, 1]} : vector<8x256xf32> to vector<8x128xf32>
    %cst_29 = arith.constant dense<0.000000e+00> : vector<8x1152xf32>
    %85 = tpu.matmul %81, %12, %cst_29 {dimension_numbers = #tpu.dot_dimension_numbers<[1], [0], [0], [1], [0, 0, 1, 1], [], []>} : vector<8x256xf32>, vector<256x1152xf32>, vector<8x1152xf32> -> vector<8x1152xf32>
    %86 = arith.index_cast %c1_i32_28 : i32 to index
    %c0_30 = arith.constant 0 : index
    %c0_31 = arith.constant 0 : index
    %87 = vector.load %arg16[%86, %c0_30, %c0_31] : memref<8x8x384xf32, #tpu.memory_space<vmem>>, vector<1x8x384xf32>
    %88 = vector.shape_cast %87 : vector<1x8x384xf32> to vector<8x384xf32>
    %89 = vector.extract_strided_slice %88 {offsets = [0, 0], sizes = [8, 256], strides = [1, 1]} : vector<8x384xf32> to vector<8x256xf32>
    %90 = vector.extract_strided_slice %88 {offsets = [0, 256], sizes = [8, 128], strides = [1, 1]} : vector<8x384xf32> to vector<8x128xf32>
    %91 = vector.extract_strided_slice %85 {offsets = [0, 0], sizes = [8, 256], strides = [1, 1]} : vector<8x1152xf32> to vector<8x256xf32>
    %92 = vector.extract_strided_slice %85 {offsets = [0, 256], sizes = [8, 128], strides = [1, 1]} : vector<8x1152xf32> to vector<8x128xf32>
    %93 = arith.addf %92, %15 : vector<8x128xf32>
    %94 = arith.addf %89, %91 : vector<8x256xf32>
    %95 = arith.negf %94 : vector<8x256xf32>
    %96 = math.exp %95 : vector<8x256xf32>
    %cst_32 = arith.constant 1.000000e+00 : f32
    %97 = vector.broadcast %cst_32 : f32 to vector<8x256xf32>
    %98 = arith.addf %97, %96 : vector<8x256xf32>
    %99 = arith.divf %97, %98 : vector<8x256xf32>
    %100 = vector.extract_strided_slice %99 {offsets = [0, 0], sizes = [8, 128], strides = [1, 1]} : vector<8x256xf32> to vector<8x128xf32>
    %101 = vector.extract_strided_slice %99 {offsets = [0, 128], sizes = [8, 128], strides = [1, 1]} : vector<8x256xf32> to vector<8x128xf32>
    %102 = arith.mulf %100, %93 : vector<8x128xf32>
    %103 = arith.addf %90, %102 : vector<8x128xf32>
    %104 = math.tanh %103 : vector<8x128xf32>
    %105 = arith.subf %83, %104 : vector<8x128xf32>
    %106 = arith.mulf %101, %105 : vector<8x128xf32>
    %107 = arith.addf %104, %106 : vector<8x128xf32>
    %108 = vector.extract_strided_slice %85 {offsets = [0, 384], sizes = [8, 256], strides = [1, 1]} : vector<8x1152xf32> to vector<8x256xf32>
    %109 = arith.addf %108, %18 : vector<8x256xf32>
    %110 = vector.extract_strided_slice %85 {offsets = [0, 640], sizes = [8, 128], strides = [1, 1]} : vector<8x1152xf32> to vector<8x128xf32>
    %111 = arith.addf %110, %21 : vector<8x128xf32>
    %112 = vector.extract_strided_slice %85 {offsets = [0, 768], sizes = [8, 256], strides = [1, 1]} : vector<8x1152xf32> to vector<8x256xf32>
    %113 = vector.extract_strided_slice %85 {offsets = [0, 1024], sizes = [8, 128], strides = [1, 1]} : vector<8x1152xf32> to vector<8x128xf32>
    %114 = arith.addf %113, %24 : vector<8x128xf32>
    %115 = arith.addf %109, %112 : vector<8x256xf32>
    %116 = arith.negf %115 : vector<8x256xf32>
    %117 = math.exp %116 : vector<8x256xf32>
    %cst_33 = arith.constant 1.000000e+00 : f32
    %118 = vector.broadcast %cst_33 : f32 to vector<8x256xf32>
    %119 = arith.addf %118, %117 : vector<8x256xf32>
    %120 = arith.divf %118, %119 : vector<8x256xf32>
    %121 = vector.extract_strided_slice %120 {offsets = [0, 0], sizes = [8, 128], strides = [1, 1]} : vector<8x256xf32> to vector<8x128xf32>
    %122 = vector.extract_strided_slice %120 {offsets = [0, 128], sizes = [8, 128], strides = [1, 1]} : vector<8x256xf32> to vector<8x128xf32>
    %123 = arith.mulf %121, %114 : vector<8x128xf32>
    %124 = arith.addf %111, %123 : vector<8x128xf32>
    %125 = math.tanh %124 : vector<8x128xf32>
    %126 = arith.subf %84, %125 : vector<8x128xf32>
    %127 = arith.mulf %122, %126 : vector<8x128xf32>
    %128 = arith.addf %125, %127 : vector<8x128xf32>
    %c1_i32_34 = arith.constant 1 : i32
    %129 = arith.cmpi sge, %82, %c1_i32_34 : i32
    %130 = arith.extui %129 : i1 to i32
    %131 = arith.sitofp %130 : i32 to f32
    %132 = arith.subf %128, %84 : vector<8x128xf32>
    %133 = vector.broadcast %131 : f32 to vector<8x128xf32>
    %134 = arith.mulf %133, %132 : vector<8x128xf32>
    %135 = arith.addf %84, %134 : vector<8x128xf32>
    %136 = tpu.concatenate %107, %135 in 1 : vector<8x128xf32>, vector<8x128xf32> -> vector<8x256xf32>
    %c2_i32 = arith.constant 2 : i32
    %137 = arith.addi %25, %c2_i32 : i32
    %138 = vector.extract_strided_slice %136 {offsets = [0, 0], sizes = [8, 128], strides = [1, 1]} : vector<8x256xf32> to vector<8x128xf32>
    %139 = vector.extract_strided_slice %136 {offsets = [0, 128], sizes = [8, 128], strides = [1, 1]} : vector<8x256xf32> to vector<8x128xf32>
    %cst_35 = arith.constant dense<0.000000e+00> : vector<8x1152xf32>
    %140 = tpu.matmul %136, %12, %cst_35 {dimension_numbers = #tpu.dot_dimension_numbers<[1], [0], [0], [1], [0, 0, 1, 1], [], []>} : vector<8x256xf32>, vector<256x1152xf32>, vector<8x1152xf32> -> vector<8x1152xf32>
    %141 = arith.index_cast %c2_i32 : i32 to index
    %c0_36 = arith.constant 0 : index
    %c0_37 = arith.constant 0 : index
    %142 = vector.load %arg16[%141, %c0_36, %c0_37] : memref<8x8x384xf32, #tpu.memory_space<vmem>>, vector<1x8x384xf32>
    %143 = vector.shape_cast %142 : vector<1x8x384xf32> to vector<8x384xf32>
    %144 = vector.extract_strided_slice %143 {offsets = [0, 0], sizes = [8, 256], strides = [1, 1]} : vector<8x384xf32> to vector<8x256xf32>
    %145 = vector.extract_strided_slice %143 {offsets = [0, 256], sizes = [8, 128], strides = [1, 1]} : vector<8x384xf32> to vector<8x128xf32>
    %146 = vector.extract_strided_slice %140 {offsets = [0, 0], sizes = [8, 256], strides = [1, 1]} : vector<8x1152xf32> to vector<8x256xf32>
    %147 = vector.extract_strided_slice %140 {offsets = [0, 256], sizes = [8, 128], strides = [1, 1]} : vector<8x1152xf32> to vector<8x128xf32>
    %148 = arith.addf %147, %15 : vector<8x128xf32>
    %149 = arith.addf %144, %146 : vector<8x256xf32>
    %150 = arith.negf %149 : vector<8x256xf32>
    %151 = math.exp %150 : vector<8x256xf32>
    %cst_38 = arith.constant 1.000000e+00 : f32
    %152 = vector.broadcast %cst_38 : f32 to vector<8x256xf32>
    %153 = arith.addf %152, %151 : vector<8x256xf32>
    %154 = arith.divf %152, %153 : vector<8x256xf32>
    %155 = vector.extract_strided_slice %154 {offsets = [0, 0], sizes = [8, 128], strides = [1, 1]} : vector<8x256xf32> to vector<8x128xf32>
    %156 = vector.extract_strided_slice %154 {offsets = [0, 128], sizes = [8, 128], strides = [1, 1]} : vector<8x256xf32> to vector<8x128xf32>
    %157 = arith.mulf %155, %148 : vector<8x128xf32>
    %158 = arith.addf %145, %157 : vector<8x128xf32>
    %159 = math.tanh %158 : vector<8x128xf32>
    %160 = arith.subf %138, %159 : vector<8x128xf32>
    %161 = arith.mulf %156, %160 : vector<8x128xf32>
    %162 = arith.addf %159, %161 : vector<8x128xf32>
    %163 = vector.extract_strided_slice %140 {offsets = [0, 384], sizes = [8, 256], strides = [1, 1]} : vector<8x1152xf32> to vector<8x256xf32>
    %164 = arith.addf %163, %18 : vector<8x256xf32>
    %165 = vector.extract_strided_slice %140 {offsets = [0, 640], sizes = [8, 128], strides = [1, 1]} : vector<8x1152xf32> to vector<8x128xf32>
    %166 = arith.addf %165, %21 : vector<8x128xf32>
    %167 = vector.extract_strided_slice %140 {offsets = [0, 768], sizes = [8, 256], strides = [1, 1]} : vector<8x1152xf32> to vector<8x256xf32>
    %168 = vector.extract_strided_slice %140 {offsets = [0, 1024], sizes = [8, 128], strides = [1, 1]} : vector<8x1152xf32> to vector<8x128xf32>
    %169 = arith.addf %168, %24 : vector<8x128xf32>
    %170 = arith.addf %164, %167 : vector<8x256xf32>
    %171 = arith.negf %170 : vector<8x256xf32>
    %172 = math.exp %171 : vector<8x256xf32>
    %cst_39 = arith.constant 1.000000e+00 : f32
    %173 = vector.broadcast %cst_39 : f32 to vector<8x256xf32>
    %174 = arith.addf %173, %172 : vector<8x256xf32>
    %175 = arith.divf %173, %174 : vector<8x256xf32>
    %176 = vector.extract_strided_slice %175 {offsets = [0, 0], sizes = [8, 128], strides = [1, 1]} : vector<8x256xf32> to vector<8x128xf32>
    %177 = vector.extract_strided_slice %175 {offsets = [0, 128], sizes = [8, 128], strides = [1, 1]} : vector<8x256xf32> to vector<8x128xf32>
    %178 = arith.mulf %176, %169 : vector<8x128xf32>
    %179 = arith.addf %166, %178 : vector<8x128xf32>
    %180 = math.tanh %179 : vector<8x128xf32>
    %181 = arith.subf %139, %180 : vector<8x128xf32>
    %182 = arith.mulf %177, %181 : vector<8x128xf32>
    %183 = arith.addf %180, %182 : vector<8x128xf32>
    %c1_i32_40 = arith.constant 1 : i32
    %184 = arith.cmpi sge, %137, %c1_i32_40 : i32
    %185 = arith.extui %184 : i1 to i32
    %186 = arith.sitofp %185 : i32 to f32
    %187 = arith.subf %183, %139 : vector<8x128xf32>
    %188 = vector.broadcast %186 : f32 to vector<8x128xf32>
    %189 = arith.mulf %188, %187 : vector<8x128xf32>
    %190 = arith.addf %139, %189 : vector<8x128xf32>
    %191 = tpu.concatenate %162, %190 in 1 : vector<8x128xf32>, vector<8x128xf32> -> vector<8x256xf32>
    %c3_i32 = arith.constant 3 : i32
    %192 = arith.addi %25, %c3_i32 : i32
    %193 = vector.extract_strided_slice %191 {offsets = [0, 0], sizes = [8, 128], strides = [1, 1]} : vector<8x256xf32> to vector<8x128xf32>
    %194 = vector.extract_strided_slice %191 {offsets = [0, 128], sizes = [8, 128], strides = [1, 1]} : vector<8x256xf32> to vector<8x128xf32>
    %cst_41 = arith.constant dense<0.000000e+00> : vector<8x1152xf32>
    %195 = tpu.matmul %191, %12, %cst_41 {dimension_numbers = #tpu.dot_dimension_numbers<[1], [0], [0], [1], [0, 0, 1, 1], [], []>} : vector<8x256xf32>, vector<256x1152xf32>, vector<8x1152xf32> -> vector<8x1152xf32>
    %196 = arith.index_cast %c3_i32 : i32 to index
    %c0_42 = arith.constant 0 : index
    %c0_43 = arith.constant 0 : index
    %197 = vector.load %arg16[%196, %c0_42, %c0_43] : memref<8x8x384xf32, #tpu.memory_space<vmem>>, vector<1x8x384xf32>
    %198 = vector.shape_cast %197 : vector<1x8x384xf32> to vector<8x384xf32>
    %199 = vector.extract_strided_slice %198 {offsets = [0, 0], sizes = [8, 256], strides = [1, 1]} : vector<8x384xf32> to vector<8x256xf32>
    %200 = vector.extract_strided_slice %198 {offsets = [0, 256], sizes = [8, 128], strides = [1, 1]} : vector<8x384xf32> to vector<8x128xf32>
    %201 = vector.extract_strided_slice %195 {offsets = [0, 0], sizes = [8, 256], strides = [1, 1]} : vector<8x1152xf32> to vector<8x256xf32>
    %202 = vector.extract_strided_slice %195 {offsets = [0, 256], sizes = [8, 128], strides = [1, 1]} : vector<8x1152xf32> to vector<8x128xf32>
    %203 = arith.addf %202, %15 : vector<8x128xf32>
    %204 = arith.addf %199, %201 : vector<8x256xf32>
    %205 = arith.negf %204 : vector<8x256xf32>
    %206 = math.exp %205 : vector<8x256xf32>
    %cst_44 = arith.constant 1.000000e+00 : f32
    %207 = vector.broadcast %cst_44 : f32 to vector<8x256xf32>
    %208 = arith.addf %207, %206 : vector<8x256xf32>
    %209 = arith.divf %207, %208 : vector<8x256xf32>
    %210 = vector.extract_strided_slice %209 {offsets = [0, 0], sizes = [8, 128], strides = [1, 1]} : vector<8x256xf32> to vector<8x128xf32>
    %211 = vector.extract_strided_slice %209 {offsets = [0, 128], sizes = [8, 128], strides = [1, 1]} : vector<8x256xf32> to vector<8x128xf32>
    %212 = arith.mulf %210, %203 : vector<8x128xf32>
    %213 = arith.addf %200, %212 : vector<8x128xf32>
    %214 = math.tanh %213 : vector<8x128xf32>
    %215 = arith.subf %193, %214 : vector<8x128xf32>
    %216 = arith.mulf %211, %215 : vector<8x128xf32>
    %217 = arith.addf %214, %216 : vector<8x128xf32>
    %218 = vector.extract_strided_slice %195 {offsets = [0, 384], sizes = [8, 256], strides = [1, 1]} : vector<8x1152xf32> to vector<8x256xf32>
    %219 = arith.addf %218, %18 : vector<8x256xf32>
    %220 = vector.extract_strided_slice %195 {offsets = [0, 640], sizes = [8, 128], strides = [1, 1]} : vector<8x1152xf32> to vector<8x128xf32>
    %221 = arith.addf %220, %21 : vector<8x128xf32>
    %222 = vector.extract_strided_slice %195 {offsets = [0, 768], sizes = [8, 256], strides = [1, 1]} : vector<8x1152xf32> to vector<8x256xf32>
    %223 = vector.extract_strided_slice %195 {offsets = [0, 1024], sizes = [8, 128], strides = [1, 1]} : vector<8x1152xf32> to vector<8x128xf32>
    %224 = arith.addf %223, %24 : vector<8x128xf32>
    %225 = arith.addf %219, %222 : vector<8x256xf32>
    %226 = arith.negf %225 : vector<8x256xf32>
    %227 = math.exp %226 : vector<8x256xf32>
    %cst_45 = arith.constant 1.000000e+00 : f32
    %228 = vector.broadcast %cst_45 : f32 to vector<8x256xf32>
    %229 = arith.addf %228, %227 : vector<8x256xf32>
    %230 = arith.divf %228, %229 : vector<8x256xf32>
    %231 = vector.extract_strided_slice %230 {offsets = [0, 0], sizes = [8, 128], strides = [1, 1]} : vector<8x256xf32> to vector<8x128xf32>
    %232 = vector.extract_strided_slice %230 {offsets = [0, 128], sizes = [8, 128], strides = [1, 1]} : vector<8x256xf32> to vector<8x128xf32>
    %233 = arith.mulf %231, %224 : vector<8x128xf32>
    %234 = arith.addf %221, %233 : vector<8x128xf32>
    %235 = math.tanh %234 : vector<8x128xf32>
    %236 = arith.subf %194, %235 : vector<8x128xf32>
    %237 = arith.mulf %232, %236 : vector<8x128xf32>
    %238 = arith.addf %235, %237 : vector<8x128xf32>
    %c1_i32_46 = arith.constant 1 : i32
    %239 = arith.cmpi sge, %192, %c1_i32_46 : i32
    %240 = arith.extui %239 : i1 to i32
    %241 = arith.sitofp %240 : i32 to f32
    %242 = arith.subf %238, %194 : vector<8x128xf32>
    %243 = vector.broadcast %241 : f32 to vector<8x128xf32>
    %244 = arith.mulf %243, %242 : vector<8x128xf32>
    %245 = arith.addf %194, %244 : vector<8x128xf32>
    %246 = tpu.concatenate %217, %245 in 1 : vector<8x128xf32>, vector<8x128xf32> -> vector<8x256xf32>
    %c4_i32 = arith.constant 4 : i32
    %247 = arith.addi %25, %c4_i32 : i32
    %248 = vector.extract_strided_slice %246 {offsets = [0, 0], sizes = [8, 128], strides = [1, 1]} : vector<8x256xf32> to vector<8x128xf32>
    %249 = vector.extract_strided_slice %246 {offsets = [0, 128], sizes = [8, 128], strides = [1, 1]} : vector<8x256xf32> to vector<8x128xf32>
    %cst_47 = arith.constant dense<0.000000e+00> : vector<8x1152xf32>
    %250 = tpu.matmul %246, %12, %cst_47 {dimension_numbers = #tpu.dot_dimension_numbers<[1], [0], [0], [1], [0, 0, 1, 1], [], []>} : vector<8x256xf32>, vector<256x1152xf32>, vector<8x1152xf32> -> vector<8x1152xf32>
    %251 = arith.index_cast %c4_i32 : i32 to index
    %c0_48 = arith.constant 0 : index
    %c0_49 = arith.constant 0 : index
    %252 = vector.load %arg16[%251, %c0_48, %c0_49] : memref<8x8x384xf32, #tpu.memory_space<vmem>>, vector<1x8x384xf32>
    %253 = vector.shape_cast %252 : vector<1x8x384xf32> to vector<8x384xf32>
    %254 = vector.extract_strided_slice %253 {offsets = [0, 0], sizes = [8, 256], strides = [1, 1]} : vector<8x384xf32> to vector<8x256xf32>
    %255 = vector.extract_strided_slice %253 {offsets = [0, 256], sizes = [8, 128], strides = [1, 1]} : vector<8x384xf32> to vector<8x128xf32>
    %256 = vector.extract_strided_slice %250 {offsets = [0, 0], sizes = [8, 256], strides = [1, 1]} : vector<8x1152xf32> to vector<8x256xf32>
    %257 = vector.extract_strided_slice %250 {offsets = [0, 256], sizes = [8, 128], strides = [1, 1]} : vector<8x1152xf32> to vector<8x128xf32>
    %258 = arith.addf %257, %15 : vector<8x128xf32>
    %259 = arith.addf %254, %256 : vector<8x256xf32>
    %260 = arith.negf %259 : vector<8x256xf32>
    %261 = math.exp %260 : vector<8x256xf32>
    %cst_50 = arith.constant 1.000000e+00 : f32
    %262 = vector.broadcast %cst_50 : f32 to vector<8x256xf32>
    %263 = arith.addf %262, %261 : vector<8x256xf32>
    %264 = arith.divf %262, %263 : vector<8x256xf32>
    %265 = vector.extract_strided_slice %264 {offsets = [0, 0], sizes = [8, 128], strides = [1, 1]} : vector<8x256xf32> to vector<8x128xf32>
    %266 = vector.extract_strided_slice %264 {offsets = [0, 128], sizes = [8, 128], strides = [1, 1]} : vector<8x256xf32> to vector<8x128xf32>
    %267 = arith.mulf %265, %258 : vector<8x128xf32>
    %268 = arith.addf %255, %267 : vector<8x128xf32>
    %269 = math.tanh %268 : vector<8x128xf32>
    %270 = arith.subf %248, %269 : vector<8x128xf32>
    %271 = arith.mulf %266, %270 : vector<8x128xf32>
    %272 = arith.addf %269, %271 : vector<8x128xf32>
    %273 = vector.extract_strided_slice %250 {offsets = [0, 384], sizes = [8, 256], strides = [1, 1]} : vector<8x1152xf32> to vector<8x256xf32>
    %274 = arith.addf %273, %18 : vector<8x256xf32>
    %275 = vector.extract_strided_slice %250 {offsets = [0, 640], sizes = [8, 128], strides = [1, 1]} : vector<8x1152xf32> to vector<8x128xf32>
    %276 = arith.addf %275, %21 : vector<8x128xf32>
    %277 = vector.extract_strided_slice %250 {offsets = [0, 768], sizes = [8, 256], strides = [1, 1]} : vector<8x1152xf32> to vector<8x256xf32>
    %278 = vector.extract_strided_slice %250 {offsets = [0, 1024], sizes = [8, 128], strides = [1, 1]} : vector<8x1152xf32> to vector<8x128xf32>
    %279 = arith.addf %278, %24 : vector<8x128xf32>
    %280 = arith.addf %274, %277 : vector<8x256xf32>
    %281 = arith.negf %280 : vector<8x256xf32>
    %282 = math.exp %281 : vector<8x256xf32>
    %cst_51 = arith.constant 1.000000e+00 : f32
    %283 = vector.broadcast %cst_51 : f32 to vector<8x256xf32>
    %284 = arith.addf %283, %282 : vector<8x256xf32>
    %285 = arith.divf %283, %284 : vector<8x256xf32>
    %286 = vector.extract_strided_slice %285 {offsets = [0, 0], sizes = [8, 128], strides = [1, 1]} : vector<8x256xf32> to vector<8x128xf32>
    %287 = vector.extract_strided_slice %285 {offsets = [0, 128], sizes = [8, 128], strides = [1, 1]} : vector<8x256xf32> to vector<8x128xf32>
    %288 = arith.mulf %286, %279 : vector<8x128xf32>
    %289 = arith.addf %276, %288 : vector<8x128xf32>
    %290 = math.tanh %289 : vector<8x128xf32>
    %291 = arith.subf %249, %290 : vector<8x128xf32>
    %292 = arith.mulf %287, %291 : vector<8x128xf32>
    %293 = arith.addf %290, %292 : vector<8x128xf32>
    %c1_i32_52 = arith.constant 1 : i32
    %294 = arith.cmpi sge, %247, %c1_i32_52 : i32
    %295 = arith.extui %294 : i1 to i32
    %296 = arith.sitofp %295 : i32 to f32
    %297 = arith.subf %293, %249 : vector<8x128xf32>
    %298 = vector.broadcast %296 : f32 to vector<8x128xf32>
    %299 = arith.mulf %298, %297 : vector<8x128xf32>
    %300 = arith.addf %249, %299 : vector<8x128xf32>
    %301 = tpu.concatenate %272, %300 in 1 : vector<8x128xf32>, vector<8x128xf32> -> vector<8x256xf32>
    %c5_i32 = arith.constant 5 : i32
    %302 = arith.addi %25, %c5_i32 : i32
    %303 = vector.extract_strided_slice %301 {offsets = [0, 0], sizes = [8, 128], strides = [1, 1]} : vector<8x256xf32> to vector<8x128xf32>
    %304 = vector.extract_strided_slice %301 {offsets = [0, 128], sizes = [8, 128], strides = [1, 1]} : vector<8x256xf32> to vector<8x128xf32>
    %cst_53 = arith.constant dense<0.000000e+00> : vector<8x1152xf32>
    %305 = tpu.matmul %301, %12, %cst_53 {dimension_numbers = #tpu.dot_dimension_numbers<[1], [0], [0], [1], [0, 0, 1, 1], [], []>} : vector<8x256xf32>, vector<256x1152xf32>, vector<8x1152xf32> -> vector<8x1152xf32>
    %306 = arith.index_cast %c5_i32 : i32 to index
    %c0_54 = arith.constant 0 : index
    %c0_55 = arith.constant 0 : index
    %307 = vector.load %arg16[%306, %c0_54, %c0_55] : memref<8x8x384xf32, #tpu.memory_space<vmem>>, vector<1x8x384xf32>
    %308 = vector.shape_cast %307 : vector<1x8x384xf32> to vector<8x384xf32>
    %309 = vector.extract_strided_slice %308 {offsets = [0, 0], sizes = [8, 256], strides = [1, 1]} : vector<8x384xf32> to vector<8x256xf32>
    %310 = vector.extract_strided_slice %308 {offsets = [0, 256], sizes = [8, 128], strides = [1, 1]} : vector<8x384xf32> to vector<8x128xf32>
    %311 = vector.extract_strided_slice %305 {offsets = [0, 0], sizes = [8, 256], strides = [1, 1]} : vector<8x1152xf32> to vector<8x256xf32>
    %312 = vector.extract_strided_slice %305 {offsets = [0, 256], sizes = [8, 128], strides = [1, 1]} : vector<8x1152xf32> to vector<8x128xf32>
    %313 = arith.addf %312, %15 : vector<8x128xf32>
    %314 = arith.addf %309, %311 : vector<8x256xf32>
    %315 = arith.negf %314 : vector<8x256xf32>
    %316 = math.exp %315 : vector<8x256xf32>
    %cst_56 = arith.constant 1.000000e+00 : f32
    %317 = vector.broadcast %cst_56 : f32 to vector<8x256xf32>
    %318 = arith.addf %317, %316 : vector<8x256xf32>
    %319 = arith.divf %317, %318 : vector<8x256xf32>
    %320 = vector.extract_strided_slice %319 {offsets = [0, 0], sizes = [8, 128], strides = [1, 1]} : vector<8x256xf32> to vector<8x128xf32>
    %321 = vector.extract_strided_slice %319 {offsets = [0, 128], sizes = [8, 128], strides = [1, 1]} : vector<8x256xf32> to vector<8x128xf32>
    %322 = arith.mulf %320, %313 : vector<8x128xf32>
    %323 = arith.addf %310, %322 : vector<8x128xf32>
    %324 = math.tanh %323 : vector<8x128xf32>
    %325 = arith.subf %303, %324 : vector<8x128xf32>
    %326 = arith.mulf %321, %325 : vector<8x128xf32>
    %327 = arith.addf %324, %326 : vector<8x128xf32>
    %328 = vector.extract_strided_slice %305 {offsets = [0, 384], sizes = [8, 256], strides = [1, 1]} : vector<8x1152xf32> to vector<8x256xf32>
    %329 = arith.addf %328, %18 : vector<8x256xf32>
    %330 = vector.extract_strided_slice %305 {offsets = [0, 640], sizes = [8, 128], strides = [1, 1]} : vector<8x1152xf32> to vector<8x128xf32>
    %331 = arith.addf %330, %21 : vector<8x128xf32>
    %332 = vector.extract_strided_slice %305 {offsets = [0, 768], sizes = [8, 256], strides = [1, 1]} : vector<8x1152xf32> to vector<8x256xf32>
    %333 = vector.extract_strided_slice %305 {offsets = [0, 1024], sizes = [8, 128], strides = [1, 1]} : vector<8x1152xf32> to vector<8x128xf32>
    %334 = arith.addf %333, %24 : vector<8x128xf32>
    %335 = arith.addf %329, %332 : vector<8x256xf32>
    %336 = arith.negf %335 : vector<8x256xf32>
    %337 = math.exp %336 : vector<8x256xf32>
    %cst_57 = arith.constant 1.000000e+00 : f32
    %338 = vector.broadcast %cst_57 : f32 to vector<8x256xf32>
    %339 = arith.addf %338, %337 : vector<8x256xf32>
    %340 = arith.divf %338, %339 : vector<8x256xf32>
    %341 = vector.extract_strided_slice %340 {offsets = [0, 0], sizes = [8, 128], strides = [1, 1]} : vector<8x256xf32> to vector<8x128xf32>
    %342 = vector.extract_strided_slice %340 {offsets = [0, 128], sizes = [8, 128], strides = [1, 1]} : vector<8x256xf32> to vector<8x128xf32>
    %343 = arith.mulf %341, %334 : vector<8x128xf32>
    %344 = arith.addf %331, %343 : vector<8x128xf32>
    %345 = math.tanh %344 : vector<8x128xf32>
    %346 = arith.subf %304, %345 : vector<8x128xf32>
    %347 = arith.mulf %342, %346 : vector<8x128xf32>
    %348 = arith.addf %345, %347 : vector<8x128xf32>
    %c1_i32_58 = arith.constant 1 : i32
    %349 = arith.cmpi sge, %302, %c1_i32_58 : i32
    %350 = arith.extui %349 : i1 to i32
    %351 = arith.sitofp %350 : i32 to f32
    %352 = arith.subf %348, %304 : vector<8x128xf32>
    %353 = vector.broadcast %351 : f32 to vector<8x128xf32>
    %354 = arith.mulf %353, %352 : vector<8x128xf32>
    %355 = arith.addf %304, %354 : vector<8x128xf32>
    %356 = tpu.concatenate %327, %355 in 1 : vector<8x128xf32>, vector<8x128xf32> -> vector<8x256xf32>
    %c6_i32 = arith.constant 6 : i32
    %357 = arith.addi %25, %c6_i32 : i32
    %358 = vector.extract_strided_slice %356 {offsets = [0, 0], sizes = [8, 128], strides = [1, 1]} : vector<8x256xf32> to vector<8x128xf32>
    %359 = vector.extract_strided_slice %356 {offsets = [0, 128], sizes = [8, 128], strides = [1, 1]} : vector<8x256xf32> to vector<8x128xf32>
    %cst_59 = arith.constant dense<0.000000e+00> : vector<8x1152xf32>
    %360 = tpu.matmul %356, %12, %cst_59 {dimension_numbers = #tpu.dot_dimension_numbers<[1], [0], [0], [1], [0, 0, 1, 1], [], []>} : vector<8x256xf32>, vector<256x1152xf32>, vector<8x1152xf32> -> vector<8x1152xf32>
    %361 = arith.index_cast %c6_i32 : i32 to index
    %c0_60 = arith.constant 0 : index
    %c0_61 = arith.constant 0 : index
    %362 = vector.load %arg16[%361, %c0_60, %c0_61] : memref<8x8x384xf32, #tpu.memory_space<vmem>>, vector<1x8x384xf32>
    %363 = vector.shape_cast %362 : vector<1x8x384xf32> to vector<8x384xf32>
    %364 = vector.extract_strided_slice %363 {offsets = [0, 0], sizes = [8, 256], strides = [1, 1]} : vector<8x384xf32> to vector<8x256xf32>
    %365 = vector.extract_strided_slice %363 {offsets = [0, 256], sizes = [8, 128], strides = [1, 1]} : vector<8x384xf32> to vector<8x128xf32>
    %366 = vector.extract_strided_slice %360 {offsets = [0, 0], sizes = [8, 256], strides = [1, 1]} : vector<8x1152xf32> to vector<8x256xf32>
    %367 = vector.extract_strided_slice %360 {offsets = [0, 256], sizes = [8, 128], strides = [1, 1]} : vector<8x1152xf32> to vector<8x128xf32>
    %368 = arith.addf %367, %15 : vector<8x128xf32>
    %369 = arith.addf %364, %366 : vector<8x256xf32>
    %370 = arith.negf %369 : vector<8x256xf32>
    %371 = math.exp %370 : vector<8x256xf32>
    %cst_62 = arith.constant 1.000000e+00 : f32
    %372 = vector.broadcast %cst_62 : f32 to vector<8x256xf32>
    %373 = arith.addf %372, %371 : vector<8x256xf32>
    %374 = arith.divf %372, %373 : vector<8x256xf32>
    %375 = vector.extract_strided_slice %374 {offsets = [0, 0], sizes = [8, 128], strides = [1, 1]} : vector<8x256xf32> to vector<8x128xf32>
    %376 = vector.extract_strided_slice %374 {offsets = [0, 128], sizes = [8, 128], strides = [1, 1]} : vector<8x256xf32> to vector<8x128xf32>
    %377 = arith.mulf %375, %368 : vector<8x128xf32>
    %378 = arith.addf %365, %377 : vector<8x128xf32>
    %379 = math.tanh %378 : vector<8x128xf32>
    %380 = arith.subf %358, %379 : vector<8x128xf32>
    %381 = arith.mulf %376, %380 : vector<8x128xf32>
    %382 = arith.addf %379, %381 : vector<8x128xf32>
    %383 = vector.extract_strided_slice %360 {offsets = [0, 384], sizes = [8, 256], strides = [1, 1]} : vector<8x1152xf32> to vector<8x256xf32>
    %384 = arith.addf %383, %18 : vector<8x256xf32>
    %385 = vector.extract_strided_slice %360 {offsets = [0, 640], sizes = [8, 128], strides = [1, 1]} : vector<8x1152xf32> to vector<8x128xf32>
    %386 = arith.addf %385, %21 : vector<8x128xf32>
    %387 = vector.extract_strided_slice %360 {offsets = [0, 768], sizes = [8, 256], strides = [1, 1]} : vector<8x1152xf32> to vector<8x256xf32>
    %388 = vector.extract_strided_slice %360 {offsets = [0, 1024], sizes = [8, 128], strides = [1, 1]} : vector<8x1152xf32> to vector<8x128xf32>
    %389 = arith.addf %388, %24 : vector<8x128xf32>
    %390 = arith.addf %384, %387 : vector<8x256xf32>
    %391 = arith.negf %390 : vector<8x256xf32>
    %392 = math.exp %391 : vector<8x256xf32>
    %cst_63 = arith.constant 1.000000e+00 : f32
    %393 = vector.broadcast %cst_63 : f32 to vector<8x256xf32>
    %394 = arith.addf %393, %392 : vector<8x256xf32>
    %395 = arith.divf %393, %394 : vector<8x256xf32>
    %396 = vector.extract_strided_slice %395 {offsets = [0, 0], sizes = [8, 128], strides = [1, 1]} : vector<8x256xf32> to vector<8x128xf32>
    %397 = vector.extract_strided_slice %395 {offsets = [0, 128], sizes = [8, 128], strides = [1, 1]} : vector<8x256xf32> to vector<8x128xf32>
    %398 = arith.mulf %396, %389 : vector<8x128xf32>
    %399 = arith.addf %386, %398 : vector<8x128xf32>
    %400 = math.tanh %399 : vector<8x128xf32>
    %401 = arith.subf %359, %400 : vector<8x128xf32>
    %402 = arith.mulf %397, %401 : vector<8x128xf32>
    %403 = arith.addf %400, %402 : vector<8x128xf32>
    %c1_i32_64 = arith.constant 1 : i32
    %404 = arith.cmpi sge, %357, %c1_i32_64 : i32
    %405 = arith.extui %404 : i1 to i32
    %406 = arith.sitofp %405 : i32 to f32
    %407 = arith.subf %403, %359 : vector<8x128xf32>
    %408 = vector.broadcast %406 : f32 to vector<8x128xf32>
    %409 = arith.mulf %408, %407 : vector<8x128xf32>
    %410 = arith.addf %359, %409 : vector<8x128xf32>
    %411 = tpu.concatenate %382, %410 in 1 : vector<8x128xf32>, vector<8x128xf32> -> vector<8x256xf32>
    %c7_i32 = arith.constant 7 : i32
    %412 = arith.addi %25, %c7_i32 : i32
    %413 = vector.extract_strided_slice %411 {offsets = [0, 0], sizes = [8, 128], strides = [1, 1]} : vector<8x256xf32> to vector<8x128xf32>
    %414 = vector.extract_strided_slice %411 {offsets = [0, 128], sizes = [8, 128], strides = [1, 1]} : vector<8x256xf32> to vector<8x128xf32>
    %cst_65 = arith.constant dense<0.000000e+00> : vector<8x1152xf32>
    %415 = tpu.matmul %411, %12, %cst_65 {dimension_numbers = #tpu.dot_dimension_numbers<[1], [0], [0], [1], [0, 0, 1, 1], [], []>} : vector<8x256xf32>, vector<256x1152xf32>, vector<8x1152xf32> -> vector<8x1152xf32>
    %416 = arith.index_cast %c7_i32 : i32 to index
    %c0_66 = arith.constant 0 : index
    %c0_67 = arith.constant 0 : index
    %417 = vector.load %arg16[%416, %c0_66, %c0_67] : memref<8x8x384xf32, #tpu.memory_space<vmem>>, vector<1x8x384xf32>
    %418 = vector.shape_cast %417 : vector<1x8x384xf32> to vector<8x384xf32>
    %419 = vector.extract_strided_slice %418 {offsets = [0, 0], sizes = [8, 256], strides = [1, 1]} : vector<8x384xf32> to vector<8x256xf32>
    %420 = vector.extract_strided_slice %418 {offsets = [0, 256], sizes = [8, 128], strides = [1, 1]} : vector<8x384xf32> to vector<8x128xf32>
    %421 = vector.extract_strided_slice %415 {offsets = [0, 0], sizes = [8, 256], strides = [1, 1]} : vector<8x1152xf32> to vector<8x256xf32>
    %422 = vector.extract_strided_slice %415 {offsets = [0, 256], sizes = [8, 128], strides = [1, 1]} : vector<8x1152xf32> to vector<8x128xf32>
    %423 = arith.addf %422, %15 : vector<8x128xf32>
    %424 = arith.addf %419, %421 : vector<8x256xf32>
    %425 = arith.negf %424 : vector<8x256xf32>
    %426 = math.exp %425 : vector<8x256xf32>
    %cst_68 = arith.constant 1.000000e+00 : f32
    %427 = vector.broadcast %cst_68 : f32 to vector<8x256xf32>
    %428 = arith.addf %427, %426 : vector<8x256xf32>
    %429 = arith.divf %427, %428 : vector<8x256xf32>
    %430 = vector.extract_strided_slice %429 {offsets = [0, 0], sizes = [8, 128], strides = [1, 1]} : vector<8x256xf32> to vector<8x128xf32>
    %431 = vector.extract_strided_slice %429 {offsets = [0, 128], sizes = [8, 128], strides = [1, 1]} : vector<8x256xf32> to vector<8x128xf32>
    %432 = arith.mulf %430, %423 : vector<8x128xf32>
    %433 = arith.addf %420, %432 : vector<8x128xf32>
    %434 = math.tanh %433 : vector<8x128xf32>
    %435 = arith.subf %413, %434 : vector<8x128xf32>
    %436 = arith.mulf %431, %435 : vector<8x128xf32>
    %437 = arith.addf %434, %436 : vector<8x128xf32>
    %438 = vector.extract_strided_slice %415 {offsets = [0, 384], sizes = [8, 256], strides = [1, 1]} : vector<8x1152xf32> to vector<8x256xf32>
    %439 = arith.addf %438, %18 : vector<8x256xf32>
    %440 = vector.extract_strided_slice %415 {offsets = [0, 640], sizes = [8, 128], strides = [1, 1]} : vector<8x1152xf32> to vector<8x128xf32>
    %441 = arith.addf %440, %21 : vector<8x128xf32>
    %442 = vector.extract_strided_slice %415 {offsets = [0, 768], sizes = [8, 256], strides = [1, 1]} : vector<8x1152xf32> to vector<8x256xf32>
    %443 = vector.extract_strided_slice %415 {offsets = [0, 1024], sizes = [8, 128], strides = [1, 1]} : vector<8x1152xf32> to vector<8x128xf32>
    %444 = arith.addf %443, %24 : vector<8x128xf32>
    %445 = arith.addf %439, %442 : vector<8x256xf32>
    %446 = arith.negf %445 : vector<8x256xf32>
    %447 = math.exp %446 : vector<8x256xf32>
    %cst_69 = arith.constant 1.000000e+00 : f32
    %448 = vector.broadcast %cst_69 : f32 to vector<8x256xf32>
    %449 = arith.addf %448, %447 : vector<8x256xf32>
    %450 = arith.divf %448, %449 : vector<8x256xf32>
    %451 = vector.extract_strided_slice %450 {offsets = [0, 0], sizes = [8, 128], strides = [1, 1]} : vector<8x256xf32> to vector<8x128xf32>
    %452 = vector.extract_strided_slice %450 {offsets = [0, 128], sizes = [8, 128], strides = [1, 1]} : vector<8x256xf32> to vector<8x128xf32>
    %453 = arith.mulf %451, %444 : vector<8x128xf32>
    %454 = arith.addf %441, %453 : vector<8x128xf32>
    %455 = math.tanh %454 : vector<8x128xf32>
    %456 = arith.subf %414, %455 : vector<8x128xf32>
    %457 = arith.mulf %452, %456 : vector<8x128xf32>
    %458 = arith.addf %455, %457 : vector<8x128xf32>
    %c1_i32_70 = arith.constant 1 : i32
    %459 = arith.cmpi sge, %412, %c1_i32_70 : i32
    %460 = arith.extui %459 : i1 to i32
    %461 = arith.sitofp %460 : i32 to f32
    %462 = arith.subf %458, %414 : vector<8x128xf32>
    %463 = vector.broadcast %461 : f32 to vector<8x128xf32>
    %464 = arith.mulf %463, %462 : vector<8x128xf32>
    %465 = arith.addf %414, %464 : vector<8x128xf32>
    %466 = tpu.concatenate %437, %465 in 1 : vector<8x128xf32>, vector<8x128xf32> -> vector<8x256xf32>
    %c8_i32_71 = arith.constant 8 : i32
    %c0_72 = arith.constant 0 : index
    %c0_73 = arith.constant 0 : index
    %467 = vector.load %arg15[%c0_72, %c0_73] : memref<8x256xf32, #tpu.memory_space<vmem>>, vector<8x256xf32>
    tpu.vector_store %arg15[%c0_72, %c0_73], %466 {strides = array<i32>} : memref<8x256xf32, #tpu.memory_space<vmem>>, vector<8x256xf32>,
    %c0_i32_74 = arith.constant 0 : i32
    %468 = arith.cmpi eq, %arg1, %c0_i32_74 : i32
    %469 = arith.extui %468 : i1 to i32
    %c0_i32_75 = arith.constant 0 : i32
    %470 = arith.cmpi ne, %469, %c0_i32_75 : i32
    scf.if %470 {
      %471 = vector.extract_strided_slice %466 {offsets = [0, 0], sizes = [8, 128], strides = [1, 1]} : vector<8x256xf32> to vector<8x128xf32>
      %472 = vector.extract_strided_slice %466 {offsets = [0, 128], sizes = [8, 128], strides = [1, 1]} : vector<8x256xf32> to vector<8x128xf32>
      %cst_76 = arith.constant dense<0.000000e+00> : vector<8x1152xf32>
      %473 = tpu.matmul %466, %12, %cst_76 {dimension_numbers = #tpu.dot_dimension_numbers<[1], [0], [0], [1], [0, 0, 1, 1], [], []>} : vector<8x256xf32>, vector<256x1152xf32>, vector<8x1152xf32> -> vector<8x1152xf32>
      %474 = vector.extract_strided_slice %473 {offsets = [0, 384], sizes = [8, 256], strides = [1, 1]} : vector<8x1152xf32> to vector<8x256xf32>
      %475 = arith.addf %474, %18 : vector<8x256xf32>
      %476 = vector.extract_strided_slice %473 {offsets = [0, 640], sizes = [8, 128], strides = [1, 1]} : vector<8x1152xf32> to vector<8x128xf32>
      %477 = arith.addf %476, %21 : vector<8x128xf32>
      %478 = vector.extract_strided_slice %473 {offsets = [0, 768], sizes = [8, 256], strides = [1, 1]} : vector<8x1152xf32> to vector<8x256xf32>
      %479 = vector.extract_strided_slice %473 {offsets = [0, 1024], sizes = [8, 128], strides = [1, 1]} : vector<8x1152xf32> to vector<8x128xf32>
      %480 = arith.addf %479, %24 : vector<8x128xf32>
      %481 = arith.addf %475, %478 : vector<8x256xf32>
      %482 = arith.negf %481 : vector<8x256xf32>
      %483 = math.exp %482 : vector<8x256xf32>
      %cst_77 = arith.constant 1.000000e+00 : f32
      %484 = vector.broadcast %cst_77 : f32 to vector<8x256xf32>
      %485 = arith.addf %484, %483 : vector<8x256xf32>
      %486 = arith.divf %484, %485 : vector<8x256xf32>
      %487 = vector.extract_strided_slice %486 {offsets = [0, 0], sizes = [8, 128], strides = [1, 1]} : vector<8x256xf32> to vector<8x128xf32>
      %488 = vector.extract_strided_slice %486 {offsets = [0, 128], sizes = [8, 128], strides = [1, 1]} : vector<8x256xf32> to vector<8x128xf32>
      %489 = arith.mulf %487, %480 : vector<8x128xf32>
      %490 = arith.addf %477, %489 : vector<8x128xf32>
      %491 = math.tanh %490 : vector<8x128xf32>
      %492 = arith.subf %472, %491 : vector<8x128xf32>
      %493 = arith.mulf %488, %492 : vector<8x128xf32>
      %494 = arith.addf %491, %493 : vector<8x128xf32>
      %c0_78 = arith.constant 0 : index
      %c0_79 = arith.constant 0 : index
      %c0_80 = arith.constant 0 : index
      %495 = vector.load %arg14[%c0_78, %c0_79, %c0_80] : memref<2x8x128xf32, #tpu.memory_space<vmem>>, vector<1x8x128xf32>
      %496 = vector.shape_cast %495 : vector<1x8x128xf32> to vector<8x128xf32>
      %497 = vector.shape_cast %471 : vector<8x128xf32> to vector<1x8x128xf32>
      tpu.vector_store %arg14[%c0_78, %c0_79, %c0_80], %497 {strides = array<i32>} : memref<2x8x128xf32, #tpu.memory_space<vmem>>, vector<1x8x128xf32>,
      %c1 = arith.constant 1 : index
      %c0_81 = arith.constant 0 : index
      %c0_82 = arith.constant 0 : index
      %498 = vector.load %arg14[%c1, %c0_81, %c0_82] : memref<2x8x128xf32, #tpu.memory_space<vmem>>, vector<1x8x128xf32>
      %499 = vector.shape_cast %498 : vector<1x8x128xf32> to vector<8x128xf32>
      %500 = vector.shape_cast %494 : vector<8x128xf32> to vector<1x8x128xf32>
      tpu.vector_store %arg14[%c1, %c0_81, %c0_82], %500 {strides = array<i32>} : memref<2x8x128xf32, #tpu.memory_space<vmem>>, vector<1x8x128xf32>,
      %c0_83 = arith.constant 0 : index
      %c0_84 = arith.constant 0 : index
      %501 = vector.load %arg11[%c0_83, %c0_84] : memref<128x128xf32, #tpu.memory_space<vmem>>, vector<128x128xf32>
      %cst_85 = arith.constant dense<0.000000e+00> : vector<8x128xf32>
      %502 = tpu.matmul %494, %501, %cst_85 {dimension_numbers = #tpu.dot_dimension_numbers<[1], [0], [0], [1], [0, 0, 1, 1], [], []>} : vector<8x128xf32>, vector<128x128xf32>, vector<8x128xf32> -> vector<8x128xf32>
      %c0_86 = arith.constant 0 : index
      %c0_87 = arith.constant 0 : index
      %503 = vector.load %arg12[%c0_86, %c0_87] : memref<1x128xf32, #tpu.memory_space<vmem>>, vector<1x128xf32>
      %504 = vector.broadcast %503 : vector<1x128xf32> to vector<8x128xf32>
      %505 = arith.addf %502, %504 : vector<8x128xf32>
      %c0_88 = arith.constant 0 : index
      %c0_89 = arith.constant 0 : index
      %506 = vector.load %arg13[%c0_88, %c0_89] : memref<8x128xf32, #tpu.memory_space<vmem>>, vector<8x128xf32>
      tpu.vector_store %arg13[%c0_88, %c0_89], %505 {strides = array<i32>} : memref<8x128xf32, #tpu.memory_space<vmem>>, vector<8x128xf32>,
    } else {
    }
    return
  }
  func.func @transform_0(%arg0: i32, %arg1: i32) -> (i32, i32, i32) {
    %c0_i32 = arith.constant 0 : i32
    %c0_i32_0 = arith.constant 0 : i32
    return %arg1, %arg0, %c0_i32 : i32, i32, i32
  }
  func.func @transform_1(%arg0: i32, %arg1: i32) -> (i32, i32, i32) {
    %c0_i32 = arith.constant 0 : i32
    %c0_i32_0 = arith.constant 0 : i32
    %c0_i32_1 = arith.constant 0 : i32
    return %c0_i32, %arg0, %c0_i32_0 : i32, i32, i32
  }
  func.func @transform_2(%arg0: i32, %arg1: i32) -> (i32, i32) {
    %c0_i32 = arith.constant 0 : i32
    %c0_i32_0 = arith.constant 0 : i32
    %c0_i32_1 = arith.constant 0 : i32
    return %c0_i32, %c0_i32_0 : i32, i32
  }
  func.func @transform_3(%arg0: i32, %arg1: i32) -> (i32, i32) {
    %c0_i32 = arith.constant 0 : i32
    %c0_i32_0 = arith.constant 0 : i32
    %c0_i32_1 = arith.constant 0 : i32
    return %c0_i32, %c0_i32_0 : i32, i32
  }
  func.func @transform_4(%arg0: i32, %arg1: i32) -> (i32, i32) {
    %c0_i32 = arith.constant 0 : i32
    %c0_i32_0 = arith.constant 0 : i32
    %c0_i32_1 = arith.constant 0 : i32
    return %c0_i32, %c0_i32_0 : i32, i32
  }
  func.func @transform_5(%arg0: i32, %arg1: i32) -> (i32, i32) {
    %c0_i32 = arith.constant 0 : i32
    %c0_i32_0 = arith.constant 0 : i32
    %c0_i32_1 = arith.constant 0 : i32
    return %c0_i32, %c0_i32_0 : i32, i32
  }
  func.func @transform_6(%arg0: i32, %arg1: i32) -> (i32, i32) {
    %c0_i32 = arith.constant 0 : i32
    %c0_i32_0 = arith.constant 0 : i32
    %c0_i32_1 = arith.constant 0 : i32
    return %c0_i32, %c0_i32_0 : i32, i32
  }
  func.func @transform_7(%arg0: i32, %arg1: i32) -> (i32, i32) {
    %c0_i32 = arith.constant 0 : i32
    %c0_i32_0 = arith.constant 0 : i32
    %c0_i32_1 = arith.constant 0 : i32
    return %c0_i32, %c0_i32_0 : i32, i32
  }
  func.func @transform_8(%arg0: i32, %arg1: i32) -> (i32, i32) {
    %c0_i32 = arith.constant 0 : i32
    %c0_i32_0 = arith.constant 0 : i32
    %c0_i32_1 = arith.constant 0 : i32
    return %c0_i32, %c0_i32_0 : i32, i32
  }
  func.func @transform_9(%arg0: i32, %arg1: i32) -> (i32, i32) {
    %c0_i32 = arith.constant 0 : i32
    %c0_i32_0 = arith.constant 0 : i32
    %c0_i32_1 = arith.constant 0 : i32
    return %c0_i32, %c0_i32_0 : i32, i32
  }
  func.func @transform_10(%arg0: i32, %arg1: i32) -> (i32, i32) {
    %c0_i32 = arith.constant 0 : i32
    %c0_i32_0 = arith.constant 0 : i32
    %c0_i32_1 = arith.constant 0 : i32
    return %c0_i32, %c0_i32_0 : i32, i32
  }
  func.func @transform_11(%arg0: i32, %arg1: i32) -> (i32, i32) {
    %c0_i32 = arith.constant 0 : i32
    %c0_i32_0 = arith.constant 0 : i32
    return %arg0, %c0_i32 : i32, i32
  }
  func.func @transform_12(%arg0: i32, %arg1: i32) -> (i32, i32, i32) {
    %c0_i32 = arith.constant 0 : i32
    %c0_i32_0 = arith.constant 0 : i32
    %c0_i32_1 = arith.constant 0 : i32
    return %c0_i32, %arg0, %c0_i32_0 : i32, i32, i32
  }
}

</mosaic_0001>

<bundles_post_ra>
// kernel: tpu_custom_call.1
= control target key start
LH: loop header
LB: loop body
LE: loop exit
PB: predicated region body
PF: predicated region fallthrough
CT: control target
= control target key end

     0   :  { %18 = vsyncpa [#allocation5], 0  ;;  %s10281_s0 = inlined_call_operand.hbm [shape: f32[8,8,128], index: 0, kind: input, shape index: {}]   ;;  %s10282_s1 = inlined_call_operand.hbm [shape: f32[2,8,128], index: 1, kind: input, shape index: {}, may-alias: {1,12}]   ;;  %s10283_s2 = inlined_call_operand.hbm [shape: f32[128,384], index: 2, kind: input, shape index: {}]   ;;  %s10284_s3 = inlined_call_operand.hbm [shape: f32[1,384], index: 3, kind: input, shape index: {}]   ;;  %s10285_s4 = inlined_call_operand.hbm [shape: f32[256,1152], index: 4, kind: input, shape index: {}]   ;;  %s10286_s5 = inlined_call_operand.hbm [shape: f32[1,128], index: 5, kind: input, shape index: {}]   ;;  %s10287_s6 = inlined_call_operand.hbm [shape: f32[1,256], index: 6, kind: input, shape index: {}]   ;;  %s10288_s7 = inlined_call_operand.hbm [shape: f32[1,128], index: 7, kind: input, shape index: {}]   ;;  %s10289_s8 = inlined_call_operand.hbm [shape: f32[1,128], index: 8, kind: input, shape index: {}]   ;;  %s10290_s9 = inlined_call_operand.hbm [shape: f32[128,128], index: 9, kind: input, shape index: {}]   ;;  %s10291_s10 = inlined_call_operand.hbm [shape: f32[1,128], index: 10, kind: input, shape index: {}]   ;;  %s10292_s11 = inlined_call_operand.hbm [shape: f32[8,128], index: 11, kind: output, shape index: {0}]   ;;  %s10293_s12 = inlined_call_operand.hbm [shape: f32[2,8,128], index: 12, kind: output, shape index: {1}, may-alias: {1,12}]  }
   0x1   :  { %19 = vsyncpa [#allocation8], 0 }
   0x2   :  { %20 = vsyncpa [#allocation11], 0 }
   0x3   :  { %21 = vsyncpa [#allocation14], 0 }
   0x4   :  { %22 = vsyncpa [#allocation17], 0 }
   0x5   :  { %23 = vsyncpa [#allocation20], 0 }
   0x6   :  { %24 = vsyncpa [#allocation6], 0 }
   0x7   :  { %25 = vsyncpa [#allocation24], 0  ;;  %s8179_s21 = smov [#allocation7]   ;;  %s8180_s23 = smov [#allocation10]  }
   0x8   :  { %s43_s22 = sshll.u32 %s8179_s21, 4  ;;  %s68_s24 = sshll.u32 %s8180_s23, 4  ;;  %s44_s22 = int_to_ptr.vmem [resolvable:$true] %s43_s22  ;;  %s8266_s24 = int_to_ptr.vmem [resolvable:$true] %s68_s24 }
   0x9   :  { %s7877_s27 = scalar_lea.hbm %s10282_s1, 256 }
   0xa   :  { %p7878_p0 = scmp.ne.s32.totalorder %s10282_s1, %s7877_s27  ;;  %p7881_p1 = scmp.lt.u32.totalorder %s7877_s27, %s10282_s1 }
   0xc   :  { %p7883_p2 = pnand %p7881_p1, %p7878_p0 }
   0xe   :  { %7886 = shalt.err (!%p7883_p2)
}
   0xf   :  { %s7887_s14 = scalar_lea.vmem %s44_s22, 256  ;;  %p7892_p4 = scmp.lt.s32.totalorder %s44_s22, %s44_s22 }
  0x10   :  { %p7888_p3 = scmp.ne.s32.totalorder %s44_s22, %s7887_s14  ;;  %p7893_p5 = scmp.lt.s32.totalorder %s7887_s14, %s7887_s14 }
  0x12   :  { %p7894_p6 = por %p7893_p5, %p7892_p4 }
  0x14   :  { %p7895_p7 = pnand %p7894_p6, %p7888_p3 }
  0x16   :  { %7898 = shalt.err (!%p7895_p7)
}
  0x17   :  { %s8181_s15 = smov 128   ;;  %s8182_s16 = smov 8  }
  0x18   :  { %49 = dma.hbm_to_vmem [thread:$0]  %s10282_s1, 256, %s44_s22, [#allocation8], %s8181_s15, %s8181_s15, %s8182_s16  }
  0x19   :  { %s7899_s21 = scalar_lea.hbm %s10284_s3, 48 }
  0x1a   :  { %p7900_p8 = scmp.ne.s32.totalorder %s10284_s3, %s7899_s21  ;;  %p7903_p9 = scmp.lt.u32.totalorder %s7899_s21, %s10284_s3 }
  0x1c   :  { %p7905_p10 = pnand %p7903_p9, %p7900_p8 }
  0x1e   :  { %7908 = shalt.err (!%p7905_p10)
}
  0x1f   :  { %s7909_s28 = scalar_lea.vmem %s8266_s24, 48  ;;  %s7913_s1 = scalar_lea.vmem %s8266_s24, 64 }
  0x20   :  { %p7910_p11 = scmp.ne.s32.totalorder %s8266_s24, %s7909_s28  ;;  %p7914_p12 = scmp.lt.s32.totalorder %s8266_s24, %s8266_s24 }
  0x21   :  { %p7915_p13 = scmp.lt.s32.totalorder %s7913_s1, %s7909_s28 }
  0x23   :  { %p7916_p0 = por %p7915_p13, %p7914_p12 }
  0x25   :  { %p7917_p1 = pnand %p7916_p0, %p7910_p11 }
  0x27   :  { %7920 = shalt.err (!%p7917_p1)
}
  0x28   :  { %71 = dma.hbm_to_vmem [thread:$0]  %s10284_s3, 48, %s8266_s24, [#allocation11]  }
  0x29   :  { %s8183_s30 = smov [#allocation13]   ;;  %s8184_s14 = smov [#allocation16]  }
  0x2a   :  { %s90_s13 = sshll.u32 %s8183_s30, 4  ;;  %s110_s17 = sshll.u32 %s8184_s14, 4  ;;  %s91_s13 = int_to_ptr.vmem [resolvable:$true] %s90_s13  ;;  %s111_s17 = int_to_ptr.vmem [resolvable:$true] %s110_s17 }
  0x2b   :  { %s7921_s20 = scalar_lea.hbm %s10286_s5, 16 }
  0x2c   :  { %p7922_p2 = scmp.ne.s32.totalorder %s10286_s5, %s7921_s20  ;;  %p7925_p3 = scmp.lt.u32.totalorder %s7921_s20, %s10286_s5 }
  0x2e   :  { %p7927_p4 = pnand %p7925_p3, %p7922_p2 }
  0x30   :  { %7930 = shalt.err (!%p7927_p4)
}
  0x31   :  { %s7931_s3 = scalar_lea.vmem %s91_s13, 16  ;;  %s7935_s24 = scalar_lea.vmem %s91_s13, 32 }
  0x32   :  { %p7932_p5 = scmp.ne.s32.totalorder %s91_s13, %s7931_s3  ;;  %p7936_p6 = scmp.lt.s32.totalorder %s91_s13, %s91_s13 }
  0x33   :  { %p7937_p7 = scmp.lt.s32.totalorder %s7935_s24, %s7931_s3 }
  0x35   :  { %p7938_p8 = por %p7937_p7, %p7936_p6 }
  0x37   :  { %p7939_p9 = pnand %p7938_p8, %p7932_p5 }
  0x39   :  { %7942 = shalt.err (!%p7939_p9)
}
  0x3a   :  { %93 = dma.hbm_to_vmem [thread:$0]  %s10286_s5, 16, %s91_s13, [#allocation14]  }
  0x3b   :  { %s7943_s29 = scalar_lea.hbm %s10288_s7, 16 }
  0x3c   :  { %p7944_p10 = scmp.ne.s32.totalorder %s10288_s7, %s7943_s29  ;;  %p7947_p11 = scmp.lt.u32.totalorder %s7943_s29, %s10288_s7 }
  0x3e   :  { %p7949_p12 = pnand %p7947_p11, %p7944_p10 }
  0x40   :  { %7952 = shalt.err (!%p7949_p12)
}
  0x41   :  { %s7953_s20 = scalar_lea.vmem %s111_s17, 16  ;;  %s7957_s21 = scalar_lea.vmem %s111_s17, 32 }
  0x42   :  { %p7954_p13 = scmp.ne.s32.totalorder %s111_s17, %s7953_s20  ;;  %p7958_p0 = scmp.lt.s32.totalorder %s111_s17, %s111_s17 }
  0x43   :  { %p7959_p1 = scmp.lt.s32.totalorder %s7957_s21, %s7953_s20 }
  0x45   :  { %p7960_p2 = por %p7959_p1, %p7958_p0 }
  0x47   :  { %p7961_p3 = pnand %p7960_p2, %p7954_p13 }
  0x49   :  { %7964 = shalt.err (!%p7961_p3)
}
  0x4a   :  { %113 = dma.hbm_to_vmem [thread:$0]  %s10288_s7, 16, %s111_s17, [#allocation17]  }
  0x4b   :  { %s8185_s23 = smov [#allocation19]   ;;  %s8186_s26 = smov [#allocation4]  }
  0x4c   :  { %s129_s25 = sshll.u32 %s8185_s23, 4  ;;  %s31_s3 = sshll.u32 %s8186_s26, 4  ;;  %s130_s25 = int_to_ptr.vmem [resolvable:$true] %s129_s25  ;;  %s8325_s3 = int_to_ptr.vmem [resolvable:$true] %s31_s3 }
  0x4d   :  { %s7965_s28 = scalar_lea.hbm %s10290_s9, 2048 }
  0x4e   :  { %p7966_p4 = scmp.ne.s32.totalorder %s10290_s9, %s7965_s28  ;;  %p7969_p5 = scmp.lt.u32.totalorder %s7965_s28, %s10290_s9 }
  0x50   :  { %p7971_p6 = pnand %p7969_p5, %p7966_p4 }
  0x52   :  { %7974 = shalt.err (!%p7971_p6)
}
  0x53   :  { %s7975_s7 = scalar_lea.vmem %s130_s25, 2048  ;;  %p7980_p8 = scmp.lt.s32.totalorder %s130_s25, %s130_s25 }
  0x54   :  { %p7976_p7 = scmp.ne.s32.totalorder %s130_s25, %s7975_s7  ;;  %p7981_p9 = scmp.lt.s32.totalorder %s7975_s7, %s7975_s7 }
  0x56   :  { %p7982_p10 = por %p7981_p9, %p7980_p8 }
  0x58   :  { %p7983_p11 = pnand %p7982_p10, %p7976_p7 }
  0x5a   :  { %7986 = shalt.err (!%p7983_p11)
}
  0x5b   :  { %135 = dma.hbm_to_vmem [thread:$0]  %s10290_s9, 2048, %s130_s25, [#allocation20], %s8181_s15, %s8181_s15, %s8182_s16  }
  0x5c   :  { %s7987_s20 = scalar_lea.hbm %s10281_s0, 1024 }
  0x5d   :  { %p7988_p12 = scmp.ne.s32.totalorder %s10281_s0, %s7987_s20  ;;  %p7991_p13 = scmp.lt.u32.totalorder %s7987_s20, %s10281_s0 }
  0x5f   :  { %p7993_p0 = pnand %p7991_p13, %p7988_p12 }
  0x61   :  { %7996 = shalt.err (!%p7993_p0)
}
  0x62   :  { %s7997_s26 = scalar_lea.vmem %s8325_s3, 1024  ;;  %p8002_p2 = scmp.lt.s32.totalorder %s8325_s3, %s8325_s3 }
  0x63   :  { %p7998_p1 = scmp.ne.s32.totalorder %s8325_s3, %s7997_s26  ;;  %p8003_p3 = scmp.lt.s32.totalorder %s7997_s26, %s7997_s26 }
  0x65   :  { %p8004_p4 = por %p8003_p3, %p8002_p2 }
  0x67   :  { %p8005_p5 = pnand %p8004_p4, %p7998_p1 }
  0x69   :  { %8008 = shalt.err (!%p8005_p5)
}
  0x6a   :  { %37 = dma.hbm_to_vmem [thread:$0]  %s10281_s0, 1024, %s8325_s3, [#allocation5], %s8181_s15, %s8181_s15, %s8182_s16  }
  0x6b   :  { %s8187_s24 = smov [#allocation9]   ;;  %s8009_s22 = scalar_lea.hbm %s10283_s2, 6144 }
  0x6c   :  { %s55_s27 = sshll.u32 %s8187_s24, 4  ;;  %p8010_p6 = scmp.ne.s32.totalorder %s10283_s2, %s8009_s22  ;;  %s56_s27 = int_to_ptr.vmem [resolvable:$true] %s55_s27 }
  0x6d   :  { %p8013_p7 = scmp.lt.u32.totalorder %s8009_s22, %s10283_s2 }
  0x6f   :  { %p8015_p8 = pnand %p8013_p7, %p8010_p6 }
  0x71   :  { %8018 = shalt.err (!%p8015_p8)
}
  0x72   :  { %s8019_s14 = scalar_lea.vmem %s56_s27, 6144  ;;  %p8024_p10 = scmp.lt.s32.totalorder %s56_s27, %s56_s27 }
  0x73   :  { %p8020_p9 = scmp.ne.s32.totalorder %s56_s27, %s8019_s14  ;;  %p8025_p11 = scmp.lt.s32.totalorder %s8019_s14, %s8019_s14 }
  0x75   :  { %p8026_p12 = por %p8025_p11, %p8024_p10 }
  0x77   :  { %p8027_p13 = pnand %p8026_p12, %p8020_p9 }
  0x79   :  { %8030 = shalt.err (!%p8027_p13)
}
  0x7a   :  { %s8188_s0 = smov 384   ;;  %s8189_s3 = smov 24  }
  0x7b   :  { %61 = dma.hbm_to_vmem [thread:$0]  %s10283_s2, 6144, %s56_s27, [#allocation8], %s8188_s0, %s8188_s0, %s8189_s3  }
  0x7c   :  { %s8190_s20 = smov [#allocation12]   ;;  %s8031_s23 = scalar_lea.hbm %s10285_s4, 36864 }
  0x7d   :  { %s77_s21 = sshll.u32 %s8190_s20, 4  ;;  %p8032_p0 = scmp.ne.s32.totalorder %s10285_s4, %s8031_s23  ;;  %s78_s21 = int_to_ptr.vmem [resolvable:$true] %s77_s21 }
  0x7e   :  { %p8035_p1 = scmp.lt.u32.totalorder %s8031_s23, %s10285_s4 }
  0x80   :  { %p8037_p2 = pnand %p8035_p1, %p8032_p0 }
  0x82   :  { %8040 = shalt.err (!%p8037_p2)
}
  0x83   :  { %s8041_s28 = scalar_lea.vmem %s78_s21, 36864  ;;  %p8046_p4 = scmp.lt.s32.totalorder %s78_s21, %s78_s21 }
  0x84   :  { %p8042_p3 = scmp.ne.s32.totalorder %s78_s21, %s8041_s28  ;;  %p8047_p5 = scmp.lt.s32.totalorder %s8041_s28, %s8041_s28 }
  0x86   :  { %p8048_p6 = por %p8047_p5, %p8046_p4 }
  0x88   :  { %p8049_p7 = pnand %p8048_p6, %p8042_p3 }
  0x8a   :  { %8052 = shalt.err (!%p8049_p7)
}
  0x8b   :  { %s8191_s2 = smov 1152   ;;  %s8192_s27 = smov 72  }
  0x8c   :  { %83 = dma.hbm_to_vmem [thread:$0]  %s10285_s4, 36864, %s78_s21, [#allocation11], %s8191_s2, %s8191_s2, %s8192_s27  }
  0x8d   :  { %s8193_s29 = smov [#allocation15]   ;;  %s8194_s7 = smov [#allocation18]  }
  0x8e   :  { %s100_s30 = sshll.u32 %s8193_s29, 4  ;;  %s120_s17 = sshll.u32 %s8194_s7, 4  ;;  %s101_s30 = int_to_ptr.vmem [resolvable:$true] %s100_s30  ;;  %s121_s17 = int_to_ptr.vmem [resolvable:$true] %s120_s17 }
  0x8f   :  { %s8053_s3 = scalar_lea.hbm %s10287_s6, 32 }
  0x90   :  { %p8054_p8 = scmp.ne.s32.totalorder %s10287_s6, %s8053_s3  ;;  %p8057_p9 = scmp.lt.u32.totalorder %s8053_s3, %s10287_s6 }
  0x92   :  { %p8059_p10 = pnand %p8057_p9, %p8054_p8 }
  0x94   :  { %8062 = shalt.err (!%p8059_p10)
}
  0x95   :  { %s8063_s4 = scalar_lea.vmem %s101_s30, 32  ;;  %p8068_p12 = scmp.lt.s32.totalorder %s101_s30, %s101_s30 }
  0x96   :  { %p8064_p11 = scmp.ne.s32.totalorder %s101_s30, %s8063_s4  ;;  %p8069_p13 = scmp.lt.s32.totalorder %s8063_s4, %s8063_s4 }
  0x98   :  { %p8070_p0 = por %p8069_p13, %p8068_p12 }
  0x9a   :  { %p8071_p1 = pnand %p8070_p0, %p8064_p11 }
  0x9c   :  { %8074 = shalt.err (!%p8071_p1)
}
  0x9d   :  { %103 = dma.hbm_to_vmem [thread:$0]  %s10287_s6, 32, %s101_s30, [#allocation14]  }
  0x9e   :  { %s8075_s9 = scalar_lea.hbm %s10289_s8, 16 }
  0x9f   :  { %p8076_p2 = scmp.ne.s32.totalorder %s10289_s8, %s8075_s9  ;;  %p8079_p3 = scmp.lt.u32.totalorder %s8075_s9, %s10289_s8 }
  0xa1   :  { %p8081_p4 = pnand %p8079_p3, %p8076_p2 }
  0xa3   :  { %8084 = shalt.err (!%p8081_p4)
}
  0xa4   :  { %s8085_s27 = scalar_lea.vmem %s121_s17, 16  ;;  %s8089_s1 = scalar_lea.vmem %s121_s17, 32 }
  0xa5   :  { %p8086_p5 = scmp.ne.s32.totalorder %s121_s17, %s8085_s27  ;;  %p8090_p6 = scmp.lt.s32.totalorder %s121_s17, %s121_s17 }
  0xa6   :  { %p8091_p7 = scmp.lt.s32.totalorder %s8089_s1, %s8085_s27 }
  0xa8   :  { %p8092_p8 = por %p8091_p7, %p8090_p6 }
  0xaa   :  { %p8093_p9 = pnand %p8092_p8, %p8086_p5 }
  0xac   :  { %8096 = shalt.err (!%p8093_p9)
}
  0xad   :  { %123 = dma.hbm_to_vmem [thread:$0]  %s10289_s8, 16, %s121_s17, [#allocation17]  }
  0xae   :  { %s8195_s29 = smov [#allocation21]   ;;  %s8097_s0 = scalar_lea.hbm %s10291_s10, 16 }
  0xaf   :  { %s142_s30 = sshll.u32 %s8195_s29, 4  ;;  %p8098_p10 = scmp.ne.s32.totalorder %s10291_s10, %s8097_s0  ;;  %s143_s30 = int_to_ptr.vmem [resolvable:$true] %s142_s30 }
  0xb0   :  { %p8101_p11 = scmp.lt.u32.totalorder %s8097_s0, %s10291_s10 }
  0xb2   :  { %p8103_p12 = pnand %p8101_p11, %p8098_p10 }
  0xb4   :  { %8106 = shalt.err (!%p8103_p12)
}
  0xb5   :  { %s8107_s5 = scalar_lea.vmem %s143_s30, 16  ;;  %s8111_s8 = scalar_lea.vmem %s143_s30, 32 }
  0xb6   :  { %p8108_p13 = scmp.ne.s32.totalorder %s143_s30, %s8107_s5  ;;  %p8112_p0 = scmp.lt.s32.totalorder %s143_s30, %s143_s30 }
  0xb7   :  { %p8113_p1 = scmp.lt.s32.totalorder %s8111_s8, %s8107_s5 }
  0xb9   :  { %p8114_p2 = por %p8113_p1, %p8112_p0 }
  0xbb   :  { %p8115_p3 = pnand %p8114_p2, %p8108_p13 }
  0xbd   :  { %8118 = shalt.err (!%p8115_p3)
}
  0xbe   :  { %145 = dma.hbm_to_vmem [thread:$0]  %s10291_s10, 16, %s143_s30, [#allocation20]  }
  0xbf   :  { %8163 = dma.done.wait [#allocation5], 1024  }
  0xc0   :  { %8164 = vsyncadd [#allocation5], 4294966272 }
  0xc1   :  { %8165 = dma.done.wait [#allocation8], 6400  }
  0xc2   :  { %8166 = vsyncadd [#allocation8], 4294960896 }
  0xc3   :  { %8167 = dma.done.wait [#allocation11], 36912  }
  0xc4   :  { %8168 = vsyncadd [#allocation11], 4294930384 }
  0xc5   :  { %8169 = dma.done.wait [#allocation14], 48  }
  0xc6   :  { %8170 = vsyncadd [#allocation14], 4294967248 }
  0xc7   :  { %8171 = dma.done.wait [#allocation17], 32  }
  0xc8   :  { %8172 = vsyncadd [#allocation17], 4294967264 }
  0xc9   :  { %8173 = dma.done.wait [#allocation20], 2064  }
  0xca   :  { %8174 = vsyncadd [#allocation20], 4294965232  ;;  %v10294_v0 = vmov 0.0   ;;  %v188_v1 = vld [vmem:[#allocation9 + $0x8] sm:$0xff]  ;;  %v191_v2 = vld [vmem:[#allocation9 + $0x20] sm:$0xff]  ;;  %vm8198_vm0 = vmmov 0  }
  0xcb   :  { %316 = vmatprep.mubr.f32.mxu0 %v10294_v0  ;;  %v189_v3 = vld [vmem:[#allocation9 + $0x10] sm:$0xff]  ;;  %v5030_v4 = vpack.c.bf16 %v191_v2, %v188_v1  ;;  %v192_v5 = vld [vmem:[#allocation9 + $0x28] sm:$0xff]  ;;  %v187_v6 = vld [vmem:[#allocation9] sm:$0xff]  ;;  %s8199_s10 = smov [#allocation23]  }
  0xcc   :  { %v190_v7 = vld [vmem:[#allocation9 + $0x18] sm:$0xff]  ;;  %v5062_v8 = vpack.c.bf16 %v192_v5, %v189_v3  ;;  %v197_v11 = vld [vmem:[#allocation9 + $0x50] sm:$0xff]  ;;  %v195_v12 = vld [vmem:[#allocation9 + $0x40] sm:$0xff]  ;;  %s4536_s21 = sshll.u32 %s8199_s10, 4  ;;  %s4537_s21 = int_to_ptr.vmem [resolvable:$true] %s4536_s21 }
  0xcd   :  { %v5032_v9 = vpack.c.bf16 %v190_v7, %v187_v6  ;;  %v194_v10 = vld [vmem:[#allocation9 + $0x38] sm:$0xff]  ;;  %5031 = vmatprep.subr.bf16.mxu0 %v5030_v4  ;;  %v193_v15 = vld [vmem:[#allocation9 + $0x30] sm:$0xff]  ;;  %v196_v16 = vld [vmem:[#allocation9 + $0x48] sm:$0xff]  ;;  %s8119_s13 = scalar_lea.vmem %s4537_s21, 256  ;;  %p8124_p5 = scmp.lt.s32.totalorder %s4537_s21, %s4537_s21 }
  0xce   :  { %v5034_v13 = vpack.c.bf16 %v197_v11, %v194_v10  ;;  %v198_v14 = vld [vmem:[#allocation9 + $0x58] sm:$0xff]  ;;  %5063 = vmatprep.subr.bf16.mxu1 %v5062_v8  ;;  %v5036_v18 = vpack.c.bf16 %v196_v16, %v193_v15  ;;  %v200_v19 = vld [vmem:[#allocation9 + $0x68] sm:$0xff]  ;;  %v203_v20 = vld [vmem:[#allocation9 + $0x80] sm:$0xff]  ;;  %p8120_p4 = scmp.ne.s32.totalorder %s4537_s21, %s8119_s13  ;;  %p8125_p6 = scmp.lt.s32.totalorder %s8119_s13, %s8119_s13 }
  0xcf   :  { %5033 = vmatpush1.bf16.msra.mxu0 %v5032_v9  ;;  %v5066_v17 = vpack.c.bf16 %v198_v14, %v195_v12  ;;  %v201_v21 = vld [vmem:[#allocation9 + $0x70] sm:$0xff]  ;;  %5065 = vmatpush3.bf16.msra.mxu1 %v5062_v8  ;;  %v5038_v22 = vpack.c.bf16 %v203_v20, %v200_v19  ;;  %v204_v23 = vld [vmem:[#allocation9 + $0x88] sm:$0xff]  ;;  %v199_v24 = vld [vmem:[#allocation9 + $0x60] sm:$0xff] }
  0xd0   :  { %5035 = vmatprep.subr.bf16.mxu0 %v5034_v13  ;;  %v202_v25 = vld [vmem:[#allocation9 + $0x78] sm:$0xff]  ;;  %v5070_v26 = vpack.c.bf16 %v204_v23, %v201_v21  ;;  %v209_v28 = vld [vmem:[#allocation9 + $0xb0] sm:$0xff]  ;;  %v207_v29 = vld [vmem:[#allocation9 + $0xa0] sm:$0xff]  ;;  %p8126_p7 = por %p8125_p6, %p8124_p5 }
  0xd1   :  { %5067 = vmatprep.subr.bf16.mxu1 %v5066_v17  ;;  %v206_v27 = vld [vmem:[#allocation9 + $0x98] sm:$0xff]  ;;  %v5040_v31 = vpack.c.bf16 %v202_v25, %v199_v24  ;;  %v205_v33 = vld [vmem:[#allocation9 + $0x90] sm:$0xff]  ;;  %v208_v34 = vld [vmem:[#allocation9 + $0xa8] sm:$0xff] }
  0xd2   :  { %v210_v30 = vld [vmem:[#allocation9 + $0xb8] sm:$0xff]  ;;  %v5042_v32 = vpack.c.bf16 %v209_v28, %v206_v27  ;;  %v212_v36 = vld [vmem:[#allocation9 + $0xc8] sm:$0xff]  ;;  %v215_v37 = vld [vmem:[#allocation9 + $0xe0] sm:$0xff]  ;;  %v5044_v40 = vpack.c.bf16 %v208_v34, %v205_v33  ;;  %p8127_p8 = pnand %p8126_p7, %p8120_p4 }
  0xd3   :  { %5037 = vmatpush1.bf16.msra.mxu0 %v5036_v18  ;;  %5069 = vmatpush3.bf16.msra.mxu1 %v5066_v17  ;;  %v5074_v35 = vpack.c.bf16 %v210_v30, %v207_v29  ;;  %v213_v38 = vld [vmem:[#allocation9 + $0xd0] sm:$0xff]  ;;  %v216_v39 = vld [vmem:[#allocation9 + $0xe8] sm:$0xff]  ;;  %v5046_v41 = vpack.c.bf16 %v215_v37, %v212_v36  ;;  %v211_v42 = vld [vmem:[#allocation9 + $0xc0] sm:$0xff] }
  0xd4   :  { %5039 = vmatprep.subr.bf16.mxu0 %v5038_v22  ;;  %5071 = vmatprep.subr.bf16.mxu1 %v5070_v26  ;;  %v214_v43 = vld [vmem:[#allocation9 + $0xd8] sm:$0xff]  ;;  %v5078_v44 = vpack.c.bf16 %v216_v39, %v213_v38  ;;  %v221_v46 = vld [vmem:[#allocation9 + $0x110] sm:$0xff]  ;;  %v219_v47 = vld [vmem:[#allocation9 + $0x100] sm:$0xff] }
  0xd5   :  { %v218_v45 = vld [vmem:[#allocation9 + $0xf8] sm:$0xff]  ;;  %v5048_v49 = vpack.c.bf16 %v214_v43, %v211_v42  ;;  %v8423_v50 = vld [vmem:[#allocation4] sm:$0xff]  ;;  %v220_v53 = vld [vmem:[#allocation9 + $0x108] sm:$0xff] }
  0xd6   :  { %v222_v48 = vld [vmem:[#allocation9 + $0x118] sm:$0xff]  ;;  %v5050_v51 = vpack.c.bf16 %v221_v46, %v218_v45  ;;  %v217_v52 = vld [vmem:[#allocation9 + $0xf0] sm:$0xff]  ;;  %v224_v55 = vld [vmem:[#allocation9 + $0x128] sm:$0xff]  ;;  %4983 = vmatprep.mubr.f32.mxu1 %v8423_v50 }
  0xd7   :  { %5041 = vmatpush1.bf16.msra.mxu0 %v5040_v31  ;;  %5073 = vmatpush3.bf16.msra.mxu1 %v5070_v26  ;;  %v5082_v54 = vpack.c.bf16 %v222_v48, %v219_v47  ;;  %v227_v56 = vld [vmem:[#allocation9 + $0x140] sm:$0xff]  ;;  %v225_v57 = vld [vmem:[#allocation9 + $0x130] sm:$0xff]  ;;  %v228_v58 = vld [vmem:[#allocation9 + $0x148] sm:$0xff]  ;;  %v5052_v59 = vpack.c.bf16 %v220_v53, %v217_v52 }
  0xd8   :  { %5043 = vmatprep.subr.bf16.mxu0 %v5042_v32  ;;  %5075 = vmatprep.subr.bf16.mxu1 %v5074_v35  ;;  %v5054_v60 = vpack.c.bf16 %v227_v56, %v224_v55  ;;  %v223_v61 = vld [vmem:[#allocation9 + $0x120] sm:$0xff]  ;;  %v226_v62 = vld [vmem:[#allocation9 + $0x138] sm:$0xff]  ;;  %v5086_v63 = vpack.c.bf16 %v228_v58, %v225_v57  ;;  %v233_v2 = vld [vmem:[#allocation9 + $0x170] sm:$0xff] }
  0xd9   :  { %v230_v1 = vld [vmem:[#allocation9 + $0x158] sm:$0xff]  ;;  %v231_v3 = vld [vmem:[#allocation9 + $0x160] sm:$0xff]  ;;  %v5056_v5 = vpack.c.bf16 %v226_v62, %v223_v61  ;;  %v229_v7 = vld [vmem:[#allocation9 + $0x150] sm:$0xff] }
  0xda   :  { %v234_v4 = vld [vmem:[#allocation9 + $0x178] sm:$0xff]  ;;  %v5058_v6 = vpack.c.bf16 %v233_v2, %v230_v1  ;;  %v232_v8 = vld [vmem:[#allocation9 + $0x168] sm:$0xff]  ;;  %v181_v62 = vld [vmem:[#allocation4 + $0x10] sm:$0xff] }
  0xdb   :  { %5045 = vmatpush1.bf16.msra.mxu0 %v5044_v40  ;;  %5077 = vmatpush3.bf16.msra.mxu1 %v5074_v35  ;;  %v5090_v9 = vpack.c.bf16 %v234_v4, %v231_v3  ;;  %v504_v10 = vld [vmem:[#allocation12 + $0x8] sm:$0xff]  ;;  %v513_v11 = vld [vmem:[#allocation12 + $0x50] sm:$0xff]  ;;  %v506_v12 = vld [vmem:[#allocation12 + $0x18] sm:$0xff]  ;;  %v5060_v14 = vpack.c.bf16 %v232_v8, %v229_v7 }
  0xdc   :  { %5047 = vmatprep.subr.bf16.mxu0 %v5046_v41  ;;  %5079 = vmatprep.subr.bf16.mxu1 %v5078_v44  ;;  %v515_v13 = vld [vmem:[#allocation12 + $0x60] sm:$0xff]  ;;  %v8426_v15 = vpack.c.bf16 %v513_v11, %v504_v10  ;;  %v512_v17 = vld [vmem:[#allocation12 + $0x48] sm:$0xff]  ;;  %v505_v18 = vld [vmem:[#allocation12 + $0x10] sm:$0xff] }
  0xdd   :  { %v503_v16 = vld [vmem:[#allocation12] sm:$0xff]  ;;  %v8428_v19 = vpack.c.bf16 %v515_v13, %v506_v12  ;;  %v514_v20 = vld [vmem:[#allocation12 + $0x58] sm:$0xff]  ;;  %v524_v23 = vld [vmem:[#allocation12 + $0xa8] sm:$0xff] }
  0xde   :  { %10638 = vst [vmem:[#allocation33_spill] sm:$0xff] %v8426_v15  ;;  %v522_v21 = vld [vmem:[#allocation12 + $0x98] sm:$0xff]  ;;  %v531_v22 = vld [vmem:[#allocation12 + $0xe0] sm:$0xff]  ;;  %v533_v24 = vld [vmem:[#allocation12 + $0xf0] sm:$0xff]  ;;  %v8430_v26 = vpack.c.bf16 %v512_v17, %v503_v16  ;;  %v8433_v27 = vpack.c.bf16 %v514_v20, %v505_v18 }
  0xdf   :  { %5049 = vmatpush1.bf16.msra.mxu0 %v5048_v49  ;;  %5081 = vmatpush3.bf16.msra.mxu1 %v5078_v44  ;;  %10639 = vst [vmem:[#allocation34_spill] sm:$0xff] %v8428_v19  ;;  %v180_v25 = vld [vmem:[#allocation4 + $0x8] sm:$0xff]  ;;  %v8435_v28 = vpack.c.bf16 %v531_v22, %v522_v21  ;;  %v523_v31 = vld [vmem:[#allocation12 + $0xa0] sm:$0xff]  ;;  %v8438_v32 = vpack.c.bf16 %v533_v24, %v524_v23  ;;  %v532_v33 = vld [vmem:[#allocation12 + $0xe8] sm:$0xff] }
  0xe0   :  { %5051 = vmatprep.subr.bf16.mxu0 %v5050_v51  ;;  %5083 = vmatprep.subr.bf16.mxu1 %v5082_v54  ;;  %10640 = vst [vmem:[#allocation35_spill] sm:$0xff] %v8430_v26  ;;  %10641 = vst [vmem:[#allocation36_spill] sm:$0xff] %v8433_v27  ;;  %v521_v29 = vld [vmem:[#allocation12 + $0x90] sm:$0xff]  ;;  %v530_v30 = vld [vmem:[#allocation12 + $0xd8] sm:$0xff]  ;;  %v8446_v39 = vpack.c.bf16 %v532_v33, %v523_v31 }
  0xe1   :  { %10642 = vst [vmem:[#allocation37_spill] sm:$0xff] %v8435_v28  ;;  %10643 = vst [vmem:[#allocation38_spill] sm:$0xff] %v8438_v32  ;;  %v540_v34 = vld [vmem:[#allocation12 + $0x128] sm:$0xff]  ;;  %v549_v35 = vld [vmem:[#allocation12 + $0x170] sm:$0xff]  ;;  %v8442_v38 = vpack.c.bf16 %v530_v30, %v521_v29 }
  0xe2   :  { %v542_v36 = vld [vmem:[#allocation12 + $0x138] sm:$0xff]  ;;  %v551_v37 = vld [vmem:[#allocation12 + $0x180] sm:$0xff]  ;;  %10645 = vst [vmem:[#allocation40_spill] sm:$0xff] %v8446_v39  ;;  %v8448_v40 = vpack.c.bf16 %v549_v35, %v540_v34  ;;  %v548_v42 = vld [vmem:[#allocation12 + $0x168] sm:$0xff] }
  0xe3   :  { %5053 = vmatpush1.bf16.msra.mxu0 %v5052_v59  ;;  %5085 = vmatpush3.bf16.msra.mxu1 %v5082_v54  ;;  %10644 = vst [vmem:[#allocation39_spill] sm:$0xff] %v8442_v38  ;;  %v539_v41 = vld [vmem:[#allocation12 + $0x120] sm:$0xff]  ;;  %v541_v43 = vld [vmem:[#allocation12 + $0x130] sm:$0xff]  ;;  %v8451_v44 = vpack.c.bf16 %v551_v37, %v542_v36  ;;  %v550_v45 = vld [vmem:[#allocation12 + $0x178] sm:$0xff] }
  0xe4   :  { %5055 = vmatprep.subr.bf16.mxu0 %v5054_v60  ;;  %5087 = vmatprep.subr.bf16.mxu1 %v5086_v63  ;;  %10646 = vst [vmem:[#allocation41_spill] sm:$0xff] %v8448_v40  ;;  %v558_v46 = vld [vmem:[#allocation12 + $0x1b8] sm:$0xff]  ;;  %v567_v47 = vld [vmem:[#allocation12 + $0x200] sm:$0xff]  ;;  %v560_v48 = vld [vmem:[#allocation12 + $0x1c8] sm:$0xff]  ;;  %v8460_v51 = vpack.c.bf16 %v550_v45, %v541_v43 }
  0xe5   :  { %10647 = vst [vmem:[#allocation42_spill] sm:$0xff] %v8451_v44  ;;  %v569_v49 = vld [vmem:[#allocation12 + $0x210] sm:$0xff]  ;;  %v8462_v52 = vpack.c.bf16 %v567_v47, %v558_v46  ;;  %v566_v54 = vld [vmem:[#allocation12 + $0x1f8] sm:$0xff]  ;;  %v559_v55 = vld [vmem:[#allocation12 + $0x1c0] sm:$0xff] }
  0xe6   :  { %10649 = vst [vmem:[#allocation44_spill] sm:$0xff] %v8460_v51  ;;  %v557_v53 = vld [vmem:[#allocation12 + $0x1b0] sm:$0xff]  ;;  %v8465_v56 = vpack.c.bf16 %v569_v49, %v560_v48  ;;  %v568_v57 = vld [vmem:[#allocation12 + $0x208] sm:$0xff]  ;;  %v578_v60 = vld [vmem:[#allocation12 + $0x258] sm:$0xff] }
  0xe7   :  { %5057 = vmatpush1.bf16.msra.mxu0 %v5056_v5  ;;  %5089 = vmatpush3.bf16.msra.mxu1 %v5086_v63  ;;  %10650 = vst [vmem:[#allocation45_spill] sm:$0xff] %v8462_v52  ;;  %v576_v58 = vld [vmem:[#allocation12 + $0x248] sm:$0xff]  ;;  %v585_v59 = vld [vmem:[#allocation12 + $0x290] sm:$0xff]  ;;  %v587_v61 = vld [vmem:[#allocation12 + $0x2a0] sm:$0xff]  ;;  %v8468_v63 = vpack.c.bf16 %v566_v54, %v557_v53  ;;  %v8472_v2 = vpack.c.bf16 %v568_v57, %v559_v55 }
  0xe8   :  { %5059 = vmatprep.subr.bf16.mxu0 %v5058_v6  ;;  %5091 = vmatprep.subr.bf16.mxu1 %v5090_v9  ;;  %10651 = vst [vmem:[#allocation46_spill] sm:$0xff] %v8465_v56  ;;  %v575_v1 = vld [vmem:[#allocation12 + $0x240] sm:$0xff]  ;;  %v8474_v3 = vpack.c.bf16 %v585_v59, %v576_v58  ;;  %v584_v4 = vld [vmem:[#allocation12 + $0x288] sm:$0xff]  ;;  %v577_v5 = vld [vmem:[#allocation12 + $0x250] sm:$0xff]  ;;  %v8477_v7 = vpack.c.bf16 %v587_v61, %v578_v60 }
  0xe9   :  { %10652 = vst [vmem:[#allocation47_spill] sm:$0xff] %v8468_v63  ;;  %10653 = vst [vmem:[#allocation48_spill] sm:$0xff] %v8472_v2  ;;  %v586_v6 = vld [vmem:[#allocation12 + $0x298] sm:$0xff]  ;;  %v182_v10 = vld [vmem:[#allocation4 + $0x18] sm:$0xff]  ;;  %v8481_v13 = vpack.c.bf16 %v584_v4, %v575_v1 }
  0xea   :  { %10654 = vst [vmem:[#allocation49_spill] sm:$0xff] %v8474_v3  ;;  %10655 = vst [vmem:[#allocation50_spill] sm:$0xff] %v8477_v7  ;;  %v594_v8 = vld [vmem:[#allocation12 + $0x2d8] sm:$0xff]  ;;  %v596_v11 = vld [vmem:[#allocation12 + $0x2e8] sm:$0xff]  ;;  %v8485_v16 = vpack.c.bf16 %v586_v6, %v577_v5 }
  0xeb   :  { %5061 = vmatpush1.bf16.msra.mxu0 %v5060_v14  ;;  %5093 = vmatpush3.bf16.msra.mxu1 %v5090_v9  ;;  %v603_v9 = vld [vmem:[#allocation12 + $0x320] sm:$0xff]  ;;  %v605_v12 = vld [vmem:[#allocation12 + $0x330] sm:$0xff]  ;;  %10656 = vst [vmem:[#allocation51_spill] sm:$0xff] %v8481_v13  ;;  %v602_v18 = vld [vmem:[#allocation12 + $0x318] sm:$0xff] }
  0xec   :  { %5095 = vmatprep.subr.bf16.mxu0 %v8426_v15  ;;  %5159 = vmatprep.subr.bf16.mxu1 %v8428_v19  ;;  %v593_v14 = vld [vmem:[#allocation12 + $0x2d0] sm:$0xff]  ;;  %10657 = vst [vmem:[#allocation52_spill] sm:$0xff] %v8485_v16  ;;  %v8487_v17 = vpack.c.bf16 %v603_v9, %v594_v8  ;;  %v595_v20 = vld [vmem:[#allocation12 + $0x2e0] sm:$0xff]  ;;  %v604_v21 = vld [vmem:[#allocation12 + $0x328] sm:$0xff]  ;;  %v8490_v22 = vpack.c.bf16 %v605_v12, %v596_v11 }
  0xed   :  { %v612_v23 = vld [vmem:[#allocation12 + $0x368] sm:$0xff]  ;;  %v621_v24 = vld [vmem:[#allocation12 + $0x3b0] sm:$0xff]  ;;  %v614_v29 = vld [vmem:[#allocation12 + $0x378] sm:$0xff]  ;;  %v8494_v31 = vpack.c.bf16 %v602_v18, %v593_v14  ;;  %v8498_v34 = vpack.c.bf16 %v604_v21, %v595_v20 }
  0xee   :  { %317 = vmatmul.mubr.f32.vlgmr.msra.gmra.mrb[0].mxu0 %v8423_v50  ;;  %4984 = vmatmul.mubr.f32.vlgmr.msra.gmra.mrb[0].mxu1 %v180_v25  ;;  %v8455_v50 = vpack.c.bf16 %v548_v42, %v539_v41  ;;  %10658 = vst [vmem:[#allocation53_spill] sm:$0xff] %v8487_v17  ;;  %10659 = vst [vmem:[#allocation54_spill] sm:$0xff] %v8490_v22  ;;  %v623_v30 = vld [vmem:[#allocation12 + $0x3c0] sm:$0xff]  ;;  %v8500_v35 = vpack.c.bf16 %v621_v24, %v612_v23  ;;  %v620_v36 = vld [vmem:[#allocation12 + $0x3a8] sm:$0xff] }
  0xef   :  { %5097 = vmatpush1.bf16.msra.mxu0 %v8430_v26  ;;  %5161 = vmatpush1.bf16.msra.mxu1 %v8433_v27  ;;  %10660 = vst [vmem:[#allocation55_spill] sm:$0xff] %v8494_v31  ;;  %v611_v33 = vld [vmem:[#allocation12 + $0x360] sm:$0xff]  ;;  %10661 = vst [vmem:[#allocation56_spill] sm:$0xff] %v8498_v34  ;;  %v613_v37 = vld [vmem:[#allocation12 + $0x370] sm:$0xff]  ;;  %v8503_v42 = vpack.c.bf16 %v623_v30, %v614_v29 }
  0xf0   :  { %5099 = vmatprep.subr.bf16.mxu0 %v8435_v28  ;;  %5163 = vmatprep.subr.bf16.mxu1 %v8438_v32  ;;  %10648 = vst [vmem:[#allocation43_spill] sm:$0xff] %v8455_v50  ;;  %10662 = vst [vmem:[#allocation57_spill] sm:$0xff] %v8500_v35  ;;  %v622_v41 = vld [vmem:[#allocation12 + $0x3b8] sm:$0xff]  ;;  %v639_v45 = vld [vmem:[#allocation12 + $0x440] sm:$0xff]  ;;  %v8507_v53 = vpack.c.bf16 %v620_v36, %v611_v33 }
  0xf1   :  { %322 = vmatprep.mubr.f32.mxu0 %v10294_v0  ;;  %4986 = vmatprep.mubr.f32.mxu1 %v181_v62  ;;  %10663 = vst [vmem:[#allocation58_spill] sm:$0xff] %v8503_v42  ;;  %v630_v43 = vld [vmem:[#allocation12 + $0x3f8] sm:$0xff]  ;;  %v632_v47 = vld [vmem:[#allocation12 + $0x408] sm:$0xff]  ;;  %v641_v48 = vld [vmem:[#allocation12 + $0x450] sm:$0xff]  ;;  %v8511_v55 = vpack.c.bf16 %v622_v41, %v613_v37 }
  0xf2   :  { %323 = vmatmul.mubr.f32.gmra.mrb[2].mxu0 %v180_v25  ;;  %4987 = vmatmul.mubr.f32.gmra.mrb[2].mxu1 %v182_v10  ;;  %v183_v25 = vld [vmem:[#allocation4 + $0x20] sm:$0xff]  ;;  %v184_v46 = vld [vmem:[#allocation4 + $0x28] sm:$0xff]  ;;  %v185_v49 = vld [vmem:[#allocation4 + $0x30] sm:$0xff]  ;;  %10664 = vst [vmem:[#allocation59_spill] sm:$0xff] %v8507_v53  ;;  %v8513_v57 = vpack.c.bf16 %v639_v45, %v630_v43  ;;  %v8516_v61 = vpack.c.bf16 %v641_v48, %v632_v47 }
  0xf3   :  { %5101 = vmatpush1.bf16.msra.mxu0 %v8442_v38  ;;  %328 = vmatprep.mubr.f32.mxu0 %v10294_v0  ;;  %v629_v54 = vld [vmem:[#allocation12 + $0x3f0] sm:$0xff]  ;;  %10665 = vst [vmem:[#allocation60_spill] sm:$0xff] %v8511_v55  ;;  %v638_v58 = vld [vmem:[#allocation12 + $0x438] sm:$0xff]  ;;  %v631_v59 = vld [vmem:[#allocation12 + $0x400] sm:$0xff] }
  0xf4   :  { %5165 = vmatpush1.bf16.msra.mxu1 %v8446_v39  ;;  %5103 = vmatprep.subr.bf16.mxu0 %v8448_v40  ;;  %10666 = vst [vmem:[#allocation61_spill] sm:$0xff] %v8513_v57  ;;  %v640_v60 = vld [vmem:[#allocation12 + $0x448] sm:$0xff]  ;;  %10667 = vst [vmem:[#allocation62_spill] sm:$0xff] %v8516_v61  ;;  %v657_v1 = vld [vmem:[#allocation12 + $0x4d0] sm:$0xff]  ;;  %v8520_v8 = vpack.c.bf16 %v638_v58, %v629_v54 }
  0xf5   :  { %5167 = vmatprep.subr.bf16.mxu1 %v8451_v44  ;;  %4989 = vmatprep.mubr.f32.mxu1 %v183_v25  ;;  %v186_v4 = vld [vmem:[#allocation4 + $0x38] sm:$0xff]  ;;  %v650_v5 = vld [vmem:[#allocation12 + $0x498] sm:$0xff]  ;;  %v649_v14 = vld [vmem:[#allocation12 + $0x490] sm:$0xff] }
  0xf6   :  { %329 = vmatmul.mubr.f32.gmra.mrb[4].mxu0 %v181_v62  ;;  %4990 = vmatmul.mubr.f32.gmra.mrb[4].mxu1 %v184_v46  ;;  %v648_v62 = vld [vmem:[#allocation12 + $0x488] sm:$0xff]  ;;  %v659_v6 = vld [vmem:[#allocation12 + $0x4e0] sm:$0xff]  ;;  %10668 = vst [vmem:[#allocation63_spill] sm:$0xff] %v8520_v8  ;;  %v8528_v18 = vld [vmem:[#allocation7 + $0x8] sm:$0xff] }
  0xf7   :  { %5105 = vmatpush1.bf16.msra.mxu0 %v8455_v50  ;;  %334 = vmatprep.mubr.f32.mxu0 %v10294_v0  ;;  %v647_v9 = vld [vmem:[#allocation12 + $0x480] sm:$0xff]  ;;  %v8526_v11 = vpack.c.bf16 %v657_v1, %v648_v62  ;;  %v656_v12 = vld [vmem:[#allocation12 + $0x4c8] sm:$0xff]  ;;  %v8531_v20 = vpack.c.bf16 %v659_v6, %v650_v5  ;;  %v658_v21 = vld [vmem:[#allocation12 + $0x4d8] sm:$0xff] }
  0xf8   :  { %5169 = vmatpush1.bf16.msra.mxu1 %v8460_v51  ;;  %5107 = vmatprep.subr.bf16.mxu0 %v8462_v52  ;;  %v666_v23 = vld [vmem:[#allocation12 + $0x518] sm:$0xff]  ;;  %v675_v24 = vld [vmem:[#allocation12 + $0x560] sm:$0xff]  ;;  %v677_v29 = vld [vmem:[#allocation12 + $0x570] sm:$0xff]  ;;  %v8536_v30 = vpack.c.bf16 %v656_v12, %v647_v9  ;;  %v8540_v33 = vpack.c.bf16 %v658_v21, %v649_v14 }
  0xf9   :  { %5171 = vmatprep.subr.bf16.mxu1 %v8465_v56  ;;  %4992 = vmatprep.mubr.f32.mxu1 %v185_v49  ;;  %10670 = vst [vmem:[#allocation65_spill] sm:$0xff] %v8526_v11  ;;  %10671 = vst [vmem:[#allocation66_spill] sm:$0xff] %v8531_v20  ;;  %v8542_v36 = vpack.c.bf16 %v675_v24, %v666_v23  ;;  %v665_v37 = vld [vmem:[#allocation12 + $0x510] sm:$0xff]  ;;  %v674_v41 = vld [vmem:[#allocation12 + $0x558] sm:$0xff] }
  0xfa   :  { %335 = vmatmul.mubr.f32.gmra.mrb[6].mxu0 %v182_v10  ;;  %4993 = vmatmul.mubr.f32.gmra.mrb[6].mxu1 %v186_v4  ;;  %v8524_v10 = vpack.c.bf16 %v640_v60, %v631_v59  ;;  %10672 = vst [vmem:[#allocation67_spill] sm:$0xff] %v8536_v30  ;;  %10673 = vst [vmem:[#allocation68_spill] sm:$0xff] %v8540_v33  ;;  %v667_v43 = vld [vmem:[#allocation12 + $0x520] sm:$0xff]  ;;  %v684_v47 = vld [vmem:[#allocation12 + $0x5a8] sm:$0xff]  ;;  %v8549_v58 = vpack.c.bf16 %v674_v41, %v665_v37 }
  0xfb   :  { %5109 = vmatpush1.bf16.msra.mxu0 %v8468_v63  ;;  %340 = vmatprep.mubr.f32.mxu0 %v10294_v0  ;;  %10674 = vst [vmem:[#allocation69_spill] sm:$0xff] %v8542_v36  ;;  %v693_v48 = vld [vmem:[#allocation12 + $0x5f0] sm:$0xff]  ;;  %v695_v54 = vld [vmem:[#allocation12 + $0x600] sm:$0xff]  ;;  %v692_v1 = vld [vmem:[#allocation12 + $0x5e8] sm:$0xff] }
  0xfc   :  { %5173 = vmatpush1.bf16.msra.mxu1 %v8472_v2  ;;  %5111 = vmatprep.subr.bf16.mxu0 %v8474_v3  ;;  %10669 = vst [vmem:[#allocation64_spill] sm:$0xff] %v8524_v10  ;;  %10676 = vst [vmem:[#allocation71_spill] sm:$0xff] %v8549_v58  ;;  %v8555_v60 = vpack.c.bf16 %v693_v48, %v684_v47  ;;  %v683_v62 = vld [vmem:[#allocation12 + $0x5a0] sm:$0xff]  ;;  %v685_v5 = vld [vmem:[#allocation12 + $0x5b0] sm:$0xff] }
  0xfd   :  { %5175 = vmatprep.subr.bf16.mxu1 %v8477_v7  ;;  %962 = vmatprep.mubr.f32.mxu1 %v8528_v18  ;;  %v694_v6 = vld [vmem:[#allocation12 + $0x5f8] sm:$0xff]  ;;  %v711_v12 = vld [vmem:[#allocation12 + $0x680] sm:$0xff]  ;;  %v704_v14 = vld [vmem:[#allocation12 + $0x648] sm:$0xff]  ;;  %v8561_v23 = vpack.c.bf16 %v692_v1, %v683_v62 }
  0xfe   :  { %341 = vmatmul.mubr.f32.gmra.mrb[8].mxu0 %v183_v25  ;;  %v668_v25 = vld [vmem:[#allocation12 + $0x528] sm:$0xff]  ;;  %10678 = vst [vmem:[#allocation73_spill] sm:$0xff] %v8555_v60  ;;  %v702_v9 = vld [vmem:[#allocation12 + $0x638] sm:$0xff]  ;;  %v713_v21 = vld [vmem:[#allocation12 + $0x690] sm:$0xff]  ;;  %v8565_v24 = vpack.c.bf16 %v694_v6, %v685_v5 }
  0xff   :  { %5113 = vmatpush1.bf16.msra.mxu0 %v8481_v13  ;;  %346 = vmatprep.mubr.f32.mxu0 %v10294_v0  ;;  %v8545_v45 = vpack.c.bf16 %v677_v29, %v668_v25  ;;  %10680 = vst [vmem:[#allocation75_spill] sm:$0xff] %v8561_v23  ;;  %v8567_v25 = vpack.c.bf16 %v711_v12, %v702_v9  ;;  %v701_v29 = vld [vmem:[#allocation12 + $0x630] sm:$0xff]  ;;  %v710_v37 = vld [vmem:[#allocation12 + $0x678] sm:$0xff]  ;;  %v703_v41 = vld [vmem:[#allocation12 + $0x640] sm:$0xff] }
 0x100   :  { %5177 = vmatpush1.bf16.msra.mxu1 %v8485_v16  ;;  %5115 = vmatprep.subr.bf16.mxu0 %v8487_v17  ;;  %10681 = vst [vmem:[#allocation76_spill] sm:$0xff] %v8565_v24  ;;  %v720_v47 = vld [vmem:[#allocation12 + $0x6c8] sm:$0xff]  ;;  %v729_v48 = vld [vmem:[#allocation12 + $0x710] sm:$0xff]  ;;  %v8573_v62 = vpack.c.bf16 %v710_v37, %v701_v29  ;;  %v719_v6 = vld [vmem:[#allocation12 + $0x6c0] sm:$0xff] }
 0x101   :  { %5179 = vmatprep.subr.bf16.mxu1 %v8490_v22  ;;  %10675 = vst [vmem:[#allocation70_spill] sm:$0xff] %v8545_v45  ;;  %10682 = vst [vmem:[#allocation77_spill] sm:$0xff] %v8567_v25  ;;  %v8579_v5 = vpack.c.bf16 %v729_v48, %v720_v47  ;;  %v728_v9 = vld [vmem:[#allocation12 + $0x708] sm:$0xff]  ;;  %v721_v12 = vld [vmem:[#allocation12 + $0x6d0] sm:$0xff] }
 0x102   :  { %347 = vmatmul.mubr.f32.gmra.mrb[10].mxu0 %v184_v46  ;;  %v676_v46 = vld [vmem:[#allocation12 + $0x568] sm:$0xff]  ;;  %10684 = vst [vmem:[#allocation79_spill] sm:$0xff] %v8573_v62  ;;  %v749_v37 = vld [vmem:[#allocation12 + $0x7b0] sm:$0xff]  ;;  %v746_v48 = vld [vmem:[#allocation12 + $0x798] sm:$0xff] }
 0x103   :  { %5117 = vmatpush1.bf16.msra.mxu0 %v8494_v31  ;;  %352 = vmatprep.mubr.f32.mxu0 %v10294_v0  ;;  %v8553_v59 = vpack.c.bf16 %v676_v46, %v667_v43  ;;  %v8570_v43 = vpack.c.bf16 %v713_v21, %v704_v14  ;;  %v712_v46 = vld [vmem:[#allocation12 + $0x688] sm:$0xff]  ;;  %10686 = vst [vmem:[#allocation81_spill] sm:$0xff] %v8579_v5  ;;  %v730_v21 = vld [vmem:[#allocation12 + $0x718] sm:$0xff]  ;;  %v737_v47 = vld [vmem:[#allocation12 + $0x750] sm:$0xff] }
 0x104   :  { %5181 = vmatpush1.bf16.msra.mxu1 %v8498_v34  ;;  %5119 = vmatprep.subr.bf16.mxu0 %v8500_v35  ;;  %v8577_v1 = vpack.c.bf16 %v712_v46, %v703_v41  ;;  %v740_v29 = vld [vmem:[#allocation12 + $0x768] sm:$0xff]  ;;  %v8589_v41 = vpack.c.bf16 %v730_v21, %v721_v12  ;;  %v755_v12 = vld [vmem:[#allocation12 + $0x7e0] sm:$0xff] }
 0x105   :  { %5183 = vmatprep.subr.bf16.mxu1 %v8503_v42  ;;  %10677 = vst [vmem:[#allocation72_spill] sm:$0xff] %v8553_v59  ;;  %10683 = vst [vmem:[#allocation78_spill] sm:$0xff] %v8570_v43  ;;  %v764_v21 = vld [vmem:[#allocation12 + $0x828] sm:$0xff] }
 0x106   :  { %353 = vmatmul.mubr.f32.gmra.mrb[12].mxu0 %v185_v49  ;;  %v686_v49 = vld [vmem:[#allocation12 + $0x5b8] sm:$0xff]  ;;  %10685 = vst [vmem:[#allocation80_spill] sm:$0xff] %v8577_v1  ;;  %10689 = vst [vmem:[#allocation84_spill] sm:$0xff] %v8589_v41 }
 0x107   :  { %5121 = vmatpush1.bf16.msra.mxu0 %v8507_v53  ;;  %358 = vmatprep.mubr.f32.mxu0 %v10294_v0  ;;  %v738_v0 = vld [vmem:[#allocation12 + $0x758] sm:$0xff] }
 0x108   :  { %5185 = vmatpush1.bf16.msra.mxu1 %v8511_v55  ;;  %5123 = vmatprep.subr.bf16.mxu0 %v8513_v57  ;;  %v526_v53 = vld [vmem:[#allocation12 + $0xb8] sm:$0xff] }
 0x109   :  { %5187 = vmatprep.subr.bf16.mxu1 %v8516_v61 }
 0x10a   :  { %359 = vmatmul.mubr.f32.gmra.mrb[14].mxu0 %v186_v4  ;;  %v8558_v4 = vpack.c.bf16 %v695_v54, %v686_v49  ;;  %v722_v49 = vld [vmem:[#allocation12 + $0x6d8] sm:$0xff]  ;;  %v731_v54 = vld [vmem:[#allocation12 + $0x720] sm:$0xff] }
 0x10b   :  { %5125 = vmatpush1.bf16.msra.mxu0 %v8520_v8  ;;  %891 = vmatprep.mubr.f32.mxu0 %v8528_v18  ;;  %v8582_v14 = vpack.c.bf16 %v731_v54, %v722_v49  ;;  %v739_v49 = vld [vmem:[#allocation12 + $0x760] sm:$0xff]  ;;  %v8594_v54 = vpack.c.bf16 %v749_v37, %v740_v29  ;;  %v757_v29 = vld [vmem:[#allocation12 + $0x7f0] sm:$0xff]  ;;  %v508_v8 = vld [vmem:[#allocation12 + $0x28] sm:$0xff] }
 0x10c   :  { %5189 = vmatpush1.bf16.msra.mxu1 %v8524_v10  ;;  %5127 = vmatprep.subr.bf16.mxu0 %v8526_v11  ;;  %10679 = vst [vmem:[#allocation74_spill] sm:$0xff] %v8558_v4  ;;  %v8609_v11 = vpack.c.bf16 %v764_v21, %v755_v12  ;;  %v510_v12 = vld [vmem:[#allocation12 + $0x38] sm:$0xff]  ;;  %v519_v21 = vld [vmem:[#allocation12 + $0x80] sm:$0xff] }
 0x10d   :  { %5191 = vmatprep.subr.bf16.mxu1 %v8531_v20  ;;  %10687 = vst [vmem:[#allocation82_spill] sm:$0xff] %v8582_v14  ;;  %10691 = vst [vmem:[#allocation86_spill] sm:$0xff] %v8594_v54 }
 0x10e   :  { %10696 = vst [vmem:[#allocation91_spill] sm:$0xff] %v8609_v11 }
 0x10f   :  { %5129 = vmatpush1.bf16.msra.mxu0 %v8536_v30  ;;  %v774_v30 = vld [vmem:[#allocation12 + $0x878] sm:$0xff] }
 0x110   :  { %5193 = vmatpush1.bf16.msra.mxu1 %v8540_v33  ;;  %5131 = vmatprep.subr.bf16.mxu0 %v8542_v36  ;;  %v8597_v36 = vpack.c.bf16 %v746_v48, %v737_v47  ;;  %v776_v47 = vld [vmem:[#allocation12 + $0x888] sm:$0xff]  ;;  %v785_v48 = vld [vmem:[#allocation12 + $0x8d0] sm:$0xff] }
 0x111   :  { %5195 = vmatprep.subr.bf16.mxu1 %v8545_v45 }
 0x112   :  { %10692 = vst [vmem:[#allocation87_spill] sm:$0xff] %v8597_v36 }
 0x113   :  { %5133 = vmatpush1.bf16.msra.mxu0 %v8549_v58  ;;  %v756_v58 = vld [vmem:[#allocation12 + $0x7e8] sm:$0xff] }
 0x114   :  { %5197 = vmatpush1.bf16.msra.mxu1 %v8553_v59  ;;  %5135 = vmatprep.subr.bf16.mxu0 %v8555_v60  ;;  %v8585_v60 = vpack.c.bf16 %v728_v9, %v719_v6  ;;  %v758_v6 = vld [vmem:[#allocation12 + $0x7f8] sm:$0xff]  ;;  %v767_v9 = vld [vmem:[#allocation12 + $0x840] sm:$0xff] }
 0x115   :  { %5199 = vmatprep.subr.bf16.mxu1 %v8558_v4  ;;  %v8606_v37 = vpack.c.bf16 %v767_v9, %v758_v6  ;;  %v775_v6 = vld [vmem:[#allocation12 + $0x880] sm:$0xff]  ;;  %v8618_v9 = vpack.c.bf16 %v785_v48, %v776_v47  ;;  %v509_v47 = vld [vmem:[#allocation12 + $0x30] sm:$0xff]  ;;  %v8630_v48 = vpack.c.bf16 %v519_v21, %v510_v12  ;;  %v534_v12 = vld [vmem:[#allocation12 + $0xf8] sm:$0xff] }
 0x116   :  { %10688 = vst [vmem:[#allocation83_spill] sm:$0xff] %v8585_v60  ;;  %v527_v21 = vld [vmem:[#allocation12 + $0xc0] sm:$0xff] }
 0x117   :  { %5137 = vmatpush1.bf16.msra.mxu0 %v8561_v23  ;;  %v747_v23 = vld [vmem:[#allocation12 + $0x7a0] sm:$0xff]  ;;  %10695 = vst [vmem:[#allocation90_spill] sm:$0xff] %v8606_v37  ;;  %10699 = vst [vmem:[#allocation94_spill] sm:$0xff] %v8618_v9 }
 0x118   :  { %5201 = vmatpush1.bf16.msra.mxu1 %v8565_v24  ;;  %5139 = vmatprep.subr.bf16.mxu0 %v8567_v25  ;;  %v8591_v46 = vpack.c.bf16 %v747_v23, %v738_v0  ;;  %v748_v25 = vld [vmem:[#allocation12 + $0x7a8] sm:$0xff]  ;;  %10703 = vst [vmem:[#allocation98_spill] sm:$0xff] %v8630_v48 }
 0x119   :  { %5203 = vmatprep.subr.bf16.mxu1 %v8570_v43  ;;  %v8601_v0 = vpack.c.bf16 %v748_v25, %v739_v49  ;;  %v782_v49 = vld [vmem:[#allocation12 + $0x8b8] sm:$0xff] }
 0x11a   :  { %10690 = vst [vmem:[#allocation85_spill] sm:$0xff] %v8591_v46 }
 0x11b   :  { %5141 = vmatpush1.bf16.msra.mxu0 %v8573_v62  ;;  %v765_v62 = vld [vmem:[#allocation12 + $0x830] sm:$0xff]  ;;  %10693 = vst [vmem:[#allocation88_spill] sm:$0xff] %v8601_v0 }
 0x11c   :  { %5205 = vmatpush1.bf16.msra.mxu1 %v8577_v1  ;;  %5143 = vmatprep.subr.bf16.mxu0 %v8579_v5  ;;  %v8603_v23 = vpack.c.bf16 %v765_v62, %v756_v58  ;;  %v766_v5 = vld [vmem:[#allocation12 + $0x838] sm:$0xff]  ;;  %v773_v62 = vld [vmem:[#allocation12 + $0x870] sm:$0xff] }
 0x11d   :  { %5207 = vmatprep.subr.bf16.mxu1 %v8582_v14  ;;  %v8613_v58 = vpack.c.bf16 %v766_v5, %v757_v29  ;;  %v8621_v57 = vpack.c.bf16 %v782_v49, %v773_v62  ;;  %v507_v5 = vld [vmem:[#allocation12 + $0x20] sm:$0xff]  ;;  %v516_v29 = vld [vmem:[#allocation12 + $0x68] sm:$0xff]  ;;  %v537_v49 = vld [vmem:[#allocation12 + $0x110] sm:$0xff] }
 0x11e   :  { %10694 = vst [vmem:[#allocation89_spill] sm:$0xff] %v8603_v23  ;;  %v528_v62 = vld [vmem:[#allocation12 + $0xc8] sm:$0xff] }
 0x11f   :  { %5145 = vmatpush1.bf16.msra.mxu0 %v8585_v60  ;;  %v783_v60 = vld [vmem:[#allocation12 + $0x8c0] sm:$0xff]  ;;  %10697 = vst [vmem:[#allocation92_spill] sm:$0xff] %v8613_v58  ;;  %10700 = vst [vmem:[#allocation95_spill] sm:$0xff] %v8621_v57 }
 0x120   :  { %5209 = vmatpush1.bf16.msra.mxu1 %v8589_v41  ;;  %5147 = vmatprep.subr.bf16.mxu0 %v8591_v46  ;;  %v8615_v25 = vpack.c.bf16 %v783_v60, %v774_v30  ;;  %v784_v46 = vld [vmem:[#allocation12 + $0x8c8] sm:$0xff] }
 0x121   :  { %5211 = vmatprep.subr.bf16.mxu1 %v8594_v54  ;;  %v8625_v30 = vpack.c.bf16 %v784_v46, %v775_v6  ;;  %v8635_v46 = vpack.c.bf16 %v516_v29, %v507_v5  ;;  %v525_v6 = vld [vmem:[#allocation12 + $0xb0] sm:$0xff]  ;;  %v546_v5 = vld [vmem:[#allocation12 + $0x158] sm:$0xff]  ;;  %v555_v29 = vld [vmem:[#allocation12 + $0x1a0] sm:$0xff] }
 0x122   :  { %10698 = vst [vmem:[#allocation93_spill] sm:$0xff] %v8615_v25 }
 0x123   :  { %5149 = vmatpush1.bf16.msra.mxu0 %v8597_v36  ;;  %v517_v36 = vld [vmem:[#allocation12 + $0x70] sm:$0xff]  ;;  %10701 = vst [vmem:[#allocation96_spill] sm:$0xff] %v8625_v30  ;;  %10704 = vst [vmem:[#allocation99_spill] sm:$0xff] %v8635_v46 }
 0x124   :  { %5213 = vmatpush1.bf16.msra.mxu1 %v8601_v0  ;;  %5151 = vmatprep.subr.bf16.mxu0 %v8603_v23  ;;  %v8627_v60 = vpack.c.bf16 %v517_v36, %v508_v8  ;;  %v518_v23 = vld [vmem:[#allocation12 + $0x78] sm:$0xff] }
 0x125   :  { %5215 = vmatprep.subr.bf16.mxu1 %v8606_v37  ;;  %v8639_v8 = vpack.c.bf16 %v518_v23, %v509_v47  ;;  %v553_v37 = vld [vmem:[#allocation12 + $0x190] sm:$0xff]  ;;  %v543_v47 = vld [vmem:[#allocation12 + $0x140] sm:$0xff] }
 0x126   :  { %10702 = vst [vmem:[#allocation97_spill] sm:$0xff] %v8627_v60 }
 0x127   :  { %5153 = vmatpush1.bf16.msra.mxu0 %v8609_v11  ;;  %v535_v11 = vld [vmem:[#allocation12 + $0x100] sm:$0xff]  ;;  %10705 = vst [vmem:[#allocation100_spill] sm:$0xff] %v8639_v8 }
 0x128   :  { %5217 = vmatpush1.bf16.msra.mxu1 %v8613_v58  ;;  %5155 = vmatprep.subr.bf16.mxu0 %v8615_v25  ;;  %v8633_v58 = vld [vmem:[#allocation7] sm:$0xff]  ;;  %v8641_v36 = vpack.c.bf16 %v535_v11, %v526_v53  ;;  %v8644_v25 = vpack.c.bf16 %v537_v49, %v528_v62  ;;  %v8649_v53 = vpack.c.bf16 %v534_v12, %v525_v6 }
 0x129   :  { %5219 = vmatprep.subr.bf16.mxu1 %v8618_v9  ;;  %v544_v9 = vld [vmem:[#allocation12 + $0x148] sm:$0xff]  ;;  %v545_v49 = vld [vmem:[#allocation12 + $0x150] sm:$0xff] }
 0x12a   :  { %10706 = vst [vmem:[#allocation101_spill] sm:$0xff] %v8641_v36  ;;  %10707 = vst [vmem:[#allocation102_spill] sm:$0xff] %v8644_v25  ;;  %v8655_v23 = vpack.c.bf16 %v553_v37, %v544_v9  ;;  %v552_v62 = vld [vmem:[#allocation12 + $0x188] sm:$0xff]  ;;  %v573_v12 = vld [vmem:[#allocation12 + $0x230] sm:$0xff] }
 0x12b   :  { %5157 = vmatpush1.bf16.msra.mxu0 %v8621_v57  ;;  %v536_v57 = vld [vmem:[#allocation12 + $0x108] sm:$0xff]  ;;  %10708 = vst [vmem:[#allocation103_spill] sm:$0xff] %v8649_v53 }
 0x12c   :  { %5221 = vmatpush1.bf16.msra.mxu1 %v8625_v30  ;;  %5223 = vmatprep.subr.bf16.mxu0 %v8627_v60  ;;  %v8653_v11 = vpack.c.bf16 %v536_v57, %v527_v21  ;;  %10710 = vst [vmem:[#allocation105_spill] sm:$0xff] %v8655_v23  ;;  %v554_v60 = vld [vmem:[#allocation12 + $0x198] sm:$0xff]  ;;  %v564_v6 = vld [vmem:[#allocation12 + $0x1e8] sm:$0xff]  ;;  %v8663_v57 = vpack.c.bf16 %v552_v62, %v543_v47  ;;  %v561_v21 = vld [vmem:[#allocation12 + $0x1d0] sm:$0xff] }
 0x12d   :  { %5287 = vmatprep.subr.bf16.mxu1 %v8630_v48  ;;  %v8658_v48 = vpack.c.bf16 %v555_v29, %v546_v5  ;;  %v562_v30 = vld [vmem:[#allocation12 + $0x1d8] sm:$0xff]  ;;  %v8667_v37 = vpack.c.bf16 %v554_v60, %v545_v49  ;;  %v563_v29 = vld [vmem:[#allocation12 + $0x1e0] sm:$0xff]  ;;  %v588_v49 = vld [vmem:[#allocation12 + $0x2a8] sm:$0xff] }
 0x12e   :  { %892 = vmatmul.mubr.f32.vlgmr.msra.gmra.mrb[0].mxu0 %v8633_v58  ;;  %10709 = vst [vmem:[#allocation104_spill] sm:$0xff] %v8653_v11  ;;  %10712 = vst [vmem:[#allocation107_spill] sm:$0xff] %v8663_v57  ;;  %v570_v5 = vld [vmem:[#allocation12 + $0x218] sm:$0xff]  ;;  %v591_v62 = vld [vmem:[#allocation12 + $0x2c0] sm:$0xff] }
 0x12f   :  { %963 = vmatmul.mubr.f32.vlgmr.msra.gmra.mrb[8].mxu1 %v8633_v58  ;;  %5225 = vmatpush1.bf16.msra.mxu0 %v8635_v46  ;;  %10711 = vst [vmem:[#allocation106_spill] sm:$0xff] %v8658_v48  ;;  %v571_v46 = vld [vmem:[#allocation12 + $0x220] sm:$0xff]  ;;  %10713 = vst [vmem:[#allocation108_spill] sm:$0xff] %v8667_v37  ;;  %v582_v47 = vld [vmem:[#allocation12 + $0x278] sm:$0xff] }
 0x130   :  { %5289 = vmatpush1.bf16.msra.mxu1 %v8639_v8  ;;  %5227 = vmatprep.subr.bf16.mxu0 %v8641_v36  ;;  %v8669_v9 = vpack.c.bf16 %v571_v46, %v562_v30  ;;  %v572_v36 = vld [vmem:[#allocation12 + $0x228] sm:$0xff]  ;;  %v579_v46 = vld [vmem:[#allocation12 + $0x260] sm:$0xff] }
 0x131   :  { %5291 = vmatprep.subr.bf16.mxu1 %v8644_v25  ;;  %1033 = vmatprep.mubr.f32.mxu0 %v8528_v18  ;;  %v8672_v25 = vpack.c.bf16 %v573_v12, %v564_v6  ;;  %v580_v8 = vld [vmem:[#allocation12 + $0x268] sm:$0xff]  ;;  %v8679_v30 = vpack.c.bf16 %v572_v36, %v563_v29  ;;  %v581_v6 = vld [vmem:[#allocation12 + $0x270] sm:$0xff]  ;;  %v8684_v12 = vpack.c.bf16 %v591_v62, %v582_v47  ;;  %v606_v29 = vld [vmem:[#allocation12 + $0x338] sm:$0xff] }
 0x132   :  { %1104 = vmatprep.mubr.f32.mxu1 %v8528_v18  ;;  %10714 = vst [vmem:[#allocation109_spill] sm:$0xff] %v8669_v9  ;;  %v599_v47 = vld [vmem:[#allocation12 + $0x300] sm:$0xff] }
 0x133   :  { %5229 = vmatpush1.bf16.msra.mxu0 %v8649_v53  ;;  %10715 = vst [vmem:[#allocation110_spill] sm:$0xff] %v8672_v25  ;;  %v589_v53 = vld [vmem:[#allocation12 + $0x2b0] sm:$0xff]  ;;  %10717 = vst [vmem:[#allocation112_spill] sm:$0xff] %v8679_v30 }
 0x134   :  { %5293 = vmatpush1.bf16.msra.mxu1 %v8653_v11  ;;  %5231 = vmatprep.subr.bf16.mxu0 %v8655_v23  ;;  %v8675_v11 = vpack.c.bf16 %v570_v5, %v561_v21  ;;  %v8681_v60 = vpack.c.bf16 %v589_v53, %v580_v8  ;;  %10719 = vst [vmem:[#allocation114_spill] sm:$0xff] %v8684_v12  ;;  %v598_v23 = vld [vmem:[#allocation12 + $0x2f8] sm:$0xff]  ;;  %v600_v21 = vld [vmem:[#allocation12 + $0x308] sm:$0xff]  ;;  %v609_v5 = vld [vmem:[#allocation12 + $0x350] sm:$0xff] }
 0x135   :  { %5295 = vmatprep.subr.bf16.mxu1 %v8658_v48  ;;  %v590_v48 = vld [vmem:[#allocation12 + $0x2b8] sm:$0xff]  ;;  %v597_v53 = vld [vmem:[#allocation12 + $0x2f0] sm:$0xff]  ;;  %v8696_v62 = vpack.c.bf16 %v609_v5, %v600_v21 }
 0x136   :  { %10716 = vst [vmem:[#allocation111_spill] sm:$0xff] %v8675_v11  ;;  %10718 = vst [vmem:[#allocation113_spill] sm:$0xff] %v8681_v60  ;;  %v8691_v8 = vpack.c.bf16 %v590_v48, %v581_v6  ;;  %v624_v6 = vld [vmem:[#allocation12 + $0x3c8] sm:$0xff]  ;;  %v617_v21 = vld [vmem:[#allocation12 + $0x390] sm:$0xff] }
 0x137   :  { %5233 = vmatpush1.bf16.msra.mxu0 %v8663_v57  ;;  %v607_v57 = vld [vmem:[#allocation12 + $0x340] sm:$0xff]  ;;  %10723 = vst [vmem:[#allocation118_spill] sm:$0xff] %v8696_v62 }
 0x138   :  { %5297 = vmatpush1.bf16.msra.mxu1 %v8667_v37  ;;  %5235 = vmatprep.subr.bf16.mxu0 %v8669_v9  ;;  %v8687_v37 = vpack.c.bf16 %v588_v49, %v579_v46  ;;  %10721 = vst [vmem:[#allocation116_spill] sm:$0xff] %v8691_v8  ;;  %v8693_v36 = vpack.c.bf16 %v607_v57, %v598_v23  ;;  %v616_v9 = vld [vmem:[#allocation12 + $0x388] sm:$0xff]  ;;  %v618_v46 = vld [vmem:[#allocation12 + $0x398] sm:$0xff]  ;;  %v627_v49 = vld [vmem:[#allocation12 + $0x3e0] sm:$0xff] }
 0x139   :  { %5299 = vmatprep.subr.bf16.mxu1 %v8672_v25  ;;  %v608_v25 = vld [vmem:[#allocation12 + $0x348] sm:$0xff]  ;;  %v615_v57 = vld [vmem:[#allocation12 + $0x380] sm:$0xff]  ;;  %v8708_v5 = vpack.c.bf16 %v627_v49, %v618_v46 }
 0x13a   :  { %10720 = vst [vmem:[#allocation115_spill] sm:$0xff] %v8687_v37  ;;  %10722 = vst [vmem:[#allocation117_spill] sm:$0xff] %v8693_v36  ;;  %v8703_v48 = vpack.c.bf16 %v608_v25, %v599_v47  ;;  %v642_v47 = vld [vmem:[#allocation12 + $0x458] sm:$0xff]  ;;  %v635_v46 = vld [vmem:[#allocation12 + $0x420] sm:$0xff] }
 0x13b   :  { %5237 = vmatpush1.bf16.msra.mxu0 %v8675_v11  ;;  %v625_v11 = vld [vmem:[#allocation12 + $0x3d0] sm:$0xff]  ;;  %10727 = vst [vmem:[#allocation122_spill] sm:$0xff] %v8708_v5 }
 0x13c   :  { %5301 = vmatpush1.bf16.msra.mxu1 %v8679_v30  ;;  %5239 = vmatprep.subr.bf16.mxu0 %v8681_v60  ;;  %v8699_v30 = vpack.c.bf16 %v606_v29, %v597_v53  ;;  %10725 = vst [vmem:[#allocation120_spill] sm:$0xff] %v8703_v48  ;;  %v8705_v23 = vpack.c.bf16 %v625_v11, %v616_v9  ;;  %v634_v60 = vld [vmem:[#allocation12 + $0x418] sm:$0xff]  ;;  %v636_v53 = vld [vmem:[#allocation12 + $0x428] sm:$0xff]  ;;  %v645_v29 = vld [vmem:[#allocation12 + $0x470] sm:$0xff] }
 0x13d   :  { %5303 = vmatprep.subr.bf16.mxu1 %v8684_v12  ;;  %v626_v12 = vld [vmem:[#allocation12 + $0x3d8] sm:$0xff]  ;;  %v633_v9 = vld [vmem:[#allocation12 + $0x410] sm:$0xff]  ;;  %v8720_v49 = vpack.c.bf16 %v645_v29, %v636_v53 }
 0x13e   :  { %10724 = vst [vmem:[#allocation119_spill] sm:$0xff] %v8699_v30  ;;  %10726 = vst [vmem:[#allocation121_spill] sm:$0xff] %v8705_v23  ;;  %v8715_v25 = vpack.c.bf16 %v626_v12, %v617_v21  ;;  %v651_v12 = vld [vmem:[#allocation12 + $0x4a0] sm:$0xff]  ;;  %v660_v21 = vld [vmem:[#allocation12 + $0x4e8] sm:$0xff] }
 0x13f   :  { %5241 = vmatpush1.bf16.msra.mxu0 %v8687_v37  ;;  %v643_v37 = vld [vmem:[#allocation12 + $0x460] sm:$0xff]  ;;  %10731 = vst [vmem:[#allocation126_spill] sm:$0xff] %v8720_v49  ;;  %v653_v53 = vld [vmem:[#allocation12 + $0x4b0] sm:$0xff] }
 0x140   :  { %5305 = vmatpush1.bf16.msra.mxu1 %v8691_v8  ;;  %5243 = vmatprep.subr.bf16.mxu0 %v8693_v36  ;;  %v8711_v8 = vpack.c.bf16 %v624_v6, %v615_v57  ;;  %10729 = vst [vmem:[#allocation124_spill] sm:$0xff] %v8715_v25  ;;  %v8717_v11 = vpack.c.bf16 %v643_v37, %v634_v60  ;;  %v652_v36 = vld [vmem:[#allocation12 + $0x4a8] sm:$0xff]  ;;  %v654_v57 = vld [vmem:[#allocation12 + $0x4b8] sm:$0xff]  ;;  %v663_v6 = vld [vmem:[#allocation12 + $0x500] sm:$0xff] }
 0x141   :  { %5307 = vmatprep.subr.bf16.mxu1 %v8696_v62  ;;  %v644_v62 = vld [vmem:[#allocation12 + $0x468] sm:$0xff]  ;;  %v8732_v29 = vpack.c.bf16 %v663_v6, %v654_v57  ;;  %v671_v57 = vld [vmem:[#allocation12 + $0x540] sm:$0xff] }
 0x142   :  { %10728 = vst [vmem:[#allocation123_spill] sm:$0xff] %v8711_v8  ;;  %10730 = vst [vmem:[#allocation125_spill] sm:$0xff] %v8717_v11  ;;  %v8727_v37 = vpack.c.bf16 %v644_v62, %v635_v46  ;;  %v669_v62 = vld [vmem:[#allocation12 + $0x530] sm:$0xff]  ;;  %v678_v46 = vld [vmem:[#allocation12 + $0x578] sm:$0xff] }
 0x143   :  { %5245 = vmatpush1.bf16.msra.mxu0 %v8699_v30  ;;  %v661_v30 = vld [vmem:[#allocation12 + $0x4f0] sm:$0xff]  ;;  %10735 = vst [vmem:[#allocation130_spill] sm:$0xff] %v8732_v29 }
 0x144   :  { %5309 = vmatpush1.bf16.msra.mxu1 %v8703_v48  ;;  %5247 = vmatprep.subr.bf16.mxu0 %v8705_v23  ;;  %v8723_v48 = vpack.c.bf16 %v642_v47, %v633_v9  ;;  %10733 = vst [vmem:[#allocation128_spill] sm:$0xff] %v8727_v37  ;;  %v8729_v60 = vpack.c.bf16 %v661_v30, %v652_v36  ;;  %v670_v23 = vld [vmem:[#allocation12 + $0x538] sm:$0xff]  ;;  %v672_v9 = vld [vmem:[#allocation12 + $0x548] sm:$0xff]  ;;  %v681_v47 = vld [vmem:[#allocation12 + $0x590] sm:$0xff] }
 0x145   :  { %5311 = vmatprep.subr.bf16.mxu1 %v8708_v5  ;;  %v662_v5 = vld [vmem:[#allocation12 + $0x4f8] sm:$0xff]  ;;  %v8744_v6 = vpack.c.bf16 %v681_v47, %v672_v9  ;;  %v689_v9 = vld [vmem:[#allocation12 + $0x5d0] sm:$0xff] }
 0x146   :  { %10732 = vst [vmem:[#allocation127_spill] sm:$0xff] %v8723_v48  ;;  %10734 = vst [vmem:[#allocation129_spill] sm:$0xff] %v8729_v60  ;;  %v8739_v30 = vpack.c.bf16 %v662_v5, %v653_v53  ;;  %v687_v5 = vld [vmem:[#allocation12 + $0x5c0] sm:$0xff]  ;;  %v696_v53 = vld [vmem:[#allocation12 + $0x608] sm:$0xff] }
 0x147   :  { %5249 = vmatpush1.bf16.msra.mxu0 %v8711_v8  ;;  %v679_v8 = vld [vmem:[#allocation12 + $0x580] sm:$0xff]  ;;  %10739 = vst [vmem:[#allocation134_spill] sm:$0xff] %v8744_v6 }
 0x148   :  { %5313 = vmatpush1.bf16.msra.mxu1 %v8715_v25  ;;  %5251 = vmatprep.subr.bf16.mxu0 %v8717_v11  ;;  %v8735_v25 = vpack.c.bf16 %v660_v21, %v651_v12  ;;  %10737 = vst [vmem:[#allocation132_spill] sm:$0xff] %v8739_v30  ;;  %v8741_v36 = vpack.c.bf16 %v679_v8, %v670_v23  ;;  %v688_v11 = vld [vmem:[#allocation12 + $0x5c8] sm:$0xff]  ;;  %v690_v12 = vld [vmem:[#allocation12 + $0x5d8] sm:$0xff]  ;;  %v699_v21 = vld [vmem:[#allocation12 + $0x620] sm:$0xff] }
 0x149   :  { %5315 = vmatprep.subr.bf16.mxu1 %v8720_v49  ;;  %v680_v49 = vld [vmem:[#allocation12 + $0x588] sm:$0xff]  ;;  %v8756_v47 = vpack.c.bf16 %v699_v21, %v690_v12  ;;  %v707_v12 = vld [vmem:[#allocation12 + $0x660] sm:$0xff] }
 0x14a   :  { %10736 = vst [vmem:[#allocation131_spill] sm:$0xff] %v8735_v25  ;;  %10738 = vst [vmem:[#allocation133_spill] sm:$0xff] %v8741_v36  ;;  %v8751_v8 = vpack.c.bf16 %v680_v49, %v671_v57  ;;  %v705_v49 = vld [vmem:[#allocation12 + $0x650] sm:$0xff]  ;;  %v714_v57 = vld [vmem:[#allocation12 + $0x698] sm:$0xff] }
 0x14b   :  { %5253 = vmatpush1.bf16.msra.mxu0 %v8723_v48  ;;  %v697_v48 = vld [vmem:[#allocation12 + $0x610] sm:$0xff]  ;;  %10743 = vst [vmem:[#allocation138_spill] sm:$0xff] %v8756_v47 }
 0x14c   :  { %5317 = vmatpush1.bf16.msra.mxu1 %v8727_v37  ;;  %5255 = vmatprep.subr.bf16.mxu0 %v8729_v60  ;;  %v8747_v37 = vpack.c.bf16 %v678_v46, %v669_v62  ;;  %10741 = vst [vmem:[#allocation136_spill] sm:$0xff] %v8751_v8  ;;  %v8753_v23 = vpack.c.bf16 %v697_v48, %v688_v11  ;;  %v706_v60 = vld [vmem:[#allocation12 + $0x658] sm:$0xff]  ;;  %v708_v62 = vld [vmem:[#allocation12 + $0x668] sm:$0xff]  ;;  %v717_v46 = vld [vmem:[#allocation12 + $0x6b0] sm:$0xff] }
 0x14d   :  { %5319 = vmatprep.subr.bf16.mxu1 %v8732_v29  ;;  %v698_v29 = vld [vmem:[#allocation12 + $0x618] sm:$0xff]  ;;  %v8768_v21 = vpack.c.bf16 %v717_v46, %v708_v62  ;;  %v725_v62 = vld [vmem:[#allocation12 + $0x6f0] sm:$0xff] }
 0x14e   :  { %10740 = vst [vmem:[#allocation135_spill] sm:$0xff] %v8747_v37  ;;  %10742 = vst [vmem:[#allocation137_spill] sm:$0xff] %v8753_v23  ;;  %v8763_v48 = vpack.c.bf16 %v698_v29, %v689_v9  ;;  %v723_v29 = vld [vmem:[#allocation12 + $0x6e0] sm:$0xff]  ;;  %v732_v9 = vld [vmem:[#allocation12 + $0x728] sm:$0xff] }
 0x14f   :  { %5257 = vmatpush1.bf16.msra.mxu0 %v8735_v25  ;;  %v715_v25 = vld [vmem:[#allocation12 + $0x6a0] sm:$0xff]  ;;  %10747 = vst [vmem:[#allocation142_spill] sm:$0xff] %v8768_v21 }
 0x150   :  { %5321 = vmatpush1.bf16.msra.mxu1 %v8739_v30  ;;  %5259 = vmatprep.subr.bf16.mxu0 %v8741_v36  ;;  %v8759_v30 = vpack.c.bf16 %v696_v53, %v687_v5  ;;  %10745 = vst [vmem:[#allocation140_spill] sm:$0xff] %v8763_v48  ;;  %v8765_v11 = vpack.c.bf16 %v715_v25, %v706_v60  ;;  %v724_v36 = vld [vmem:[#allocation12 + $0x6e8] sm:$0xff]  ;;  %v726_v5 = vld [vmem:[#allocation12 + $0x6f8] sm:$0xff]  ;;  %v735_v53 = vld [vmem:[#allocation12 + $0x740] sm:$0xff] }
 0x151   :  { %5323 = vmatprep.subr.bf16.mxu1 %v8744_v6  ;;  %v716_v6 = vld [vmem:[#allocation12 + $0x6a8] sm:$0xff]  ;;  %v8780_v46 = vpack.c.bf16 %v735_v53, %v726_v5  ;;  %v743_v5 = vld [vmem:[#allocation12 + $0x780] sm:$0xff] }
 0x152   :  { %10744 = vst [vmem:[#allocation139_spill] sm:$0xff] %v8759_v30  ;;  %10746 = vst [vmem:[#allocation141_spill] sm:$0xff] %v8765_v11  ;;  %v8775_v25 = vpack.c.bf16 %v716_v6, %v707_v12  ;;  %v741_v6 = vld [vmem:[#allocation12 + $0x770] sm:$0xff]  ;;  %v750_v12 = vld [vmem:[#allocation12 + $0x7b8] sm:$0xff] }
 0x153   :  { %5261 = vmatpush1.bf16.msra.mxu0 %v8747_v37  ;;  %v733_v37 = vld [vmem:[#allocation12 + $0x730] sm:$0xff]  ;;  %10751 = vst [vmem:[#allocation146_spill] sm:$0xff] %v8780_v46 }
 0x154   :  { %5325 = vmatpush1.bf16.msra.mxu1 %v8751_v8  ;;  %5263 = vmatprep.subr.bf16.mxu0 %v8753_v23  ;;  %v8771_v8 = vpack.c.bf16 %v714_v57, %v705_v49  ;;  %10749 = vst [vmem:[#allocation144_spill] sm:$0xff] %v8775_v25  ;;  %v8777_v60 = vpack.c.bf16 %v733_v37, %v724_v36  ;;  %v742_v23 = vld [vmem:[#allocation12 + $0x778] sm:$0xff]  ;;  %v744_v49 = vld [vmem:[#allocation12 + $0x788] sm:$0xff]  ;;  %v753_v57 = vld [vmem:[#allocation12 + $0x7d0] sm:$0xff] }
 0x155   :  { %5327 = vmatprep.subr.bf16.mxu1 %v8756_v47  ;;  %v734_v47 = vld [vmem:[#allocation12 + $0x738] sm:$0xff]  ;;  %v8792_v53 = vpack.c.bf16 %v753_v57, %v744_v49  ;;  %v761_v49 = vld [vmem:[#allocation12 + $0x810] sm:$0xff] }
 0x156   :  { %10748 = vst [vmem:[#allocation143_spill] sm:$0xff] %v8771_v8  ;;  %10750 = vst [vmem:[#allocation145_spill] sm:$0xff] %v8777_v60  ;;  %v8787_v37 = vpack.c.bf16 %v734_v47, %v725_v62  ;;  %v759_v47 = vld [vmem:[#allocation12 + $0x800] sm:$0xff]  ;;  %v768_v62 = vld [vmem:[#allocation12 + $0x848] sm:$0xff] }
 0x157   :  { %5265 = vmatpush1.bf16.msra.mxu0 %v8759_v30  ;;  %v751_v30 = vld [vmem:[#allocation12 + $0x7c0] sm:$0xff]  ;;  %10755 = vst [vmem:[#allocation150_spill] sm:$0xff] %v8792_v53 }
 0x158   :  { %5329 = vmatpush1.bf16.msra.mxu1 %v8763_v48  ;;  %5267 = vmatprep.subr.bf16.mxu0 %v8765_v11  ;;  %v8783_v48 = vpack.c.bf16 %v732_v9, %v723_v29  ;;  %10753 = vst [vmem:[#allocation148_spill] sm:$0xff] %v8787_v37  ;;  %v8789_v36 = vpack.c.bf16 %v751_v30, %v742_v23  ;;  %v760_v11 = vld [vmem:[#allocation12 + $0x808] sm:$0xff]  ;;  %v762_v29 = vld [vmem:[#allocation12 + $0x818] sm:$0xff]  ;;  %v771_v9 = vld [vmem:[#allocation12 + $0x860] sm:$0xff] }
 0x159   :  { %5331 = vmatprep.subr.bf16.mxu1 %v8768_v21  ;;  %v752_v21 = vld [vmem:[#allocation12 + $0x7c8] sm:$0xff]  ;;  %v8804_v57 = vpack.c.bf16 %v771_v9, %v762_v29  ;;  %v779_v29 = vld [vmem:[#allocation12 + $0x8a0] sm:$0xff] }
 0x15a   :  { %10752 = vst [vmem:[#allocation147_spill] sm:$0xff] %v8783_v48  ;;  %10754 = vst [vmem:[#allocation149_spill] sm:$0xff] %v8789_v36  ;;  %v8799_v30 = vpack.c.bf16 %v752_v21, %v743_v5  ;;  %v777_v21 = vld [vmem:[#allocation12 + $0x890] sm:$0xff]  ;;  %v786_v5 = vld [vmem:[#allocation12 + $0x8d8] sm:$0xff] }
 0x15b   :  { %5269 = vmatpush1.bf16.msra.mxu0 %v8771_v8  ;;  %v769_v8 = vld [vmem:[#allocation12 + $0x850] sm:$0xff]  ;;  %10759 = vst [vmem:[#allocation154_spill] sm:$0xff] %v8804_v57 }
 0x15c   :  { %5333 = vmatpush1.bf16.msra.mxu1 %v8775_v25  ;;  %5271 = vmatprep.subr.bf16.mxu0 %v8777_v60  ;;  %v8795_v25 = vpack.c.bf16 %v750_v12, %v741_v6  ;;  %10757 = vst [vmem:[#allocation152_spill] sm:$0xff] %v8799_v30  ;;  %v8801_v23 = vpack.c.bf16 %v769_v8, %v760_v11  ;;  %v778_v60 = vld [vmem:[#allocation12 + $0x898] sm:$0xff]  ;;  %v780_v6 = vld [vmem:[#allocation12 + $0x8a8] sm:$0xff]  ;;  %v789_v12 = vld [vmem:[#allocation12 + $0x8f0] sm:$0xff] }
 0x15d   :  { %5335 = vmatprep.subr.bf16.mxu1 %v8780_v46  ;;  %v770_v46 = vld [vmem:[#allocation12 + $0x858] sm:$0xff]  ;;  %v8816_v9 = vpack.c.bf16 %v789_v12, %v780_v6 }
 0x15e   :  { %10756 = vst [vmem:[#allocation151_spill] sm:$0xff] %v8795_v25  ;;  %10758 = vst [vmem:[#allocation153_spill] sm:$0xff] %v8801_v23  ;;  %v8811_v8 = vpack.c.bf16 %v770_v46, %v761_v49  ;;  %v511_v46 = vld [vmem:[#allocation12 + $0x40] sm:$0xff]  ;;  %v673_v49 = vld [vmem:[#allocation12 + $0x550] sm:$0xff] }
 0x15f   :  { %5273 = vmatpush1.bf16.msra.mxu0 %v8783_v48  ;;  %v787_v48 = vld [vmem:[#allocation12 + $0x8e0] sm:$0xff]  ;;  %10763 = vst [vmem:[#allocation158_spill] sm:$0xff] %v8816_v9  ;;  %v682_v6 = vld [vmem:[#allocation12 + $0x598] sm:$0xff] }
 0x160   :  { %5337 = vmatpush1.bf16.msra.mxu1 %v8787_v37  ;;  %5275 = vmatprep.subr.bf16.mxu0 %v8789_v36  ;;  %v8807_v37 = vpack.c.bf16 %v768_v62, %v759_v47  ;;  %10761 = vst [vmem:[#allocation156_spill] sm:$0xff] %v8811_v8  ;;  %v8813_v11 = vpack.c.bf16 %v787_v48, %v778_v60  ;;  %v655_v36 = vld [vmem:[#allocation12 + $0x4c0] sm:$0xff]  ;;  %v520_v62 = vld [vmem:[#allocation12 + $0x88] sm:$0xff] }
 0x161   :  { %5339 = vmatprep.subr.bf16.mxu1 %v8792_v53  ;;  %v788_v53 = vld [vmem:[#allocation12 + $0x8e8] sm:$0xff]  ;;  %v8819_v47 = vpack.c.bf16 %v786_v5, %v777_v21  ;;  %v8829_v12 = vpack.c.bf16 %v520_v62, %v511_v46  ;;  %v8833_v21 = vpack.c.bf16 %v682_v6, %v673_v49  ;;  %v538_v5 = vld [vmem:[#allocation12 + $0x118] sm:$0xff]  ;;  %v547_v62 = vld [vmem:[#allocation12 + $0x160] sm:$0xff] }
 0x162   :  { %10760 = vst [vmem:[#allocation155_spill] sm:$0xff] %v8807_v37  ;;  %10762 = vst [vmem:[#allocation157_spill] sm:$0xff] %v8813_v11  ;;  %v8823_v48 = vpack.c.bf16 %v788_v53, %v779_v29  ;;  %v529_v53 = vld [vmem:[#allocation12 + $0xd0] sm:$0xff]  ;;  %v556_v49 = vld [vmem:[#allocation12 + $0x1a8] sm:$0xff] }
 0x163   :  { %5277 = vmatpush1.bf16.msra.mxu0 %v8795_v25  ;;  %v664_v25 = vld [vmem:[#allocation12 + $0x508] sm:$0xff]  ;;  %10764 = vst [vmem:[#allocation159_spill] sm:$0xff] %v8819_v47  ;;  %10767 = vst [vmem:[#allocation162_spill] sm:$0xff] %v8829_v12  ;;  %v8839_v29 = vpack.c.bf16 %v538_v5, %v529_v53  ;;  %v709_v6 = vld [vmem:[#allocation12 + $0x670] sm:$0xff] }
 0x164   :  { %5341 = vmatpush1.bf16.msra.mxu1 %v8799_v30  ;;  %5279 = vmatprep.subr.bf16.mxu0 %v8801_v23  ;;  %10765 = vst [vmem:[#allocation160_spill] sm:$0xff] %v8823_v48  ;;  %v8825_v60 = vpack.c.bf16 %v664_v25, %v655_v36  ;;  %10768 = vst [vmem:[#allocation163_spill] sm:$0xff] %v8833_v21  ;;  %v691_v25 = vld [vmem:[#allocation12 + $0x5e0] sm:$0xff]  ;;  %v700_v36 = vld [vmem:[#allocation12 + $0x628] sm:$0xff] }
 0x165   :  { %5343 = vmatprep.subr.bf16.mxu1 %v8804_v57  ;;  %10769 = vst [vmem:[#allocation164_spill] sm:$0xff] %v8839_v29  ;;  %v8842_v46 = vpack.c.bf16 %v700_v36, %v691_v25  ;;  %v565_v5 = vld [vmem:[#allocation12 + $0x1f0] sm:$0xff]  ;;  %v574_v25 = vld [vmem:[#allocation12 + $0x238] sm:$0xff]  ;;  %v727_v36 = vld [vmem:[#allocation12 + $0x700] sm:$0xff] }
 0x166   :  { %10766 = vst [vmem:[#allocation161_spill] sm:$0xff] %v8825_v60 }
 0x167   :  { %5281 = vmatpush1.bf16.msra.mxu0 %v8807_v37  ;;  %10770 = vst [vmem:[#allocation165_spill] sm:$0xff] %v8842_v46 }
 0x168   :  { %5345 = vmatpush1.bf16.msra.mxu1 %v8811_v8  ;;  %5283 = vmatprep.subr.bf16.mxu0 %v8813_v11 }
 0x169   :  { %5347 = vmatprep.subr.bf16.mxu1 %v8816_v9 }
 0x16b   :  { %5285 = vmatpush1.bf16.msra.mxu0 %v8819_v47 }
 0x16c   :  { %5349 = vmatpush1.bf16.msra.mxu1 %v8823_v48  ;;  %5351 = vmatprep.subr.bf16.mxu0 %v8825_v60  ;;  %v718_v60 = vld [vmem:[#allocation12 + $0x6b8] sm:$0xff] }
 0x16d   :  { %5447 = vmatprep.subr.bf16.mxu1 %v8428_v19  ;;  %v8848_v19 = vpack.c.bf16 %v556_v49, %v547_v62  ;;  %v8851_v53 = vpack.c.bf16 %v718_v60, %v709_v6  ;;  %v583_v49 = vld [vmem:[#allocation12 + $0x280] sm:$0xff]  ;;  %v745_v60 = vld [vmem:[#allocation12 + $0x790] sm:$0xff]  ;;  %v754_v6 = vld [vmem:[#allocation12 + $0x7d8] sm:$0xff] }
 0x16e   :  { %1034 = vmatmul.mubr.f32.vlgmr.msra.gmra.mrb[16].mxu0 %v8633_v58 }
 0x16f   :  { %1105 = vmatmul.mubr.f32.vlgmr.msra.gmra.mrb[10].mxu1 %v8633_v58  ;;  %5353 = vmatpush3.bf16.msra.mxu0 %v8829_v12  ;;  %10771 = vst [vmem:[#allocation166_spill] sm:$0xff] %v8848_v19  ;;  %10772 = vst [vmem:[#allocation167_spill] sm:$0xff] %v8851_v53 }
 0x170   :  { %5355 = vmatprep.subr.bf16.mxu0 %v8833_v21  ;;  %1175 = vmatprep.mubr.f32.mxu0 %v8528_v18  ;;  %v736_v21 = vld [vmem:[#allocation12 + $0x748] sm:$0xff]  ;;  %v8856_v18 = vpack.c.bf16 %v574_v25, %v565_v5  ;;  %v8867_v5 = vpack.c.bf16 %v754_v6, %v745_v60  ;;  %v601_v25 = vld [vmem:[#allocation12 + $0x310] sm:$0xff]  ;;  %v790_v6 = vld [vmem:[#allocation12 + $0x8f8] sm:$0xff] }
 0x171   :  { %5449 = vmatpush1.bf16.msra.mxu1 %v8433_v27  ;;  %v8859_v62 = vpack.c.bf16 %v736_v21, %v727_v36  ;;  %v763_v21 = vld [vmem:[#allocation12 + $0x820] sm:$0xff]  ;;  %v772_v36 = vld [vmem:[#allocation12 + $0x868] sm:$0xff]  ;;  %v781_v60 = vld [vmem:[#allocation12 + $0x8b0] sm:$0xff] }
 0x172   :  { %5451 = vmatprep.subr.bf16.mxu1 %v8438_v32  ;;  %10773 = vst [vmem:[#allocation168_spill] sm:$0xff] %v8856_v18  ;;  %v592_v32 = vld [vmem:[#allocation12 + $0x2c8] sm:$0xff]  ;;  %10776 = vst [vmem:[#allocation171_spill] sm:$0xff] %v8867_v5 }
 0x173   :  { %5357 = vmatpush3.bf16.msra.mxu0 %v8839_v29  ;;  %10774 = vst [vmem:[#allocation169_spill] sm:$0xff] %v8859_v62 }
 0x174   :  { %5359 = vmatprep.subr.bf16.mxu0 %v8842_v46 }
 0x175   :  { %5453 = vmatpush1.bf16.msra.mxu1 %v8446_v39  ;;  %v8864_v39 = vpack.c.bf16 %v592_v32, %v583_v49  ;;  %v8875_v32 = vpack.c.bf16 %v772_v36, %v763_v21  ;;  %v619_v49 = vld [vmem:[#allocation12 + $0x3a0] sm:$0xff] }
 0x176   :  { %5455 = vmatprep.subr.bf16.mxu1 %v8451_v44  ;;  %v610_v44 = vld [vmem:[#allocation12 + $0x358] sm:$0xff]  ;;  %v10784_v36 = vld [vmem:[#allocation61_spill] sm:$0xff] }
 0x177   :  { %5361 = vmatpush3.bf16.msra.mxu0 %v8848_v19  ;;  %10775 = vst [vmem:[#allocation170_spill] sm:$0xff] %v8864_v39  ;;  %10778 = vst [vmem:[#allocation173_spill] sm:$0xff] %v8875_v32 }
 0x178   :  { %5363 = vmatprep.subr.bf16.mxu0 %v8851_v53 }
 0x179   :  { %5457 = vmatpush1.bf16.msra.mxu1 %v8460_v51  ;;  %v8872_v51 = vpack.c.bf16 %v610_v44, %v601_v25  ;;  %v8883_v44 = vpack.c.bf16 %v790_v6, %v781_v60  ;;  %v637_v25 = vld [vmem:[#allocation12 + $0x430] sm:$0xff] }
 0x17a   :  { %5459 = vmatprep.subr.bf16.mxu1 %v8465_v56  ;;  %v628_v56 = vld [vmem:[#allocation12 + $0x3e8] sm:$0xff]  ;;  %v10787_v6 = vld [vmem:[#allocation63_spill] sm:$0xff] }
 0x17b   :  { %5365 = vmatpush3.bf16.msra.mxu0 %v8856_v18  ;;  %10777 = vst [vmem:[#allocation172_spill] sm:$0xff] %v8872_v51  ;;  %10780 = vst [vmem:[#allocation175_spill] sm:$0xff] %v8883_v44  ;;  %v10786_v60 = vld [vmem:[#allocation94_spill] sm:$0xff] }
 0x17c   :  { %5367 = vmatprep.subr.bf16.mxu0 %v8859_v62 }
 0x17d   :  { %5461 = vmatpush1.bf16.msra.mxu1 %v8472_v2  ;;  %v8880_v2 = vpack.c.bf16 %v628_v56, %v619_v49  ;;  %v10782_v56 = vld [vmem:[#allocation90_spill] sm:$0xff]  ;;  %v10785_v49 = vld [vmem:[#allocation92_spill] sm:$0xff] }
 0x17e   :  { %5463 = vmatprep.subr.bf16.mxu1 %v8477_v7  ;;  %v646_v7 = vld [vmem:[#allocation12 + $0x478] sm:$0xff] }
 0x17f   :  { %5369 = vmatpush3.bf16.msra.mxu0 %v8864_v39  ;;  %10779 = vst [vmem:[#allocation174_spill] sm:$0xff] %v8880_v2  ;;  %v8888_v21 = vpack.c.bf16 %v646_v7, %v637_v25  ;;  %v10783_v7 = vld [vmem:[#allocation59_spill] sm:$0xff]  ;;  %v10788_v25 = vld [vmem:[#allocation65_spill] sm:$0xff] }
 0x180   :  { %5371 = vmatprep.subr.bf16.mxu0 %v8867_v5 }
 0x181   :  { %5465 = vmatpush1.bf16.msra.mxu1 %v8485_v16  ;;  %10781 = vst [vmem:[#allocation176_spill] sm:$0xff] %v8888_v21  ;;  %v10806_v16 = vld [vmem:[#allocation95_spill] sm:$0xff] }
 0x182   :  { %5467 = vmatprep.subr.bf16.mxu1 %v8490_v22  ;;  %v10805_v22 = vld [vmem:[#allocation93_spill] sm:$0xff] }
 0x183   :  { %5373 = vmatpush3.bf16.msra.mxu0 %v8872_v51 }
 0x184   :  { %5375 = vmatprep.subr.bf16.mxu0 %v8875_v32 }
 0x185   :  { %5469 = vmatpush1.bf16.msra.mxu1 %v8498_v34  ;;  %v10804_v34 = vld [vmem:[#allocation91_spill] sm:$0xff] }
 0x186   :  { %5471 = vmatprep.subr.bf16.mxu1 %v8503_v42  ;;  %v10803_v42 = vld [vmem:[#allocation89_spill] sm:$0xff] }
 0x187   :  { %5377 = vmatpush3.bf16.msra.mxu0 %v8880_v2 }
 0x188   :  { %5379 = vmatprep.subr.bf16.mxu0 %v8883_v44 }
 0x189   :  { %5473 = vmatpush1.bf16.msra.mxu1 %v8511_v55  ;;  %v10802_v55 = vld [vmem:[#allocation87_spill] sm:$0xff] }
 0x18a   :  { %5475 = vmatprep.subr.bf16.mxu1 %v8516_v61 }
 0x18b   :  { %5381 = vmatpush3.bf16.msra.mxu0 %v8888_v21 }
 0x18c   :  { %5383 = vmatprep.subr.bf16.mxu0 %v8426_v15 }
 0x18d   :  { %5477 = vmatpush1.bf16.msra.mxu1 %v8524_v10 }
 0x18e   :  { %1176 = vmatmul.mubr.f32.vlgmr.msra.gmra.mrb[18].mxu0 %v8633_v58  ;;  %5479 = vmatprep.subr.bf16.mxu1 %v8531_v20  ;;  %v10800_v20 = vld [vmem:[#allocation85_spill] sm:$0xff] }
 0x18f   :  { %5385 = vmatpush1.bf16.msra.mxu0 %v8430_v26 }
 0x190   :  { %5387 = vmatprep.subr.bf16.mxu0 %v8435_v28 }
 0x191   :  { %5481 = vmatpush1.bf16.msra.mxu1 %v8540_v33 }
 0x192   :  { %5483 = vmatprep.subr.bf16.mxu1 %v8545_v45  ;;  %v10798_v45 = vld [vmem:[#allocation81_spill] sm:$0xff] }
 0x193   :  { %5389 = vmatpush1.bf16.msra.mxu0 %v8442_v38 }
 0x194   :  { %5391 = vmatprep.subr.bf16.mxu0 %v8448_v40 }
 0x195   :  { %5485 = vmatpush1.bf16.msra.mxu1 %v8553_v59  ;;  %v235_v59 = vld [vmem:[#allocation10] sm:$0x7] }
 0x196   :  { %5487 = vmatprep.subr.bf16.mxu1 %v8558_v4 }
 0x197   :  { %5393 = vmatpush1.bf16.msra.mxu0 %v8455_v50 }
 0x198   :  { %5395 = vmatprep.subr.bf16.mxu0 %v8462_v52 }
 0x199   :  { %5489 = vmatpush1.bf16.msra.mxu1 %v8565_v24  ;;  %v10796_v24 = vld [vmem:[#allocation77_spill] sm:$0xff] }
 0x19a   :  { %5491 = vmatprep.subr.bf16.mxu1 %v8570_v43  ;;  %v10794_v43 = vld [vmem:[#allocation73_spill] sm:$0xff] }
 0x19b   :  { %5397 = vmatpush1.bf16.msra.mxu0 %v8468_v63 }
 0x19c   :  { %5399 = vmatprep.subr.bf16.mxu0 %v8474_v3 }
 0x19d   :  { %5493 = vmatpush1.bf16.msra.mxu1 %v8577_v1  ;;  %v10793_v1 = vld [vmem:[#allocation71_spill] sm:$0xff] }
 0x19e   :  { %5495 = vmatprep.subr.bf16.mxu1 %v8582_v14  ;;  %v10791_v14 = vld [vmem:[#allocation67_spill] sm:$0xff] }
 0x19f   :  { %5401 = vmatpush1.bf16.msra.mxu0 %v8481_v13 }
 0x1a0   :  { %5403 = vmatprep.subr.bf16.mxu0 %v8487_v17 }
 0x1a1   :  { %5497 = vmatpush1.bf16.msra.mxu1 %v8589_v41  ;;  %v10790_v41 = vld [vmem:[#allocation97_spill] sm:$0xff] }
 0x1a2   :  { %5499 = vmatprep.subr.bf16.mxu1 %v8594_v54  ;;  %v10789_v54 = vld [vmem:[#allocation96_spill] sm:$0xff] }
 0x1a3   :  { %5405 = vmatpush1.bf16.msra.mxu0 %v8494_v31 }
 0x1a4   :  { %5407 = vmatprep.subr.bf16.mxu0 %v8500_v35 }
 0x1a5   :  { %5501 = vmatpush1.bf16.msra.mxu1 %v8601_v0  ;;  %v10792_v0 = vld [vmem:[#allocation69_spill] sm:$0xff] }
 0x1a6   :  { %5503 = vmatprep.subr.bf16.mxu1 %v10782_v56  ;;  %v237_v56 = vlaneseq }
 0x1a7   :  { %5409 = vmatpush1.bf16.msra.mxu0 %v10783_v7 }
 0x1a8   :  { %5411 = vmatprep.subr.bf16.mxu0 %v10784_v36 }
 0x1a9   :  { %5505 = vmatpush1.bf16.msra.mxu1 %v10785_v49  ;;  %v8934_v49 = vshrl.u32 %v237_v56, 7 }
 0x1aa   :  { %5507 = vmatprep.subr.bf16.mxu1 %v10786_v60  ;;  %v10795_v60 = vld [vmem:[#allocation75_spill] sm:$0xff] }
 0x1ab   :  { %5413 = vmatpush1.bf16.msra.mxu0 %v10787_v6  ;;  %v247_v4 = vsub.s32 2, %v8934_v49 }
 0x1ac   :  { %5415 = vmatprep.subr.bf16.mxu0 %v10788_v25 }
 0x1ad   :  { %5509 = vmatpush1.bf16.msra.mxu1 %v10789_v54  ;;  %v10797_v54 = vld [vmem:[#allocation79_spill] sm:$0xff]  ;;  %v248_v33 = vrot.slane %v235_v59, %v247_v4 }
 0x1ae   :  { %5511 = vmatprep.subr.bf16.mxu1 %v10790_v41  ;;  %v10799_v41 = vld [vmem:[#allocation83_spill] sm:$0xff] }
 0x1af   :  { %5417 = vmatpush1.bf16.msra.mxu0 %v10791_v14 }
 0x1b0   :  { %5419 = vmatprep.subr.bf16.mxu0 %v10792_v0 }
 0x1b3   :  { %5421 = vmatpush1.bf16.msra.mxu0 %v10793_v1 }
 0x1b4   :  { %5423 = vmatprep.subr.bf16.mxu0 %v10794_v43  ;;  %v8971_v43 = vld [vmem:[#allocation13] ss:$0 sm:$0xff] }
 0x1b5   :  { %10816 = vst [vmem:[#allocation186_spill] sm:$0xff] %v8971_v43 }
 0x1b7   :  { %5425 = vmatpush1.bf16.msra.mxu0 %v10795_v60 }
 0x1b8   :  { %5427 = vmatprep.subr.bf16.mxu0 %v10796_v24 }
 0x1bb   :  { %5429 = vmatpush1.bf16.msra.mxu0 %v10797_v54 }
 0x1bc   :  { %5431 = vmatprep.subr.bf16.mxu0 %v10798_v45  ;;  %v10807_v45 = vld [vmem:[#allocation98_spill] sm:$0xff] }
 0x1bf   :  { %5433 = vmatpush1.bf16.msra.mxu0 %v10799_v41 }
 0x1c0   :  { %5435 = vmatprep.subr.bf16.mxu0 %v10800_v20 }
 0x1c1   :  { %v4985_v10 = vpop.f32.mrb[0].mxu1 }
 0x1c2   :  { %v8943_v61 = vadd.f32 %v4985_v10, %v248_v33  ;;  %v431_v56 = vpop.f32.mrb[1].mxu1 }
 0x1c3   :  { %5437 = vmatpush1.bf16.msra.mxu0 %v10802_v55 }
 0x1c4   :  { %10801 = vst [vmem:[#allocation177_spill] sm:$0xff] %v8943_v61  ;;  %5439 = vmatprep.subr.bf16.mxu0 %v10803_v42 }
 0x1c5   :  { %v4988_v4 = vpop.f32.mrb[2].mxu1 }
 0x1c6   :  { %v8951_v41 = vadd.f32 %v4988_v4, %v248_v33  ;;  %v441_v20 = vpop.f32.mrb[3].mxu1 }
 0x1c7   :  { %5441 = vmatpush1.bf16.msra.mxu0 %v10804_v34  ;;  %v8953_v54 = vadd.f32 %v441_v20, %v248_v33 }
 0x1c8   :  { %5443 = vmatprep.subr.bf16.mxu0 %v10805_v22  ;;  %10808 = vst [vmem:[#allocation178_spill] sm:$0xff] %v8951_v41  ;;  %v243_v41 = vsub.s32 1, %v8934_v49 }
 0x1c9   :  { %10809 = vst [vmem:[#allocation179_spill] sm:$0xff] %v8953_v54  ;;  %v4991_v10 = vpop.f32.mrb[4].mxu1 }
 0x1ca   :  { %v8955_v61 = vadd.f32 %v4991_v10, %v248_v33  ;;  %v451_v55 = vpop.f32.mrb[5].mxu1 }
 0x1cb   :  { %5445 = vmatpush1.bf16.msra.mxu0 %v10806_v16  ;;  %v8957_v24 = vadd.f32 %v451_v55, %v248_v33 }
 0x1cc   :  { %5575 = vmatprep.subr.bf16.mxu0 %v10807_v45  ;;  %10810 = vst [vmem:[#allocation180_spill] sm:$0xff] %v8955_v61  ;;  %v239_v45 = vsub.s32 0, %v8934_v49 }
 0x1cd   :  { %10811 = vst [vmem:[#allocation181_spill] sm:$0xff] %v8957_v24  ;;  %v4994_v42 = vpop.f32.mrb[6].mxu1  ;;  %v8968_v24 = vrot.slane %v235_v59, %v243_v41 }
 0x1ce   :  { %v8959_v34 = vadd.f32 %v4994_v42, %v248_v33  ;;  %v461_v22 = vpop.f32.mrb[7].mxu1  ;;  %v8964_v16 = vrot.slane %v235_v59, %v239_v45 }
 0x1cf   :  { %v8961_v60 = vadd.f32 %v461_v22, %v248_v33  ;;  %10815 = vst [vmem:[#allocation185_spill] sm:$0xff] %v8968_v24 }
 0x1d0   :  { %10812 = vst [vmem:[#allocation182_spill] sm:$0xff] %v8959_v34  ;;  %10814 = vst [vmem:[#allocation184_spill] sm:$0xff] %v8964_v16 }
 0x1d1   :  { %10813 = vst [vmem:[#allocation183_spill] sm:$0xff] %v8961_v60 }
 0x201   :  { %v893_v4 = vpop.f32.mrb[0].mxu0 }
 0x202   :  { %v7646_v20 = vadd.f32 %v893_v4, %v8964_v16  ;;  %v895_v10 = vpop.f32.mrb[1].mxu0  ;;  %v964_v61 = vpop.f32.mrb[8].mxu1  ;;  %v432_v16 = vadd.f32 %v431_v56, %v248_v33 }
 0x203   :  { %v966_v54 = vpop.f32.mrb[9].mxu1  ;;  %v7647_v42 = vadd.f32 %v895_v10, %v8968_v24  ;;  %v1184_v4 = vadd.f32 %v8971_v43, %v964_v61 }
 0x204   :  { %v4560_v55 = vmul.f32 -1.442695, %v7646_v20 }
 0x205   :  { %v4561_v22 = vmul.f32 -1.442695, %v7647_v42 }
 0x206   :  { %7700 = vpow2.f32 %v4560_v55 }
 0x207   :  { %7702 = vpow2.f32 %v4561_v22 }
 0x210   :  { %v7701_v34 = vpop.eup %7700 }
 0x211   :  { %v1193_v60 = vadd.f32 1.0, %v7701_v34  ;;  %v7703_v1 = vpop.eup %7702 }
 0x212   :  { %v1194_v14 = vadd.f32 1.0, %v7703_v1 }
 0x213   :  { %7704 = vrcp.f32 %v1193_v60  ;;  %v798_v60 = vld [vmem:[#allocation15] sm:$0x3] }
 0x214   :  { %v8977_v22 = vrot.slane %v798_v60, %v239_v45  ;;  %v8979_v24 = vrot.slane %v798_v60, %v243_v41  ;;  %v8983_v41 = vld [vmem:[#allocation18] ss:$0 sm:$0xff] }
 0x216   :  { %10817 = vst [vmem:[#allocation187_spill] sm:$0xff] %v8979_v24  ;;  %v1205_v61 = vadd.f32 %v966_v54, %v8977_v22 }
 0x21d   :  { %v7705_v49 = vpop.eup %7704 }
 0x21e   :  { %v1199_v0 = vmul.f32 %v7705_v49, %v1184_v4 }
 0x220   :  { %v1200_v20 = vadd.f32 %v1199_v0, %v432_v16 }
 0x222   :  { %7706 = vtanh.f32 %v1200_v20 }
 0x223   :  { %7708 = vrcp.f32 %v1194_v14 }
 0x22c   :  { %v7707_v59 = vpop.eup %7706 }
 0x22d   :  { %v1202_v10 = vsub.f32 %v8633_v58, %v7707_v59  ;;  %v7709_v55 = vpop.eup %7708 }
 0x22f   :  { %v1203_v42 = vmul.f32 %v7709_v55, %v1202_v10  ;;  %v8985_v55 = vld [vmem:[#allocation16] ss:$0 sm:$0xff] }
 0x231   :  { %v8975_v34 = vadd.f32 %v7707_v59, %v1203_v42 }
 0x241   :  { %v1035_v33 = vpop.f32.mrb[16].mxu0 }
 0x242   :  { %v1206_v1 = vadd.f32 %v1035_v33, %v8979_v24  ;;  %v1106_v16 = vpop.f32.mrb[10].mxu1  ;;  %v1037_v0 = vpop.f32.mrb[17].mxu0 }
 0x243   :  { %v1209_v14 = vadd.f32 %v1205_v61, %v1106_v16  ;;  %v1108_v56 = vpop.f32.mrb[11].mxu1  ;;  %v1207_v33 = vadd.f32 %v8985_v55, %v1037_v0  ;;  %v10818_v0 = vld [vmem:[#allocation99_spill] sm:$0xff] }
 0x244   :  { %v1210_v4 = vadd.f32 %v1206_v1, %v1108_v56 }
 0x245   :  { %v4562_v58 = vmul.f32 -1.442695, %v1209_v14 }
 0x246   :  { %v4563_v20 = vmul.f32 -1.442695, %v1210_v4  ;;  %v7870_v4 = vld [vmem:[#allocation7 + $0x8] sm:$0xff] }
 0x247   :  { %7710 = vpow2.f32 %v4562_v58 }
 0x248   :  { %7712 = vpow2.f32 %v4563_v20 }
 0x251   :  { %v7711_v49 = vpop.eup %7710 }
 0x252   :  { %v1217_v59 = vadd.f32 1.0, %v7711_v49  ;;  %v7713_v42 = vpop.eup %7712 }
 0x253   :  { %v1218_v16 = vadd.f32 1.0, %v7713_v42  ;;  %v10820_v42 = vld [vmem:[#allocation101_spill] sm:$0xff] }
 0x254   :  { %7714 = vrcp.f32 %v1217_v59 }
 0x25e   :  { %v7715_v61 = vpop.eup %7714 }
 0x261   :  { %v4651_v45 = vpop.f32.mrb[18].mxu0 }
 0x262   :  { %v4652_v10 = vpop.f32.mrb[19].mxu0 }
 0x263   :  { %v4653_v54 = vadd.f32 %v4652_v10, %v4651_v45 }
 0x265   :  { %v1208_v60 = vadd.f32 %v4653_v54, %v8983_v41  ;;  %v10819_v54 = vld [vmem:[#allocation100_spill] sm:$0xff] }
 0x267   :  { %v1223_v1 = vmul.f32 %v7715_v61, %v1208_v60  ;;  %v10821_v60 = vld [vmem:[#allocation102_spill] sm:$0xff]  ;;  %v10822_v61 = vld [vmem:[#allocation103_spill] sm:$0xff] }
 0x269   :  { %v1224_v14 = vadd.f32 %v1223_v1, %v1207_v33  ;;  %v10823_v33 = vld [vmem:[#allocation104_spill] sm:$0xff]  ;;  %v10824_v1 = vld [vmem:[#allocation105_spill] sm:$0xff] }
 0x26b   :  { %7716 = vtanh.f32 %v1224_v14  ;;  %v10826_v14 = vld [vmem:[#allocation107_spill] sm:$0xff] }
 0x26c   :  { %7718 = vrcp.f32 %v1218_v16  ;;  %v10825_v16 = vld [vmem:[#allocation106_spill] sm:$0xff] }
 0x275   :  { %v7717_v56 = vpop.eup %7716 }
 0x276   :  { %v1226_v58 = vsub.f32 %v7870_v4, %v7717_v56  ;;  %v7719_v49 = vpop.eup %7718 }
 0x278   :  { %v1227_v20 = vmul.f32 %v7719_v49, %v1226_v58  ;;  %v10829_v58 = vld [vmem:[#allocation110_spill] sm:$0xff]  ;;  %v10830_v49 = vld [vmem:[#allocation111_spill] sm:$0xff] }
 0x27a   :  { %v1228_v59 = vadd.f32 %v7717_v56, %v1227_v20  ;;  %v10827_v56 = vld [vmem:[#allocation108_spill] sm:$0xff] }
 0x27b   :  { %v10831_v20 = vld [vmem:[#allocation112_spill] sm:$0xff] }
 0x27c   :  { %v1232_v45 = vsub.f32 %v1228_v59, %v7870_v4  ;;  %v10832_v59 = vld [vmem:[#allocation113_spill] sm:$0xff] }
 0x27e   :  { %v1234_v10 = vmul.f32 0.0, %v1232_v45  ;;  %v10833_v45 = vld [vmem:[#allocation114_spill] sm:$0xff] }
 0x280   :  { %v8989_v24 = vadd.f32 %v7870_v4, %v1234_v10  ;;  %v10828_v4 = vld [vmem:[#allocation109_spill] sm:$0xff]  ;;  %v10834_v10 = vld [vmem:[#allocation115_spill] sm:$0xff] }
 0x282   :  { %1301 = vmatprep.mubr.f32.mxu0 %v8989_v24  ;;  %1372 = vmatprep.mubr.f32.mxu1 %v8989_v24 }
 0x283   :  { %1302 = vmatmul.mubr.f32.vlgmr.msra.gmra.mrb[2].mxu0 %v8975_v34  ;;  %1373 = vmatmul.mubr.f32.vlgmr.msra.gmra.mrb[12].mxu1 %v8975_v34 }
 0x284   :  { %5513 = vmatpush1.bf16.msra.mxu1 %v10818_v0  ;;  %5577 = vmatpush1.bf16.msra.mxu0 %v10819_v54 }
 0x285   :  { %1443 = vmatprep.mubr.f32.mxu1 %v8989_v24  ;;  %1514 = vmatprep.mubr.f32.mxu0 %v8989_v24 }
 0x286   :  { %5515 = vmatprep.subr.bf16.mxu1 %v10820_v42  ;;  %5579 = vmatprep.subr.bf16.mxu0 %v10821_v60 }
 0x288   :  { %5517 = vmatpush1.bf16.msra.mxu1 %v10822_v61  ;;  %5581 = vmatpush1.bf16.msra.mxu0 %v10823_v33 }
 0x289   :  { %5519 = vmatprep.subr.bf16.mxu1 %v10824_v1  ;;  %5583 = vmatprep.subr.bf16.mxu0 %v10825_v16  ;;  %v10835_v1 = vld [vmem:[#allocation116_spill] sm:$0xff]  ;;  %v10836_v16 = vld [vmem:[#allocation117_spill] sm:$0xff] }
 0x28c   :  { %5521 = vmatpush1.bf16.msra.mxu1 %v10826_v14  ;;  %5585 = vmatpush1.bf16.msra.mxu0 %v10827_v56  ;;  %v10837_v14 = vld [vmem:[#allocation118_spill] sm:$0xff]  ;;  %v10838_v56 = vld [vmem:[#allocation119_spill] sm:$0xff] }
 0x28d   :  { %5523 = vmatprep.subr.bf16.mxu1 %v10828_v4  ;;  %5587 = vmatprep.subr.bf16.mxu0 %v10829_v58  ;;  %v10839_v4 = vld [vmem:[#allocation120_spill] sm:$0xff]  ;;  %v10840_v58 = vld [vmem:[#allocation121_spill] sm:$0xff] }
 0x290   :  { %5525 = vmatpush1.bf16.msra.mxu1 %v10830_v49  ;;  %5589 = vmatpush1.bf16.msra.mxu0 %v10831_v20  ;;  %v10841_v49 = vld [vmem:[#allocation122_spill] sm:$0xff]  ;;  %v10842_v20 = vld [vmem:[#allocation123_spill] sm:$0xff] }
 0x291   :  { %5527 = vmatprep.subr.bf16.mxu1 %v10832_v59  ;;  %5591 = vmatprep.subr.bf16.mxu0 %v10833_v45  ;;  %v10843_v59 = vld [vmem:[#allocation124_spill] sm:$0xff]  ;;  %v10844_v45 = vld [vmem:[#allocation125_spill] sm:$0xff] }
 0x294   :  { %5529 = vmatpush1.bf16.msra.mxu1 %v10834_v10  ;;  %5593 = vmatpush1.bf16.msra.mxu0 %v10835_v1  ;;  %v10845_v10 = vld [vmem:[#allocation126_spill] sm:$0xff]  ;;  %v10846_v1 = vld [vmem:[#allocation127_spill] sm:$0xff] }
 0x295   :  { %5531 = vmatprep.subr.bf16.mxu1 %v10836_v16  ;;  %5595 = vmatprep.subr.bf16.mxu0 %v10837_v14  ;;  %v10847_v16 = vld [vmem:[#allocation128_spill] sm:$0xff]  ;;  %v10848_v14 = vld [vmem:[#allocation129_spill] sm:$0xff] }
 0x298   :  { %5533 = vmatpush1.bf16.msra.mxu1 %v10838_v56  ;;  %5597 = vmatpush1.bf16.msra.mxu0 %v10839_v4  ;;  %v10849_v56 = vld [vmem:[#allocation130_spill] sm:$0xff]  ;;  %v10850_v4 = vld [vmem:[#allocation131_spill] sm:$0xff] }
 0x299   :  { %5535 = vmatprep.subr.bf16.mxu1 %v10840_v58  ;;  %5599 = vmatprep.subr.bf16.mxu0 %v10841_v49  ;;  %v10851_v58 = vld [vmem:[#allocation132_spill] sm:$0xff]  ;;  %v10852_v49 = vld [vmem:[#allocation133_spill] sm:$0xff] }
 0x29c   :  { %5537 = vmatpush1.bf16.msra.mxu1 %v10842_v20  ;;  %5601 = vmatpush1.bf16.msra.mxu0 %v10843_v59  ;;  %v10853_v20 = vld [vmem:[#allocation134_spill] sm:$0xff]  ;;  %v10854_v59 = vld [vmem:[#allocation135_spill] sm:$0xff] }
 0x29d   :  { %5539 = vmatprep.subr.bf16.mxu1 %v10844_v45  ;;  %5603 = vmatprep.subr.bf16.mxu0 %v10845_v10  ;;  %v10855_v45 = vld [vmem:[#allocation136_spill] sm:$0xff]  ;;  %v10856_v10 = vld [vmem:[#allocation137_spill] sm:$0xff] }
 0x2a0   :  { %5541 = vmatpush1.bf16.msra.mxu1 %v10846_v1  ;;  %5605 = vmatpush1.bf16.msra.mxu0 %v10847_v16  ;;  %v10857_v1 = vld [vmem:[#allocation138_spill] sm:$0xff]  ;;  %v10858_v16 = vld [vmem:[#allocation139_spill] sm:$0xff] }
 0x2a1   :  { %5543 = vmatprep.subr.bf16.mxu1 %v10848_v14  ;;  %5607 = vmatprep.subr.bf16.mxu0 %v10849_v56  ;;  %v10859_v14 = vld [vmem:[#allocation140_spill] sm:$0xff]  ;;  %v10860_v56 = vld [vmem:[#allocation141_spill] sm:$0xff] }
 0x2a4   :  { %5545 = vmatpush1.bf16.msra.mxu1 %v10850_v4  ;;  %5609 = vmatpush1.bf16.msra.mxu0 %v10851_v58  ;;  %v10861_v4 = vld [vmem:[#allocation142_spill] sm:$0xff]  ;;  %v10862_v58 = vld [vmem:[#allocation143_spill] sm:$0xff] }
 0x2a5   :  { %5547 = vmatprep.subr.bf16.mxu1 %v10852_v49  ;;  %5611 = vmatprep.subr.bf16.mxu0 %v10853_v20  ;;  %v10863_v49 = vld [vmem:[#allocation144_spill] sm:$0xff]  ;;  %v10864_v20 = vld [vmem:[#allocation145_spill] sm:$0xff] }
 0x2a8   :  { %5549 = vmatpush1.bf16.msra.mxu1 %v10854_v59  ;;  %5613 = vmatpush1.bf16.msra.mxu0 %v10855_v45  ;;  %v10865_v59 = vld [vmem:[#allocation146_spill] sm:$0xff]  ;;  %v10866_v45 = vld [vmem:[#allocation147_spill] sm:$0xff] }
 0x2a9   :  { %5551 = vmatprep.subr.bf16.mxu1 %v10856_v10  ;;  %5615 = vmatprep.subr.bf16.mxu0 %v10857_v1  ;;  %v10867_v10 = vld [vmem:[#allocation148_spill] sm:$0xff]  ;;  %v10868_v1 = vld [vmem:[#allocation149_spill] sm:$0xff] }
 0x2ac   :  { %5553 = vmatpush1.bf16.msra.mxu1 %v10858_v16  ;;  %5617 = vmatpush1.bf16.msra.mxu0 %v10859_v14  ;;  %v10869_v16 = vld [vmem:[#allocation150_spill] sm:$0xff]  ;;  %v10870_v14 = vld [vmem:[#allocation151_spill] sm:$0xff] }
 0x2ad   :  { %5555 = vmatprep.subr.bf16.mxu1 %v10860_v56  ;;  %5619 = vmatprep.subr.bf16.mxu0 %v10861_v4 }
 0x2b0   :  { %5557 = vmatpush1.bf16.msra.mxu1 %v10862_v58  ;;  %5621 = vmatpush1.bf16.msra.mxu0 %v10863_v49 }
 0x2b1   :  { %5559 = vmatprep.subr.bf16.mxu1 %v10864_v20  ;;  %5623 = vmatprep.subr.bf16.mxu0 %v10865_v59 }
 0x2b4   :  { %5561 = vmatpush1.bf16.msra.mxu1 %v10866_v45  ;;  %5625 = vmatpush1.bf16.msra.mxu0 %v10867_v10 }
 0x2b5   :  { %5563 = vmatprep.subr.bf16.mxu1 %v10868_v1  ;;  %5627 = vmatprep.subr.bf16.mxu0 %v10869_v16  ;;  %v10871_v16 = vld [vmem:[#allocation161_spill] sm:$0xff] }
 0x2b8   :  { %5565 = vmatpush1.bf16.msra.mxu1 %v10870_v14  ;;  %5629 = vmatpush1.bf16.msra.mxu0 %v8799_v30 }
 0x2b9   :  { %5567 = vmatprep.subr.bf16.mxu1 %v8801_v23  ;;  %5631 = vmatprep.subr.bf16.mxu0 %v8804_v57 }
 0x2bc   :  { %5569 = vmatpush1.bf16.msra.mxu1 %v8807_v37  ;;  %5633 = vmatpush1.bf16.msra.mxu0 %v8811_v8  ;;  %v10872_v8 = vld [vmem:[#allocation163_spill] sm:$0xff] }
 0x2bd   :  { %5571 = vmatprep.subr.bf16.mxu1 %v8813_v11  ;;  %5635 = vmatprep.subr.bf16.mxu0 %v8816_v9 }
 0x2c0   :  { %5573 = vmatpush1.bf16.msra.mxu1 %v8819_v47  ;;  %5637 = vmatpush1.bf16.msra.mxu0 %v8823_v48 }
 0x2c1   :  { %5639 = vmatprep.subr.bf16.mxu1 %v10871_v16  ;;  %5671 = vmatprep.subr.bf16.mxu0 %v8426_v15  ;;  %v10893_v15 = vld [vmem:[#allocation56_spill] sm:$0xff] }
 0x2c3   :  { %1444 = vmatmul.mubr.f32.vlgmr.msra.gmra.mrb[14].mxu1 %v8975_v34  ;;  %1515 = vmatmul.mubr.f32.vlgmr.msra.gmra.mrb[20].mxu0 %v8975_v34 }
 0x2c4   :  { %5641 = vmatpush3.bf16.msra.mxu1 %v8829_v12  ;;  %1585 = vmatprep.mubr.f32.mxu1 %v8989_v24 }
 0x2c5   :  { %5643 = vmatprep.subr.bf16.mxu1 %v10872_v8  ;;  %5673 = vmatpush1.bf16.msra.mxu0 %v8430_v26  ;;  %v10892_v26 = vld [vmem:[#allocation85_spill] sm:$0xff] }
 0x2c6   :  { %5675 = vmatprep.subr.bf16.mxu0 %v8435_v28  ;;  %v10889_v28 = vld [vmem:[#allocation52_spill] sm:$0xff] }
 0x2c8   :  { %5645 = vmatpush3.bf16.msra.mxu1 %v8839_v29 }
 0x2c9   :  { %5647 = vmatprep.subr.bf16.mxu1 %v8842_v46  ;;  %5677 = vmatpush1.bf16.msra.mxu0 %v8442_v38  ;;  %v10888_v38 = vld [vmem:[#allocation81_spill] sm:$0xff] }
 0x2ca   :  { %5679 = vmatprep.subr.bf16.mxu0 %v8448_v40  ;;  %v10885_v40 = vld [vmem:[#allocation48_spill] sm:$0xff] }
 0x2cc   :  { %5649 = vmatpush3.bf16.msra.mxu1 %v8848_v19 }
 0x2cd   :  { %5651 = vmatprep.subr.bf16.mxu1 %v8851_v53  ;;  %5681 = vmatpush1.bf16.msra.mxu0 %v8455_v50  ;;  %v10884_v50 = vld [vmem:[#allocation77_spill] sm:$0xff] }
 0x2ce   :  { %5683 = vmatprep.subr.bf16.mxu0 %v8462_v52  ;;  %v10883_v52 = vld [vmem:[#allocation75_spill] sm:$0xff] }
 0x2d0   :  { %5653 = vmatpush3.bf16.msra.mxu1 %v8856_v18 }
 0x2d1   :  { %5655 = vmatprep.subr.bf16.mxu1 %v8859_v62  ;;  %5685 = vmatpush1.bf16.msra.mxu0 %v8468_v63  ;;  %v10880_v63 = vld [vmem:[#allocation73_spill] sm:$0xff] }
 0x2d2   :  { %5687 = vmatprep.subr.bf16.mxu0 %v8474_v3  ;;  %v10879_v3 = vld [vmem:[#allocation71_spill] sm:$0xff] }
 0x2d4   :  { %5657 = vmatpush3.bf16.msra.mxu1 %v8864_v39 }
 0x2d5   :  { %5659 = vmatprep.subr.bf16.mxu1 %v8867_v5  ;;  %5689 = vmatpush1.bf16.msra.mxu0 %v8481_v13  ;;  %v10873_v13 = vld [vmem:[#allocation34_spill] sm:$0xff] }
 0x2d6   :  { %5691 = vmatprep.subr.bf16.mxu0 %v8487_v17  ;;  %v10876_v17 = vld [vmem:[#allocation69_spill] sm:$0xff] }
 0x2d8   :  { %5661 = vmatpush3.bf16.msra.mxu1 %v8872_v51  ;;  %v10921_v51 = vld [vmem:[#allocation184_spill] sm:$0xff] }
 0x2d9   :  { %5663 = vmatprep.subr.bf16.mxu1 %v8875_v32  ;;  %5693 = vmatpush1.bf16.msra.mxu0 %v8494_v31  ;;  %v10875_v31 = vld [vmem:[#allocation67_spill] sm:$0xff]  ;;  %v10901_v32 = vld [vmem:[#allocation64_spill] sm:$0xff] }
 0x2da   :  { %5695 = vmatprep.subr.bf16.mxu0 %v8500_v35  ;;  %v10874_v35 = vld [vmem:[#allocation38_spill] sm:$0xff] }
 0x2dc   :  { %5665 = vmatpush3.bf16.msra.mxu1 %v8880_v2  ;;  %v10900_v2 = vld [vmem:[#allocation93_spill] sm:$0xff] }
 0x2dd   :  { %5667 = vmatprep.subr.bf16.mxu1 %v8883_v44  ;;  %5697 = vmatpush1.bf16.msra.mxu0 %v10783_v7  ;;  %v10877_v7 = vld [vmem:[#allocation40_spill] sm:$0xff] }
 0x2de   :  { %5699 = vmatprep.subr.bf16.mxu0 %v10784_v36  ;;  %v10878_v36 = vld [vmem:[#allocation42_spill] sm:$0xff]  ;;  %v10897_v44 = vld [vmem:[#allocation60_spill] sm:$0xff] }
 0x2e0   :  { %5669 = vmatpush3.bf16.msra.mxu1 %v8888_v21  ;;  %v10896_v21 = vld [vmem:[#allocation89_spill] sm:$0xff] }
 0x2e1   :  { %5735 = vmatprep.subr.bf16.mxu1 %v10873_v13  ;;  %5701 = vmatpush1.bf16.msra.mxu0 %v10787_v6  ;;  %v10881_v6 = vld [vmem:[#allocation44_spill] sm:$0xff] }
 0x2e2   :  { %5703 = vmatprep.subr.bf16.mxu0 %v10788_v25  ;;  %v10882_v25 = vld [vmem:[#allocation46_spill] sm:$0xff] }
 0x2e3   :  { %1586 = vmatmul.mubr.f32.vlgmr.msra.gmra.mrb[16].mxu1 %v8975_v34 }
 0x2e4   :  { %5737 = vmatpush1.bf16.msra.mxu1 %v8433_v27 }
 0x2e5   :  { %5739 = vmatprep.subr.bf16.mxu1 %v10874_v35  ;;  %5705 = vmatpush1.bf16.msra.mxu0 %v10875_v31  ;;  %v10886_v31 = vld [vmem:[#allocation50_spill] sm:$0xff] }
 0x2e6   :  { %5707 = vmatprep.subr.bf16.mxu0 %v10876_v17  ;;  %v10887_v17 = vld [vmem:[#allocation79_spill] sm:$0xff] }
 0x2e8   :  { %5741 = vmatpush1.bf16.msra.mxu1 %v10877_v7 }
 0x2e9   :  { %5743 = vmatprep.subr.bf16.mxu1 %v10878_v36  ;;  %5709 = vmatpush1.bf16.msra.mxu0 %v10879_v3  ;;  %v10890_v3 = vld [vmem:[#allocation54_spill] sm:$0xff] }
 0x2ea   :  { %5711 = vmatprep.subr.bf16.mxu0 %v10880_v63  ;;  %v10891_v63 = vld [vmem:[#allocation83_spill] sm:$0xff] }
 0x2ec   :  { %5745 = vmatpush1.bf16.msra.mxu1 %v10881_v6 }
 0x2ed   :  { %5747 = vmatprep.subr.bf16.mxu1 %v10882_v25  ;;  %5713 = vmatpush1.bf16.msra.mxu0 %v10883_v52  ;;  %v10894_v52 = vld [vmem:[#allocation58_spill] sm:$0xff] }
 0x2ee   :  { %5715 = vmatprep.subr.bf16.mxu0 %v10884_v50  ;;  %v10895_v50 = vld [vmem:[#allocation87_spill] sm:$0xff] }
 0x2f0   :  { %5749 = vmatpush1.bf16.msra.mxu1 %v10885_v40 }
 0x2f1   :  { %5751 = vmatprep.subr.bf16.mxu1 %v10886_v31  ;;  %5717 = vmatpush1.bf16.msra.mxu0 %v10887_v17  ;;  %v10898_v17 = vld [vmem:[#allocation62_spill] sm:$0xff]  ;;  %v10923_v31 = vld [vmem:[#allocation177_spill] sm:$0xff] }
 0x2f2   :  { %5719 = vmatprep.subr.bf16.mxu0 %v10888_v38  ;;  %v10899_v38 = vld [vmem:[#allocation91_spill] sm:$0xff] }
 0x2f4   :  { %5753 = vmatpush1.bf16.msra.mxu1 %v10889_v28 }
 0x2f5   :  { %5755 = vmatprep.subr.bf16.mxu1 %v10890_v3  ;;  %5721 = vmatpush1.bf16.msra.mxu0 %v10891_v63  ;;  %v10902_v63 = vld [vmem:[#allocation66_spill] sm:$0xff] }
 0x2f6   :  { %5723 = vmatprep.subr.bf16.mxu0 %v10892_v26  ;;  %v10903_v26 = vld [vmem:[#allocation95_spill] sm:$0xff] }
 0x2f8   :  { %5757 = vmatpush1.bf16.msra.mxu1 %v10893_v15  ;;  %v10904_v15 = vld [vmem:[#allocation97_spill] sm:$0xff] }
 0x2f9   :  { %5759 = vmatprep.subr.bf16.mxu1 %v10894_v52  ;;  %5725 = vmatpush1.bf16.msra.mxu0 %v10895_v50  ;;  %v10905_v52 = vld [vmem:[#allocation68_spill] sm:$0xff]  ;;  %v10906_v50 = vld [vmem:[#allocation70_spill] sm:$0xff] }
 0x2fa   :  { %5727 = vmatprep.subr.bf16.mxu0 %v10896_v21  ;;  %v10907_v21 = vld [vmem:[#allocation72_spill] sm:$0xff] }
 0x2fc   :  { %5761 = vmatpush1.bf16.msra.mxu1 %v10897_v44  ;;  %v10908_v44 = vld [vmem:[#allocation74_spill] sm:$0xff] }
 0x2fd   :  { %5763 = vmatprep.subr.bf16.mxu1 %v10898_v17  ;;  %5729 = vmatpush1.bf16.msra.mxu0 %v10899_v38  ;;  %v10909_v17 = vld [vmem:[#allocation76_spill] sm:$0xff]  ;;  %v10910_v38 = vld [vmem:[#allocation78_spill] sm:$0xff] }
 0x2fe   :  { %5731 = vmatprep.subr.bf16.mxu0 %v10900_v2  ;;  %v10911_v2 = vld [vmem:[#allocation80_spill] sm:$0xff] }
 0x300   :  { %5765 = vmatpush1.bf16.msra.mxu1 %v10901_v32  ;;  %v10912_v32 = vld [vmem:[#allocation82_spill] sm:$0xff] }
 0x301   :  { %5767 = vmatprep.subr.bf16.mxu1 %v10902_v63  ;;  %5733 = vmatpush1.bf16.msra.mxu0 %v10903_v26  ;;  %v10913_v63 = vld [vmem:[#allocation84_spill] sm:$0xff]  ;;  %v10914_v26 = vld [vmem:[#allocation86_spill] sm:$0xff] }
 0x302   :  { %5799 = vmatprep.subr.bf16.mxu0 %v10904_v15  ;;  %v10915_v15 = vld [vmem:[#allocation88_spill] sm:$0xff] }
 0x304   :  { %5769 = vmatpush1.bf16.msra.mxu1 %v10905_v52  ;;  %v10916_v52 = vld [vmem:[#allocation90_spill] sm:$0xff] }
 0x305   :  { %5771 = vmatprep.subr.bf16.mxu1 %v10906_v50  ;;  %v10917_v50 = vld [vmem:[#allocation92_spill] sm:$0xff] }
 0x308   :  { %5773 = vmatpush1.bf16.msra.mxu1 %v10907_v21  ;;  %v10918_v21 = vld [vmem:[#allocation94_spill] sm:$0xff] }
 0x309   :  { %5775 = vmatprep.subr.bf16.mxu1 %v10908_v44  ;;  %v10919_v44 = vld [vmem:[#allocation96_spill] sm:$0xff] }
 0x30c   :  { %5777 = vmatpush1.bf16.msra.mxu1 %v10909_v17  ;;  %v10920_v17 = vld [vmem:[#allocation98_spill] sm:$0xff] }
 0x30d   :  { %5779 = vmatprep.subr.bf16.mxu1 %v10910_v38 }
 0x310   :  { %5781 = vmatpush1.bf16.msra.mxu1 %v10911_v2 }
 0x311   :  { %5783 = vmatprep.subr.bf16.mxu1 %v10912_v32 }
 0x314   :  { %5785 = vmatpush1.bf16.msra.mxu1 %v10913_v63 }
 0x315   :  { %5787 = vmatprep.subr.bf16.mxu1 %v10914_v26  ;;  %v10922_v26 = vld [vmem:[#allocation185_spill] sm:$0xff] }
 0x318   :  { %5789 = vmatpush1.bf16.msra.mxu1 %v10915_v15 }
 0x319   :  { %5791 = vmatprep.subr.bf16.mxu1 %v10916_v52 }
 0x31c   :  { %5793 = vmatpush1.bf16.msra.mxu1 %v10917_v50 }
 0x31d   :  { %5795 = vmatprep.subr.bf16.mxu1 %v10918_v21 }
 0x320   :  { %5797 = vmatpush1.bf16.msra.mxu1 %v10919_v44 }
 0x321   :  { %5863 = vmatprep.subr.bf16.mxu1 %v10920_v17 }
 0x356   :  { %v1303_v38 = vpop.f32.mrb[2].mxu0  ;;  %v1374_v2 = vpop.f32.mrb[12].mxu1 }
 0x357   :  { %v7648_v32 = vadd.f32 %v1303_v38, %v10921_v51  ;;  %v1305_v3 = vpop.f32.mrb[3].mxu0  ;;  %v1376_v63 = vpop.f32.mrb[13].mxu1  ;;  %v1595_v44 = vadd.f32 %v8971_v43, %v1374_v2 }
 0x358   :  { %v7649_v15 = vadd.f32 %v1305_v3, %v10922_v26  ;;  %v10924_v26 = vld [vmem:[#allocation187_spill] sm:$0xff] }
 0x359   :  { %v4564_v28 = vmul.f32 -1.442695, %v7648_v32 }
 0x35a   :  { %v4565_v5 = vmul.f32 -1.442695, %v7649_v15 }
 0x35b   :  { %7720 = vpow2.f32 %v4564_v28 }
 0x35c   :  { %7722 = vpow2.f32 %v4565_v5 }
 0x365   :  { %v7721_v52 = vpop.eup %7720 }
 0x366   :  { %v1604_v39 = vadd.f32 1.0, %v7721_v52  ;;  %v7723_v21 = vpop.eup %7722  ;;  %v1616_v52 = vadd.f32 %v1376_v63, %v8977_v22 }
 0x367   :  { %v1605_v62 = vadd.f32 1.0, %v7723_v21 }
 0x368   :  { %7724 = vrcp.f32 %v1604_v39 }
 0x372   :  { %v7725_v50 = vpop.eup %7724 }
 0x373   :  { %v1610_v17 = vmul.f32 %v7725_v50, %v1595_v44 }
 0x375   :  { %v1611_v40 = vadd.f32 %v1610_v17, %v10923_v31 }
 0x377   :  { %7726 = vtanh.f32 %v1611_v40 }
 0x378   :  { %7728 = vrcp.f32 %v1605_v62 }
 0x381   :  { %v7727_v38 = vpop.eup %7726 }
 0x382   :  { %v1613_v28 = vsub.f32 %v8975_v34, %v7727_v38  ;;  %v7729_v32 = vpop.eup %7728 }
 0x384   :  { %v1614_v3 = vmul.f32 %v7729_v32, %v1613_v28 }
 0x386   :  { %v9150_v15 = vadd.f32 %v7727_v38, %v1614_v3 }
 0x396   :  { %v1445_v39 = vpop.f32.mrb[14].mxu1  ;;  %v1516_v5 = vpop.f32.mrb[20].mxu0 }
 0x397   :  { %v1617_v2 = vadd.f32 %v1445_v39, %v10924_v26  ;;  %v1620_v43 = vadd.f32 %v1616_v52, %v1516_v5  ;;  %v1447_v50 = vpop.f32.mrb[15].mxu1  ;;  %v1518_v44 = vpop.f32.mrb[21].mxu0 }
 0x398   :  { %v1618_v39 = vadd.f32 %v8985_v55, %v1447_v50  ;;  %v10927_v50 = vld [vmem:[#allocation107_spill] sm:$0xff] }
 0x399   :  { %v1621_v17 = vadd.f32 %v1617_v2, %v1518_v44  ;;  %v4566_v31 = vmul.f32 -1.442695, %v1620_v43 }
 0x39b   :  { %7730 = vpow2.f32 %v4566_v31  ;;  %v4567_v62 = vmul.f32 -1.442695, %v1621_v17 }
 0x39d   :  { %7732 = vpow2.f32 %v4567_v62 }
 0x3a5   :  { %v7731_v40 = vpop.eup %7730 }
 0x3a6   :  { %v1628_v21 = vadd.f32 1.0, %v7731_v40 }
 0x3a7   :  { %v7733_v32 = vpop.eup %7732 }
 0x3a8   :  { %7734 = vrcp.f32 %v1628_v21  ;;  %v1629_v5 = vadd.f32 1.0, %v7733_v32  ;;  %v10928_v21 = vld [vmem:[#allocation108_spill] sm:$0xff] }
 0x3a9   :  { %v10932_v32 = vld [vmem:[#allocation112_spill] sm:$0xff] }
 0x3b2   :  { %v7735_v3 = vpop.eup %7734 }
 0x3b6   :  { %v4686_v34 = vpop.f32.mrb[16].mxu1 }
 0x3b7   :  { %v4687_v38 = vpop.f32.mrb[17].mxu1 }
 0x3b8   :  { %v4688_v28 = vadd.f32 %v4687_v38, %v4686_v34  ;;  %v10929_v34 = vld [vmem:[#allocation109_spill] sm:$0xff]  ;;  %v10930_v38 = vld [vmem:[#allocation110_spill] sm:$0xff] }
 0x3ba   :  { %v1619_v63 = vadd.f32 %v4688_v28, %v8983_v41  ;;  %v10931_v28 = vld [vmem:[#allocation111_spill] sm:$0xff] }
 0x3bc   :  { %v1634_v52 = vmul.f32 %v7735_v3, %v1619_v63  ;;  %v10933_v63 = vld [vmem:[#allocation113_spill] sm:$0xff]  ;;  %v10934_v3 = vld [vmem:[#allocation114_spill] sm:$0xff] }
 0x3be   :  { %v1635_v26 = vadd.f32 %v1634_v52, %v1618_v39  ;;  %v10935_v39 = vld [vmem:[#allocation115_spill] sm:$0xff]  ;;  %v10936_v52 = vld [vmem:[#allocation116_spill] sm:$0xff] }
 0x3c0   :  { %7736 = vtanh.f32 %v1635_v26  ;;  %v10925_v26 = vld [vmem:[#allocation105_spill] sm:$0xff] }
 0x3c1   :  { %7738 = vrcp.f32 %v1629_v5  ;;  %v10937_v5 = vld [vmem:[#allocation117_spill] sm:$0xff] }
 0x3ca   :  { %v7737_v43 = vpop.eup %7736 }
 0x3cb   :  { %v1637_v2 = vsub.f32 %v8989_v24, %v7737_v43  ;;  %v7739_v44 = vpop.eup %7738 }
 0x3cd   :  { %v1638_v17 = vmul.f32 %v7739_v44, %v1637_v2  ;;  %v10939_v2 = vld [vmem:[#allocation119_spill] sm:$0xff]  ;;  %v10940_v44 = vld [vmem:[#allocation120_spill] sm:$0xff] }
 0x3cf   :  { %v1639_v31 = vadd.f32 %v7737_v43, %v1638_v17  ;;  %v10938_v43 = vld [vmem:[#allocation118_spill] sm:$0xff]  ;;  %v10941_v17 = vld [vmem:[#allocation121_spill] sm:$0xff] }
 0x3d1   :  { %v1643_v40 = vsub.f32 %v1639_v31, %v8989_v24  ;;  %v10942_v31 = vld [vmem:[#allocation122_spill] sm:$0xff] }
 0x3d3   :  { %v9159_v62 = vadd.f32 %v1643_v40, %v8989_v24  ;;  %v10926_v24 = vld [vmem:[#allocation106_spill] sm:$0xff]  ;;  %v10943_v40 = vld [vmem:[#allocation123_spill] sm:$0xff] }
 0x3d5   :  { %1712 = vmatprep.mubr.f32.mxu0 %v9159_v62  ;;  %1783 = vmatprep.mubr.f32.mxu1 %v9159_v62 }
 0x3d6   :  { %1713 = vmatmul.mubr.f32.vlgmr.msra.gmra.mrb[4].mxu0 %v9150_v15  ;;  %1784 = vmatmul.mubr.f32.vlgmr.msra.gmra.mrb[18].mxu1 %v9150_v15 }
 0x3d7   :  { %5801 = vmatpush1.bf16.msra.mxu0 %v10818_v0  ;;  %5865 = vmatpush1.bf16.msra.mxu1 %v10819_v54 }
 0x3d8   :  { %1854 = vmatprep.mubr.f32.mxu0 %v9159_v62  ;;  %1925 = vmatprep.mubr.f32.mxu1 %v9159_v62 }
 0x3d9   :  { %5803 = vmatprep.subr.bf16.mxu0 %v10820_v42  ;;  %5867 = vmatprep.subr.bf16.mxu1 %v10821_v60 }
 0x3db   :  { %5805 = vmatpush1.bf16.msra.mxu0 %v10822_v61  ;;  %5869 = vmatpush1.bf16.msra.mxu1 %v10823_v33 }
 0x3dc   :  { %5807 = vmatprep.subr.bf16.mxu0 %v10925_v26  ;;  %5871 = vmatprep.subr.bf16.mxu1 %v10926_v24 }
 0x3df   :  { %5809 = vmatpush1.bf16.msra.mxu0 %v10927_v50  ;;  %5873 = vmatpush1.bf16.msra.mxu1 %v10928_v21 }
 0x3e0   :  { %5811 = vmatprep.subr.bf16.mxu0 %v10929_v34  ;;  %5875 = vmatprep.subr.bf16.mxu1 %v10930_v38 }
 0x3e3   :  { %5813 = vmatpush1.bf16.msra.mxu0 %v10931_v28  ;;  %5877 = vmatpush1.bf16.msra.mxu1 %v10932_v32 }
 0x3e4   :  { %5815 = vmatprep.subr.bf16.mxu0 %v10933_v63  ;;  %5879 = vmatprep.subr.bf16.mxu1 %v10934_v3  ;;  %v10944_v63 = vld [vmem:[#allocation124_spill] sm:$0xff]  ;;  %v10945_v3 = vld [vmem:[#allocation125_spill] sm:$0xff] }
 0x3e7   :  { %5817 = vmatpush1.bf16.msra.mxu0 %v10935_v39  ;;  %5881 = vmatpush1.bf16.msra.mxu1 %v10936_v52  ;;  %v10946_v39 = vld [vmem:[#allocation126_spill] sm:$0xff]  ;;  %v10947_v52 = vld [vmem:[#allocation127_spill] sm:$0xff] }
 0x3e8   :  { %5819 = vmatprep.subr.bf16.mxu0 %v10937_v5  ;;  %5883 = vmatprep.subr.bf16.mxu1 %v10938_v43  ;;  %v10948_v5 = vld [vmem:[#allocation128_spill] sm:$0xff]  ;;  %v10949_v43 = vld [vmem:[#allocation129_spill] sm:$0xff] }
 0x3eb   :  { %5821 = vmatpush1.bf16.msra.mxu0 %v10939_v2  ;;  %5885 = vmatpush1.bf16.msra.mxu1 %v10940_v44  ;;  %v10950_v2 = vld [vmem:[#allocation130_spill] sm:$0xff]  ;;  %v10951_v44 = vld [vmem:[#allocation131_spill] sm:$0xff] }
 0x3ec   :  { %5823 = vmatprep.subr.bf16.mxu0 %v10941_v17  ;;  %5887 = vmatprep.subr.bf16.mxu1 %v10942_v31  ;;  %v10952_v17 = vld [vmem:[#allocation132_spill] sm:$0xff]  ;;  %v10953_v31 = vld [vmem:[#allocation133_spill] sm:$0xff] }
 0x3ef   :  { %5825 = vmatpush1.bf16.msra.mxu0 %v10943_v40  ;;  %5889 = vmatpush1.bf16.msra.mxu1 %v10944_v63  ;;  %v10954_v40 = vld [vmem:[#allocation134_spill] sm:$0xff]  ;;  %v10955_v63 = vld [vmem:[#allocation135_spill] sm:$0xff] }
 0x3f0   :  { %5827 = vmatprep.subr.bf16.mxu0 %v10945_v3  ;;  %5891 = vmatprep.subr.bf16.mxu1 %v10946_v39  ;;  %v10956_v3 = vld [vmem:[#allocation136_spill] sm:$0xff]  ;;  %v10957_v39 = vld [vmem:[#allocation137_spill] sm:$0xff] }
 0x3f3   :  { %5829 = vmatpush1.bf16.msra.mxu0 %v10947_v52  ;;  %5893 = vmatpush1.bf16.msra.mxu1 %v10948_v5  ;;  %v10958_v52 = vld [vmem:[#allocation138_spill] sm:$0xff]  ;;  %v10959_v5 = vld [vmem:[#allocation139_spill] sm:$0xff] }
 0x3f4   :  { %5831 = vmatprep.subr.bf16.mxu0 %v10949_v43  ;;  %5895 = vmatprep.subr.bf16.mxu1 %v10950_v2  ;;  %v10960_v43 = vld [vmem:[#allocation140_spill] sm:$0xff] }
 0x3f7   :  { %5833 = vmatpush1.bf16.msra.mxu0 %v10951_v44  ;;  %5897 = vmatpush1.bf16.msra.mxu1 %v10952_v17 }
 0x3f8   :  { %5835 = vmatprep.subr.bf16.mxu0 %v10953_v31  ;;  %5899 = vmatprep.subr.bf16.mxu1 %v10954_v40 }
 0x3fb   :  { %5837 = vmatpush1.bf16.msra.mxu0 %v10955_v63  ;;  %5901 = vmatpush1.bf16.msra.mxu1 %v10956_v3 }
 0x3fc   :  { %5839 = vmatprep.subr.bf16.mxu0 %v10957_v39  ;;  %5903 = vmatprep.subr.bf16.mxu1 %v10958_v52 }
 0x3ff   :  { %5841 = vmatpush1.bf16.msra.mxu0 %v10959_v5  ;;  %5905 = vmatpush1.bf16.msra.mxu1 %v10960_v43  ;;  %v10961_v5 = vld [vmem:[#allocation150_spill] sm:$0xff] }
 0x400   :  { %5843 = vmatprep.subr.bf16.mxu0 %v10860_v56  ;;  %5907 = vmatprep.subr.bf16.mxu1 %v10861_v4 }
 0x403   :  { %5845 = vmatpush1.bf16.msra.mxu0 %v10862_v58  ;;  %5909 = vmatpush1.bf16.msra.mxu1 %v10863_v49 }
 0x404   :  { %5847 = vmatprep.subr.bf16.mxu0 %v10864_v20  ;;  %5911 = vmatprep.subr.bf16.mxu1 %v10865_v59  ;;  %v10962_v20 = vld [vmem:[#allocation156_spill] sm:$0xff] }
 0x407   :  { %5849 = vmatpush1.bf16.msra.mxu0 %v10866_v45  ;;  %5913 = vmatpush1.bf16.msra.mxu1 %v10867_v10 }
 0x408   :  { %5851 = vmatprep.subr.bf16.mxu0 %v10868_v1  ;;  %5915 = vmatprep.subr.bf16.mxu1 %v10961_v5 }
 0x40b   :  { %5853 = vmatpush1.bf16.msra.mxu0 %v10870_v14  ;;  %5917 = vmatpush1.bf16.msra.mxu1 %v8799_v30 }
 0x40c   :  { %5855 = vmatprep.subr.bf16.mxu0 %v8801_v23  ;;  %5919 = vmatprep.subr.bf16.mxu1 %v8804_v57 }
 0x40f   :  { %5857 = vmatpush1.bf16.msra.mxu0 %v8807_v37  ;;  %5921 = vmatpush1.bf16.msra.mxu1 %v10962_v20 }
 0x410   :  { %5859 = vmatprep.subr.bf16.mxu0 %v8813_v11  ;;  %5923 = vmatprep.subr.bf16.mxu1 %v8816_v9 }
 0x413   :  { %5861 = vmatpush1.bf16.msra.mxu0 %v8819_v47  ;;  %5925 = vmatpush1.bf16.msra.mxu1 %v8823_v48  ;;  %v11032_v47 = vld [vmem:[#allocation179_spill] sm:$0xff] }
 0x414   :  { %5927 = vmatprep.subr.bf16.mxu0 %v10871_v16  ;;  %6023 = vmatprep.subr.bf16.mxu1 %v10873_v13  ;;  %v10965_v13 = vld [vmem:[#allocation50_spill] sm:$0xff] }
 0x416   :  { %1855 = vmatmul.mubr.f32.vlgmr.msra.gmra.mrb[22].mxu0 %v9150_v15  ;;  %1926 = vmatmul.mubr.f32.vlgmr.msra.gmra.mrb[20].mxu1 %v9150_v15 }
 0x417   :  { %5929 = vmatpush3.bf16.msra.mxu0 %v8829_v12  ;;  %1996 = vmatprep.mubr.f32.mxu0 %v9159_v62 }
 0x418   :  { %5931 = vmatprep.subr.bf16.mxu0 %v10872_v8  ;;  %6025 = vmatpush1.bf16.msra.mxu1 %v8433_v27  ;;  %v10963_v27 = vld [vmem:[#allocation169_spill] sm:$0xff] }
 0x419   :  { %6027 = vmatprep.subr.bf16.mxu1 %v10874_v35  ;;  %v10964_v35 = vld [vmem:[#allocation48_spill] sm:$0xff] }
 0x41b   :  { %5933 = vmatpush3.bf16.msra.mxu0 %v8839_v29  ;;  %v10992_v29 = vld [vmem:[#allocation76_spill] sm:$0xff] }
 0x41c   :  { %5935 = vmatprep.subr.bf16.mxu0 %v8842_v46  ;;  %6029 = vmatpush1.bf16.msra.mxu1 %v10877_v7  ;;  %v10966_v46 = vld [vmem:[#allocation170_spill] sm:$0xff]  ;;  %v10967_v7 = vld [vmem:[#allocation171_spill] sm:$0xff] }
 0x41d   :  { %6031 = vmatprep.subr.bf16.mxu1 %v10878_v36  ;;  %v10968_v36 = vld [vmem:[#allocation52_spill] sm:$0xff] }
 0x41f   :  { %5937 = vmatpush3.bf16.msra.mxu0 %v8848_v19  ;;  %v10969_v19 = vld [vmem:[#allocation54_spill] sm:$0xff] }
 0x420   :  { %5939 = vmatprep.subr.bf16.mxu0 %v8851_v53  ;;  %6033 = vmatpush1.bf16.msra.mxu1 %v10881_v6  ;;  %v10970_v53 = vld [vmem:[#allocation172_spill] sm:$0xff]  ;;  %v10971_v6 = vld [vmem:[#allocation173_spill] sm:$0xff] }
 0x421   :  { %6035 = vmatprep.subr.bf16.mxu1 %v10882_v25  ;;  %v10972_v25 = vld [vmem:[#allocation56_spill] sm:$0xff] }
 0x423   :  { %5941 = vmatpush3.bf16.msra.mxu0 %v8856_v18  ;;  %v10973_v18 = vld [vmem:[#allocation58_spill] sm:$0xff] }
 0x424   :  { %5943 = vmatprep.subr.bf16.mxu0 %v10963_v27  ;;  %6037 = vmatpush1.bf16.msra.mxu1 %v10964_v35  ;;  %v10974_v27 = vld [vmem:[#allocation174_spill] sm:$0xff]  ;;  %v10975_v35 = vld [vmem:[#allocation175_spill] sm:$0xff] }
 0x425   :  { %6039 = vmatprep.subr.bf16.mxu1 %v10965_v13  ;;  %v10976_v13 = vld [vmem:[#allocation60_spill] sm:$0xff] }
 0x427   :  { %5945 = vmatpush3.bf16.msra.mxu0 %v10966_v46  ;;  %v10977_v46 = vld [vmem:[#allocation62_spill] sm:$0xff] }
 0x428   :  { %5947 = vmatprep.subr.bf16.mxu0 %v10967_v7  ;;  %6041 = vmatpush1.bf16.msra.mxu1 %v10968_v36  ;;  %v10978_v7 = vld [vmem:[#allocation176_spill] sm:$0xff]  ;;  %v10979_v36 = vld [vmem:[#allocation33_spill] sm:$0xff] }
 0x429   :  { %6043 = vmatprep.subr.bf16.mxu1 %v10969_v19  ;;  %v10980_v19 = vld [vmem:[#allocation64_spill] sm:$0xff] }
 0x42b   :  { %5949 = vmatpush3.bf16.msra.mxu0 %v10970_v53  ;;  %v10981_v53 = vld [vmem:[#allocation66_spill] sm:$0xff] }
 0x42c   :  { %5951 = vmatprep.subr.bf16.mxu0 %v10971_v6  ;;  %6045 = vmatpush1.bf16.msra.mxu1 %v10972_v25  ;;  %v10982_v25 = vld [vmem:[#allocation35_spill] sm:$0xff]  ;;  %v10989_v6 = vld [vmem:[#allocation74_spill] sm:$0xff] }
 0x42d   :  { %6047 = vmatprep.subr.bf16.mxu1 %v10973_v18  ;;  %v10983_v18 = vld [vmem:[#allocation37_spill] sm:$0xff] }
 0x42f   :  { %5953 = vmatpush3.bf16.msra.mxu0 %v10974_v27  ;;  %v10984_v27 = vld [vmem:[#allocation68_spill] sm:$0xff] }
 0x430   :  { %5955 = vmatprep.subr.bf16.mxu0 %v10975_v35  ;;  %6049 = vmatpush1.bf16.msra.mxu1 %v10976_v13  ;;  %v10985_v35 = vld [vmem:[#allocation70_spill] sm:$0xff]  ;;  %v10986_v13 = vld [vmem:[#allocation39_spill] sm:$0xff] }
 0x431   :  { %6051 = vmatprep.subr.bf16.mxu1 %v10977_v46  ;;  %v10987_v46 = vld [vmem:[#allocation41_spill] sm:$0xff] }
 0x433   :  { %5957 = vmatpush3.bf16.msra.mxu0 %v10978_v7  ;;  %v10988_v7 = vld [vmem:[#allocation72_spill] sm:$0xff] }
 0x434   :  { %5959 = vmatprep.subr.bf16.mxu0 %v10979_v36  ;;  %6053 = vmatpush1.bf16.msra.mxu1 %v10980_v19  ;;  %v10990_v19 = vld [vmem:[#allocation43_spill] sm:$0xff] }
 0x435   :  { %6055 = vmatprep.subr.bf16.mxu1 %v10981_v53  ;;  %v10991_v53 = vld [vmem:[#allocation45_spill] sm:$0xff] }
 0x436   :  { %1997 = vmatmul.mubr.f32.vlgmr.msra.gmra.mrb[24].mxu0 %v9150_v15 }
 0x437   :  { %5961 = vmatpush1.bf16.msra.mxu0 %v10982_v25  ;;  %v10993_v25 = vld [vmem:[#allocation78_spill] sm:$0xff] }
 0x438   :  { %5963 = vmatprep.subr.bf16.mxu0 %v10983_v18  ;;  %6057 = vmatpush1.bf16.msra.mxu1 %v10984_v27  ;;  %v10994_v18 = vld [vmem:[#allocation47_spill] sm:$0xff]  ;;  %v10995_v27 = vld [vmem:[#allocation49_spill] sm:$0xff] }
 0x439   :  { %6059 = vmatprep.subr.bf16.mxu1 %v10985_v35  ;;  %v10996_v35 = vld [vmem:[#allocation80_spill] sm:$0xff] }
 0x43b   :  { %5965 = vmatpush1.bf16.msra.mxu0 %v10986_v13  ;;  %v10997_v13 = vld [vmem:[#allocation82_spill] sm:$0xff] }
 0x43c   :  { %5967 = vmatprep.subr.bf16.mxu0 %v10987_v46  ;;  %6061 = vmatpush1.bf16.msra.mxu1 %v10988_v7  ;;  %v10998_v46 = vld [vmem:[#allocation51_spill] sm:$0xff]  ;;  %v10999_v7 = vld [vmem:[#allocation53_spill] sm:$0xff] }
 0x43d   :  { %6063 = vmatprep.subr.bf16.mxu1 %v10989_v6  ;;  %v11000_v6 = vld [vmem:[#allocation84_spill] sm:$0xff] }
 0x43f   :  { %5969 = vmatpush1.bf16.msra.mxu0 %v10990_v19  ;;  %v11001_v19 = vld [vmem:[#allocation86_spill] sm:$0xff] }
 0x440   :  { %5971 = vmatprep.subr.bf16.mxu0 %v10991_v53  ;;  %6065 = vmatpush1.bf16.msra.mxu1 %v10992_v29  ;;  %v11002_v53 = vld [vmem:[#allocation55_spill] sm:$0xff]  ;;  %v11003_v29 = vld [vmem:[#allocation57_spill] sm:$0xff] }
 0x441   :  { %6067 = vmatprep.subr.bf16.mxu1 %v10993_v25  ;;  %v11004_v25 = vld [vmem:[#allocation88_spill] sm:$0xff] }
 0x443   :  { %5973 = vmatpush1.bf16.msra.mxu0 %v10994_v18  ;;  %v11005_v18 = vld [vmem:[#allocation90_spill] sm:$0xff] }
 0x444   :  { %5975 = vmatprep.subr.bf16.mxu0 %v10995_v27  ;;  %6069 = vmatpush1.bf16.msra.mxu1 %v10996_v35  ;;  %v11006_v27 = vld [vmem:[#allocation59_spill] sm:$0xff]  ;;  %v11007_v35 = vld [vmem:[#allocation61_spill] sm:$0xff] }
 0x445   :  { %6071 = vmatprep.subr.bf16.mxu1 %v10997_v13  ;;  %v11008_v13 = vld [vmem:[#allocation92_spill] sm:$0xff] }
 0x447   :  { %5977 = vmatpush1.bf16.msra.mxu0 %v10998_v46  ;;  %v11009_v46 = vld [vmem:[#allocation94_spill] sm:$0xff] }
 0x448   :  { %5979 = vmatprep.subr.bf16.mxu0 %v10999_v7  ;;  %6073 = vmatpush1.bf16.msra.mxu1 %v11000_v6  ;;  %v11010_v7 = vld [vmem:[#allocation63_spill] sm:$0xff]  ;;  %v11011_v6 = vld [vmem:[#allocation65_spill] sm:$0xff] }
 0x449   :  { %6075 = vmatprep.subr.bf16.mxu1 %v11001_v19  ;;  %v11012_v19 = vld [vmem:[#allocation96_spill] sm:$0xff] }
 0x44b   :  { %5981 = vmatpush1.bf16.msra.mxu0 %v11002_v53  ;;  %v11013_v53 = vld [vmem:[#allocation97_spill] sm:$0xff] }
 0x44c   :  { %5983 = vmatprep.subr.bf16.mxu0 %v11003_v29  ;;  %6077 = vmatpush1.bf16.msra.mxu1 %v11004_v25  ;;  %v11014_v29 = vld [vmem:[#allocation67_spill] sm:$0xff]  ;;  %v11015_v25 = vld [vmem:[#allocation69_spill] sm:$0xff] }
 0x44d   :  { %6079 = vmatprep.subr.bf16.mxu1 %v11005_v18  ;;  %v11016_v18 = vld [vmem:[#allocation71_spill] sm:$0xff] }
 0x44f   :  { %5985 = vmatpush1.bf16.msra.mxu0 %v11006_v27  ;;  %v11017_v27 = vld [vmem:[#allocation73_spill] sm:$0xff] }
 0x450   :  { %5987 = vmatprep.subr.bf16.mxu0 %v11007_v35  ;;  %6081 = vmatpush1.bf16.msra.mxu1 %v11008_v13  ;;  %v11018_v35 = vld [vmem:[#allocation75_spill] sm:$0xff]  ;;  %v11019_v13 = vld [vmem:[#allocation77_spill] sm:$0xff] }
 0x451   :  { %6083 = vmatprep.subr.bf16.mxu1 %v11009_v46  ;;  %v11020_v46 = vld [vmem:[#allocation79_spill] sm:$0xff] }
 0x453   :  { %5989 = vmatpush1.bf16.msra.mxu0 %v11010_v7  ;;  %v11021_v7 = vld [vmem:[#allocation81_spill] sm:$0xff] }
 0x454   :  { %5991 = vmatprep.subr.bf16.mxu0 %v11011_v6  ;;  %6085 = vmatpush1.bf16.msra.mxu1 %v11012_v19  ;;  %v11022_v6 = vld [vmem:[#allocation83_spill] sm:$0xff]  ;;  %v11023_v19 = vld [vmem:[#allocation85_spill] sm:$0xff] }
 0x455   :  { %6087 = vmatprep.subr.bf16.mxu1 %v11013_v53  ;;  %v11024_v53 = vld [vmem:[#allocation87_spill] sm:$0xff] }
 0x457   :  { %5993 = vmatpush1.bf16.msra.mxu0 %v11014_v29  ;;  %v11025_v29 = vld [vmem:[#allocation89_spill] sm:$0xff] }
 0x458   :  { %5995 = vmatprep.subr.bf16.mxu0 %v11015_v25  ;;  %v11026_v25 = vld [vmem:[#allocation91_spill] sm:$0xff] }
 0x45b   :  { %5997 = vmatpush1.bf16.msra.mxu0 %v11016_v18  ;;  %v11027_v18 = vld [vmem:[#allocation93_spill] sm:$0xff] }
 0x45c   :  { %5999 = vmatprep.subr.bf16.mxu0 %v11017_v27  ;;  %v11028_v27 = vld [vmem:[#allocation95_spill] sm:$0xff] }
 0x45f   :  { %6001 = vmatpush1.bf16.msra.mxu0 %v11018_v35  ;;  %v11029_v35 = vld [vmem:[#allocation98_spill] sm:$0xff] }
 0x460   :  { %6003 = vmatprep.subr.bf16.mxu0 %v11019_v13 }
 0x463   :  { %6005 = vmatpush1.bf16.msra.mxu0 %v11020_v46 }
 0x464   :  { %6007 = vmatprep.subr.bf16.mxu0 %v11021_v7 }
 0x467   :  { %6009 = vmatpush1.bf16.msra.mxu0 %v11022_v6 }
 0x468   :  { %6011 = vmatprep.subr.bf16.mxu0 %v11023_v19  ;;  %v11030_v19 = vld [vmem:[#allocation185_spill] sm:$0xff] }
 0x46b   :  { %6013 = vmatpush1.bf16.msra.mxu0 %v11024_v53 }
 0x46c   :  { %6015 = vmatprep.subr.bf16.mxu0 %v11025_v29 }
 0x46f   :  { %6017 = vmatpush1.bf16.msra.mxu0 %v11026_v25  ;;  %v11031_v25 = vld [vmem:[#allocation186_spill] sm:$0xff] }
 0x470   :  { %6019 = vmatprep.subr.bf16.mxu0 %v11027_v18 }
 0x473   :  { %6021 = vmatpush1.bf16.msra.mxu0 %v11028_v27 }
 0x474   :  { %6151 = vmatprep.subr.bf16.mxu0 %v11029_v35 }
 0x4a9   :  { %v1714_v13 = vpop.f32.mrb[4].mxu0  ;;  %v1785_v46 = vpop.f32.mrb[18].mxu1 }
 0x4aa   :  { %v7650_v7 = vadd.f32 %v1714_v13, %v10921_v51  ;;  %v1716_v8 = vpop.f32.mrb[5].mxu0  ;;  %v1787_v6 = vpop.f32.mrb[19].mxu1  ;;  %v2006_v27 = vadd.f32 %v11031_v25, %v1785_v46 }
 0x4ab   :  { %v7651_v53 = vadd.f32 %v1716_v8, %v11030_v19  ;;  %v11033_v19 = vld [vmem:[#allocation187_spill] sm:$0xff] }
 0x4ac   :  { %v4568_v12 = vmul.f32 -1.442695, %v7650_v7 }
 0x4ad   :  { %v4569_v36 = vmul.f32 -1.442695, %v7651_v53 }
 0x4ae   :  { %7740 = vpow2.f32 %v4568_v12 }
 0x4af   :  { %7742 = vpow2.f32 %v4569_v36 }
 0x4b8   :  { %v7741_v29 = vpop.eup %7740 }
 0x4b9   :  { %v2015_v16 = vadd.f32 1.0, %v7741_v29  ;;  %v7743_v18 = vpop.eup %7742  ;;  %v2027_v29 = vadd.f32 %v1787_v6, %v8977_v22 }
 0x4ba   :  { %v2016_v11 = vadd.f32 1.0, %v7743_v18 }
 0x4bb   :  { %7744 = vrcp.f32 %v2015_v16 }
 0x4c5   :  { %v7745_v48 = vpop.eup %7744 }
 0x4c6   :  { %v2021_v35 = vmul.f32 %v7745_v48, %v2006_v27 }
 0x4c8   :  { %v2022_v9 = vadd.f32 %v2021_v35, %v11032_v47 }
 0x4ca   :  { %7746 = vtanh.f32 %v2022_v9 }
 0x4cb   :  { %7748 = vrcp.f32 %v2016_v11 }
 0x4d4   :  { %v7747_v13 = vpop.eup %7746 }
 0x4d5   :  { %v2024_v12 = vsub.f32 %v9150_v15, %v7747_v13  ;;  %v7749_v7 = vpop.eup %7748 }
 0x4d7   :  { %v2025_v8 = vmul.f32 %v7749_v7, %v2024_v12 }
 0x4d9   :  { %v9320_v53 = vadd.f32 %v7747_v13, %v2025_v8 }
 0x4e9   :  { %v1856_v36 = vpop.f32.mrb[22].mxu0  ;;  %v1927_v16 = vpop.f32.mrb[20].mxu1 }
 0x4ea   :  { %v2028_v46 = vadd.f32 %v1856_v36, %v11033_v19  ;;  %v2031_v25 = vadd.f32 %v2027_v29, %v1927_v16  ;;  %v1858_v27 = vpop.f32.mrb[23].mxu0  ;;  %v1929_v48 = vpop.f32.mrb[21].mxu1 }
 0x4eb   :  { %v2029_v36 = vadd.f32 %v8985_v55, %v1858_v27  ;;  %v11036_v55 = vld [vmem:[#allocation115_spill] sm:$0xff]  ;;  %v11038_v27 = vld [vmem:[#allocation117_spill] sm:$0xff] }
 0x4ec   :  { %v2032_v35 = vadd.f32 %v2028_v46, %v1929_v48  ;;  %v4570_v47 = vmul.f32 -1.442695, %v2031_v25 }
 0x4ee   :  { %7750 = vpow2.f32 %v4570_v47  ;;  %v4571_v9 = vmul.f32 -1.442695, %v2032_v35 }
 0x4f0   :  { %7752 = vpow2.f32 %v4571_v9 }
 0x4f8   :  { %v7751_v11 = vpop.eup %7750 }
 0x4f9   :  { %v2039_v18 = vadd.f32 1.0, %v7751_v11 }
 0x4fa   :  { %v7753_v7 = vpop.eup %7752 }
 0x4fb   :  { %7754 = vrcp.f32 %v2039_v18  ;;  %v2040_v16 = vadd.f32 1.0, %v7753_v7  ;;  %v11039_v18 = vld [vmem:[#allocation118_spill] sm:$0xff] }
 0x4fc   :  { %v11043_v7 = vld [vmem:[#allocation122_spill] sm:$0xff] }
 0x505   :  { %v7755_v8 = vpop.eup %7754 }
 0x509   :  { %v4721_v15 = vpop.f32.mrb[24].mxu0 }
 0x50a   :  { %v4722_v13 = vpop.f32.mrb[25].mxu0 }
 0x50b   :  { %v4723_v12 = vadd.f32 %v4722_v13, %v4721_v15  ;;  %v11040_v15 = vld [vmem:[#allocation119_spill] sm:$0xff]  ;;  %v11041_v13 = vld [vmem:[#allocation120_spill] sm:$0xff] }
 0x50d   :  { %v2030_v6 = vadd.f32 %v4723_v12, %v8983_v41  ;;  %v11035_v41 = vld [vmem:[#allocation114_spill] sm:$0xff]  ;;  %v11042_v12 = vld [vmem:[#allocation121_spill] sm:$0xff] }
 0x50f   :  { %v2045_v29 = vmul.f32 %v7755_v8, %v2030_v6  ;;  %v11044_v6 = vld [vmem:[#allocation123_spill] sm:$0xff]  ;;  %v11045_v8 = vld [vmem:[#allocation124_spill] sm:$0xff] }
 0x511   :  { %v2046_v19 = vadd.f32 %v2045_v29, %v2029_v36  ;;  %v11046_v36 = vld [vmem:[#allocation125_spill] sm:$0xff]  ;;  %v11047_v29 = vld [vmem:[#allocation126_spill] sm:$0xff] }
 0x513   :  { %7756 = vtanh.f32 %v2046_v19  ;;  %v11034_v19 = vld [vmem:[#allocation113_spill] sm:$0xff] }
 0x514   :  { %7758 = vrcp.f32 %v2040_v16  ;;  %v11048_v16 = vld [vmem:[#allocation127_spill] sm:$0xff] }
 0x51d   :  { %v7757_v46 = vpop.eup %7756 }
 0x51e   :  { %v2048_v25 = vsub.f32 %v9159_v62, %v7757_v46  ;;  %v7759_v48 = vpop.eup %7758 }
 0x520   :  { %v2049_v35 = vmul.f32 %v7759_v48, %v2048_v25  ;;  %v11050_v25 = vld [vmem:[#allocation129_spill] sm:$0xff]  ;;  %v11051_v48 = vld [vmem:[#allocation139_spill] sm:$0xff] }
 0x522   :  { %v2050_v47 = vadd.f32 %v7757_v46, %v2049_v35  ;;  %v11049_v46 = vld [vmem:[#allocation128_spill] sm:$0xff]  ;;  %v11052_v35 = vld [vmem:[#allocation145_spill] sm:$0xff] }
 0x524   :  { %v2054_v11 = vsub.f32 %v2050_v47, %v9159_v62  ;;  %v11053_v47 = vld [vmem:[#allocation157_spill] sm:$0xff] }
 0x526   :  { %v9329_v9 = vadd.f32 %v2054_v11, %v9159_v62  ;;  %v11037_v62 = vld [vmem:[#allocation116_spill] sm:$0xff]  ;;  %v11054_v11 = vld [vmem:[#allocation158_spill] sm:$0xff] }
 0x528   :  { %2123 = vmatprep.mubr.f32.mxu0 %v9329_v9  ;;  %2194 = vmatprep.mubr.f32.mxu1 %v9329_v9 }
 0x529   :  { %2124 = vmatmul.mubr.f32.vlgmr.msra.gmra.mrb[6].mxu0 %v9320_v53  ;;  %2195 = vmatmul.mubr.f32.vlgmr.msra.gmra.mrb[22].mxu1 %v9320_v53 }
 0x52a   :  { %6089 = vmatpush1.bf16.msra.mxu1 %v10818_v0  ;;  %6153 = vmatpush1.bf16.msra.mxu0 %v10819_v54 }
 0x52b   :  { %2265 = vmatprep.mubr.f32.mxu1 %v9329_v9  ;;  %2336 = vmatprep.mubr.f32.mxu0 %v9329_v9 }
 0x52c   :  { %6091 = vmatprep.subr.bf16.mxu1 %v10820_v42  ;;  %6155 = vmatprep.subr.bf16.mxu0 %v10821_v60 }
 0x52e   :  { %6093 = vmatpush1.bf16.msra.mxu1 %v10822_v61  ;;  %6157 = vmatpush1.bf16.msra.mxu0 %v10823_v33 }
 0x52f   :  { %6095 = vmatprep.subr.bf16.mxu1 %v10925_v26  ;;  %6159 = vmatprep.subr.bf16.mxu0 %v10926_v24 }
 0x532   :  { %6097 = vmatpush1.bf16.msra.mxu1 %v10927_v50  ;;  %6161 = vmatpush1.bf16.msra.mxu0 %v10928_v21 }
 0x533   :  { %6099 = vmatprep.subr.bf16.mxu1 %v10929_v34  ;;  %6163 = vmatprep.subr.bf16.mxu0 %v10930_v38 }
 0x536   :  { %6101 = vmatpush1.bf16.msra.mxu1 %v10931_v28  ;;  %6165 = vmatpush1.bf16.msra.mxu0 %v10932_v32 }
 0x537   :  { %6103 = vmatprep.subr.bf16.mxu1 %v11034_v19  ;;  %6167 = vmatprep.subr.bf16.mxu0 %v11035_v41 }
 0x53a   :  { %6105 = vmatpush1.bf16.msra.mxu1 %v11036_v55  ;;  %6169 = vmatpush1.bf16.msra.mxu0 %v11037_v62 }
 0x53b   :  { %6107 = vmatprep.subr.bf16.mxu1 %v11038_v27  ;;  %6171 = vmatprep.subr.bf16.mxu0 %v11039_v18 }
 0x53e   :  { %6109 = vmatpush1.bf16.msra.mxu1 %v11040_v15  ;;  %6173 = vmatpush1.bf16.msra.mxu0 %v11041_v13 }
 0x53f   :  { %6111 = vmatprep.subr.bf16.mxu1 %v11042_v12  ;;  %6175 = vmatprep.subr.bf16.mxu0 %v11043_v7 }
 0x542   :  { %6113 = vmatpush1.bf16.msra.mxu1 %v11044_v6  ;;  %6177 = vmatpush1.bf16.msra.mxu0 %v11045_v8 }
 0x543   :  { %6115 = vmatprep.subr.bf16.mxu1 %v11046_v36  ;;  %6179 = vmatprep.subr.bf16.mxu0 %v11047_v29 }
 0x546   :  { %6117 = vmatpush1.bf16.msra.mxu1 %v11048_v16  ;;  %6181 = vmatpush1.bf16.msra.mxu0 %v11049_v46 }
 0x547   :  { %6119 = vmatprep.subr.bf16.mxu1 %v11050_v25  ;;  %6183 = vmatprep.subr.bf16.mxu0 %v10950_v2 }
 0x54a   :  { %6121 = vmatpush1.bf16.msra.mxu1 %v10951_v44  ;;  %6185 = vmatpush1.bf16.msra.mxu0 %v10952_v17 }
 0x54b   :  { %6123 = vmatprep.subr.bf16.mxu1 %v10953_v31  ;;  %6187 = vmatprep.subr.bf16.mxu0 %v10954_v40 }
 0x54e   :  { %6125 = vmatpush1.bf16.msra.mxu1 %v10955_v63  ;;  %6189 = vmatpush1.bf16.msra.mxu0 %v10956_v3 }
 0x54f   :  { %6127 = vmatprep.subr.bf16.mxu1 %v10957_v39  ;;  %6191 = vmatprep.subr.bf16.mxu0 %v10958_v52 }
 0x552   :  { %6129 = vmatpush1.bf16.msra.mxu1 %v11051_v48  ;;  %6193 = vmatpush1.bf16.msra.mxu0 %v10960_v43 }
 0x553   :  { %6131 = vmatprep.subr.bf16.mxu1 %v10860_v56  ;;  %6195 = vmatprep.subr.bf16.mxu0 %v10861_v4  ;;  %v11141_v4 = vld [vmem:[#allocation178_spill] sm:$0xff]  ;;  %v11142_v56 = vld [vmem:[#allocation187_spill] sm:$0xff] }
 0x556   :  { %6133 = vmatpush1.bf16.msra.mxu1 %v10862_v58  ;;  %6197 = vmatpush1.bf16.msra.mxu0 %v10863_v49 }
 0x557   :  { %6135 = vmatprep.subr.bf16.mxu1 %v11052_v35  ;;  %6199 = vmatprep.subr.bf16.mxu0 %v10865_v59 }
 0x55a   :  { %6137 = vmatpush1.bf16.msra.mxu1 %v10866_v45  ;;  %6201 = vmatpush1.bf16.msra.mxu0 %v10867_v10  ;;  %v11055_v10 = vld [vmem:[#allocation159_spill] sm:$0xff] }
 0x55b   :  { %6139 = vmatprep.subr.bf16.mxu1 %v10868_v1  ;;  %6203 = vmatprep.subr.bf16.mxu0 %v10961_v5  ;;  %v11056_v1 = vld [vmem:[#allocation160_spill] sm:$0xff]  ;;  %v11057_v5 = vld [vmem:[#allocation161_spill] sm:$0xff] }
 0x55e   :  { %6141 = vmatpush1.bf16.msra.mxu1 %v10870_v14  ;;  %6205 = vmatpush1.bf16.msra.mxu0 %v8799_v30  ;;  %v11058_v14 = vld [vmem:[#allocation33_spill] sm:$0xff] }
 0x55f   :  { %6143 = vmatprep.subr.bf16.mxu1 %v8801_v23  ;;  %6207 = vmatprep.subr.bf16.mxu0 %v8804_v57  ;;  %v11059_v57 = vld [vmem:[#allocation162_spill] sm:$0xff]  ;;  %v11068_v23 = vld [vmem:[#allocation167_spill] sm:$0xff]  ;;  %v11070_v30 = vld [vmem:[#allocation45_spill] sm:$0xff] }
 0x562   :  { %6145 = vmatpush1.bf16.msra.mxu1 %v8807_v37  ;;  %6209 = vmatpush1.bf16.msra.mxu0 %v10962_v20  ;;  %v11060_v20 = vld [vmem:[#allocation163_spill] sm:$0xff]  ;;  %v11067_v37 = vld [vmem:[#allocation166_spill] sm:$0xff] }
 0x563   :  { %6147 = vmatprep.subr.bf16.mxu1 %v11053_v47  ;;  %6211 = vmatprep.subr.bf16.mxu0 %v11054_v11  ;;  %v11061_v47 = vld [vmem:[#allocation35_spill] sm:$0xff]  ;;  %v11062_v11 = vld [vmem:[#allocation37_spill] sm:$0xff] }
 0x566   :  { %6149 = vmatpush1.bf16.msra.mxu1 %v11055_v10  ;;  %6213 = vmatpush1.bf16.msra.mxu0 %v11056_v1  ;;  %v11063_v10 = vld [vmem:[#allocation164_spill] sm:$0xff]  ;;  %v11064_v1 = vld [vmem:[#allocation165_spill] sm:$0xff] }
 0x567   :  { %6215 = vmatprep.subr.bf16.mxu1 %v11057_v5  ;;  %6247 = vmatprep.subr.bf16.mxu0 %v11058_v14  ;;  %v11065_v5 = vld [vmem:[#allocation39_spill] sm:$0xff]  ;;  %v11066_v14 = vld [vmem:[#allocation41_spill] sm:$0xff] }
 0x569   :  { %2266 = vmatmul.mubr.f32.vlgmr.msra.gmra.mrb[24].mxu1 %v9320_v53  ;;  %2337 = vmatmul.mubr.f32.vlgmr.msra.gmra.mrb[26].mxu0 %v9320_v53 }
 0x56a   :  { %6217 = vmatpush3.bf16.msra.mxu1 %v11059_v57  ;;  %2407 = vmatprep.mubr.f32.mxu1 %v9329_v9  ;;  %v11069_v57 = vld [vmem:[#allocation43_spill] sm:$0xff] }
 0x56b   :  { %6219 = vmatprep.subr.bf16.mxu1 %v11060_v20  ;;  %6249 = vmatpush1.bf16.msra.mxu0 %v11061_v47  ;;  %v11071_v20 = vld [vmem:[#allocation168_spill] sm:$0xff]  ;;  %v11072_v47 = vld [vmem:[#allocation169_spill] sm:$0xff] }
 0x56c   :  { %6251 = vmatprep.subr.bf16.mxu0 %v11062_v11  ;;  %v11073_v11 = vld [vmem:[#allocation47_spill] sm:$0xff] }
 0x56e   :  { %6221 = vmatpush3.bf16.msra.mxu1 %v11063_v10  ;;  %v11074_v10 = vld [vmem:[#allocation49_spill] sm:$0xff] }
 0x56f   :  { %6223 = vmatprep.subr.bf16.mxu1 %v11064_v1  ;;  %6253 = vmatpush1.bf16.msra.mxu0 %v11065_v5  ;;  %v11075_v1 = vld [vmem:[#allocation170_spill] sm:$0xff]  ;;  %v11076_v5 = vld [vmem:[#allocation171_spill] sm:$0xff] }
 0x570   :  { %6255 = vmatprep.subr.bf16.mxu0 %v11066_v14  ;;  %v11077_v14 = vld [vmem:[#allocation51_spill] sm:$0xff] }
 0x572   :  { %6225 = vmatpush3.bf16.msra.mxu1 %v11067_v37  ;;  %v11078_v37 = vld [vmem:[#allocation53_spill] sm:$0xff] }
 0x573   :  { %6227 = vmatprep.subr.bf16.mxu1 %v11068_v23  ;;  %6257 = vmatpush1.bf16.msra.mxu0 %v11069_v57  ;;  %v11079_v23 = vld [vmem:[#allocation172_spill] sm:$0xff]  ;;  %v11080_v57 = vld [vmem:[#allocation173_spill] sm:$0xff] }
 0x574   :  { %6259 = vmatprep.subr.bf16.mxu0 %v11070_v30  ;;  %v11081_v30 = vld [vmem:[#allocation55_spill] sm:$0xff] }
 0x576   :  { %6229 = vmatpush3.bf16.msra.mxu1 %v11071_v20  ;;  %v11082_v20 = vld [vmem:[#allocation57_spill] sm:$0xff] }
 0x577   :  { %6231 = vmatprep.subr.bf16.mxu1 %v11072_v47  ;;  %6261 = vmatpush1.bf16.msra.mxu0 %v11073_v11  ;;  %v11083_v47 = vld [vmem:[#allocation174_spill] sm:$0xff]  ;;  %v11084_v11 = vld [vmem:[#allocation175_spill] sm:$0xff] }
 0x578   :  { %6263 = vmatprep.subr.bf16.mxu0 %v11074_v10  ;;  %v11085_v10 = vld [vmem:[#allocation59_spill] sm:$0xff] }
 0x57a   :  { %6233 = vmatpush3.bf16.msra.mxu1 %v11075_v1  ;;  %v11086_v1 = vld [vmem:[#allocation61_spill] sm:$0xff] }
 0x57b   :  { %6235 = vmatprep.subr.bf16.mxu1 %v11076_v5  ;;  %6265 = vmatpush1.bf16.msra.mxu0 %v11077_v14  ;;  %v11087_v5 = vld [vmem:[#allocation176_spill] sm:$0xff]  ;;  %v11088_v14 = vld [vmem:[#allocation34_spill] sm:$0xff] }
 0x57c   :  { %6267 = vmatprep.subr.bf16.mxu0 %v11078_v37  ;;  %v11089_v37 = vld [vmem:[#allocation63_spill] sm:$0xff] }
 0x57e   :  { %6237 = vmatpush3.bf16.msra.mxu1 %v11079_v23  ;;  %v11090_v23 = vld [vmem:[#allocation65_spill] sm:$0xff] }
 0x57f   :  { %6239 = vmatprep.subr.bf16.mxu1 %v11080_v57  ;;  %6269 = vmatpush1.bf16.msra.mxu0 %v11081_v30  ;;  %v11091_v30 = vld [vmem:[#allocation36_spill] sm:$0xff]  ;;  %v11098_v57 = vld [vmem:[#allocation73_spill] sm:$0xff] }
 0x580   :  { %6271 = vmatprep.subr.bf16.mxu0 %v11082_v20  ;;  %v11092_v20 = vld [vmem:[#allocation38_spill] sm:$0xff] }
 0x582   :  { %6241 = vmatpush3.bf16.msra.mxu1 %v11083_v47  ;;  %v11093_v47 = vld [vmem:[#allocation67_spill] sm:$0xff] }
 0x583   :  { %6243 = vmatprep.subr.bf16.mxu1 %v11084_v11  ;;  %6273 = vmatpush1.bf16.msra.mxu0 %v11085_v10  ;;  %v11094_v11 = vld [vmem:[#allocation69_spill] sm:$0xff]  ;;  %v11095_v10 = vld [vmem:[#allocation40_spill] sm:$0xff] }
 0x584   :  { %6275 = vmatprep.subr.bf16.mxu0 %v11086_v1  ;;  %v11096_v1 = vld [vmem:[#allocation42_spill] sm:$0xff] }
 0x586   :  { %6245 = vmatpush3.bf16.msra.mxu1 %v11087_v5  ;;  %v11097_v5 = vld [vmem:[#allocation71_spill] sm:$0xff] }
 0x587   :  { %6311 = vmatprep.subr.bf16.mxu1 %v11088_v14  ;;  %6277 = vmatpush1.bf16.msra.mxu0 %v11089_v37  ;;  %v11099_v37 = vld [vmem:[#allocation44_spill] sm:$0xff]  ;;  %v11101_v14 = vld [vmem:[#allocation75_spill] sm:$0xff] }
 0x588   :  { %6279 = vmatprep.subr.bf16.mxu0 %v11090_v23  ;;  %v11100_v23 = vld [vmem:[#allocation46_spill] sm:$0xff] }
 0x589   :  { %2408 = vmatmul.mubr.f32.vlgmr.msra.gmra.mrb[26].mxu1 %v9320_v53 }
 0x58a   :  { %6313 = vmatpush1.bf16.msra.mxu1 %v11091_v30  ;;  %v11102_v30 = vld [vmem:[#allocation77_spill] sm:$0xff] }
 0x58b   :  { %6315 = vmatprep.subr.bf16.mxu1 %v11092_v20  ;;  %6281 = vmatpush1.bf16.msra.mxu0 %v11093_v47  ;;  %v11103_v20 = vld [vmem:[#allocation48_spill] sm:$0xff]  ;;  %v11104_v47 = vld [vmem:[#allocation50_spill] sm:$0xff] }
 0x58c   :  { %6283 = vmatprep.subr.bf16.mxu0 %v11094_v11  ;;  %v11105_v11 = vld [vmem:[#allocation79_spill] sm:$0xff] }
 0x58e   :  { %6317 = vmatpush1.bf16.msra.mxu1 %v11095_v10  ;;  %v11106_v10 = vld [vmem:[#allocation81_spill] sm:$0xff] }
 0x58f   :  { %6319 = vmatprep.subr.bf16.mxu1 %v11096_v1  ;;  %6285 = vmatpush1.bf16.msra.mxu0 %v11097_v5  ;;  %v11107_v1 = vld [vmem:[#allocation52_spill] sm:$0xff]  ;;  %v11108_v5 = vld [vmem:[#allocation54_spill] sm:$0xff] }
 0x590   :  { %6287 = vmatprep.subr.bf16.mxu0 %v11098_v57  ;;  %v11109_v57 = vld [vmem:[#allocation83_spill] sm:$0xff] }
 0x592   :  { %6321 = vmatpush1.bf16.msra.mxu1 %v11099_v37  ;;  %v11110_v37 = vld [vmem:[#allocation85_spill] sm:$0xff] }
 0x593   :  { %6323 = vmatprep.subr.bf16.mxu1 %v11100_v23  ;;  %6289 = vmatpush1.bf16.msra.mxu0 %v11101_v14  ;;  %v11111_v23 = vld [vmem:[#allocation56_spill] sm:$0xff]  ;;  %v11112_v14 = vld [vmem:[#allocation58_spill] sm:$0xff] }
 0x594   :  { %6291 = vmatprep.subr.bf16.mxu0 %v11102_v30  ;;  %v11113_v30 = vld [vmem:[#allocation87_spill] sm:$0xff] }
 0x596   :  { %6325 = vmatpush1.bf16.msra.mxu1 %v11103_v20  ;;  %v11114_v20 = vld [vmem:[#allocation89_spill] sm:$0xff] }
 0x597   :  { %6327 = vmatprep.subr.bf16.mxu1 %v11104_v47  ;;  %6293 = vmatpush1.bf16.msra.mxu0 %v11105_v11  ;;  %v11115_v47 = vld [vmem:[#allocation60_spill] sm:$0xff]  ;;  %v11116_v11 = vld [vmem:[#allocation62_spill] sm:$0xff] }
 0x598   :  { %6295 = vmatprep.subr.bf16.mxu0 %v11106_v10  ;;  %v11117_v10 = vld [vmem:[#allocation91_spill] sm:$0xff] }
 0x59a   :  { %6329 = vmatpush1.bf16.msra.mxu1 %v11107_v1  ;;  %v11118_v1 = vld [vmem:[#allocation93_spill] sm:$0xff] }
 0x59b   :  { %6331 = vmatprep.subr.bf16.mxu1 %v11108_v5  ;;  %6297 = vmatpush1.bf16.msra.mxu0 %v11109_v57  ;;  %v11119_v5 = vld [vmem:[#allocation64_spill] sm:$0xff]  ;;  %v11120_v57 = vld [vmem:[#allocation66_spill] sm:$0xff] }
 0x59c   :  { %6299 = vmatprep.subr.bf16.mxu0 %v11110_v37  ;;  %v11121_v37 = vld [vmem:[#allocation95_spill] sm:$0xff] }
 0x59e   :  { %6333 = vmatpush1.bf16.msra.mxu1 %v11111_v23  ;;  %v11122_v23 = vld [vmem:[#allocation97_spill] sm:$0xff] }
 0x59f   :  { %6335 = vmatprep.subr.bf16.mxu1 %v11112_v14  ;;  %6301 = vmatpush1.bf16.msra.mxu0 %v11113_v30  ;;  %v11123_v14 = vld [vmem:[#allocation68_spill] sm:$0xff]  ;;  %v11124_v30 = vld [vmem:[#allocation70_spill] sm:$0xff] }
 0x5a0   :  { %6303 = vmatprep.subr.bf16.mxu0 %v11114_v20  ;;  %v11125_v20 = vld [vmem:[#allocation72_spill] sm:$0xff] }
 0x5a2   :  { %6337 = vmatpush1.bf16.msra.mxu1 %v11115_v47  ;;  %v11126_v47 = vld [vmem:[#allocation74_spill] sm:$0xff] }
 0x5a3   :  { %6339 = vmatprep.subr.bf16.mxu1 %v11116_v11  ;;  %6305 = vmatpush1.bf16.msra.mxu0 %v11117_v10  ;;  %v11127_v11 = vld [vmem:[#allocation76_spill] sm:$0xff]  ;;  %v11128_v10 = vld [vmem:[#allocation78_spill] sm:$0xff] }
 0x5a4   :  { %6307 = vmatprep.subr.bf16.mxu0 %v11118_v1  ;;  %v11129_v1 = vld [vmem:[#allocation80_spill] sm:$0xff] }
 0x5a6   :  { %6341 = vmatpush1.bf16.msra.mxu1 %v11119_v5  ;;  %v11130_v5 = vld [vmem:[#allocation82_spill] sm:$0xff] }
 0x5a7   :  { %6343 = vmatprep.subr.bf16.mxu1 %v11120_v57  ;;  %6309 = vmatpush1.bf16.msra.mxu0 %v11121_v37  ;;  %v11131_v57 = vld [vmem:[#allocation84_spill] sm:$0xff]  ;;  %v11132_v37 = vld [vmem:[#allocation86_spill] sm:$0xff] }
 0x5a8   :  { %6375 = vmatprep.subr.bf16.mxu0 %v11122_v23  ;;  %v11133_v23 = vld [vmem:[#allocation88_spill] sm:$0xff] }
 0x5aa   :  { %6345 = vmatpush1.bf16.msra.mxu1 %v11123_v14  ;;  %v11134_v14 = vld [vmem:[#allocation90_spill] sm:$0xff] }
 0x5ab   :  { %6347 = vmatprep.subr.bf16.mxu1 %v11124_v30  ;;  %v11135_v30 = vld [vmem:[#allocation92_spill] sm:$0xff] }
 0x5ae   :  { %6349 = vmatpush1.bf16.msra.mxu1 %v11125_v20  ;;  %v11136_v20 = vld [vmem:[#allocation94_spill] sm:$0xff] }
 0x5af   :  { %6351 = vmatprep.subr.bf16.mxu1 %v11126_v47  ;;  %v11137_v47 = vld [vmem:[#allocation96_spill] sm:$0xff] }
 0x5b2   :  { %6353 = vmatpush1.bf16.msra.mxu1 %v11127_v11  ;;  %v11138_v11 = vld [vmem:[#allocation98_spill] sm:$0xff] }
 0x5b3   :  { %6355 = vmatprep.subr.bf16.mxu1 %v11128_v10 }
 0x5b6   :  { %6357 = vmatpush1.bf16.msra.mxu1 %v11129_v1 }
 0x5b7   :  { %6359 = vmatprep.subr.bf16.mxu1 %v11130_v5 }
 0x5ba   :  { %6361 = vmatpush1.bf16.msra.mxu1 %v11131_v57 }
 0x5bb   :  { %6363 = vmatprep.subr.bf16.mxu1 %v11132_v37  ;;  %v11139_v37 = vld [vmem:[#allocation185_spill] sm:$0xff] }
 0x5be   :  { %6365 = vmatpush1.bf16.msra.mxu1 %v11133_v23 }
 0x5bf   :  { %6367 = vmatprep.subr.bf16.mxu1 %v11134_v14 }
 0x5c2   :  { %6369 = vmatpush1.bf16.msra.mxu1 %v11135_v30  ;;  %v9487_v30 = vld [vmem:[#allocation13] ss:$0 sm:$0xff] }
 0x5c3   :  { %6371 = vmatprep.subr.bf16.mxu1 %v11136_v20  ;;  %11140 = vst [vmem:[#allocation99_spill] sm:$0xff] %v9487_v30 }
 0x5c6   :  { %6373 = vmatpush1.bf16.msra.mxu1 %v11137_v47 }
 0x5c7   :  { %6439 = vmatprep.subr.bf16.mxu1 %v11138_v11 }
 0x5fc   :  { %v2125_v10 = vpop.f32.mrb[6].mxu0  ;;  %v2196_v1 = vpop.f32.mrb[22].mxu1 }
 0x5fd   :  { %v7652_v5 = vadd.f32 %v2125_v10, %v10921_v51  ;;  %v2127_v45 = vpop.f32.mrb[7].mxu0  ;;  %v2198_v57 = vpop.f32.mrb[23].mxu1  ;;  %v2417_v11 = vadd.f32 %v9487_v30, %v2196_v1 }
 0x5fe   :  { %v7653_v23 = vadd.f32 %v2127_v45, %v11139_v37 }
 0x5ff   :  { %v4572_v59 = vmul.f32 -1.442695, %v7652_v5 }
 0x600   :  { %v4573_v35 = vmul.f32 -1.442695, %v7653_v23 }
 0x601   :  { %7760 = vpow2.f32 %v4572_v59 }
 0x602   :  { %7762 = vpow2.f32 %v4573_v35 }
 0x60b   :  { %v7761_v14 = vpop.eup %7760 }
 0x60c   :  { %v2426_v49 = vadd.f32 1.0, %v7761_v14  ;;  %v7763_v20 = vpop.eup %7762 }
 0x60d   :  { %v2427_v51 = vadd.f32 1.0, %v7763_v20 }
 0x60e   :  { %7764 = vrcp.f32 %v2426_v49  ;;  %v2438_v49 = vadd.f32 %v2198_v57, %v8977_v22  ;;  %v9496_v57 = vld [vmem:[#allocation18] ss:$0 sm:$0xff] }
 0x618   :  { %v7765_v47 = vpop.eup %7764 }
 0x619   :  { %v2432_v58 = vmul.f32 %v7765_v47, %v2417_v11 }
 0x61b   :  { %v2433_v10 = vadd.f32 %v2432_v58, %v11141_v4 }
 0x61d   :  { %7766 = vtanh.f32 %v2433_v10 }
 0x61e   :  { %7768 = vrcp.f32 %v2427_v51 }
 0x627   :  { %v7767_v59 = vpop.eup %7766 }
 0x628   :  { %v2435_v45 = vsub.f32 %v9320_v53, %v7767_v59  ;;  %v7769_v23 = vpop.eup %7768 }
 0x62a   :  { %v2436_v5 = vmul.f32 %v7769_v23, %v2435_v45 }
 0x62c   :  { %v9492_v14 = vadd.f32 %v7767_v59, %v2436_v5 }
 0x63c   :  { %v2267_v35 = vpop.f32.mrb[24].mxu1  ;;  %v2338_v37 = vpop.f32.mrb[26].mxu0 }
 0x63d   :  { %v2439_v1 = vadd.f32 %v2267_v35, %v11142_v56  ;;  %v2442_v30 = vadd.f32 %v2438_v49, %v2338_v37  ;;  %v2269_v47 = vpop.f32.mrb[25].mxu1  ;;  %v2340_v11 = vpop.f32.mrb[27].mxu0  ;;  %v9499_v37 = vld [vmem:[#allocation16] ss:$0 sm:$0xff] }
 0x63e   :  { %v2440_v49 = vadd.f32 %v9499_v37, %v2269_v47  ;;  %v11144_v47 = vld [vmem:[#allocation142_spill] sm:$0xff] }
 0x63f   :  { %v2443_v4 = vadd.f32 %v2439_v1, %v2340_v11  ;;  %v4574_v58 = vmul.f32 -1.442695, %v2442_v30 }
 0x641   :  { %7770 = vpow2.f32 %v4574_v58  ;;  %v4575_v20 = vmul.f32 -1.442695, %v2443_v4 }
 0x643   :  { %7772 = vpow2.f32 %v4575_v20 }
 0x64b   :  { %v7771_v51 = vpop.eup %7770 }
 0x64c   :  { %v2450_v10 = vadd.f32 1.0, %v7771_v51 }
 0x64d   :  { %v7773_v23 = vpop.eup %7772 }
 0x64e   :  { %7774 = vrcp.f32 %v2450_v10  ;;  %v2451_v1 = vadd.f32 1.0, %v7773_v23  ;;  %v11146_v23 = vld [vmem:[#allocation144_spill] sm:$0xff] }
 0x658   :  { %v7775_v35 = vpop.eup %7774 }
 0x65c   :  { %v4756_v53 = vpop.f32.mrb[26].mxu1 }
 0x65d   :  { %v4757_v59 = vpop.f32.mrb[27].mxu1 }
 0x65e   :  { %v4758_v45 = vadd.f32 %v4757_v59, %v4756_v53 }
 0x660   :  { %v2441_v5 = vadd.f32 %v9496_v57, %v4758_v45  ;;  %v11145_v45 = vld [vmem:[#allocation143_spill] sm:$0xff] }
 0x662   :  { %v2456_v30 = vmul.f32 %v7775_v35, %v2441_v5  ;;  %v11147_v5 = vld [vmem:[#allocation145_spill] sm:$0xff]  ;;  %v11148_v35 = vld [vmem:[#allocation146_spill] sm:$0xff] }
 0x664   :  { %v2457_v11 = vadd.f32 %v2456_v30, %v2440_v49  ;;  %v11149_v49 = vld [vmem:[#allocation147_spill] sm:$0xff]  ;;  %v11150_v30 = vld [vmem:[#allocation148_spill] sm:$0xff] }
 0x666   :  { %7776 = vtanh.f32 %v2457_v11  ;;  %v11152_v11 = vld [vmem:[#allocation150_spill] sm:$0xff] }
 0x667   :  { %7778 = vrcp.f32 %v2451_v1  ;;  %v11151_v1 = vld [vmem:[#allocation149_spill] sm:$0xff] }
 0x670   :  { %v7777_v4 = vpop.eup %7776 }
 0x671   :  { %v2459_v58 = vsub.f32 %v9329_v9, %v7777_v4  ;;  %v7779_v51 = vpop.eup %7778 }
 0x673   :  { %v2460_v20 = vmul.f32 %v7779_v51, %v2459_v58  ;;  %v11154_v58 = vld [vmem:[#allocation152_spill] sm:$0xff]  ;;  %v11155_v51 = vld [vmem:[#allocation153_spill] sm:$0xff] }
 0x675   :  { %v2461_v10 = vadd.f32 %v7777_v4, %v2460_v20  ;;  %v11153_v4 = vld [vmem:[#allocation151_spill] sm:$0xff]  ;;  %v11156_v20 = vld [vmem:[#allocation154_spill] sm:$0xff] }
 0x677   :  { %v2465_v53 = vsub.f32 %v2461_v10, %v9329_v9  ;;  %v11157_v10 = vld [vmem:[#allocation155_spill] sm:$0xff] }
 0x679   :  { %v9505_v59 = vadd.f32 %v2465_v53, %v9329_v9  ;;  %v11143_v9 = vld [vmem:[#allocation141_spill] sm:$0xff]  ;;  %v11158_v53 = vld [vmem:[#allocation156_spill] sm:$0xff] }
 0x67b   :  { %2534 = vmatprep.mubr.f32.mxu0 %v9505_v59  ;;  %2605 = vmatprep.mubr.f32.mxu1 %v9505_v59 }
 0x67c   :  { %2535 = vmatmul.mubr.f32.vlgmr.msra.gmra.mrb[8].mxu0 %v9492_v14  ;;  %2606 = vmatmul.mubr.f32.vlgmr.msra.gmra.mrb[28].mxu1 %v9492_v14 }
 0x67d   :  { %6377 = vmatpush1.bf16.msra.mxu0 %v10818_v0  ;;  %6441 = vmatpush1.bf16.msra.mxu1 %v10819_v54 }
 0x67e   :  { %2676 = vmatprep.mubr.f32.mxu0 %v9505_v59  ;;  %2747 = vmatprep.mubr.f32.mxu1 %v9505_v59 }
 0x67f   :  { %6379 = vmatprep.subr.bf16.mxu0 %v10820_v42  ;;  %6443 = vmatprep.subr.bf16.mxu1 %v10821_v60 }
 0x681   :  { %6381 = vmatpush1.bf16.msra.mxu0 %v10822_v61  ;;  %6445 = vmatpush1.bf16.msra.mxu1 %v10823_v33 }
 0x682   :  { %6383 = vmatprep.subr.bf16.mxu0 %v10925_v26  ;;  %6447 = vmatprep.subr.bf16.mxu1 %v10926_v24 }
 0x685   :  { %6385 = vmatpush1.bf16.msra.mxu0 %v10927_v50  ;;  %6449 = vmatpush1.bf16.msra.mxu1 %v10928_v21 }
 0x686   :  { %6387 = vmatprep.subr.bf16.mxu0 %v10929_v34  ;;  %6451 = vmatprep.subr.bf16.mxu1 %v10930_v38 }
 0x689   :  { %6389 = vmatpush1.bf16.msra.mxu0 %v10931_v28  ;;  %6453 = vmatpush1.bf16.msra.mxu1 %v10932_v32 }
 0x68a   :  { %6391 = vmatprep.subr.bf16.mxu0 %v11034_v19  ;;  %6455 = vmatprep.subr.bf16.mxu1 %v11035_v41 }
 0x68d   :  { %6393 = vmatpush1.bf16.msra.mxu0 %v11036_v55  ;;  %6457 = vmatpush1.bf16.msra.mxu1 %v11037_v62 }
 0x68e   :  { %6395 = vmatprep.subr.bf16.mxu0 %v11038_v27  ;;  %6459 = vmatprep.subr.bf16.mxu1 %v11039_v18 }
 0x691   :  { %6397 = vmatpush1.bf16.msra.mxu0 %v11040_v15  ;;  %6461 = vmatpush1.bf16.msra.mxu1 %v11041_v13 }
 0x692   :  { %6399 = vmatprep.subr.bf16.mxu0 %v11042_v12  ;;  %6463 = vmatprep.subr.bf16.mxu1 %v11043_v7 }
 0x695   :  { %6401 = vmatpush1.bf16.msra.mxu0 %v11044_v6  ;;  %6465 = vmatpush1.bf16.msra.mxu1 %v11045_v8 }
 0x696   :  { %6403 = vmatprep.subr.bf16.mxu0 %v11046_v36  ;;  %6467 = vmatprep.subr.bf16.mxu1 %v11047_v29 }
 0x699   :  { %6405 = vmatpush1.bf16.msra.mxu0 %v11048_v16  ;;  %6469 = vmatpush1.bf16.msra.mxu1 %v11049_v46 }
 0x69a   :  { %6407 = vmatprep.subr.bf16.mxu0 %v11050_v25  ;;  %6471 = vmatprep.subr.bf16.mxu1 %v10950_v2 }
 0x69d   :  { %6409 = vmatpush1.bf16.msra.mxu0 %v10951_v44  ;;  %6473 = vmatpush1.bf16.msra.mxu1 %v10952_v17 }
 0x69e   :  { %6411 = vmatprep.subr.bf16.mxu0 %v10953_v31  ;;  %6475 = vmatprep.subr.bf16.mxu1 %v10954_v40 }
 0x6a1   :  { %6413 = vmatpush1.bf16.msra.mxu0 %v10955_v63  ;;  %6477 = vmatpush1.bf16.msra.mxu1 %v10956_v3 }
 0x6a2   :  { %6415 = vmatprep.subr.bf16.mxu0 %v10957_v39  ;;  %6479 = vmatprep.subr.bf16.mxu1 %v10958_v52 }
 0x6a5   :  { %6417 = vmatpush1.bf16.msra.mxu0 %v11051_v48  ;;  %6481 = vmatpush1.bf16.msra.mxu1 %v10960_v43  ;;  %v11248_v48 = vld [vmem:[#allocation181_spill] sm:$0xff] }
 0x6a6   :  { %6419 = vmatprep.subr.bf16.mxu0 %v11143_v9  ;;  %6483 = vmatprep.subr.bf16.mxu1 %v11144_v47 }
 0x6a9   :  { %6421 = vmatpush1.bf16.msra.mxu0 %v11145_v45  ;;  %6485 = vmatpush1.bf16.msra.mxu1 %v11146_v23 }
 0x6aa   :  { %6423 = vmatprep.subr.bf16.mxu0 %v11147_v5  ;;  %6487 = vmatprep.subr.bf16.mxu1 %v11148_v35  ;;  %v11159_v35 = vld [vmem:[#allocation157_spill] sm:$0xff]  ;;  %v11245_v5 = vld [vmem:[#allocation184_spill] sm:$0xff] }
 0x6ad   :  { %6425 = vmatpush1.bf16.msra.mxu0 %v11149_v49  ;;  %6489 = vmatpush1.bf16.msra.mxu1 %v11150_v30  ;;  %v11160_v49 = vld [vmem:[#allocation158_spill] sm:$0xff]  ;;  %v11161_v30 = vld [vmem:[#allocation159_spill] sm:$0xff] }
 0x6ae   :  { %6427 = vmatprep.subr.bf16.mxu0 %v11151_v1  ;;  %6491 = vmatprep.subr.bf16.mxu1 %v11152_v11  ;;  %v11162_v1 = vld [vmem:[#allocation160_spill] sm:$0xff]  ;;  %v11163_v11 = vld [vmem:[#allocation161_spill] sm:$0xff] }
 0x6b1   :  { %6429 = vmatpush1.bf16.msra.mxu0 %v11153_v4  ;;  %6493 = vmatpush1.bf16.msra.mxu1 %v11154_v58  ;;  %v11164_v4 = vld [vmem:[#allocation34_spill] sm:$0xff] }
 0x6b2   :  { %6431 = vmatprep.subr.bf16.mxu0 %v11155_v51  ;;  %6495 = vmatprep.subr.bf16.mxu1 %v11156_v20  ;;  %v11165_v20 = vld [vmem:[#allocation162_spill] sm:$0xff]  ;;  %v11174_v51 = vld [vmem:[#allocation167_spill] sm:$0xff] }
 0x6b3   :  { %v11176_v58 = vld [vmem:[#allocation46_spill] sm:$0xff] }
 0x6b5   :  { %6433 = vmatpush1.bf16.msra.mxu0 %v11157_v10  ;;  %6497 = vmatpush1.bf16.msra.mxu1 %v11158_v53  ;;  %v11166_v53 = vld [vmem:[#allocation163_spill] sm:$0xff]  ;;  %v11173_v10 = vld [vmem:[#allocation166_spill] sm:$0xff] }
 0x6b6   :  { %6435 = vmatprep.subr.bf16.mxu0 %v11159_v35  ;;  %6499 = vmatprep.subr.bf16.mxu1 %v11160_v49  ;;  %v11167_v35 = vld [vmem:[#allocation36_spill] sm:$0xff]  ;;  %v11168_v49 = vld [vmem:[#allocation38_spill] sm:$0xff] }
 0x6b9   :  { %6437 = vmatpush1.bf16.msra.mxu0 %v11161_v30  ;;  %6501 = vmatpush1.bf16.msra.mxu1 %v11162_v1  ;;  %v11169_v30 = vld [vmem:[#allocation164_spill] sm:$0xff]  ;;  %v11170_v1 = vld [vmem:[#allocation165_spill] sm:$0xff] }
 0x6ba   :  { %6503 = vmatprep.subr.bf16.mxu0 %v11163_v11  ;;  %6599 = vmatprep.subr.bf16.mxu1 %v11164_v4  ;;  %v11171_v11 = vld [vmem:[#allocation40_spill] sm:$0xff]  ;;  %v11172_v4 = vld [vmem:[#allocation42_spill] sm:$0xff] }
 0x6bc   :  { %2677 = vmatmul.mubr.f32.vlgmr.msra.gmra.mrb[28].mxu0 %v9492_v14  ;;  %2748 = vmatmul.mubr.f32.vlgmr.msra.gmra.mrb[30].mxu1 %v9492_v14 }
 0x6bd   :  { %6505 = vmatpush3.bf16.msra.mxu0 %v11165_v20  ;;  %2818 = vmatprep.mubr.f32.mxu0 %v9505_v59  ;;  %v11175_v20 = vld [vmem:[#allocation44_spill] sm:$0xff] }
 0x6be   :  { %6507 = vmatprep.subr.bf16.mxu0 %v11166_v53  ;;  %6601 = vmatpush1.bf16.msra.mxu1 %v11167_v35  ;;  %v11177_v53 = vld [vmem:[#allocation168_spill] sm:$0xff]  ;;  %v11178_v35 = vld [vmem:[#allocation169_spill] sm:$0xff] }
 0x6bf   :  { %6603 = vmatprep.subr.bf16.mxu1 %v11168_v49  ;;  %v11179_v49 = vld [vmem:[#allocation48_spill] sm:$0xff] }
 0x6c1   :  { %6509 = vmatpush3.bf16.msra.mxu0 %v11169_v30  ;;  %v11180_v30 = vld [vmem:[#allocation50_spill] sm:$0xff] }
 0x6c2   :  { %6511 = vmatprep.subr.bf16.mxu0 %v11170_v1  ;;  %6605 = vmatpush1.bf16.msra.mxu1 %v11171_v11  ;;  %v11181_v1 = vld [vmem:[#allocation170_spill] sm:$0xff]  ;;  %v11182_v11 = vld [vmem:[#allocation171_spill] sm:$0xff] }
 0x6c3   :  { %6607 = vmatprep.subr.bf16.mxu1 %v11172_v4  ;;  %v11183_v4 = vld [vmem:[#allocation52_spill] sm:$0xff] }
 0x6c5   :  { %6513 = vmatpush3.bf16.msra.mxu0 %v11173_v10  ;;  %v11184_v10 = vld [vmem:[#allocation54_spill] sm:$0xff] }
 0x6c6   :  { %6515 = vmatprep.subr.bf16.mxu0 %v11174_v51  ;;  %6609 = vmatpush1.bf16.msra.mxu1 %v11175_v20  ;;  %v11185_v51 = vld [vmem:[#allocation172_spill] sm:$0xff]  ;;  %v11186_v20 = vld [vmem:[#allocation173_spill] sm:$0xff] }
 0x6c7   :  { %6611 = vmatprep.subr.bf16.mxu1 %v11176_v58  ;;  %v11187_v58 = vld [vmem:[#allocation56_spill] sm:$0xff] }
 0x6c9   :  { %6517 = vmatpush3.bf16.msra.mxu0 %v11177_v53  ;;  %v11188_v53 = vld [vmem:[#allocation58_spill] sm:$0xff] }
 0x6ca   :  { %6519 = vmatprep.subr.bf16.mxu0 %v11178_v35  ;;  %6613 = vmatpush1.bf16.msra.mxu1 %v11179_v49  ;;  %v11189_v35 = vld [vmem:[#allocation174_spill] sm:$0xff]  ;;  %v11190_v49 = vld [vmem:[#allocation175_spill] sm:$0xff] }
 0x6cb   :  { %6615 = vmatprep.subr.bf16.mxu1 %v11180_v30  ;;  %v11191_v30 = vld [vmem:[#allocation60_spill] sm:$0xff] }
 0x6cd   :  { %6521 = vmatpush3.bf16.msra.mxu0 %v11181_v1  ;;  %v11192_v1 = vld [vmem:[#allocation62_spill] sm:$0xff] }
 0x6ce   :  { %6523 = vmatprep.subr.bf16.mxu0 %v11182_v11  ;;  %6617 = vmatpush1.bf16.msra.mxu1 %v11183_v4  ;;  %v11193_v11 = vld [vmem:[#allocation176_spill] sm:$0xff]  ;;  %v11194_v4 = vld [vmem:[#allocation33_spill] sm:$0xff] }
 0x6cf   :  { %6619 = vmatprep.subr.bf16.mxu1 %v11184_v10  ;;  %v11195_v10 = vld [vmem:[#allocation64_spill] sm:$0xff] }
 0x6d1   :  { %6525 = vmatpush3.bf16.msra.mxu0 %v11185_v51  ;;  %v11196_v51 = vld [vmem:[#allocation66_spill] sm:$0xff] }
 0x6d2   :  { %6527 = vmatprep.subr.bf16.mxu0 %v11186_v20  ;;  %6621 = vmatpush1.bf16.msra.mxu1 %v11187_v58  ;;  %v11197_v58 = vld [vmem:[#allocation35_spill] sm:$0xff]  ;;  %v11204_v20 = vld [vmem:[#allocation74_spill] sm:$0xff] }
 0x6d3   :  { %6623 = vmatprep.subr.bf16.mxu1 %v11188_v53  ;;  %v11198_v53 = vld [vmem:[#allocation37_spill] sm:$0xff] }
 0x6d5   :  { %6529 = vmatpush3.bf16.msra.mxu0 %v11189_v35  ;;  %v11199_v35 = vld [vmem:[#allocation68_spill] sm:$0xff] }
 0x6d6   :  { %6531 = vmatprep.subr.bf16.mxu0 %v11190_v49  ;;  %6625 = vmatpush1.bf16.msra.mxu1 %v11191_v30  ;;  %v11200_v49 = vld [vmem:[#allocation70_spill] sm:$0xff]  ;;  %v11201_v30 = vld [vmem:[#allocation39_spill] sm:$0xff] }
 0x6d7   :  { %6627 = vmatprep.subr.bf16.mxu1 %v11192_v1  ;;  %v11202_v1 = vld [vmem:[#allocation41_spill] sm:$0xff] }
 0x6d9   :  { %6533 = vmatpush3.bf16.msra.mxu0 %v11193_v11  ;;  %v11203_v11 = vld [vmem:[#allocation72_spill] sm:$0xff] }
 0x6da   :  { %6535 = vmatprep.subr.bf16.mxu0 %v11194_v4  ;;  %6629 = vmatpush1.bf16.msra.mxu1 %v11195_v10  ;;  %v11205_v10 = vld [vmem:[#allocation43_spill] sm:$0xff]  ;;  %v11207_v4 = vld [vmem:[#allocation76_spill] sm:$0xff] }
 0x6db   :  { %6631 = vmatprep.subr.bf16.mxu1 %v11196_v51  ;;  %v11206_v51 = vld [vmem:[#allocation45_spill] sm:$0xff] }
 0x6dc   :  { %2819 = vmatmul.mubr.f32.vlgmr.msra.gmra.mrb[30].mxu0 %v9492_v14 }
 0x6dd   :  { %6537 = vmatpush1.bf16.msra.mxu0 %v11197_v58  ;;  %v11208_v58 = vld [vmem:[#allocation78_spill] sm:$0xff] }
 0x6de   :  { %6539 = vmatprep.subr.bf16.mxu0 %v11198_v53  ;;  %6633 = vmatpush1.bf16.msra.mxu1 %v11199_v35  ;;  %v11209_v53 = vld [vmem:[#allocation47_spill] sm:$0xff]  ;;  %v11210_v35 = vld [vmem:[#allocation49_spill] sm:$0xff] }
 0x6df   :  { %6635 = vmatprep.subr.bf16.mxu1 %v11200_v49  ;;  %v11211_v49 = vld [vmem:[#allocation80_spill] sm:$0xff] }
 0x6e1   :  { %6541 = vmatpush1.bf16.msra.mxu0 %v11201_v30  ;;  %v11212_v30 = vld [vmem:[#allocation82_spill] sm:$0xff] }
 0x6e2   :  { %6543 = vmatprep.subr.bf16.mxu0 %v11202_v1  ;;  %6637 = vmatpush1.bf16.msra.mxu1 %v11203_v11  ;;  %v11213_v1 = vld [vmem:[#allocation51_spill] sm:$0xff]  ;;  %v11214_v11 = vld [vmem:[#allocation53_spill] sm:$0xff] }
 0x6e3   :  { %6639 = vmatprep.subr.bf16.mxu1 %v11204_v20  ;;  %v11215_v20 = vld [vmem:[#allocation84_spill] sm:$0xff] }
 0x6e5   :  { %6545 = vmatpush1.bf16.msra.mxu0 %v11205_v10  ;;  %v11216_v10 = vld [vmem:[#allocation86_spill] sm:$0xff] }
 0x6e6   :  { %6547 = vmatprep.subr.bf16.mxu0 %v11206_v51  ;;  %6641 = vmatpush1.bf16.msra.mxu1 %v11207_v4  ;;  %v11217_v51 = vld [vmem:[#allocation55_spill] sm:$0xff]  ;;  %v11218_v4 = vld [vmem:[#allocation57_spill] sm:$0xff] }
 0x6e7   :  { %6643 = vmatprep.subr.bf16.mxu1 %v11208_v58  ;;  %v11219_v58 = vld [vmem:[#allocation88_spill] sm:$0xff] }
 0x6e9   :  { %6549 = vmatpush1.bf16.msra.mxu0 %v11209_v53  ;;  %v11220_v53 = vld [vmem:[#allocation90_spill] sm:$0xff] }
 0x6ea   :  { %6551 = vmatprep.subr.bf16.mxu0 %v11210_v35  ;;  %6645 = vmatpush1.bf16.msra.mxu1 %v11211_v49  ;;  %v11221_v35 = vld [vmem:[#allocation59_spill] sm:$0xff]  ;;  %v11222_v49 = vld [vmem:[#allocation61_spill] sm:$0xff] }
 0x6eb   :  { %6647 = vmatprep.subr.bf16.mxu1 %v11212_v30  ;;  %v11223_v30 = vld [vmem:[#allocation92_spill] sm:$0xff] }
 0x6ed   :  { %6553 = vmatpush1.bf16.msra.mxu0 %v11213_v1  ;;  %v11224_v1 = vld [vmem:[#allocation94_spill] sm:$0xff] }
 0x6ee   :  { %6555 = vmatprep.subr.bf16.mxu0 %v11214_v11  ;;  %6649 = vmatpush1.bf16.msra.mxu1 %v11215_v20  ;;  %v11225_v11 = vld [vmem:[#allocation63_spill] sm:$0xff]  ;;  %v11226_v20 = vld [vmem:[#allocation65_spill] sm:$0xff] }
 0x6ef   :  { %6651 = vmatprep.subr.bf16.mxu1 %v11216_v10  ;;  %v11227_v10 = vld [vmem:[#allocation96_spill] sm:$0xff] }
 0x6f1   :  { %6557 = vmatpush1.bf16.msra.mxu0 %v11217_v51  ;;  %v11228_v51 = vld [vmem:[#allocation97_spill] sm:$0xff] }
 0x6f2   :  { %6559 = vmatprep.subr.bf16.mxu0 %v11218_v4  ;;  %6653 = vmatpush1.bf16.msra.mxu1 %v11219_v58  ;;  %v11229_v4 = vld [vmem:[#allocation67_spill] sm:$0xff]  ;;  %v11230_v58 = vld [vmem:[#allocation69_spill] sm:$0xff] }
 0x6f3   :  { %6655 = vmatprep.subr.bf16.mxu1 %v11220_v53  ;;  %v11231_v53 = vld [vmem:[#allocation71_spill] sm:$0xff] }
 0x6f5   :  { %6561 = vmatpush1.bf16.msra.mxu0 %v11221_v35  ;;  %v11232_v35 = vld [vmem:[#allocation73_spill] sm:$0xff] }
 0x6f6   :  { %6563 = vmatprep.subr.bf16.mxu0 %v11222_v49  ;;  %6657 = vmatpush1.bf16.msra.mxu1 %v11223_v30  ;;  %v11233_v49 = vld [vmem:[#allocation75_spill] sm:$0xff]  ;;  %v11234_v30 = vld [vmem:[#allocation77_spill] sm:$0xff] }
 0x6f7   :  { %6659 = vmatprep.subr.bf16.mxu1 %v11224_v1  ;;  %v11235_v1 = vld [vmem:[#allocation79_spill] sm:$0xff] }
 0x6f9   :  { %6565 = vmatpush1.bf16.msra.mxu0 %v11225_v11  ;;  %v11236_v11 = vld [vmem:[#allocation81_spill] sm:$0xff] }
 0x6fa   :  { %6567 = vmatprep.subr.bf16.mxu0 %v11226_v20  ;;  %6661 = vmatpush1.bf16.msra.mxu1 %v11227_v10  ;;  %v11237_v20 = vld [vmem:[#allocation83_spill] sm:$0xff]  ;;  %v11238_v10 = vld [vmem:[#allocation85_spill] sm:$0xff] }
 0x6fb   :  { %6663 = vmatprep.subr.bf16.mxu1 %v11228_v51  ;;  %v11239_v51 = vld [vmem:[#allocation87_spill] sm:$0xff] }
 0x6fd   :  { %6569 = vmatpush1.bf16.msra.mxu0 %v11229_v4  ;;  %v11240_v4 = vld [vmem:[#allocation89_spill] sm:$0xff] }
 0x6fe   :  { %6571 = vmatprep.subr.bf16.mxu0 %v11230_v58  ;;  %v11241_v58 = vld [vmem:[#allocation91_spill] sm:$0xff] }
 0x701   :  { %6573 = vmatpush1.bf16.msra.mxu0 %v11231_v53  ;;  %v11242_v53 = vld [vmem:[#allocation93_spill] sm:$0xff] }
 0x702   :  { %6575 = vmatprep.subr.bf16.mxu0 %v11232_v35  ;;  %v11243_v35 = vld [vmem:[#allocation95_spill] sm:$0xff] }
 0x705   :  { %6577 = vmatpush1.bf16.msra.mxu0 %v11233_v49  ;;  %v11244_v49 = vld [vmem:[#allocation98_spill] sm:$0xff] }
 0x706   :  { %6579 = vmatprep.subr.bf16.mxu0 %v11234_v30 }
 0x709   :  { %6581 = vmatpush1.bf16.msra.mxu0 %v11235_v1 }
 0x70a   :  { %6583 = vmatprep.subr.bf16.mxu0 %v11236_v11 }
 0x70d   :  { %6585 = vmatpush1.bf16.msra.mxu0 %v11237_v20 }
 0x70e   :  { %6587 = vmatprep.subr.bf16.mxu0 %v11238_v10  ;;  %v11246_v10 = vld [vmem:[#allocation185_spill] sm:$0xff] }
 0x711   :  { %6589 = vmatpush1.bf16.msra.mxu0 %v11239_v51 }
 0x712   :  { %6591 = vmatprep.subr.bf16.mxu0 %v11240_v4 }
 0x715   :  { %6593 = vmatpush1.bf16.msra.mxu0 %v11241_v58  ;;  %v11247_v58 = vld [vmem:[#allocation99_spill] sm:$0xff] }
 0x716   :  { %6595 = vmatprep.subr.bf16.mxu0 %v11242_v53 }
 0x719   :  { %6597 = vmatpush1.bf16.msra.mxu0 %v11243_v35 }
 0x71a   :  { %6727 = vmatprep.subr.bf16.mxu0 %v11244_v49 }
 0x74f   :  { %v2536_v30 = vpop.f32.mrb[8].mxu0  ;;  %v2607_v1 = vpop.f32.mrb[28].mxu1 }
 0x750   :  { %v7654_v11 = vadd.f32 %v2536_v30, %v11245_v5  ;;  %v2538_v23 = vpop.f32.mrb[9].mxu0  ;;  %v2609_v20 = vpop.f32.mrb[29].mxu1  ;;  %v2828_v35 = vadd.f32 %v11247_v58, %v2607_v1 }
 0x751   :  { %v7655_v51 = vadd.f32 %v2538_v23, %v11246_v10 }
 0x752   :  { %v4576_v45 = vmul.f32 -1.442695, %v7654_v11 }
 0x753   :  { %v4577_v47 = vmul.f32 -1.442695, %v7655_v51 }
 0x754   :  { %7780 = vpow2.f32 %v4576_v45 }
 0x755   :  { %7782 = vpow2.f32 %v4577_v47  ;;  %v2849_v47 = vadd.f32 %v2609_v20, %v8977_v22 }
 0x75e   :  { %v7781_v4 = vpop.eup %7780 }
 0x75f   :  { %v2837_v9 = vadd.f32 1.0, %v7781_v4  ;;  %v7783_v53 = vpop.eup %7782 }
 0x760   :  { %v2838_v39 = vadd.f32 1.0, %v7783_v53 }
 0x761   :  { %7784 = vrcp.f32 %v2837_v9 }
 0x76b   :  { %v7785_v43 = vpop.eup %7784 }
 0x76c   :  { %v2843_v49 = vmul.f32 %v7785_v43, %v2828_v35 }
 0x76e   :  { %v2844_v52 = vadd.f32 %v2843_v49, %v11248_v48 }
 0x770   :  { %7786 = vtanh.f32 %v2844_v52 }
 0x771   :  { %7788 = vrcp.f32 %v2838_v39 }
 0x77a   :  { %v7787_v30 = vpop.eup %7786 }
 0x77b   :  { %v2846_v45 = vsub.f32 %v9492_v14, %v7787_v30  ;;  %v7789_v11 = vpop.eup %7788 }
 0x77d   :  { %v2847_v23 = vmul.f32 %v7789_v11, %v2846_v45 }
 0x77f   :  { %v9666_v51 = vadd.f32 %v7787_v30, %v2847_v23 }
 0x78f   :  { %v2678_v9 = vpop.f32.mrb[28].mxu0  ;;  %v2749_v4 = vpop.f32.mrb[30].mxu1 }
 0x790   :  { %v2850_v1 = vadd.f32 %v2678_v9, %v11142_v56  ;;  %v2853_v58 = vadd.f32 %v2849_v47, %v2749_v4  ;;  %v2680_v43 = vpop.f32.mrb[29].mxu0  ;;  %v2751_v35 = vpop.f32.mrb[31].mxu1 }
 0x791   :  { %v2851_v9 = vadd.f32 %v9499_v37, %v2680_v43  ;;  %v11251_v43 = vld [vmem:[#allocation139_spill] sm:$0xff] }
 0x792   :  { %v2854_v48 = vadd.f32 %v2850_v1, %v2751_v35  ;;  %v4578_v49 = vmul.f32 -1.442695, %v2853_v58 }
 0x794   :  { %7790 = vpow2.f32 %v4578_v49  ;;  %v4579_v52 = vmul.f32 -1.442695, %v2854_v48 }
 0x796   :  { %7792 = vpow2.f32 %v4579_v52 }
 0x79e   :  { %v7791_v39 = vpop.eup %7790 }
 0x79f   :  { %v2861_v53 = vadd.f32 1.0, %v7791_v39 }
 0x7a0   :  { %v7793_v11 = vpop.eup %7792 }
 0x7a1   :  { %7794 = vrcp.f32 %v2861_v53  ;;  %v2862_v4 = vadd.f32 1.0, %v7793_v11  ;;  %v11252_v53 = vld [vmem:[#allocation140_spill] sm:$0xff] }
 0x7a2   :  { %v11256_v11 = vld [vmem:[#allocation144_spill] sm:$0xff] }
 0x7ab   :  { %v7795_v23 = vpop.eup %7794 }
 0x7af   :  { %v4791_v14 = vpop.f32.mrb[30].mxu0 }
 0x7b0   :  { %v4792_v30 = vpop.f32.mrb[31].mxu0 }
 0x7b1   :  { %v4793_v45 = vadd.f32 %v4792_v30, %v4791_v14  ;;  %v11253_v14 = vld [vmem:[#allocation141_spill] sm:$0xff]  ;;  %v11254_v30 = vld [vmem:[#allocation142_spill] sm:$0xff] }
 0x7b3   :  { %v2852_v20 = vadd.f32 %v9496_v57, %v4793_v45  ;;  %v11255_v45 = vld [vmem:[#allocation143_spill] sm:$0xff] }
 0x7b5   :  { %v2867_v47 = vmul.f32 %v7795_v23, %v2852_v20  ;;  %v11257_v20 = vld [vmem:[#allocation145_spill] sm:$0xff]  ;;  %v11258_v23 = vld [vmem:[#allocation146_spill] sm:$0xff] }
 0x7b7   :  { %v2868_v56 = vadd.f32 %v2867_v47, %v2851_v9  ;;  %v11259_v9 = vld [vmem:[#allocation147_spill] sm:$0xff]  ;;  %v11260_v47 = vld [vmem:[#allocation148_spill] sm:$0xff] }
 0x7b9   :  { %7796 = vtanh.f32 %v2868_v56  ;;  %v11249_v56 = vld [vmem:[#allocation137_spill] sm:$0xff] }
 0x7ba   :  { %7798 = vrcp.f32 %v2862_v4  ;;  %v11261_v4 = vld [vmem:[#allocation149_spill] sm:$0xff] }
 0x7c3   :  { %v7797_v58 = vpop.eup %7796 }
 0x7c4   :  { %v2870_v1 = vsub.f32 %v9505_v59, %v7797_v58  ;;  %v7799_v35 = vpop.eup %7798 }
 0x7c6   :  { %v2871_v48 = vmul.f32 %v7799_v35, %v2870_v1  ;;  %v11263_v1 = vld [vmem:[#allocation151_spill] sm:$0xff]  ;;  %v11264_v35 = vld [vmem:[#allocation152_spill] sm:$0xff] }
 0x7c8   :  { %v2872_v49 = vadd.f32 %v7797_v58, %v2871_v48  ;;  %v11262_v58 = vld [vmem:[#allocation150_spill] sm:$0xff]  ;;  %v11265_v48 = vld [vmem:[#allocation153_spill] sm:$0xff] }
 0x7ca   :  { %v2876_v39 = vsub.f32 %v2872_v49, %v9505_v59  ;;  %v11266_v49 = vld [vmem:[#allocation154_spill] sm:$0xff] }
 0x7cc   :  { %v9675_v52 = vadd.f32 %v2876_v39, %v9505_v59  ;;  %v11250_v59 = vld [vmem:[#allocation138_spill] sm:$0xff]  ;;  %v11267_v39 = vld [vmem:[#allocation155_spill] sm:$0xff] }
 0x7ce   :  { %2945 = vmatprep.mubr.f32.mxu0 %v9675_v52  ;;  %3016 = vmatprep.mubr.f32.mxu1 %v9675_v52 }
 0x7cf   :  { %2946 = vmatmul.mubr.f32.vlgmr.msra.gmra.mrb[10].mxu0 %v9666_v51  ;;  %3017 = vmatmul.mubr.f32.vlgmr.msra.gmra.mrb[32].mxu1 %v9666_v51 }
 0x7d0   :  { %6665 = vmatpush1.bf16.msra.mxu1 %v10818_v0  ;;  %6729 = vmatpush1.bf16.msra.mxu0 %v10819_v54 }
 0x7d1   :  { %3087 = vmatprep.mubr.f32.mxu1 %v9675_v52  ;;  %3158 = vmatprep.mubr.f32.mxu0 %v9675_v52 }
 0x7d2   :  { %6667 = vmatprep.subr.bf16.mxu1 %v10820_v42  ;;  %6731 = vmatprep.subr.bf16.mxu0 %v10821_v60 }
 0x7d4   :  { %6669 = vmatpush1.bf16.msra.mxu1 %v10822_v61  ;;  %6733 = vmatpush1.bf16.msra.mxu0 %v10823_v33 }
 0x7d5   :  { %6671 = vmatprep.subr.bf16.mxu1 %v10925_v26  ;;  %6735 = vmatprep.subr.bf16.mxu0 %v10926_v24 }
 0x7d8   :  { %6673 = vmatpush1.bf16.msra.mxu1 %v10927_v50  ;;  %6737 = vmatpush1.bf16.msra.mxu0 %v10928_v21 }
 0x7d9   :  { %6675 = vmatprep.subr.bf16.mxu1 %v10929_v34  ;;  %6739 = vmatprep.subr.bf16.mxu0 %v10930_v38 }
 0x7dc   :  { %6677 = vmatpush1.bf16.msra.mxu1 %v10931_v28  ;;  %6741 = vmatpush1.bf16.msra.mxu0 %v10932_v32 }
 0x7dd   :  { %6679 = vmatprep.subr.bf16.mxu1 %v11034_v19  ;;  %6743 = vmatprep.subr.bf16.mxu0 %v11035_v41 }
 0x7e0   :  { %6681 = vmatpush1.bf16.msra.mxu1 %v11036_v55  ;;  %6745 = vmatpush1.bf16.msra.mxu0 %v11037_v62 }
 0x7e1   :  { %6683 = vmatprep.subr.bf16.mxu1 %v11038_v27  ;;  %6747 = vmatprep.subr.bf16.mxu0 %v11039_v18 }
 0x7e4   :  { %6685 = vmatpush1.bf16.msra.mxu1 %v11040_v15  ;;  %6749 = vmatpush1.bf16.msra.mxu0 %v11041_v13 }
 0x7e5   :  { %6687 = vmatprep.subr.bf16.mxu1 %v11042_v12  ;;  %6751 = vmatprep.subr.bf16.mxu0 %v11043_v7 }
 0x7e8   :  { %6689 = vmatpush1.bf16.msra.mxu1 %v11044_v6  ;;  %6753 = vmatpush1.bf16.msra.mxu0 %v11045_v8 }
 0x7e9   :  { %6691 = vmatprep.subr.bf16.mxu1 %v11046_v36  ;;  %6755 = vmatprep.subr.bf16.mxu0 %v11047_v29 }
 0x7ec   :  { %6693 = vmatpush1.bf16.msra.mxu1 %v11048_v16  ;;  %6757 = vmatpush1.bf16.msra.mxu0 %v11049_v46 }
 0x7ed   :  { %6695 = vmatprep.subr.bf16.mxu1 %v11050_v25  ;;  %6759 = vmatprep.subr.bf16.mxu0 %v10950_v2 }
 0x7f0   :  { %6697 = vmatpush1.bf16.msra.mxu1 %v10951_v44  ;;  %6761 = vmatpush1.bf16.msra.mxu0 %v10952_v17 }
 0x7f1   :  { %6699 = vmatprep.subr.bf16.mxu1 %v10953_v31  ;;  %6763 = vmatprep.subr.bf16.mxu0 %v10954_v40 }
 0x7f4   :  { %6701 = vmatpush1.bf16.msra.mxu1 %v10955_v63  ;;  %6765 = vmatpush1.bf16.msra.mxu0 %v10956_v3 }
 0x7f5   :  { %6703 = vmatprep.subr.bf16.mxu1 %v11249_v56  ;;  %6767 = vmatprep.subr.bf16.mxu0 %v11250_v59 }
 0x7f8   :  { %6705 = vmatpush1.bf16.msra.mxu1 %v11251_v43  ;;  %6769 = vmatpush1.bf16.msra.mxu0 %v11252_v53  ;;  %v11356_v53 = vld [vmem:[#allocation180_spill] sm:$0xff] }
 0x7f9   :  { %6707 = vmatprep.subr.bf16.mxu1 %v11253_v14  ;;  %6771 = vmatprep.subr.bf16.mxu0 %v11254_v30 }
 0x7fc   :  { %6709 = vmatpush1.bf16.msra.mxu1 %v11255_v45  ;;  %6773 = vmatpush1.bf16.msra.mxu0 %v11256_v11 }
 0x7fd   :  { %6711 = vmatprep.subr.bf16.mxu1 %v11257_v20  ;;  %6775 = vmatprep.subr.bf16.mxu0 %v11258_v23  ;;  %v11268_v20 = vld [vmem:[#allocation156_spill] sm:$0xff]  ;;  %v11269_v23 = vld [vmem:[#allocation157_spill] sm:$0xff] }
 0x800   :  { %6713 = vmatpush1.bf16.msra.mxu1 %v11259_v9  ;;  %6777 = vmatpush1.bf16.msra.mxu0 %v11260_v47  ;;  %v11270_v9 = vld [vmem:[#allocation158_spill] sm:$0xff]  ;;  %v11271_v47 = vld [vmem:[#allocation159_spill] sm:$0xff] }
 0x801   :  { %6715 = vmatprep.subr.bf16.mxu1 %v11261_v4  ;;  %6779 = vmatprep.subr.bf16.mxu0 %v11262_v58  ;;  %v11272_v4 = vld [vmem:[#allocation160_spill] sm:$0xff]  ;;  %v11273_v58 = vld [vmem:[#allocation161_spill] sm:$0xff] }
 0x804   :  { %6717 = vmatpush1.bf16.msra.mxu1 %v11263_v1  ;;  %6781 = vmatpush1.bf16.msra.mxu0 %v11264_v35  ;;  %v11274_v1 = vld [vmem:[#allocation33_spill] sm:$0xff] }
 0x805   :  { %6719 = vmatprep.subr.bf16.mxu1 %v11265_v48  ;;  %6783 = vmatprep.subr.bf16.mxu0 %v11266_v49  ;;  %v11275_v49 = vld [vmem:[#allocation162_spill] sm:$0xff]  ;;  %v11284_v48 = vld [vmem:[#allocation167_spill] sm:$0xff]  ;;  %v11286_v35 = vld [vmem:[#allocation45_spill] sm:$0xff] }
 0x808   :  { %6721 = vmatpush1.bf16.msra.mxu1 %v11267_v39  ;;  %6785 = vmatpush1.bf16.msra.mxu0 %v11268_v20  ;;  %v11276_v20 = vld [vmem:[#allocation163_spill] sm:$0xff]  ;;  %v11283_v39 = vld [vmem:[#allocation166_spill] sm:$0xff] }
 0x809   :  { %6723 = vmatprep.subr.bf16.mxu1 %v11269_v23  ;;  %6787 = vmatprep.subr.bf16.mxu0 %v11270_v9  ;;  %v11277_v23 = vld [vmem:[#allocation35_spill] sm:$0xff]  ;;  %v11278_v9 = vld [vmem:[#allocation37_spill] sm:$0xff] }
 0x80c   :  { %6725 = vmatpush1.bf16.msra.mxu1 %v11271_v47  ;;  %6789 = vmatpush1.bf16.msra.mxu0 %v11272_v4  ;;  %v11279_v47 = vld [vmem:[#allocation164_spill] sm:$0xff]  ;;  %v11280_v4 = vld [vmem:[#allocation165_spill] sm:$0xff] }
 0x80d   :  { %6791 = vmatprep.subr.bf16.mxu1 %v11273_v58  ;;  %6823 = vmatprep.subr.bf16.mxu0 %v11274_v1  ;;  %v11281_v58 = vld [vmem:[#allocation39_spill] sm:$0xff]  ;;  %v11282_v1 = vld [vmem:[#allocation41_spill] sm:$0xff] }
 0x80f   :  { %3088 = vmatmul.mubr.f32.vlgmr.msra.gmra.mrb[34].mxu1 %v9666_v51  ;;  %3159 = vmatmul.mubr.f32.vlgmr.msra.gmra.mrb[32].mxu0 %v9666_v51 }
 0x810   :  { %6793 = vmatpush3.bf16.msra.mxu1 %v11275_v49  ;;  %3229 = vmatprep.mubr.f32.mxu1 %v9675_v52  ;;  %v11285_v49 = vld [vmem:[#allocation43_spill] sm:$0xff] }
 0x811   :  { %6795 = vmatprep.subr.bf16.mxu1 %v11276_v20  ;;  %6825 = vmatpush1.bf16.msra.mxu0 %v11277_v23  ;;  %v11287_v20 = vld [vmem:[#allocation168_spill] sm:$0xff]  ;;  %v11288_v23 = vld [vmem:[#allocation169_spill] sm:$0xff] }
 0x812   :  { %6827 = vmatprep.subr.bf16.mxu0 %v11278_v9  ;;  %v11289_v9 = vld [vmem:[#allocation47_spill] sm:$0xff] }
 0x814   :  { %6797 = vmatpush3.bf16.msra.mxu1 %v11279_v47  ;;  %v11290_v47 = vld [vmem:[#allocation49_spill] sm:$0xff] }
 0x815   :  { %6799 = vmatprep.subr.bf16.mxu1 %v11280_v4  ;;  %6829 = vmatpush1.bf16.msra.mxu0 %v11281_v58  ;;  %v11291_v4 = vld [vmem:[#allocation170_spill] sm:$0xff]  ;;  %v11292_v58 = vld [vmem:[#allocation171_spill] sm:$0xff] }
 0x816   :  { %6831 = vmatprep.subr.bf16.mxu0 %v11282_v1  ;;  %v11293_v1 = vld [vmem:[#allocation51_spill] sm:$0xff] }
 0x818   :  { %6801 = vmatpush3.bf16.msra.mxu1 %v11283_v39  ;;  %v11294_v39 = vld [vmem:[#allocation53_spill] sm:$0xff] }
 0x819   :  { %6803 = vmatprep.subr.bf16.mxu1 %v11284_v48  ;;  %6833 = vmatpush1.bf16.msra.mxu0 %v11285_v49  ;;  %v11295_v48 = vld [vmem:[#allocation172_spill] sm:$0xff]  ;;  %v11296_v49 = vld [vmem:[#allocation173_spill] sm:$0xff] }
 0x81a   :  { %6835 = vmatprep.subr.bf16.mxu0 %v11286_v35  ;;  %v11297_v35 = vld [vmem:[#allocation55_spill] sm:$0xff] }
 0x81c   :  { %6805 = vmatpush3.bf16.msra.mxu1 %v11287_v20  ;;  %v11298_v20 = vld [vmem:[#allocation57_spill] sm:$0xff] }
 0x81d   :  { %6807 = vmatprep.subr.bf16.mxu1 %v11288_v23  ;;  %6837 = vmatpush1.bf16.msra.mxu0 %v11289_v9  ;;  %v11299_v23 = vld [vmem:[#allocation174_spill] sm:$0xff]  ;;  %v11300_v9 = vld [vmem:[#allocation175_spill] sm:$0xff] }
 0x81e   :  { %6839 = vmatprep.subr.bf16.mxu0 %v11290_v47  ;;  %v11301_v47 = vld [vmem:[#allocation59_spill] sm:$0xff] }
 0x820   :  { %6809 = vmatpush3.bf16.msra.mxu1 %v11291_v4  ;;  %v11302_v4 = vld [vmem:[#allocation61_spill] sm:$0xff] }
 0x821   :  { %6811 = vmatprep.subr.bf16.mxu1 %v11292_v58  ;;  %6841 = vmatpush1.bf16.msra.mxu0 %v11293_v1  ;;  %v11303_v58 = vld [vmem:[#allocation176_spill] sm:$0xff]  ;;  %v11304_v1 = vld [vmem:[#allocation34_spill] sm:$0xff] }
 0x822   :  { %6843 = vmatprep.subr.bf16.mxu0 %v11294_v39  ;;  %v11305_v39 = vld [vmem:[#allocation63_spill] sm:$0xff] }
 0x824   :  { %6813 = vmatpush3.bf16.msra.mxu1 %v11295_v48  ;;  %v11306_v48 = vld [vmem:[#allocation65_spill] sm:$0xff] }
 0x825   :  { %6815 = vmatprep.subr.bf16.mxu1 %v11296_v49  ;;  %6845 = vmatpush1.bf16.msra.mxu0 %v11297_v35  ;;  %v11307_v35 = vld [vmem:[#allocation36_spill] sm:$0xff]  ;;  %v11314_v49 = vld [vmem:[#allocation73_spill] sm:$0xff] }
 0x826   :  { %6847 = vmatprep.subr.bf16.mxu0 %v11298_v20  ;;  %v11308_v20 = vld [vmem:[#allocation38_spill] sm:$0xff] }
 0x828   :  { %6817 = vmatpush3.bf16.msra.mxu1 %v11299_v23  ;;  %v11309_v23 = vld [vmem:[#allocation67_spill] sm:$0xff] }
 0x829   :  { %6819 = vmatprep.subr.bf16.mxu1 %v11300_v9  ;;  %6849 = vmatpush1.bf16.msra.mxu0 %v11301_v47  ;;  %v11310_v9 = vld [vmem:[#allocation69_spill] sm:$0xff]  ;;  %v11311_v47 = vld [vmem:[#allocation40_spill] sm:$0xff] }
 0x82a   :  { %6851 = vmatprep.subr.bf16.mxu0 %v11302_v4  ;;  %v11312_v4 = vld [vmem:[#allocation42_spill] sm:$0xff] }
 0x82c   :  { %6821 = vmatpush3.bf16.msra.mxu1 %v11303_v58  ;;  %v11313_v58 = vld [vmem:[#allocation71_spill] sm:$0xff] }
 0x82d   :  { %6887 = vmatprep.subr.bf16.mxu1 %v11304_v1  ;;  %6853 = vmatpush1.bf16.msra.mxu0 %v11305_v39  ;;  %v11315_v39 = vld [vmem:[#allocation44_spill] sm:$0xff]  ;;  %v11317_v1 = vld [vmem:[#allocation75_spill] sm:$0xff] }
 0x82e   :  { %6855 = vmatprep.subr.bf16.mxu0 %v11306_v48  ;;  %v11316_v48 = vld [vmem:[#allocation46_spill] sm:$0xff] }
 0x82f   :  { %3230 = vmatmul.mubr.f32.vlgmr.msra.gmra.mrb[36].mxu1 %v9666_v51 }
 0x830   :  { %6889 = vmatpush1.bf16.msra.mxu1 %v11307_v35  ;;  %v11318_v35 = vld [vmem:[#allocation77_spill] sm:$0xff] }
 0x831   :  { %6891 = vmatprep.subr.bf16.mxu1 %v11308_v20  ;;  %6857 = vmatpush1.bf16.msra.mxu0 %v11309_v23  ;;  %v11319_v20 = vld [vmem:[#allocation48_spill] sm:$0xff]  ;;  %v11320_v23 = vld [vmem:[#allocation50_spill] sm:$0xff] }
 0x832   :  { %6859 = vmatprep.subr.bf16.mxu0 %v11310_v9  ;;  %v11321_v9 = vld [vmem:[#allocation79_spill] sm:$0xff] }
 0x834   :  { %6893 = vmatpush1.bf16.msra.mxu1 %v11311_v47  ;;  %v11322_v47 = vld [vmem:[#allocation81_spill] sm:$0xff] }
 0x835   :  { %6895 = vmatprep.subr.bf16.mxu1 %v11312_v4  ;;  %6861 = vmatpush1.bf16.msra.mxu0 %v11313_v58  ;;  %v11323_v4 = vld [vmem:[#allocation52_spill] sm:$0xff]  ;;  %v11324_v58 = vld [vmem:[#allocation54_spill] sm:$0xff] }
 0x836   :  { %6863 = vmatprep.subr.bf16.mxu0 %v11314_v49  ;;  %v11325_v49 = vld [vmem:[#allocation83_spill] sm:$0xff] }
 0x838   :  { %6897 = vmatpush1.bf16.msra.mxu1 %v11315_v39  ;;  %v11326_v39 = vld [vmem:[#allocation85_spill] sm:$0xff] }
 0x839   :  { %6899 = vmatprep.subr.bf16.mxu1 %v11316_v48  ;;  %6865 = vmatpush1.bf16.msra.mxu0 %v11317_v1  ;;  %v11327_v48 = vld [vmem:[#allocation56_spill] sm:$0xff]  ;;  %v11328_v1 = vld [vmem:[#allocation58_spill] sm:$0xff] }
 0x83a   :  { %6867 = vmatprep.subr.bf16.mxu0 %v11318_v35  ;;  %v11329_v35 = vld [vmem:[#allocation87_spill] sm:$0xff] }
 0x83c   :  { %6901 = vmatpush1.bf16.msra.mxu1 %v11319_v20  ;;  %v11330_v20 = vld [vmem:[#allocation89_spill] sm:$0xff] }
 0x83d   :  { %6903 = vmatprep.subr.bf16.mxu1 %v11320_v23  ;;  %6869 = vmatpush1.bf16.msra.mxu0 %v11321_v9  ;;  %v11331_v23 = vld [vmem:[#allocation60_spill] sm:$0xff]  ;;  %v11332_v9 = vld [vmem:[#allocation62_spill] sm:$0xff] }
 0x83e   :  { %6871 = vmatprep.subr.bf16.mxu0 %v11322_v47  ;;  %v11333_v47 = vld [vmem:[#allocation91_spill] sm:$0xff] }
 0x840   :  { %6905 = vmatpush1.bf16.msra.mxu1 %v11323_v4  ;;  %v11334_v4 = vld [vmem:[#allocation93_spill] sm:$0xff] }
 0x841   :  { %6907 = vmatprep.subr.bf16.mxu1 %v11324_v58  ;;  %6873 = vmatpush1.bf16.msra.mxu0 %v11325_v49  ;;  %v11335_v58 = vld [vmem:[#allocation64_spill] sm:$0xff]  ;;  %v11336_v49 = vld [vmem:[#allocation66_spill] sm:$0xff] }
 0x842   :  { %6875 = vmatprep.subr.bf16.mxu0 %v11326_v39  ;;  %v11337_v39 = vld [vmem:[#allocation95_spill] sm:$0xff] }
 0x844   :  { %6909 = vmatpush1.bf16.msra.mxu1 %v11327_v48  ;;  %v11338_v48 = vld [vmem:[#allocation97_spill] sm:$0xff] }
 0x845   :  { %6911 = vmatprep.subr.bf16.mxu1 %v11328_v1  ;;  %6877 = vmatpush1.bf16.msra.mxu0 %v11329_v35  ;;  %v11339_v1 = vld [vmem:[#allocation68_spill] sm:$0xff]  ;;  %v11340_v35 = vld [vmem:[#allocation70_spill] sm:$0xff] }
 0x846   :  { %6879 = vmatprep.subr.bf16.mxu0 %v11330_v20  ;;  %v11341_v20 = vld [vmem:[#allocation72_spill] sm:$0xff] }
 0x848   :  { %6913 = vmatpush1.bf16.msra.mxu1 %v11331_v23  ;;  %v11342_v23 = vld [vmem:[#allocation74_spill] sm:$0xff] }
 0x849   :  { %6915 = vmatprep.subr.bf16.mxu1 %v11332_v9  ;;  %6881 = vmatpush1.bf16.msra.mxu0 %v11333_v47  ;;  %v11343_v9 = vld [vmem:[#allocation76_spill] sm:$0xff]  ;;  %v11344_v47 = vld [vmem:[#allocation78_spill] sm:$0xff] }
 0x84a   :  { %6883 = vmatprep.subr.bf16.mxu0 %v11334_v4  ;;  %v11345_v4 = vld [vmem:[#allocation80_spill] sm:$0xff] }
 0x84c   :  { %6917 = vmatpush1.bf16.msra.mxu1 %v11335_v58  ;;  %v11346_v58 = vld [vmem:[#allocation82_spill] sm:$0xff] }
 0x84d   :  { %6919 = vmatprep.subr.bf16.mxu1 %v11336_v49  ;;  %6885 = vmatpush1.bf16.msra.mxu0 %v11337_v39  ;;  %v11347_v49 = vld [vmem:[#allocation84_spill] sm:$0xff]  ;;  %v11348_v39 = vld [vmem:[#allocation86_spill] sm:$0xff] }
 0x84e   :  { %6951 = vmatprep.subr.bf16.mxu0 %v11338_v48  ;;  %v11349_v48 = vld [vmem:[#allocation88_spill] sm:$0xff] }
 0x850   :  { %6921 = vmatpush1.bf16.msra.mxu1 %v11339_v1  ;;  %v11350_v1 = vld [vmem:[#allocation90_spill] sm:$0xff] }
 0x851   :  { %6923 = vmatprep.subr.bf16.mxu1 %v11340_v35  ;;  %v11351_v35 = vld [vmem:[#allocation92_spill] sm:$0xff] }
 0x854   :  { %6925 = vmatpush1.bf16.msra.mxu1 %v11341_v20  ;;  %v11352_v20 = vld [vmem:[#allocation94_spill] sm:$0xff] }
 0x855   :  { %6927 = vmatprep.subr.bf16.mxu1 %v11342_v23  ;;  %v11353_v23 = vld [vmem:[#allocation96_spill] sm:$0xff] }
 0x858   :  { %6929 = vmatpush1.bf16.msra.mxu1 %v11343_v9  ;;  %v11354_v9 = vld [vmem:[#allocation98_spill] sm:$0xff] }
 0x859   :  { %6931 = vmatprep.subr.bf16.mxu1 %v11344_v47 }
 0x85c   :  { %6933 = vmatpush1.bf16.msra.mxu1 %v11345_v4 }
 0x85d   :  { %6935 = vmatprep.subr.bf16.mxu1 %v11346_v58 }
 0x860   :  { %6937 = vmatpush1.bf16.msra.mxu1 %v11347_v49 }
 0x861   :  { %6939 = vmatprep.subr.bf16.mxu1 %v11348_v39 }
 0x864   :  { %6941 = vmatpush1.bf16.msra.mxu1 %v11349_v48 }
 0x865   :  { %6943 = vmatprep.subr.bf16.mxu1 %v11350_v1 }
 0x868   :  { %6945 = vmatpush1.bf16.msra.mxu1 %v11351_v35  ;;  %v11355_v35 = vld [vmem:[#allocation99_spill] sm:$0xff] }
 0x869   :  { %6947 = vmatprep.subr.bf16.mxu1 %v11352_v20 }
 0x86c   :  { %6949 = vmatpush1.bf16.msra.mxu1 %v11353_v23 }
 0x86d   :  { %7015 = vmatprep.subr.bf16.mxu1 %v11354_v9 }
 0x8a2   :  { %v2947_v47 = vpop.f32.mrb[10].mxu0  ;;  %v3018_v4 = vpop.f32.mrb[32].mxu1 }
 0x8a3   :  { %v7656_v58 = vadd.f32 %v2947_v47, %v11245_v5  ;;  %v2949_v11 = vpop.f32.mrb[11].mxu0  ;;  %v3020_v49 = vpop.f32.mrb[33].mxu1  ;;  %v3239_v23 = vadd.f32 %v11355_v35, %v3018_v4 }
 0x8a4   :  { %v7657_v48 = vadd.f32 %v2949_v11, %v11246_v10  ;;  %v11357_v10 = vld [vmem:[#allocation187_spill] sm:$0xff] }
 0x8a5   :  { %v4580_v45 = vmul.f32 -1.442695, %v7656_v58 }
 0x8a6   :  { %v4581_v39 = vmul.f32 -1.442695, %v7657_v48 }
 0x8a7   :  { %7800 = vpow2.f32 %v4580_v45 }
 0x8a8   :  { %7802 = vpow2.f32 %v4581_v39 }
 0x8b1   :  { %v7801_v1 = vpop.eup %7800 }
 0x8b2   :  { %v3248_v30 = vadd.f32 1.0, %v7801_v1  ;;  %v7803_v20 = vpop.eup %7802  ;;  %v3260_v1 = vadd.f32 %v3020_v49, %v8977_v22 }
 0x8b3   :  { %v3249_v59 = vadd.f32 1.0, %v7803_v20 }
 0x8b4   :  { %7804 = vrcp.f32 %v3248_v30 }
 0x8be   :  { %v7805_v14 = vpop.eup %7804 }
 0x8bf   :  { %v3254_v9 = vmul.f32 %v7805_v14, %v3239_v23 }
 0x8c1   :  { %v3255_v43 = vadd.f32 %v3254_v9, %v11356_v53 }
 0x8c3   :  { %7806 = vtanh.f32 %v3255_v43 }
 0x8c4   :  { %7808 = vrcp.f32 %v3249_v59 }
 0x8cd   :  { %v7807_v47 = vpop.eup %7806 }
 0x8ce   :  { %v3257_v45 = vsub.f32 %v9666_v51, %v7807_v47  ;;  %v7809_v58 = vpop.eup %7808 }
 0x8d0   :  { %v3258_v11 = vmul.f32 %v7809_v58, %v3257_v45 }
 0x8d2   :  { %v9836_v48 = vadd.f32 %v7807_v47, %v3258_v11 }
 0x8e2   :  { %v3089_v30 = vpop.f32.mrb[34].mxu1  ;;  %v3160_v39 = vpop.f32.mrb[32].mxu0 }
 0x8e3   :  { %v3261_v4 = vadd.f32 %v3089_v30, %v11357_v10  ;;  %v3264_v35 = vadd.f32 %v3260_v1, %v3160_v39  ;;  %v3091_v14 = vpop.f32.mrb[35].mxu1  ;;  %v3162_v23 = vpop.f32.mrb[33].mxu0 }
 0x8e4   :  { %v3262_v30 = vadd.f32 %v9499_v37, %v3091_v14  ;;  %v11359_v37 = vld [vmem:[#allocation139_spill] sm:$0xff]  ;;  %v11362_v14 = vld [vmem:[#allocation142_spill] sm:$0xff] }
 0x8e5   :  { %v3265_v53 = vadd.f32 %v3261_v4, %v3162_v23  ;;  %v4582_v20 = vmul.f32 -1.442695, %v3264_v35 }
 0x8e7   :  { %7810 = vpow2.f32 %v4582_v20  ;;  %v4583_v43 = vmul.f32 -1.442695, %v3265_v53 }
 0x8e9   :  { %7812 = vpow2.f32 %v4583_v43 }
 0x8f1   :  { %v7811_v59 = vpop.eup %7810 }
 0x8f2   :  { %v3272_v9 = vadd.f32 1.0, %v7811_v59 }
 0x8f3   :  { %v7813_v58 = vpop.eup %7812 }
 0x8f4   :  { %7814 = vrcp.f32 %v3272_v9  ;;  %v3273_v39 = vadd.f32 1.0, %v7813_v58  ;;  %v11363_v9 = vld [vmem:[#allocation143_spill] sm:$0xff] }
 0x8f5   :  { %v11367_v58 = vld [vmem:[#allocation147_spill] sm:$0xff] }
 0x8fe   :  { %v7815_v11 = vpop.eup %7814 }
 0x902   :  { %v4826_v51 = vpop.f32.mrb[36].mxu1 }
 0x903   :  { %v4827_v47 = vpop.f32.mrb[37].mxu1 }
 0x904   :  { %v4828_v45 = vadd.f32 %v4827_v47, %v4826_v51  ;;  %v11364_v51 = vld [vmem:[#allocation144_spill] sm:$0xff]  ;;  %v11365_v47 = vld [vmem:[#allocation145_spill] sm:$0xff] }
 0x906   :  { %v3263_v49 = vadd.f32 %v9496_v57, %v4828_v45  ;;  %v11358_v57 = vld [vmem:[#allocation138_spill] sm:$0xff] }
 0x907   :  { %v11366_v45 = vld [vmem:[#allocation146_spill] sm:$0xff] }
 0x908   :  { %v3278_v1 = vmul.f32 %v7815_v11, %v3263_v49  ;;  %v11368_v49 = vld [vmem:[#allocation148_spill] sm:$0xff]  ;;  %v11369_v11 = vld [vmem:[#allocation149_spill] sm:$0xff] }
 0x90a   :  { %v3279_v10 = vadd.f32 %v3278_v1, %v3262_v30  ;;  %v11370_v30 = vld [vmem:[#allocation150_spill] sm:$0xff]  ;;  %v11371_v1 = vld [vmem:[#allocation151_spill] sm:$0xff] }
 0x90c   :  { %7816 = vtanh.f32 %v3279_v10  ;;  %v11360_v10 = vld [vmem:[#allocation140_spill] sm:$0xff] }
 0x90d   :  { %7818 = vrcp.f32 %v3273_v39  ;;  %v11372_v39 = vld [vmem:[#allocation152_spill] sm:$0xff] }
 0x916   :  { %v7817_v4 = vpop.eup %7816 }
 0x917   :  { %v3281_v35 = vsub.f32 %v9675_v52, %v7817_v4  ;;  %v7819_v23 = vpop.eup %7818 }
 0x919   :  { %v3282_v53 = vmul.f32 %v7819_v23, %v3281_v35  ;;  %v11374_v35 = vld [vmem:[#allocation154_spill] sm:$0xff]  ;;  %v11375_v23 = vld [vmem:[#allocation155_spill] sm:$0xff] }
 0x91b   :  { %v3283_v20 = vadd.f32 %v7817_v4, %v3282_v53  ;;  %v11373_v4 = vld [vmem:[#allocation153_spill] sm:$0xff]  ;;  %v11376_v53 = vld [vmem:[#allocation156_spill] sm:$0xff] }
 0x91d   :  { %v3287_v59 = vsub.f32 %v3283_v20, %v9675_v52  ;;  %v11377_v20 = vld [vmem:[#allocation157_spill] sm:$0xff] }
 0x91f   :  { %v9845_v43 = vadd.f32 %v3287_v59, %v9675_v52  ;;  %v11361_v52 = vld [vmem:[#allocation141_spill] sm:$0xff]  ;;  %v11378_v59 = vld [vmem:[#allocation158_spill] sm:$0xff] }
 0x921   :  { %3356 = vmatprep.mubr.f32.mxu0 %v9845_v43  ;;  %3427 = vmatprep.mubr.f32.mxu1 %v9845_v43 }
 0x922   :  { %3357 = vmatmul.mubr.f32.vlgmr.msra.gmra.mrb[12].mxu0 %v9836_v48  ;;  %3428 = vmatmul.mubr.f32.vlgmr.msra.gmra.mrb[38].mxu1 %v9836_v48 }
 0x923   :  { %6953 = vmatpush1.bf16.msra.mxu0 %v10818_v0  ;;  %7017 = vmatpush1.bf16.msra.mxu1 %v10819_v54 }
 0x924   :  { %3498 = vmatprep.mubr.f32.mxu0 %v9845_v43  ;;  %3569 = vmatprep.mubr.f32.mxu1 %v9845_v43 }
 0x925   :  { %6955 = vmatprep.subr.bf16.mxu0 %v10820_v42  ;;  %7019 = vmatprep.subr.bf16.mxu1 %v10821_v60 }
 0x927   :  { %6957 = vmatpush1.bf16.msra.mxu0 %v10822_v61  ;;  %7021 = vmatpush1.bf16.msra.mxu1 %v10823_v33 }
 0x928   :  { %6959 = vmatprep.subr.bf16.mxu0 %v10925_v26  ;;  %7023 = vmatprep.subr.bf16.mxu1 %v10926_v24 }
 0x92b   :  { %6961 = vmatpush1.bf16.msra.mxu0 %v10927_v50  ;;  %7025 = vmatpush1.bf16.msra.mxu1 %v10928_v21 }
 0x92c   :  { %6963 = vmatprep.subr.bf16.mxu0 %v10929_v34  ;;  %7027 = vmatprep.subr.bf16.mxu1 %v10930_v38 }
 0x92f   :  { %6965 = vmatpush1.bf16.msra.mxu0 %v10931_v28  ;;  %7029 = vmatpush1.bf16.msra.mxu1 %v10932_v32 }
 0x930   :  { %6967 = vmatprep.subr.bf16.mxu0 %v11034_v19  ;;  %7031 = vmatprep.subr.bf16.mxu1 %v11035_v41 }
 0x933   :  { %6969 = vmatpush1.bf16.msra.mxu0 %v11036_v55  ;;  %7033 = vmatpush1.bf16.msra.mxu1 %v11037_v62 }
 0x934   :  { %6971 = vmatprep.subr.bf16.mxu0 %v11038_v27  ;;  %7035 = vmatprep.subr.bf16.mxu1 %v11039_v18 }
 0x937   :  { %6973 = vmatpush1.bf16.msra.mxu0 %v11040_v15  ;;  %7037 = vmatpush1.bf16.msra.mxu1 %v11041_v13 }
 0x938   :  { %6975 = vmatprep.subr.bf16.mxu0 %v11042_v12  ;;  %7039 = vmatprep.subr.bf16.mxu1 %v11043_v7 }
 0x93b   :  { %6977 = vmatpush1.bf16.msra.mxu0 %v11044_v6  ;;  %7041 = vmatpush1.bf16.msra.mxu1 %v11045_v8 }
 0x93c   :  { %6979 = vmatprep.subr.bf16.mxu0 %v11046_v36  ;;  %7043 = vmatprep.subr.bf16.mxu1 %v11047_v29 }
 0x93f   :  { %6981 = vmatpush1.bf16.msra.mxu0 %v11048_v16  ;;  %7045 = vmatpush1.bf16.msra.mxu1 %v11049_v46 }
 0x940   :  { %6983 = vmatprep.subr.bf16.mxu0 %v11050_v25  ;;  %7047 = vmatprep.subr.bf16.mxu1 %v10950_v2 }
 0x943   :  { %6985 = vmatpush1.bf16.msra.mxu0 %v10951_v44  ;;  %7049 = vmatpush1.bf16.msra.mxu1 %v10952_v17 }
 0x944   :  { %6987 = vmatprep.subr.bf16.mxu0 %v10953_v31  ;;  %7051 = vmatprep.subr.bf16.mxu1 %v10954_v40 }
 0x947   :  { %6989 = vmatpush1.bf16.msra.mxu0 %v10955_v63  ;;  %7053 = vmatpush1.bf16.msra.mxu1 %v10956_v3 }
 0x948   :  { %6991 = vmatprep.subr.bf16.mxu0 %v11249_v56  ;;  %7055 = vmatprep.subr.bf16.mxu1 %v11358_v57 }
 0x94b   :  { %6993 = vmatpush1.bf16.msra.mxu0 %v11359_v37  ;;  %7057 = vmatpush1.bf16.msra.mxu1 %v11360_v10 }
 0x94c   :  { %6995 = vmatprep.subr.bf16.mxu0 %v11361_v52  ;;  %7059 = vmatprep.subr.bf16.mxu1 %v11362_v14  ;;  %v11465_v14 = vld [vmem:[#allocation183_spill] sm:$0xff] }
 0x94d   :  { %v11466_v52 = vld [vmem:[#allocation187_spill] sm:$0xff] }
 0x94f   :  { %6997 = vmatpush1.bf16.msra.mxu0 %v11363_v9  ;;  %7061 = vmatpush1.bf16.msra.mxu1 %v11364_v51 }
 0x950   :  { %6999 = vmatprep.subr.bf16.mxu0 %v11365_v47  ;;  %7063 = vmatprep.subr.bf16.mxu1 %v11366_v45 }
 0x953   :  { %7001 = vmatpush1.bf16.msra.mxu0 %v11367_v58  ;;  %7065 = vmatpush1.bf16.msra.mxu1 %v11368_v49  ;;  %v11379_v49 = vld [vmem:[#allocation159_spill] sm:$0xff] }
 0x954   :  { %7003 = vmatprep.subr.bf16.mxu0 %v11369_v11  ;;  %7067 = vmatprep.subr.bf16.mxu1 %v11370_v30  ;;  %v11380_v11 = vld [vmem:[#allocation160_spill] sm:$0xff]  ;;  %v11381_v30 = vld [vmem:[#allocation161_spill] sm:$0xff] }
 0x957   :  { %7005 = vmatpush1.bf16.msra.mxu0 %v11371_v1  ;;  %7069 = vmatpush1.bf16.msra.mxu1 %v11372_v39  ;;  %v11382_v1 = vld [vmem:[#allocation34_spill] sm:$0xff] }
 0x958   :  { %7007 = vmatprep.subr.bf16.mxu0 %v11373_v4  ;;  %7071 = vmatprep.subr.bf16.mxu1 %v11374_v35  ;;  %v11383_v35 = vld [vmem:[#allocation162_spill] sm:$0xff]  ;;  %v11392_v4 = vld [vmem:[#allocation167_spill] sm:$0xff] }
 0x959   :  { %v11394_v39 = vld [vmem:[#allocation46_spill] sm:$0xff] }
 0x95b   :  { %7009 = vmatpush1.bf16.msra.mxu0 %v11375_v23  ;;  %7073 = vmatpush1.bf16.msra.mxu1 %v11376_v53  ;;  %v11384_v53 = vld [vmem:[#allocation163_spill] sm:$0xff]  ;;  %v11391_v23 = vld [vmem:[#allocation166_spill] sm:$0xff] }
 0x95c   :  { %7011 = vmatprep.subr.bf16.mxu0 %v11377_v20  ;;  %7075 = vmatprep.subr.bf16.mxu1 %v11378_v59  ;;  %v11385_v20 = vld [vmem:[#allocation36_spill] sm:$0xff]  ;;  %v11386_v59 = vld [vmem:[#allocation38_spill] sm:$0xff] }
 0x95f   :  { %7013 = vmatpush1.bf16.msra.mxu0 %v11379_v49  ;;  %7077 = vmatpush1.bf16.msra.mxu1 %v11380_v11  ;;  %v11387_v49 = vld [vmem:[#allocation164_spill] sm:$0xff]  ;;  %v11388_v11 = vld [vmem:[#allocation165_spill] sm:$0xff] }
 0x960   :  { %7079 = vmatprep.subr.bf16.mxu0 %v11381_v30  ;;  %7175 = vmatprep.subr.bf16.mxu1 %v11382_v1  ;;  %v11389_v30 = vld [vmem:[#allocation40_spill] sm:$0xff]  ;;  %v11390_v1 = vld [vmem:[#allocation42_spill] sm:$0xff] }
 0x962   :  { %3499 = vmatmul.mubr.f32.vlgmr.msra.gmra.mrb[34].mxu0 %v9836_v48  ;;  %3570 = vmatmul.mubr.f32.vlgmr.msra.gmra.mrb[40].mxu1 %v9836_v48 }
 0x963   :  { %7081 = vmatpush3.bf16.msra.mxu0 %v11383_v35  ;;  %3640 = vmatprep.mubr.f32.mxu0 %v9845_v43  ;;  %v11393_v35 = vld [vmem:[#allocation44_spill] sm:$0xff] }
 0x964   :  { %7083 = vmatprep.subr.bf16.mxu0 %v11384_v53  ;;  %7177 = vmatpush1.bf16.msra.mxu1 %v11385_v20  ;;  %v11395_v53 = vld [vmem:[#allocation168_spill] sm:$0xff]  ;;  %v11396_v20 = vld [vmem:[#allocation169_spill] sm:$0xff] }
 0x965   :  { %7179 = vmatprep.subr.bf16.mxu1 %v11386_v59  ;;  %v11397_v59 = vld [vmem:[#allocation48_spill] sm:$0xff] }
 0x967   :  { %7085 = vmatpush3.bf16.msra.mxu0 %v11387_v49  ;;  %v11398_v49 = vld [vmem:[#allocation50_spill] sm:$0xff] }
 0x968   :  { %7087 = vmatprep.subr.bf16.mxu0 %v11388_v11  ;;  %7181 = vmatpush1.bf16.msra.mxu1 %v11389_v30  ;;  %v11399_v11 = vld [vmem:[#allocation170_spill] sm:$0xff]  ;;  %v11400_v30 = vld [vmem:[#allocation171_spill] sm:$0xff] }
 0x969   :  { %7183 = vmatprep.subr.bf16.mxu1 %v11390_v1  ;;  %v11401_v1 = vld [vmem:[#allocation52_spill] sm:$0xff] }
 0x96b   :  { %7089 = vmatpush3.bf16.msra.mxu0 %v11391_v23  ;;  %v11402_v23 = vld [vmem:[#allocation54_spill] sm:$0xff] }
 0x96c   :  { %7091 = vmatprep.subr.bf16.mxu0 %v11392_v4  ;;  %7185 = vmatpush1.bf16.msra.mxu1 %v11393_v35  ;;  %v11403_v4 = vld [vmem:[#allocation172_spill] sm:$0xff]  ;;  %v11404_v35 = vld [vmem:[#allocation173_spill] sm:$0xff] }
 0x96d   :  { %7187 = vmatprep.subr.bf16.mxu1 %v11394_v39  ;;  %v11405_v39 = vld [vmem:[#allocation56_spill] sm:$0xff] }
 0x96f   :  { %7093 = vmatpush3.bf16.msra.mxu0 %v11395_v53  ;;  %v11406_v53 = vld [vmem:[#allocation58_spill] sm:$0xff] }
 0x970   :  { %7095 = vmatprep.subr.bf16.mxu0 %v11396_v20  ;;  %7189 = vmatpush1.bf16.msra.mxu1 %v11397_v59  ;;  %v11407_v20 = vld [vmem:[#allocation174_spill] sm:$0xff]  ;;  %v11408_v59 = vld [vmem:[#allocation175_spill] sm:$0xff] }
 0x971   :  { %7191 = vmatprep.subr.bf16.mxu1 %v11398_v49  ;;  %v11409_v49 = vld [vmem:[#allocation60_spill] sm:$0xff] }
 0x973   :  { %7097 = vmatpush3.bf16.msra.mxu0 %v11399_v11  ;;  %v11410_v11 = vld [vmem:[#allocation62_spill] sm:$0xff] }
 0x974   :  { %7099 = vmatprep.subr.bf16.mxu0 %v11400_v30  ;;  %7193 = vmatpush1.bf16.msra.mxu1 %v11401_v1  ;;  %v11411_v30 = vld [vmem:[#allocation176_spill] sm:$0xff]  ;;  %v11412_v1 = vld [vmem:[#allocation33_spill] sm:$0xff] }
 0x975   :  { %7195 = vmatprep.subr.bf16.mxu1 %v11402_v23  ;;  %v11413_v23 = vld [vmem:[#allocation64_spill] sm:$0xff] }
 0x977   :  { %7101 = vmatpush3.bf16.msra.mxu0 %v11403_v4  ;;  %v11414_v4 = vld [vmem:[#allocation66_spill] sm:$0xff] }
 0x978   :  { %7103 = vmatprep.subr.bf16.mxu0 %v11404_v35  ;;  %7197 = vmatpush1.bf16.msra.mxu1 %v11405_v39  ;;  %v11415_v39 = vld [vmem:[#allocation35_spill] sm:$0xff]  ;;  %v11425_v35 = vld [vmem:[#allocation76_spill] sm:$0xff] }
 0x979   :  { %7199 = vmatprep.subr.bf16.mxu1 %v11406_v53  ;;  %v11416_v53 = vld [vmem:[#allocation37_spill] sm:$0xff] }
 0x97b   :  { %7105 = vmatpush3.bf16.msra.mxu0 %v11407_v20  ;;  %v11417_v20 = vld [vmem:[#allocation68_spill] sm:$0xff] }
 0x97c   :  { %7107 = vmatprep.subr.bf16.mxu0 %v11408_v59  ;;  %7201 = vmatpush1.bf16.msra.mxu1 %v11409_v49  ;;  %v11418_v59 = vld [vmem:[#allocation70_spill] sm:$0xff]  ;;  %v11419_v49 = vld [vmem:[#allocation39_spill] sm:$0xff] }
 0x97d   :  { %7203 = vmatprep.subr.bf16.mxu1 %v11410_v11  ;;  %v11420_v11 = vld [vmem:[#allocation41_spill] sm:$0xff] }
 0x97f   :  { %7109 = vmatpush3.bf16.msra.mxu0 %v11411_v30  ;;  %v11421_v30 = vld [vmem:[#allocation72_spill] sm:$0xff] }
 0x980   :  { %7111 = vmatprep.subr.bf16.mxu0 %v11412_v1  ;;  %7205 = vmatpush1.bf16.msra.mxu1 %v11413_v23  ;;  %v11422_v1 = vld [vmem:[#allocation74_spill] sm:$0xff]  ;;  %v11423_v23 = vld [vmem:[#allocation43_spill] sm:$0xff] }
 0x981   :  { %7207 = vmatprep.subr.bf16.mxu1 %v11414_v4  ;;  %v11424_v4 = vld [vmem:[#allocation45_spill] sm:$0xff] }
 0x982   :  { %3641 = vmatmul.mubr.f32.vlgmr.msra.gmra.mrb[36].mxu0 %v9836_v48 }
 0x983   :  { %7113 = vmatpush1.bf16.msra.mxu0 %v11415_v39  ;;  %v11426_v39 = vld [vmem:[#allocation78_spill] sm:$0xff] }
 0x984   :  { %7115 = vmatprep.subr.bf16.mxu0 %v11416_v53  ;;  %7209 = vmatpush1.bf16.msra.mxu1 %v11417_v20  ;;  %v11427_v53 = vld [vmem:[#allocation47_spill] sm:$0xff]  ;;  %v11428_v20 = vld [vmem:[#allocation49_spill] sm:$0xff] }
 0x985   :  { %7211 = vmatprep.subr.bf16.mxu1 %v11418_v59  ;;  %v11429_v59 = vld [vmem:[#allocation80_spill] sm:$0xff] }
 0x987   :  { %7117 = vmatpush1.bf16.msra.mxu0 %v11419_v49  ;;  %v11430_v49 = vld [vmem:[#allocation82_spill] sm:$0xff] }
 0x988   :  { %7119 = vmatprep.subr.bf16.mxu0 %v11420_v11  ;;  %7213 = vmatpush1.bf16.msra.mxu1 %v11421_v30  ;;  %v11431_v11 = vld [vmem:[#allocation51_spill] sm:$0xff]  ;;  %v11432_v30 = vld [vmem:[#allocation53_spill] sm:$0xff] }
 0x989   :  { %7215 = vmatprep.subr.bf16.mxu1 %v11422_v1  ;;  %v11433_v1 = vld [vmem:[#allocation84_spill] sm:$0xff] }
 0x98b   :  { %7121 = vmatpush1.bf16.msra.mxu0 %v11423_v23  ;;  %v11434_v23 = vld [vmem:[#allocation86_spill] sm:$0xff] }
 0x98c   :  { %7123 = vmatprep.subr.bf16.mxu0 %v11424_v4  ;;  %7217 = vmatpush1.bf16.msra.mxu1 %v11425_v35  ;;  %v11435_v4 = vld [vmem:[#allocation55_spill] sm:$0xff]  ;;  %v11436_v35 = vld [vmem:[#allocation57_spill] sm:$0xff] }
 0x98d   :  { %7219 = vmatprep.subr.bf16.mxu1 %v11426_v39  ;;  %v11437_v39 = vld [vmem:[#allocation88_spill] sm:$0xff] }
 0x98f   :  { %7125 = vmatpush1.bf16.msra.mxu0 %v11427_v53  ;;  %v11438_v53 = vld [vmem:[#allocation90_spill] sm:$0xff] }
 0x990   :  { %7127 = vmatprep.subr.bf16.mxu0 %v11428_v20  ;;  %7221 = vmatpush1.bf16.msra.mxu1 %v11429_v59  ;;  %v11439_v20 = vld [vmem:[#allocation59_spill] sm:$0xff]  ;;  %v11440_v59 = vld [vmem:[#allocation61_spill] sm:$0xff] }
 0x991   :  { %7223 = vmatprep.subr.bf16.mxu1 %v11430_v49  ;;  %v11441_v49 = vld [vmem:[#allocation92_spill] sm:$0xff] }
 0x993   :  { %7129 = vmatpush1.bf16.msra.mxu0 %v11431_v11  ;;  %v11442_v11 = vld [vmem:[#allocation94_spill] sm:$0xff] }
 0x994   :  { %7131 = vmatprep.subr.bf16.mxu0 %v11432_v30  ;;  %7225 = vmatpush1.bf16.msra.mxu1 %v11433_v1  ;;  %v11443_v30 = vld [vmem:[#allocation63_spill] sm:$0xff]  ;;  %v11444_v1 = vld [vmem:[#allocation65_spill] sm:$0xff] }
 0x995   :  { %7227 = vmatprep.subr.bf16.mxu1 %v11434_v23  ;;  %v11445_v23 = vld [vmem:[#allocation96_spill] sm:$0xff] }
 0x997   :  { %7133 = vmatpush1.bf16.msra.mxu0 %v11435_v4  ;;  %v11446_v4 = vld [vmem:[#allocation97_spill] sm:$0xff] }
 0x998   :  { %7135 = vmatprep.subr.bf16.mxu0 %v11436_v35  ;;  %7229 = vmatpush1.bf16.msra.mxu1 %v11437_v39  ;;  %v11447_v35 = vld [vmem:[#allocation67_spill] sm:$0xff]  ;;  %v11448_v39 = vld [vmem:[#allocation69_spill] sm:$0xff] }
 0x999   :  { %7231 = vmatprep.subr.bf16.mxu1 %v11438_v53  ;;  %v11449_v53 = vld [vmem:[#allocation71_spill] sm:$0xff] }
 0x99b   :  { %7137 = vmatpush1.bf16.msra.mxu0 %v11439_v20  ;;  %v11450_v20 = vld [vmem:[#allocation73_spill] sm:$0xff] }
 0x99c   :  { %7139 = vmatprep.subr.bf16.mxu0 %v11440_v59  ;;  %7233 = vmatpush1.bf16.msra.mxu1 %v11441_v49  ;;  %v11451_v59 = vld [vmem:[#allocation75_spill] sm:$0xff]  ;;  %v11452_v49 = vld [vmem:[#allocation77_spill] sm:$0xff] }
 0x99d   :  { %7235 = vmatprep.subr.bf16.mxu1 %v11442_v11  ;;  %v11453_v11 = vld [vmem:[#allocation79_spill] sm:$0xff] }
 0x99f   :  { %7141 = vmatpush1.bf16.msra.mxu0 %v11443_v30  ;;  %v11454_v30 = vld [vmem:[#allocation81_spill] sm:$0xff] }
 0x9a0   :  { %7143 = vmatprep.subr.bf16.mxu0 %v11444_v1  ;;  %7237 = vmatpush1.bf16.msra.mxu1 %v11445_v23  ;;  %v11455_v1 = vld [vmem:[#allocation83_spill] sm:$0xff]  ;;  %v11456_v23 = vld [vmem:[#allocation85_spill] sm:$0xff] }
 0x9a1   :  { %7239 = vmatprep.subr.bf16.mxu1 %v11446_v4  ;;  %v11457_v4 = vld [vmem:[#allocation87_spill] sm:$0xff] }
 0x9a3   :  { %7145 = vmatpush1.bf16.msra.mxu0 %v11447_v35  ;;  %v11458_v35 = vld [vmem:[#allocation89_spill] sm:$0xff] }
 0x9a4   :  { %7147 = vmatprep.subr.bf16.mxu0 %v11448_v39  ;;  %v11459_v39 = vld [vmem:[#allocation91_spill] sm:$0xff] }
 0x9a7   :  { %7149 = vmatpush1.bf16.msra.mxu0 %v11449_v53  ;;  %v11460_v53 = vld [vmem:[#allocation93_spill] sm:$0xff] }
 0x9a8   :  { %7151 = vmatprep.subr.bf16.mxu0 %v11450_v20  ;;  %v11461_v20 = vld [vmem:[#allocation95_spill] sm:$0xff] }
 0x9ab   :  { %7153 = vmatpush1.bf16.msra.mxu0 %v11451_v59  ;;  %v11462_v59 = vld [vmem:[#allocation98_spill] sm:$0xff] }
 0x9ac   :  { %7155 = vmatprep.subr.bf16.mxu0 %v11452_v49 }
 0x9af   :  { %7157 = vmatpush1.bf16.msra.mxu0 %v11453_v11 }
 0x9b0   :  { %7159 = vmatprep.subr.bf16.mxu0 %v11454_v30 }
 0x9b3   :  { %7161 = vmatpush1.bf16.msra.mxu0 %v11455_v1 }
 0x9b4   :  { %7163 = vmatprep.subr.bf16.mxu0 %v11456_v23  ;;  %v11463_v23 = vld [vmem:[#allocation185_spill] sm:$0xff] }
 0x9b7   :  { %7165 = vmatpush1.bf16.msra.mxu0 %v11457_v4 }
 0x9b8   :  { %7167 = vmatprep.subr.bf16.mxu0 %v11458_v35 }
 0x9bb   :  { %7169 = vmatpush1.bf16.msra.mxu0 %v11459_v39 }
 0x9bc   :  { %7171 = vmatprep.subr.bf16.mxu0 %v11460_v53  ;;  %v10003_v53 = vld [vmem:[#allocation13] ss:$0 sm:$0xff] }
 0x9bd   :  { %11464 = vst [vmem:[#allocation100_spill] sm:$0xff] %v10003_v53 }
 0x9bf   :  { %7173 = vmatpush1.bf16.msra.mxu0 %v11461_v20 }
 0x9c0   :  { %7303 = vmatprep.subr.bf16.mxu0 %v11462_v59 }
 0x9f5   :  { %v3358_v49 = vpop.f32.mrb[12].mxu0  ;;  %v3429_v11 = vpop.f32.mrb[38].mxu1 }
 0x9f6   :  { %v7658_v30 = vadd.f32 %v3358_v49, %v11245_v5  ;;  %v3360_v58 = vpop.f32.mrb[13].mxu0  ;;  %v3431_v1 = vpop.f32.mrb[39].mxu1  ;;  %v3650_v20 = vadd.f32 %v10003_v53, %v3429_v11 }
 0x9f7   :  { %v7659_v4 = vadd.f32 %v3360_v58, %v11463_v23 }
 0x9f8   :  { %v4584_v45 = vmul.f32 -1.442695, %v7658_v30 }
 0x9f9   :  { %v4585_v47 = vmul.f32 -1.442695, %v7659_v4 }
 0x9fa   :  { %7820 = vpow2.f32 %v4584_v45 }
 0x9fb   :  { %7822 = vpow2.f32 %v4585_v47 }
 0xa04   :  { %v7821_v35 = vpop.eup %7820 }
 0xa05   :  { %v3659_v51 = vadd.f32 1.0, %v7821_v35  ;;  %v7823_v39 = vpop.eup %7822 }
 0xa06   :  { %v3660_v5 = vadd.f32 1.0, %v7823_v39 }
 0xa07   :  { %7824 = vrcp.f32 %v3659_v51  ;;  %v3671_v51 = vadd.f32 %v3431_v1, %v8977_v22  ;;  %v10012_v1 = vld [vmem:[#allocation18] ss:$0 sm:$0xff] }
 0xa11   :  { %v7825_v59 = vpop.eup %7824 }
 0xa12   :  { %v3665_v9 = vmul.f32 %v7825_v59, %v3650_v20 }
 0xa14   :  { %v3666_v49 = vadd.f32 %v3665_v9, %v11465_v14 }
 0xa16   :  { %7826 = vtanh.f32 %v3666_v49 }
 0xa17   :  { %7828 = vrcp.f32 %v3660_v5 }
 0xa20   :  { %v7827_v45 = vpop.eup %7826 }
 0xa21   :  { %v3668_v58 = vsub.f32 %v9836_v48, %v7827_v45  ;;  %v7829_v30 = vpop.eup %7828 }
 0xa23   :  { %v3669_v4 = vmul.f32 %v7829_v30, %v3668_v58 }
 0xa25   :  { %v10008_v35 = vadd.f32 %v7827_v45, %v3669_v4 }
 0xa35   :  { %v3500_v47 = vpop.f32.mrb[34].mxu0  ;;  %v3571_v23 = vpop.f32.mrb[40].mxu1 }
 0xa36   :  { %v3672_v11 = vadd.f32 %v3500_v47, %v11466_v52  ;;  %v3675_v53 = vadd.f32 %v3671_v51, %v3571_v23  ;;  %v3502_v59 = vpop.f32.mrb[35].mxu0  ;;  %v3573_v20 = vpop.f32.mrb[41].mxu1  ;;  %v10015_v23 = vld [vmem:[#allocation16] ss:$0 sm:$0xff] }
 0xa37   :  { %v3673_v51 = vadd.f32 %v10015_v23, %v3502_v59  ;;  %v11468_v59 = vld [vmem:[#allocation142_spill] sm:$0xff] }
 0xa38   :  { %v3676_v14 = vadd.f32 %v3672_v11, %v3573_v20  ;;  %v4586_v9 = vmul.f32 -1.442695, %v3675_v53 }
 0xa3a   :  { %7830 = vpow2.f32 %v4586_v9  ;;  %v4587_v39 = vmul.f32 -1.442695, %v3676_v14 }
 0xa3c   :  { %7832 = vpow2.f32 %v4587_v39 }
 0xa44   :  { %v7831_v5 = vpop.eup %7830 }
 0xa45   :  { %v3683_v49 = vadd.f32 1.0, %v7831_v5 }
 0xa46   :  { %v7833_v30 = vpop.eup %7832 }
 0xa47   :  { %7834 = vrcp.f32 %v3683_v49  ;;  %v3684_v11 = vadd.f32 1.0, %v7833_v30  ;;  %v11470_v30 = vld [vmem:[#allocation144_spill] sm:$0xff] }
 0xa51   :  { %v7835_v47 = vpop.eup %7834 }
 0xa55   :  { %v4861_v48 = vpop.f32.mrb[36].mxu0 }
 0xa56   :  { %v4862_v45 = vpop.f32.mrb[37].mxu0 }
 0xa57   :  { %v4863_v58 = vadd.f32 %v4862_v45, %v4861_v48 }
 0xa59   :  { %v3674_v4 = vadd.f32 %v10012_v1, %v4863_v58  ;;  %v11469_v58 = vld [vmem:[#allocation143_spill] sm:$0xff] }
 0xa5b   :  { %v3689_v53 = vmul.f32 %v7835_v47, %v3674_v4  ;;  %v11471_v4 = vld [vmem:[#allocation145_spill] sm:$0xff]  ;;  %v11472_v47 = vld [vmem:[#allocation146_spill] sm:$0xff] }
 0xa5d   :  { %v3690_v20 = vadd.f32 %v3689_v53, %v3673_v51  ;;  %v11473_v51 = vld [vmem:[#allocation147_spill] sm:$0xff]  ;;  %v11474_v53 = vld [vmem:[#allocation148_spill] sm:$0xff] }
 0xa5f   :  { %7836 = vtanh.f32 %v3690_v20  ;;  %v11476_v20 = vld [vmem:[#allocation150_spill] sm:$0xff] }
 0xa60   :  { %7838 = vrcp.f32 %v3684_v11  ;;  %v11475_v11 = vld [vmem:[#allocation149_spill] sm:$0xff] }
 0xa69   :  { %v7837_v14 = vpop.eup %7836 }
 0xa6a   :  { %v3692_v9 = vsub.f32 %v9845_v43, %v7837_v14  ;;  %v7839_v5 = vpop.eup %7838 }
 0xa6c   :  { %v3693_v39 = vmul.f32 %v7839_v5, %v3692_v9  ;;  %v11478_v9 = vld [vmem:[#allocation152_spill] sm:$0xff]  ;;  %v11479_v5 = vld [vmem:[#allocation153_spill] sm:$0xff] }
 0xa6e   :  { %v3694_v49 = vadd.f32 %v7837_v14, %v3693_v39  ;;  %v11477_v14 = vld [vmem:[#allocation151_spill] sm:$0xff]  ;;  %v11480_v39 = vld [vmem:[#allocation154_spill] sm:$0xff] }
 0xa70   :  { %v3698_v48 = vsub.f32 %v3694_v49, %v9845_v43  ;;  %v11481_v49 = vld [vmem:[#allocation155_spill] sm:$0xff] }
 0xa72   :  { %v10021_v45 = vadd.f32 %v3698_v48, %v9845_v43  ;;  %v11467_v43 = vld [vmem:[#allocation141_spill] sm:$0xff]  ;;  %v11482_v48 = vld [vmem:[#allocation156_spill] sm:$0xff] }
 0xa74   :  { %3767 = vmatprep.mubr.f32.mxu0 %v10021_v45  ;;  %3838 = vmatprep.mubr.f32.mxu1 %v10021_v45 }
 0xa75   :  { %3768 = vmatmul.mubr.f32.vlgmr.msra.gmra.mrb[14].mxu0 %v10008_v35  ;;  %3839 = vmatmul.mubr.f32.vlgmr.msra.gmra.mrb[42].mxu1 %v10008_v35 }
 0xa76   :  { %7241 = vmatpush1.bf16.msra.mxu1 %v10818_v0  ;;  %7305 = vmatpush1.bf16.msra.mxu0 %v10819_v54 }
 0xa77   :  { %3909 = vmatprep.mubr.f32.mxu1 %v10021_v45  ;;  %3980 = vmatprep.mubr.f32.mxu0 %v10021_v45 }
 0xa78   :  { %7243 = vmatprep.subr.bf16.mxu1 %v10820_v42  ;;  %7307 = vmatprep.subr.bf16.mxu0 %v10821_v60 }
 0xa7a   :  { %7245 = vmatpush1.bf16.msra.mxu1 %v10822_v61  ;;  %7309 = vmatpush1.bf16.msra.mxu0 %v10823_v33 }
 0xa7b   :  { %7247 = vmatprep.subr.bf16.mxu1 %v10925_v26  ;;  %7311 = vmatprep.subr.bf16.mxu0 %v10926_v24 }
 0xa7e   :  { %7249 = vmatpush1.bf16.msra.mxu1 %v10927_v50  ;;  %7313 = vmatpush1.bf16.msra.mxu0 %v10928_v21 }
 0xa7f   :  { %7251 = vmatprep.subr.bf16.mxu1 %v10929_v34  ;;  %7315 = vmatprep.subr.bf16.mxu0 %v10930_v38 }
 0xa82   :  { %7253 = vmatpush1.bf16.msra.mxu1 %v10931_v28  ;;  %7317 = vmatpush1.bf16.msra.mxu0 %v10932_v32 }
 0xa83   :  { %7255 = vmatprep.subr.bf16.mxu1 %v11034_v19  ;;  %7319 = vmatprep.subr.bf16.mxu0 %v11035_v41 }
 0xa86   :  { %7257 = vmatpush1.bf16.msra.mxu1 %v11036_v55  ;;  %7321 = vmatpush1.bf16.msra.mxu0 %v11037_v62  ;;  %v11512_v62 = vld [vmem:[#allocation58_spill] sm:$0xff] }
 0xa87   :  { %7259 = vmatprep.subr.bf16.mxu1 %v11038_v27  ;;  %7323 = vmatprep.subr.bf16.mxu0 %v11039_v18  ;;  %v11509_v18 = vld [vmem:[#allocation172_spill] sm:$0xff] }
 0xa8a   :  { %7261 = vmatpush1.bf16.msra.mxu1 %v11040_v15  ;;  %7325 = vmatpush1.bf16.msra.mxu0 %v11041_v13  ;;  %v11508_v13 = vld [vmem:[#allocation54_spill] sm:$0xff] }
 0xa8b   :  { %7263 = vmatprep.subr.bf16.mxu1 %v11042_v12  ;;  %7327 = vmatprep.subr.bf16.mxu0 %v11043_v7  ;;  %v11505_v7 = vld [vmem:[#allocation170_spill] sm:$0xff] }
 0xa8e   :  { %7265 = vmatpush1.bf16.msra.mxu1 %v11044_v6  ;;  %7329 = vmatpush1.bf16.msra.mxu0 %v11045_v8  ;;  %v11504_v8 = vld [vmem:[#allocation50_spill] sm:$0xff] }
 0xa8f   :  { %7267 = vmatprep.subr.bf16.mxu1 %v11046_v36  ;;  %7331 = vmatprep.subr.bf16.mxu0 %v11047_v29  ;;  %v11501_v29 = vld [vmem:[#allocation168_spill] sm:$0xff] }
 0xa92   :  { %7269 = vmatpush1.bf16.msra.mxu1 %v11048_v16  ;;  %7333 = vmatpush1.bf16.msra.mxu0 %v11049_v46  ;;  %v11500_v46 = vld [vmem:[#allocation46_spill] sm:$0xff] }
 0xa93   :  { %7271 = vmatprep.subr.bf16.mxu1 %v11050_v25  ;;  %7335 = vmatprep.subr.bf16.mxu0 %v10950_v2  ;;  %v11499_v2 = vld [vmem:[#allocation44_spill] sm:$0xff] }
 0xa96   :  { %7273 = vmatpush1.bf16.msra.mxu1 %v10951_v44  ;;  %7337 = vmatpush1.bf16.msra.mxu0 %v10952_v17  ;;  %v11498_v17 = vld [vmem:[#allocation167_spill] sm:$0xff] }
 0xa97   :  { %7275 = vmatprep.subr.bf16.mxu1 %v10953_v31  ;;  %7339 = vmatprep.subr.bf16.mxu0 %v10954_v40  ;;  %v11497_v40 = vld [vmem:[#allocation166_spill] sm:$0xff] }
 0xa9a   :  { %7277 = vmatpush1.bf16.msra.mxu1 %v10955_v63  ;;  %7341 = vmatpush1.bf16.msra.mxu0 %v10956_v3  ;;  %v11495_v3 = vld [vmem:[#allocation40_spill] sm:$0xff] }
 0xa9b   :  { %7279 = vmatprep.subr.bf16.mxu1 %v11249_v56  ;;  %7343 = vmatprep.subr.bf16.mxu0 %v11358_v57  ;;  %v11493_v57 = vld [vmem:[#allocation164_spill] sm:$0xff] }
 0xa9e   :  { %7281 = vmatpush1.bf16.msra.mxu1 %v11359_v37  ;;  %7345 = vmatpush1.bf16.msra.mxu0 %v11360_v10  ;;  %v11488_v10 = vld [vmem:[#allocation34_spill] sm:$0xff] }
 0xa9f   :  { %7283 = vmatprep.subr.bf16.mxu1 %v11467_v43  ;;  %7347 = vmatprep.subr.bf16.mxu0 %v11468_v59  ;;  %v11486_v59 = vld [vmem:[#allocation160_spill] sm:$0xff] }
 0xaa2   :  { %7285 = vmatpush1.bf16.msra.mxu1 %v11469_v58  ;;  %7349 = vmatpush1.bf16.msra.mxu0 %v11470_v30  ;;  %v11484_v30 = vld [vmem:[#allocation158_spill] sm:$0xff] }
 0xaa3   :  { %7287 = vmatprep.subr.bf16.mxu1 %v11471_v4  ;;  %7351 = vmatprep.subr.bf16.mxu0 %v11472_v47  ;;  %v11483_v47 = vld [vmem:[#allocation157_spill] sm:$0xff] }
 0xaa6   :  { %7289 = vmatpush1.bf16.msra.mxu1 %v11473_v51  ;;  %7353 = vmatpush1.bf16.msra.mxu0 %v11474_v53  ;;  %v11485_v53 = vld [vmem:[#allocation159_spill] sm:$0xff] }
 0xaa7   :  { %7291 = vmatprep.subr.bf16.mxu1 %v11475_v11  ;;  %7355 = vmatprep.subr.bf16.mxu0 %v11476_v20  ;;  %v11487_v20 = vld [vmem:[#allocation161_spill] sm:$0xff] }
 0xaaa   :  { %7293 = vmatpush1.bf16.msra.mxu1 %v11477_v14  ;;  %7357 = vmatpush1.bf16.msra.mxu0 %v11478_v9  ;;  %v11491_v9 = vld [vmem:[#allocation36_spill] sm:$0xff] }
 0xaab   :  { %7295 = vmatprep.subr.bf16.mxu1 %v11479_v5  ;;  %7359 = vmatprep.subr.bf16.mxu0 %v11480_v39  ;;  %v11489_v39 = vld [vmem:[#allocation162_spill] sm:$0xff] }
 0xaae   :  { %7297 = vmatpush1.bf16.msra.mxu1 %v11481_v49  ;;  %7361 = vmatpush1.bf16.msra.mxu0 %v11482_v48  ;;  %v11490_v48 = vld [vmem:[#allocation163_spill] sm:$0xff] }
 0xaaf   :  { %7299 = vmatprep.subr.bf16.mxu1 %v11483_v47  ;;  %7363 = vmatprep.subr.bf16.mxu0 %v11484_v30  ;;  %v11492_v30 = vld [vmem:[#allocation38_spill] sm:$0xff] }
 0xab2   :  { %7301 = vmatpush1.bf16.msra.mxu1 %v11485_v53  ;;  %7365 = vmatpush1.bf16.msra.mxu0 %v11486_v59  ;;  %v11494_v59 = vld [vmem:[#allocation165_spill] sm:$0xff] }
 0xab3   :  { %7367 = vmatprep.subr.bf16.mxu1 %v11487_v20  ;;  %7399 = vmatprep.subr.bf16.mxu0 %v11488_v10  ;;  %v11496_v10 = vld [vmem:[#allocation42_spill] sm:$0xff] }
 0xab5   :  { %3910 = vmatmul.mubr.f32.vlgmr.msra.gmra.mrb[44].mxu1 %v10008_v35  ;;  %3981 = vmatmul.mubr.f32.vlgmr.msra.gmra.mrb[38].mxu0 %v10008_v35 }
 0xab6   :  { %7369 = vmatpush3.bf16.msra.mxu1 %v11489_v39  ;;  %4051 = vmatprep.mubr.f32.mxu1 %v10021_v45 }
 0xab7   :  { %7371 = vmatprep.subr.bf16.mxu1 %v11490_v48  ;;  %7401 = vmatpush1.bf16.msra.mxu0 %v11491_v9  ;;  %v11502_v9 = vld [vmem:[#allocation169_spill] sm:$0xff] }
 0xab8   :  { %7403 = vmatprep.subr.bf16.mxu0 %v11492_v30  ;;  %v11503_v30 = vld [vmem:[#allocation48_spill] sm:$0xff] }
 0xaba   :  { %7373 = vmatpush3.bf16.msra.mxu1 %v11493_v57 }
 0xabb   :  { %7375 = vmatprep.subr.bf16.mxu1 %v11494_v59  ;;  %7405 = vmatpush1.bf16.msra.mxu0 %v11495_v3  ;;  %v11506_v3 = vld [vmem:[#allocation171_spill] sm:$0xff] }
 0xabc   :  { %7407 = vmatprep.subr.bf16.mxu0 %v11496_v10  ;;  %v11507_v10 = vld [vmem:[#allocation52_spill] sm:$0xff] }
 0xabe   :  { %7377 = vmatpush3.bf16.msra.mxu1 %v11497_v40 }
 0xabf   :  { %7379 = vmatprep.subr.bf16.mxu1 %v11498_v17  ;;  %7409 = vmatpush1.bf16.msra.mxu0 %v11499_v2  ;;  %v11510_v2 = vld [vmem:[#allocation173_spill] sm:$0xff] }
 0xac0   :  { %7411 = vmatprep.subr.bf16.mxu0 %v11500_v46  ;;  %v11511_v46 = vld [vmem:[#allocation56_spill] sm:$0xff] }
 0xac2   :  { %7381 = vmatpush3.bf16.msra.mxu1 %v11501_v29 }
 0xac3   :  { %7383 = vmatprep.subr.bf16.mxu1 %v11502_v9  ;;  %7413 = vmatpush1.bf16.msra.mxu0 %v11503_v30  ;;  %v11513_v9 = vld [vmem:[#allocation174_spill] sm:$0xff]  ;;  %v11514_v30 = vld [vmem:[#allocation175_spill] sm:$0xff] }
 0xac4   :  { %7415 = vmatprep.subr.bf16.mxu0 %v11504_v8  ;;  %v11515_v8 = vld [vmem:[#allocation60_spill] sm:$0xff] }
 0xac6   :  { %7385 = vmatpush3.bf16.msra.mxu1 %v11505_v7  ;;  %v11516_v7 = vld [vmem:[#allocation62_spill] sm:$0xff] }
 0xac7   :  { %7387 = vmatprep.subr.bf16.mxu1 %v11506_v3  ;;  %7417 = vmatpush1.bf16.msra.mxu0 %v11507_v10  ;;  %v11517_v3 = vld [vmem:[#allocation176_spill] sm:$0xff]  ;;  %v11518_v10 = vld [vmem:[#allocation97_spill] sm:$0xff] }
 0xac8   :  { %7419 = vmatprep.subr.bf16.mxu0 %v11508_v13  ;;  %v11519_v13 = vld [vmem:[#allocation64_spill] sm:$0xff] }
 0xaca   :  { %7389 = vmatpush3.bf16.msra.mxu1 %v11509_v18  ;;  %v11520_v18 = vld [vmem:[#allocation66_spill] sm:$0xff] }
 0xacb   :  { %7391 = vmatprep.subr.bf16.mxu1 %v11510_v2  ;;  %7421 = vmatpush1.bf16.msra.mxu0 %v11511_v46  ;;  %v11522_v46 = vld [vmem:[#allocation70_spill] sm:$0xff] }
 0xacc   :  { %7423 = vmatprep.subr.bf16.mxu0 %v11512_v62  ;;  %v11521_v62 = vld [vmem:[#allocation68_spill] sm:$0xff] }
 0xace   :  { %7393 = vmatpush3.bf16.msra.mxu1 %v11513_v9 }
 0xacf   :  { %7395 = vmatprep.subr.bf16.mxu1 %v11514_v30  ;;  %7425 = vmatpush1.bf16.msra.mxu0 %v11515_v8  ;;  %v11524_v8 = vld [vmem:[#allocation74_spill] sm:$0xff] }
 0xad0   :  { %7427 = vmatprep.subr.bf16.mxu0 %v11516_v7  ;;  %v11523_v7 = vld [vmem:[#allocation72_spill] sm:$0xff] }
 0xad2   :  { %7397 = vmatpush3.bf16.msra.mxu1 %v11517_v3 }
 0xad3   :  { %7463 = vmatprep.subr.bf16.mxu1 %v11518_v10  ;;  %7429 = vmatpush1.bf16.msra.mxu0 %v11519_v13 }
 0xad4   :  { %7431 = vmatprep.subr.bf16.mxu0 %v11520_v18  ;;  %v11525_v18 = vld [vmem:[#allocation76_spill] sm:$0xff] }
 0xad5   :  { %4052 = vmatmul.mubr.f32.vlgmr.msra.gmra.mrb[46].mxu1 %v10008_v35 }
 0xad6   :  { %7465 = vmatpush1.bf16.msra.mxu1 %v10818_v0  ;;  %v11526_v0 = vld [vmem:[#allocation78_spill] sm:$0xff] }
 0xad7   :  { %7467 = vmatprep.subr.bf16.mxu1 %v10820_v42  ;;  %7433 = vmatpush1.bf16.msra.mxu0 %v11521_v62  ;;  %v11527_v42 = vld [vmem:[#allocation80_spill] sm:$0xff] }
 0xad8   :  { %7435 = vmatprep.subr.bf16.mxu0 %v11522_v46 }
 0xada   :  { %7469 = vmatpush1.bf16.msra.mxu1 %v10822_v61  ;;  %v11528_v61 = vld [vmem:[#allocation82_spill] sm:$0xff] }
 0xadb   :  { %7471 = vmatprep.subr.bf16.mxu1 %v10925_v26  ;;  %7437 = vmatpush1.bf16.msra.mxu0 %v11523_v7  ;;  %v11529_v26 = vld [vmem:[#allocation84_spill] sm:$0xff] }
 0xadc   :  { %7439 = vmatprep.subr.bf16.mxu0 %v11524_v8 }
 0xade   :  { %7473 = vmatpush1.bf16.msra.mxu1 %v10927_v50  ;;  %v11530_v50 = vld [vmem:[#allocation86_spill] sm:$0xff] }
 0xadf   :  { %7475 = vmatprep.subr.bf16.mxu1 %v10929_v34  ;;  %7441 = vmatpush1.bf16.msra.mxu0 %v11525_v18  ;;  %v11531_v34 = vld [vmem:[#allocation88_spill] sm:$0xff] }
 0xae0   :  { %7443 = vmatprep.subr.bf16.mxu0 %v11526_v0 }
 0xae2   :  { %7477 = vmatpush1.bf16.msra.mxu1 %v10931_v28  ;;  %v11532_v28 = vld [vmem:[#allocation90_spill] sm:$0xff] }
 0xae3   :  { %7479 = vmatprep.subr.bf16.mxu1 %v11034_v19  ;;  %7445 = vmatpush1.bf16.msra.mxu0 %v11527_v42  ;;  %v11533_v19 = vld [vmem:[#allocation92_spill] sm:$0xff] }
 0xae4   :  { %7447 = vmatprep.subr.bf16.mxu0 %v11528_v61 }
 0xae6   :  { %7481 = vmatpush1.bf16.msra.mxu1 %v11036_v55  ;;  %v11534_v55 = vld [vmem:[#allocation94_spill] sm:$0xff] }
 0xae7   :  { %7483 = vmatprep.subr.bf16.mxu1 %v11038_v27  ;;  %7449 = vmatpush1.bf16.msra.mxu0 %v11529_v26  ;;  %v11535_v27 = vld [vmem:[#allocation96_spill] sm:$0xff] }
 0xae8   :  { %7451 = vmatprep.subr.bf16.mxu0 %v11530_v50 }
 0xaea   :  { %7485 = vmatpush1.bf16.msra.mxu1 %v11040_v15  ;;  %v11536_v15 = vld [vmem:[#allocation98_spill] sm:$0xff] }
 0xaeb   :  { %7487 = vmatprep.subr.bf16.mxu1 %v11042_v12  ;;  %7453 = vmatpush1.bf16.msra.mxu0 %v11531_v34 }
 0xaec   :  { %7455 = vmatprep.subr.bf16.mxu0 %v11532_v28 }
 0xaee   :  { %7489 = vmatpush1.bf16.msra.mxu1 %v11044_v6 }
 0xaef   :  { %7491 = vmatprep.subr.bf16.mxu1 %v11046_v36  ;;  %7457 = vmatpush1.bf16.msra.mxu0 %v11533_v19 }
 0xaf0   :  { %7459 = vmatprep.subr.bf16.mxu0 %v11534_v55 }
 0xaf2   :  { %7493 = vmatpush1.bf16.msra.mxu1 %v11048_v16 }
 0xaf3   :  { %7495 = vmatprep.subr.bf16.mxu1 %v11050_v25  ;;  %7461 = vmatpush1.bf16.msra.mxu0 %v11535_v27  ;;  %v11538_v25 = vld [vmem:[#allocation185_spill] sm:$0xff] }
 0xaf4   :  { %7527 = vmatprep.subr.bf16.mxu0 %v11536_v15 }
 0xaf6   :  { %7497 = vmatpush1.bf16.msra.mxu1 %v10951_v44 }
 0xaf7   :  { %7499 = vmatprep.subr.bf16.mxu1 %v10953_v31  ;;  %v11537_v31 = vld [vmem:[#allocation184_spill] sm:$0xff] }
 0xafa   :  { %7501 = vmatpush1.bf16.msra.mxu1 %v10955_v63 }
 0xafb   :  { %7503 = vmatprep.subr.bf16.mxu1 %v11249_v56 }
 0xafe   :  { %7505 = vmatpush1.bf16.msra.mxu1 %v11359_v37 }
 0xaff   :  { %7507 = vmatprep.subr.bf16.mxu1 %v11467_v43 }
 0xb02   :  { %7509 = vmatpush1.bf16.msra.mxu1 %v11469_v58 }
 0xb03   :  { %7511 = vmatprep.subr.bf16.mxu1 %v11471_v4 }
 0xb06   :  { %7513 = vmatpush1.bf16.msra.mxu1 %v11473_v51 }
 0xb07   :  { %7515 = vmatprep.subr.bf16.mxu1 %v11475_v11 }
 0xb0a   :  { %7517 = vmatpush1.bf16.msra.mxu1 %v11477_v14 }
 0xb0b   :  { %7519 = vmatprep.subr.bf16.mxu1 %v11479_v5 }
 0xb0e   :  { %7521 = vmatpush1.bf16.msra.mxu1 %v11481_v49 }
 0xb0f   :  { %7523 = vmatprep.subr.bf16.mxu1 %v11483_v47  ;;  %v11539_v47 = vld [vmem:[#allocation100_spill] sm:$0xff] }
 0xb12   :  { %7525 = vmatpush1.bf16.msra.mxu1 %v11485_v53 }
 0xb13   :  { %7591 = vmatprep.subr.bf16.mxu1 %v11487_v20  ;;  %v11540_v20 = vld [vmem:[#allocation182_spill] sm:$0xff] }
 0xb48   :  { %v3769_v63 = vpop.f32.mrb[14].mxu0  ;;  %v3840_v44 = vpop.f32.mrb[42].mxu1 }
 0xb49   :  { %v7660_v12 = vadd.f32 %v3769_v63, %v11537_v31  ;;  %v3771_v6 = vpop.f32.mrb[15].mxu0  ;;  %v3842_v36 = vpop.f32.mrb[43].mxu1  ;;  %v4061_v51 = vadd.f32 %v11539_v47, %v3840_v44 }
 0xb4a   :  { %v7661_v56 = vadd.f32 %v3771_v6, %v11538_v25  ;;  %v4082_v7 = vadd.f32 %v3842_v36, %v8977_v22 }
 0xb4b   :  { %v4588_v16 = vmul.f32 -1.442695, %v7660_v12 }
 0xb4c   :  { %v4589_v37 = vmul.f32 -1.442695, %v7661_v56 }
 0xb4d   :  { %7840 = vpow2.f32 %v4588_v16 }
 0xb4e   :  { %7842 = vpow2.f32 %v4589_v37 }
 0xb57   :  { %v7841_v43 = vpop.eup %7840 }
 0xb58   :  { %v4070_v58 = vadd.f32 1.0, %v7841_v43  ;;  %v7843_v4 = vpop.eup %7842 }
 0xb59   :  { %v4071_v5 = vadd.f32 1.0, %v7843_v4 }
 0xb5a   :  { %7844 = vrcp.f32 %v4070_v58 }
 0xb64   :  { %v7845_v53 = vpop.eup %7844 }
 0xb65   :  { %v4076_v11 = vmul.f32 %v7845_v53, %v4061_v51  ;;  %v11560_v51 = vld [vmem:[#allocation146_spill] sm:$0xff] }
 0xb66   :  { %v11562_v53 = vld [vmem:[#allocation150_spill] sm:$0xff] }
 0xb67   :  { %v4077_v14 = vadd.f32 %v4076_v11, %v11540_v20  ;;  %v11563_v11 = vld [vmem:[#allocation152_spill] sm:$0xff]  ;;  %v11564_v20 = vld [vmem:[#allocation154_spill] sm:$0xff] }
 0xb69   :  { %7846 = vtanh.f32 %v4077_v14  ;;  %v11565_v14 = vld [vmem:[#allocation156_spill] sm:$0xff] }
 0xb6a   :  { %7848 = vrcp.f32 %v4071_v5  ;;  %v11566_v5 = vld [vmem:[#allocation158_spill] sm:$0xff] }
 0xb73   :  { %v7847_v49 = vpop.eup %7846 }
 0xb74   :  { %v4079_v10 = vsub.f32 %v10008_v35, %v7847_v49  ;;  %v7849_v13 = vpop.eup %7848 }
 0xb76   :  { %v4080_v62 = vmul.f32 %v7849_v13, %v4079_v10  ;;  %v4427_v10 = vld [vmem:[#allocation19] sm:$0xff]  ;;  %v4428_v13 = vld [vmem:[#allocation19 + $0x8] sm:$0xff] }
 0xb78   :  { %v10182_v46 = vadd.f32 %v7847_v49, %v4080_v62  ;;  %v11567_v49 = vld [vmem:[#allocation160_spill] sm:$0xff]  ;;  %v7623_v62 = vpack.c.bf16 %v4428_v13, %v4427_v10 }
 0xb7a   :  { %4424 = vst [vmem:[#allocation23] sm:$0xff] %v10182_v46 }
 0xb88   :  { %v3911_v8 = vpop.f32.mrb[44].mxu1  ;;  %v3982_v18 = vpop.f32.mrb[38].mxu0 }
 0xb89   :  { %v4083_v0 = vadd.f32 %v3911_v8, %v11466_v52  ;;  %v4086_v42 = vadd.f32 %v4082_v7, %v3982_v18  ;;  %v3913_v61 = vpop.f32.mrb[45].mxu1  ;;  %v3984_v26 = vpop.f32.mrb[39].mxu0  ;;  %v8197_v7 = vmov 0.0|0.0   ;;  %v4429_v8 = vld [vmem:[#allocation19 + $0x10] sm:$0xff]  ;;  %v4430_v18 = vld [vmem:[#allocation19 + $0x18] sm:$0xff] }
 0xb8a   :  { %v4084_v12 = vadd.f32 %v10015_v23, %v3913_v61  ;;  %v4432_v61 = vld [vmem:[#allocation19 + $0x28] sm:$0xff] }
 0xb8b   :  { %v4087_v50 = vadd.f32 %v4083_v0, %v3984_v26  ;;  %v4590_v34 = vmul.f32 -1.442695, %v4086_v42  ;;  %v7626_v0 = vpack.c.bf16 %v4430_v18, %v4429_v8  ;;  %v4431_v42 = vld [vmem:[#allocation19 + $0x20] sm:$0xff] }
 0xb8c   :  { %v7629_v26 = vpack.c.bf16 %v4432_v61, %v4431_v42 }
 0xb8d   :  { %7850 = vpow2.f32 %v4590_v34  ;;  %v4591_v35 = vmul.f32 -1.442695, %v4087_v50  ;;  %v4433_v50 = vld [vmem:[#allocation19 + $0x30] sm:$0xff]  ;;  %v4434_v34 = vld [vmem:[#allocation19 + $0x38] sm:$0xff] }
 0xb8f   :  { %7852 = vpow2.f32 %v4591_v35  ;;  %v4436_v35 = vld [vmem:[#allocation19 + $0x48] sm:$0xff] }
 0xb97   :  { %v7851_v28 = vpop.eup %7850 }
 0xb98   :  { %v4094_v19 = vadd.f32 1.0, %v7851_v28  ;;  %v4435_v28 = vld [vmem:[#allocation19 + $0x40] sm:$0xff] }
 0xb99   :  { %v7853_v63 = vpop.eup %7852 }
 0xb9a   :  { %7854 = vrcp.f32 %v4094_v19  ;;  %v4095_v36 = vadd.f32 1.0, %v7853_v63  ;;  %v7635_v19 = vpack.c.bf16 %v4436_v35, %v4435_v28 }
 0xba4   :  { %v7855_v31 = vpop.eup %7854 }
 0xba8   :  { %v4896_v55 = vpop.f32.mrb[46].mxu1 }
 0xba9   :  { %v4897_v27 = vpop.f32.mrb[47].mxu1 }
 0xbaa   :  { %v4898_v15 = vadd.f32 %v4897_v27, %v4896_v55  ;;  %v4437_v55 = vld [vmem:[#allocation19 + $0x50] sm:$0xff]  ;;  %v4438_v27 = vld [vmem:[#allocation19 + $0x58] sm:$0xff] }
 0xbab   :  { %v7638_v63 = vpack.c.bf16 %v4438_v27, %v4437_v55 }
 0xbac   :  { %v4085_v44 = vadd.f32 %v10012_v1, %v4898_v15  ;;  %v11568_v15 = vmov 0.0  }
 0xbae   :  { %v4100_v6 = vmul.f32 %v7855_v31, %v4085_v44  ;;  %v4439_v44 = vld [vmem:[#allocation19 + $0x60] sm:$0xff]  ;;  %v4440_v31 = vld [vmem:[#allocation19 + $0x68] sm:$0xff] }
 0xbb0   :  { %v4101_v16 = vadd.f32 %v4100_v6, %v4084_v12  ;;  %v7641_v12 = vpack.c.bf16 %v4440_v31, %v4439_v44  ;;  %v4441_v6 = vld [vmem:[#allocation19 + $0x70] sm:$0xff] }
 0xbb2   :  { %7856 = vtanh.f32 %v4101_v16 }
 0xbb3   :  { %7858 = vrcp.f32 %v4095_v36  ;;  %v4442_v36 = vld [vmem:[#allocation19 + $0x78] sm:$0xff] }
 0xbb4   :  { %v7644_v16 = vpack.c.bf16 %v4442_v36, %v4441_v6 }
 0xbbc   :  { %v7857_v25 = vpop.eup %7856 }
 0xbbd   :  { %v4103_v56 = vsub.f32 %v10021_v45, %v7857_v25  ;;  %v7859_v37 = vpop.eup %7858 }
 0xbbf   :  { %v4104_v43 = vmul.f32 %v7859_v37, %v4103_v56 }
 0xbc1   :  { %v4105_v58 = vadd.f32 %v7857_v25, %v4104_v43 }
 0xbc3   :  { %v4109_v4 = vsub.f32 %v4105_v58, %v10021_v45 }
 0xbc5   :  { %v10192_v47 = vadd.f32 %v4109_v4, %v10021_v45  ;;  %v11553_v45 = vld [vmem:[#allocation132_spill] sm:$0xff] }
 0xbc7   :  { %4182 = vmatprep.mubr.f32.mxu0 %v10192_v47  ;;  %4252 = vmatprep.mubr.f32.mxu1 %v10192_v47 }
 0xbc8   :  { %4183 = vmatmul.mubr.f32.vlgmr.msra.gmra.mrb[40].mxu0 %v10182_v46  ;;  %4253 = vmatmul.mubr.f32.vlgmr.msra.gmra.mrb[48].mxu1 %v10182_v46 }
 0xbc9   :  { %7529 = vmatpush1.bf16.msra.mxu0 %v10819_v54  ;;  %7593 = vmatpush3.bf16.msra.mxu1 %v11489_v39  ;;  %v11541_v54 = vld [vmem:[#allocation169_spill] sm:$0xff]  ;;  %v11555_v39 = vld [vmem:[#allocation136_spill] sm:$0xff] }
 0xbca   :  { %4323 = vmatprep.mubr.f32.mxu0 %v10192_v47  ;;  %4394 = vmatprep.mubr.f32.mxu1 %v10192_v47 }
 0xbcb   :  { %7531 = vmatprep.subr.bf16.mxu0 %v10821_v60  ;;  %7595 = vmatprep.subr.bf16.mxu1 %v11490_v48  ;;  %v11542_v60 = vld [vmem:[#allocation116_spill] sm:$0xff]  ;;  %v11556_v48 = vld [vmem:[#allocation138_spill] sm:$0xff] }
 0xbcd   :  { %7533 = vmatpush1.bf16.msra.mxu0 %v10823_v33  ;;  %7597 = vmatpush3.bf16.msra.mxu1 %v11493_v57  ;;  %v11543_v33 = vld [vmem:[#allocation170_spill] sm:$0xff] }
 0xbce   :  { %7535 = vmatprep.subr.bf16.mxu0 %v10926_v24  ;;  %7599 = vmatprep.subr.bf16.mxu1 %v11494_v59  ;;  %v11544_v24 = vld [vmem:[#allocation118_spill] sm:$0xff] }
 0xbcf   :  { %v11552_v57 = vld [vmem:[#allocation130_spill] sm:$0xff] }
 0xbd0   :  { %v11554_v59 = vld [vmem:[#allocation134_spill] sm:$0xff] }
 0xbd1   :  { %7537 = vmatpush1.bf16.msra.mxu0 %v10928_v21  ;;  %7601 = vmatpush3.bf16.msra.mxu1 %v11497_v40  ;;  %v11545_v21 = vld [vmem:[#allocation171_spill] sm:$0xff]  ;;  %v11546_v40 = vld [vmem:[#allocation120_spill] sm:$0xff] }
 0xbd2   :  { %7539 = vmatprep.subr.bf16.mxu0 %v10930_v38  ;;  %7603 = vmatprep.subr.bf16.mxu1 %v11498_v17  ;;  %v11547_v38 = vld [vmem:[#allocation172_spill] sm:$0xff]  ;;  %v11548_v17 = vld [vmem:[#allocation122_spill] sm:$0xff] }
 0xbd5   :  { %7541 = vmatpush1.bf16.msra.mxu0 %v10932_v32  ;;  %7605 = vmatpush3.bf16.msra.mxu1 %v11501_v29  ;;  %v11549_v32 = vld [vmem:[#allocation124_spill] sm:$0xff] }
 0xbd6   :  { %7543 = vmatprep.subr.bf16.mxu0 %v11035_v41  ;;  %7607 = vmatprep.subr.bf16.mxu1 %v11541_v54  ;;  %v11550_v41 = vld [vmem:[#allocation126_spill] sm:$0xff]  ;;  %v11551_v29 = vld [vmem:[#allocation128_spill] sm:$0xff] }
 0xbd9   :  { %7545 = vmatpush1.bf16.msra.mxu0 %v11542_v60  ;;  %7609 = vmatpush3.bf16.msra.mxu1 %v11543_v33 }
 0xbda   :  { %7547 = vmatprep.subr.bf16.mxu0 %v11544_v24  ;;  %7611 = vmatprep.subr.bf16.mxu1 %v11545_v21 }
 0xbdd   :  { %7549 = vmatpush1.bf16.msra.mxu0 %v11546_v40  ;;  %7613 = vmatpush3.bf16.msra.mxu1 %v11547_v38 }
 0xbde   :  { %7551 = vmatprep.subr.bf16.mxu0 %v11548_v17  ;;  %7615 = vmatprep.subr.bf16.mxu1 %v11510_v2  ;;  %v11558_v2 = vld [vmem:[#allocation142_spill] sm:$0xff] }
 0xbe1   :  { %7553 = vmatpush1.bf16.msra.mxu0 %v11549_v32  ;;  %7617 = vmatpush3.bf16.msra.mxu1 %v11513_v9  ;;  %v11557_v9 = vld [vmem:[#allocation140_spill] sm:$0xff] }
 0xbe2   :  { %7555 = vmatprep.subr.bf16.mxu0 %v11550_v41  ;;  %7619 = vmatprep.subr.bf16.mxu1 %v11514_v30  ;;  %v11559_v30 = vld [vmem:[#allocation144_spill] sm:$0xff] }
 0xbe5   :  { %7557 = vmatpush1.bf16.msra.mxu0 %v11551_v29  ;;  %7621 = vmatpush3.bf16.msra.mxu1 %v11517_v3  ;;  %v11561_v3 = vld [vmem:[#allocation148_spill] sm:$0xff] }
 0xbe6   :  { %7559 = vmatprep.subr.bf16.mxu0 %v11552_v57  ;;  %7622 = vmatprep.subr.bf16.mxu1 %v8197_v7 }
 0xbe8   :  { %4395 = vmatmul.mubr.f32.vlgmr.msra.gmra.mrb[50].mxu1 %v10182_v46 }
 0xbe9   :  { %7561 = vmatpush1.bf16.msra.mxu0 %v11553_v45  ;;  %7624 = vmatpush3.bf16.msra.mxu1 %v7623_v62 }
 0xbea   :  { %7563 = vmatprep.subr.bf16.mxu0 %v11554_v59  ;;  %7625 = vmatprep.subr.bf16.mxu1 %v8197_v7 }
 0xbeb   :  { %5027 = vmatprep.mubr.msk.f32.mxu1 %vm8198_vm0, %v11568_v15 }
 0xbed   :  { %7565 = vmatpush1.bf16.msra.mxu0 %v11555_v39  ;;  %7627 = vmatpush3.bf16.msra.mxu1 %v7626_v0 }
 0xbee   :  { %7567 = vmatprep.subr.bf16.mxu0 %v11556_v48  ;;  %7628 = vmatprep.subr.bf16.mxu1 %v8197_v7 }
 0xbf1   :  { %7569 = vmatpush1.bf16.msra.mxu0 %v11557_v9  ;;  %7630 = vmatpush3.bf16.msra.mxu1 %v7629_v26 }
 0xbf2   :  { %7571 = vmatprep.subr.bf16.mxu0 %v11558_v2  ;;  %7631 = vmatprep.subr.bf16.mxu1 %v8197_v7 }
 0xbf5   :  { %7573 = vmatpush1.bf16.msra.mxu0 %v11559_v30 }
 0xbf6   :  { %7575 = vmatprep.subr.bf16.mxu0 %v11560_v51 }
 0xbf9   :  { %7577 = vmatpush1.bf16.msra.mxu0 %v11561_v3 }
 0xbfa   :  { %7579 = vmatprep.subr.bf16.mxu0 %v11562_v53 }
 0xbfd   :  { %7581 = vmatpush1.bf16.msra.mxu0 %v11563_v11 }
 0xbfe   :  { %7583 = vmatprep.subr.bf16.mxu0 %v11564_v20 }
 0xc01   :  { %7585 = vmatpush1.bf16.msra.mxu0 %v11565_v14 }
 0xc02   :  { %7587 = vmatprep.subr.bf16.mxu0 %v11566_v5 }
 0xc05   :  { %7589 = vmatpush1.bf16.msra.mxu0 %v11567_v49 }
 0xc08   :  { %4324 = vmatmul.mubr.f32.vlgmr.msra.gmra.mrb[42].mxu0 %v10182_v46  ;;  %v7632_v46 = vpack.c.bf16 %v4434_v34, %v4433_v50 }
 0xc0a   :  { %7633 = vmatpush3.bf16.msra.mxu1 %v7632_v46 }
 0xc0b   :  { %7634 = vmatprep.subr.bf16.mxu1 %v8197_v7 }
 0xc0e   :  { %7636 = vmatpush3.bf16.msra.mxu1 %v7635_v19 }
 0xc0f   :  { %7637 = vmatprep.subr.bf16.mxu1 %v8197_v7 }
 0xc12   :  { %7639 = vmatpush3.bf16.msra.mxu1 %v7638_v63 }
 0xc13   :  { %7640 = vmatprep.subr.bf16.mxu1 %v8197_v7 }
 0xc16   :  { %7642 = vmatpush3.bf16.msra.mxu1 %v7641_v12 }
 0xc17   :  { %7643 = vmatprep.subr.bf16.mxu1 %v8197_v7 }
 0xc1a   :  { %7645 = vmatpush3.bf16.msra.mxu1 %v7644_v16 }
 0xc9b   :  { %v4184_v25 = vpop.f32.mrb[40].mxu0  ;;  %v4254_v56 = vpop.f32.mrb[48].mxu1 }
 0xc9c   :  { %v4185_v37 = vpop.f32.mrb[41].mxu0  ;;  %v4256_v43 = vpop.f32.mrb[49].mxu1  ;;  %v4401_v33 = vadd.f32 %v4254_v56, %v11466_v52 }
 0xc9d   :  { %v4400_v60 = vadd.f32 %v4185_v37, %v8977_v22  ;;  %v4402_v39 = vadd.f32 %v10015_v23, %v4256_v43 }
 0xcbb   :  { %v4931_v58 = vpop.f32.mrb[50].mxu1 }
 0xcbc   :  { %v4932_v4 = vpop.f32.mrb[51].mxu1 }
 0xcbd   :  { %v4933_v54 = vadd.f32 %v4932_v4, %v4931_v58 }
 0xcbf   :  { %v4403_v45 = vadd.f32 %v10012_v1, %v4933_v54 }
 0xcdb   :  { %v4325_v24 = vpop.f32.mrb[42].mxu0 }
 0xcdc   :  { %v4404_v21 = vadd.f32 %v4400_v60, %v4325_v24  ;;  %v4327_v40 = vpop.f32.mrb[43].mxu0 }
 0xcdd   :  { %v4405_v38 = vadd.f32 %v4401_v33, %v4327_v40 }
 0xcde   :  { %v4592_v17 = vmul.f32 -1.442695, %v4404_v21 }
 0xcdf   :  { %v4593_v32 = vmul.f32 -1.442695, %v4405_v38 }
 0xce0   :  { %7860 = vpow2.f32 %v4592_v17 }
 0xce1   :  { %7862 = vpow2.f32 %v4593_v32 }
 0xcea   :  { %v7861_v41 = vpop.eup %7860 }
 0xceb   :  { %v4412_v29 = vadd.f32 1.0, %v7861_v41  ;;  %v7863_v57 = vpop.eup %7862 }
 0xcec   :  { %v4413_v52 = vadd.f32 1.0, %v7863_v57 }
 0xced   :  { %7864 = vrcp.f32 %v4412_v29 }
 0xcf7   :  { %v7865_v59 = vpop.eup %7864 }
 0xcf8   :  { %v4418_v22 = vmul.f32 %v7865_v59, %v4403_v45 }
 0xcfa   :  { %v4419_v48 = vadd.f32 %v4418_v22, %v4402_v39 }
 0xcfc   :  { %7866 = vtanh.f32 %v4419_v48 }
 0xcfd   :  { %7868 = vrcp.f32 %v4413_v52 }
 0xd06   :  { %v7867_v9 = vpop.eup %7866 }
 0xd07   :  { %v4421_v2 = vsub.f32 %v10192_v47, %v7867_v9  ;;  %v7869_v30 = vpop.eup %7868 }
 0xd09   :  { %v4422_v51 = vmul.f32 %v7869_v30, %v4421_v2 }
 0xd0b   :  { %v4423_v3 = vadd.f32 %v7867_v9, %v4422_v51 }
 0xd0d   :  { %5028 = vmatmul.mubr.f32.vlgmr.msra.gmra.mrb[52].mxu1 %v4423_v3  ;;  %4426 = vst [vmem:[#allocation23 + $0x8] sm:$0xff] %v4423_v3 }
 0xd0e   :  { %8130 = shalt.err (!%p8127_p8)
}
 0xd0f   :  { %s8131_s9 = scalar_lea.hbm %s10293_s12, 256 }
 0xd10   :  { %p8132_p9 = scmp.ne.s32.totalorder %s10293_s12, %s8131_s9  ;;  %p8135_p10 = scmp.lt.u32.totalorder %s8131_s9, %s10293_s12 }
 0xd12   :  { %p8137_p11 = pnand %p8135_p10, %p8132_p9 }
 0xd14   :  { %8140 = shalt.err (!%p8137_p11)
}
 0xd15   :  { %4542 = dma.vmem_to_hbm [thread:$0]  %s4537_s21, 256, %s10293_s12, [#allocation24], %s8181_s15, %s8181_s15, %s8182_s16   ;;  %v4594_v1 = vld [vmem:[#allocation21] ss:$0 sm:$0xff] }
 0xd16   :  { %s8200_s6 = smov [#allocation22]  }
 0xd17   :  { %s4527_s22 = sshll.u32 %s8200_s6, 4  ;;  %s4528_s22 = int_to_ptr.vmem [resolvable:$true] %s4527_s22 }
 0xd18   :  { %s8141_s29 = scalar_lea.vmem %s4528_s22, 128  ;;  %p8146_p13 = scmp.lt.s32.totalorder %s4528_s22, %s4528_s22 }
 0xd19   :  { %p8142_p12 = scmp.ne.s32.totalorder %s4528_s22, %s8141_s29  ;;  %p8147_p0 = scmp.lt.s32.totalorder %s8141_s29, %s8141_s29 }
 0xd1b   :  { %p8148_p1 = por %p8147_p0, %p8146_p13 }
 0xd1d   :  { %p8149_p2 = pnand %p8148_p1, %p8142_p12 }
 0xde0   :  { %v4516_v23 = vpop.f32.mrb[52].mxu1 }
 0xde1   :  { %v4517_v47 = vadd.f32 %v4594_v1, %v4516_v23  ;;  %v5029_v53 = vpop.f32.mrb[53].mxu1 }
 0xde3   :  { %4520 = vst [vmem:[#allocation22] sm:$0xff] %v4517_v47 }
 0xde4   :  { %8152 = shalt.err (!%p8149_p2)
}
 0xde5   :  { %s8153_s14 = scalar_lea.hbm %s10292_s11, 128 }
 0xde6   :  { %p8154_p3 = scmp.ne.s32.totalorder %s10292_s11, %s8153_s14  ;;  %p8157_p4 = scmp.lt.u32.totalorder %s8153_s14, %s10292_s11 }
 0xde8   :  { %p8159_p5 = pnand %p8157_p4, %p8154_p3 }
 0xdea   :  { %8162 = shalt.err (!%p8159_p5)
}
 0xdeb   :  { %4530 = dma.vmem_to_hbm [thread:$0]  %s4528_s22, 128, %s10292_s11, [#allocation6]  }
 0xdec   :  { %8175 = dma.done.wait [#allocation6], 128  }
 0xded   :  { %8176 = vsyncadd [#allocation6], 4294967168 }
 0xdee   :  { %8177 = dma.done.wait [#allocation24], 256  }
 0xdef   :  { %8178 = vsyncadd [#allocation24], 4294967040 }
 0xdf0   :  { %4549 = vsyncpa [#allocation5], 1 }
 0xdf1   :  { %4550 = vsyncpa [#allocation8], 1 }
 0xdf2   :  { %4551 = vsyncpa [#allocation11], 1 }
 0xdf3   :  { %4552 = vsyncpa [#allocation14], 1 }
 0xdf4   :  { %4553 = vsyncpa [#allocation17], 1 }
 0xdf5   :  { %4554 = vsyncpa [#allocation20], 1 }
 0xdf6   :  { %4555 = vsyncpa [#allocation6], 1 }
 0xdf7   :  { %4556 = vsyncpa [#allocation24], 1 }

</bundles_post_ra>
